<compile_context>
chip_gen: v7x
topology: tpu7x:2x2x1
jax: 0.10.0
libtpu: 0.0.40
codegen_flags: <defaults>
</compile_context>

<pallas_src>
import jax
import jax.numpy as jnp
from jax.experimental import pallas as pl
from jax.experimental.pallas import tpu as pltpu

NODE_NUM = 19          # L, fixed by fc = Linear(64*19, 19)
LEAKY_SLOPE = 0.4
BN_EPS = 1e-5
C_LAST = 64            # channels of the last ResBlock output
N_PAD = 128            # lane-dense fc / output width (19 real outputs)
TB_MAX = 64            # samples per grid step (multiple of 8)


def _round_up(v, m):
    return ((v + m - 1) // m) * m


# ----------------------------------------------------------------------------
# Fused kernel: conv1 -> 3 ResBlocks -> fc -> sigmoid, TB samples per step
# ----------------------------------------------------------------------------
def _resnet_kernel(xp_ref, c1w_ref, c1b_ref,
                   w11_ref, b11_ref, w12_ref, b12_ref, ws1_ref, bs1_ref,
                   w21_ref, b21_ref, w22_ref, b22_ref, ws2_ref, bs2_ref,
                   w31_ref, b31_ref, w32_ref, b32_ref, ws3_ref, bs3_ref,
                   fcw_ref, fcb_ref,
                   o_ref,
                   a1_ref, a2_ref, a3_ref, a4_ref, a5_ref, a6_ref):
    f32 = jnp.float32
    L = NODE_NUM
    TB = o_ref.shape[0]          # samples in this grid step (static)
    M = L * TB                   # rows per step; row = l*TB + b (l-major)

    def leaky(v):
        return jnp.where(v >= 0.0, v, LEAKY_SLOPE * v)

    def zero_halo(buf):
        # Halo rows (TB top + TB bottom) are read by the shifted conv taps.
        # Zero them every step so the kernel is correct regardless of how the
        # "parallel" grid axis is partitioned across TensorCores.
        C = buf.shape[1]
        buf[0:TB, :] = jnp.zeros((TB, C), f32)
        buf[TB + M:2 * TB + M, :] = jnp.zeros((TB, C), f32)

    def conv3(buf, w_ref, b_ref):
        # "same" K=3 conv over a zero-haloed ((L+2)*TB, Cin) buffer -> (M, Cout).
        # Per-tap accumulation on sublane-aligned slices (offsets multiples of TB).
        cin = buf.shape[1]
        acc = jnp.dot(buf[0:M, :], w_ref[0:cin, :],
                      preferred_element_type=f32)
        acc = acc + jnp.dot(buf[TB:TB + M, :], w_ref[cin:2 * cin, :],
                            preferred_element_type=f32)
        acc = acc + jnp.dot(buf[2 * TB:2 * TB + M, :], w_ref[2 * cin:3 * cin, :],
                            preferred_element_type=f32)
        return acc + b_ref[...]

    def res_block(in_buf, mid_buf, w1, b1, w2, b2, ws, bs):
        zero_halo(mid_buf)
        mid_buf[TB:TB + M, :] = leaky(conv3(in_buf, w1, b1))     # conv3+BN+LReLU
        t2 = conv3(mid_buf, w2, b2)                              # conv3+BN
        sc = jnp.dot(in_buf[TB:TB + M, :], ws[...],              # 1x1 conv+BN
                     preferred_element_type=f32) + bs[...]
        return jnp.maximum(t2 + sc, 0.0)                         # add + ReLU

    # ---- conv1: K=5, Cin=1 (input arrives host-padded, l-major, ((L+4)*TB,1))
    acc = xp_ref[0:M, :] * c1w_ref[0:1, :]
    for k in range(1, 5):
        acc = acc + xp_ref[k * TB:k * TB + M, :] * c1w_ref[k:k + 1, :]
    zero_halo(a1_ref)
    a1_ref[TB:TB + M, :] = leaky(acc + c1b_ref[...])

    # ---- residual blocks -----------------------------------------------------
    zero_halo(a3_ref)
    a3_ref[TB:TB + M, :] = res_block(a1_ref, a2_ref, w11_ref, b11_ref,
                                     w12_ref, b12_ref, ws1_ref, bs1_ref)
    zero_halo(a5_ref)
    a5_ref[TB:TB + M, :] = res_block(a3_ref, a4_ref, w21_ref, b21_ref,
                                     w22_ref, b22_ref, ws2_ref, bs2_ref)
    h = res_block(a5_ref, a6_ref, w31_ref, b31_ref,
                  w32_ref, b32_ref, ws3_ref, bs3_ref)            # (M, 64)

    # ---- fc + sigmoid: 19 accumulating (TB,64)x(64,128) dots, lane-dense out --
    z = jnp.zeros((TB, N_PAD), f32)
    for l in range(L):
        z = z + jnp.dot(h[l * TB:(l + 1) * TB, :],
                        fcw_ref[l * C_LAST:(l + 1) * C_LAST, :],
                        preferred_element_type=f32)
    z = z + fcb_ref[...]
    s = pl.reciprocal(1.0 + jnp.exp(-z), approx=True)            # EUP exp + rcp
    o_ref[...] = jnp.minimum(s, 1.0)


# ----------------------------------------------------------------------------
# Wrapper
# ----------------------------------------------------------------------------
def resnet_forward(x, weights, tb_max=TB_MAX):
    """x: (B, NODE_NUM, 1); weights: flat list produced by prepare_params."""
    B, L, cin = x.shape
    assert L == NODE_NUM and cin == 1
    TB = min(tb_max, _round_up(B, 8))
    G = -(-B // TB)
    Bpad = G * TB

    # Host-side prep (tiny): pad batch to G*TB, pad L by 2 (conv1 halo), and
    # reorder each batch tile to l-major rows so in-kernel reads are aligned.
    xf = jnp.pad(x.astype(jnp.float32)[..., 0], ((0, Bpad - B), (2, 2)))
    xf = jnp.transpose(xf.reshape(G, TB, L + 4), (0, 2, 1))
    xf = xf.reshape(G, (L + 4) * TB, 1)

    in_specs = [pl.BlockSpec((None, (L + 4) * TB, 1), lambda i: (i, 0, 0))]
    # Whole-array, constant-index weight blocks: VMEM-resident, no re-DMA.
    in_specs += [pl.BlockSpec(w.shape, lambda i, nd=w.ndim: (0,) * nd)
                 for w in weights]

    P = (L + 2) * TB
    scratch = [
        pltpu.VMEM((P, 128), jnp.float32),   # conv1 out / block1 in
        pltpu.VMEM((P, 256), jnp.float32),   # block1 mid
        pltpu.VMEM((P, 256), jnp.float32),   # block1 out / block2 in
        pltpu.VMEM((P, 128), jnp.float32),   # block2 mid
        pltpu.VMEM((P, 128), jnp.float32),   # block2 out / block3 in
        pltpu.VMEM((P, 64), jnp.float32),    # block3 mid
    ]

    out = pl.pallas_call(
        _resnet_kernel,
        out_shape=jax.ShapeDtypeStruct((G, TB, N_PAD), jnp.float32),
        grid=(G,),
        in_specs=in_specs,
        out_specs=pl.BlockSpec((None, TB, N_PAD), lambda i: (i, 0, 0)),
        scratch_shapes=scratch,
        compiler_params=pltpu.CompilerParams(
            dimension_semantics=("parallel",),
            vmem_limit_bytes=32 * 1024 * 1024),
    )(xf, *weights)
    return out.reshape(Bpad, N_PAD)[:B, :NODE_NUM]


# ----------------------------------------------------------------------------
# Parameters: PyTorch layouts -> folded / permuted kernel operands
# ----------------------------------------------------------------------------
def _bn_init(c):
    return dict(gamma=jnp.ones((c,), jnp.float32),
                beta=jnp.zeros((c,), jnp.float32),
                mean=jnp.zeros((c,), jnp.float32),
                var=jnp.ones((c,), jnp.float32))


def init_torch_like_params(key):
    """Deterministic random params in PyTorch layouts (conv (Cout,Cin,K), fc (N,F))."""
    ks = jax.random.split(key, 12)

    def uni(k, shape, fan_in):
        b = float(fan_in) ** -0.5
        return jax.random.uniform(k, shape, jnp.float32, -b, b)

    p = {}
    p["conv1_w"] = uni(ks[0], (128, 1, 5), 1 * 5)
    p["bn1"] = _bn_init(128)
    i = 1
    for name, cin, cout in (("b1", 128, 256), ("b2", 256, 128), ("b3", 128, 64)):
        p[f"{name}_l1_w"] = uni(ks[i], (cout, cin, 3), cin * 3); i += 1
        p[f"{name}_bn1"] = _bn_init(cout)
        p[f"{name}_l2_w"] = uni(ks[i], (cout, cout, 3), cout * 3); i += 1
        p[f"{name}_bn2"] = _bn_init(cout)
        p[f"{name}_sc_w"] = uni(ks[i], (cout, cin, 1), cin); i += 1
        p[f"{name}_bns"] = _bn_init(cout)
    fin = C_LAST * NODE_NUM
    p["fc_w"] = uni(ks[10], (NODE_NUM, fin), fin)
    p["fc_b"] = uni(ks[11], (NODE_NUM,), fin)
    return p


def _fold_bn(w_oik, bn):
    """Fold eval-mode BatchNorm1d into a bias-free conv: returns (w', b')."""
    s = bn["gamma"] * jax.lax.rsqrt(bn["var"] + BN_EPS)          # (Cout,)
    return w_oik * s[:, None, None], bn["beta"] - bn["mean"] * s


def prepare_params(tp):
    """One-time prep: BN folding + layout conversion into kernel operand list."""
    def conv3_prep(w_fold):                      # (Cout, Cin, 3) -> (3*Cin, Cout)
        w = jnp.transpose(w_fold, (2, 1, 0))     # (3, Cin, Cout), row = k*Cin + c
        k, cin, cout = w.shape
        return w.reshape(k * cin, cout)

    ops = []
    w, b = _fold_bn(tp["conv1_w"], tp["bn1"])                        # (128,1,5)
    ops += [jnp.transpose(w, (2, 1, 0)).reshape(5, 128), b.reshape(1, -1)]
    for name in ("b1", "b2", "b3"):
        w1, b1 = _fold_bn(tp[f"{name}_l1_w"], tp[f"{name}_bn1"])
        w2, b2 = _fold_bn(tp[f"{name}_l2_w"], tp[f"{name}_bn2"])
        ws, bs = _fold_bn(tp[f"{name}_sc_w"], tp[f"{name}_bns"])
        ops += [conv3_prep(w1), b1.reshape(1, -1),
                conv3_prep(w2), b2.reshape(1, -1),
                jnp.transpose(ws[:, :, 0], (1, 0)), bs.reshape(1, -1)]
    # fc: PyTorch flattens (B, C, L) channel-major (f = c*L + l); the kernel does
    # per-position accumulating dots, so permute to [l, c, n] and pad N -> 128.
    L, C, N = NODE_NUM, C_LAST, NODE_NUM
    fw = tp["fc_w"].T.reshape(C, L, N)                  # [c, l, n]
    fw = jnp.transpose(fw, (1, 0, 2)).reshape(L * C, N)  # row = l*C + c
    fw = jnp.pad(fw, ((0, 0), (0, N_PAD - N)))
    fb = jnp.pad(tp["fc_b"], (0, N_PAD - N)).reshape(1, -1)
    ops += [fw, fb]
    return [jnp.asarray(o, jnp.float32) for o in ops]


# ----------------------------------------------------------------------------
# Pure-JAX reference (independent of the kernel's layout tricks)
# ----------------------------------------------------------------------------
def reference_forward(x, tp):
    hp = jax.lax.Precision.HIGHEST

    def conv1d(h, w, pad):                 # h: (B,Cin,L), w: (Cout,Cin,K)
        return jax.lax.conv_general_dilated(
            h, w, window_strides=(1,), padding=[(pad, pad)],
            dimension_numbers=("NCH", "OIH", "NCH"), precision=hp)

    def bn(h, p):
        s = p["gamma"] * jax.lax.rsqrt(p["var"] + BN_EPS)
        return (h - p["mean"][None, :, None]) * s[None, :, None] \
            + p["beta"][None, :, None]

    def lrelu(h):
        return jnp.where(h >= 0.0, h, LEAKY_SLOPE * h)

    h = jnp.transpose(x.astype(jnp.float32), (0, 2, 1))          # (B,1,L)
    h = lrelu(bn(conv1d(h, tp["conv1_w"], 2), tp["bn1"]))
    for name in ("b1", "b2", "b3"):
        left = lrelu(bn(conv1d(h, tp[f"{name}_l1_w"], 1), tp[f"{name}_bn1"]))
        left = bn(conv1d(left, tp[f"{name}_l2_w"], 1), tp[f"{name}_bn2"])
        sc = bn(conv1d(h, tp[f"{name}_sc_w"], 0), tp[f"{name}_bns"])
        h = jnp.maximum(left + sc, 0.0)
    flat = h.reshape(h.shape[0], -1)                             # c-major
    z = jnp.dot(flat, tp["fc_w"].T, precision=hp) + tp["fc_b"]
    return 1.0 / (1.0 + jnp.exp(-z))


if __name__ == "__main__":
    key = jax.random.PRNGKey(0)
    kp, kx = jax.random.split(key)
    torch_params = init_torch_like_params(kp)
    weights = prepare_params(torch_params)      # one-time BN fold + layout prep

    batch = 2
    x = jax.random.normal(kx, (batch, NODE_NUM, 1), jnp.float32)

    fwd = jax.jit(resnet_forward)
    out = jax.block_until_ready(fwd(x, weights))

    assert out.shape == (batch, NODE_NUM)
    assert bool(jnp.all(jnp.isfinite(out)))
    assert bool(jnp.all((out >= 0.0) & (out <= 1.0)))

    ref = reference_forward(x, torch_params)
    max_err = float(jnp.max(jnp.abs(out - ref)))
    assert max_err < 5e-3, f"mismatch vs reference: {max_err}"

    print("KERNEL_OK")
</pallas_src>

<mosaic_0001>
module attributes {stable_mosaic.version = 11 : i64} {
  func.func @_resnet_kernel(%arg0: i32, %arg1: memref<1x184x1xf32, #tpu.memory_space<vmem>>, %arg2: memref<5x128xf32, #tpu.memory_space<vmem>>, %arg3: memref<1x128xf32, #tpu.memory_space<vmem>>, %arg4: memref<384x256xf32, #tpu.memory_space<vmem>>, %arg5: memref<1x256xf32, #tpu.memory_space<vmem>>, %arg6: memref<768x256xf32, #tpu.memory_space<vmem>>, %arg7: memref<1x256xf32, #tpu.memory_space<vmem>>, %arg8: memref<128x256xf32, #tpu.memory_space<vmem>>, %arg9: memref<1x256xf32, #tpu.memory_space<vmem>>, %arg10: memref<768x128xf32, #tpu.memory_space<vmem>>, %arg11: memref<1x128xf32, #tpu.memory_space<vmem>>, %arg12: memref<384x128xf32, #tpu.memory_space<vmem>>, %arg13: memref<1x128xf32, #tpu.memory_space<vmem>>, %arg14: memref<256x128xf32, #tpu.memory_space<vmem>>, %arg15: memref<1x128xf32, #tpu.memory_space<vmem>>, %arg16: memref<384x64xf32, #tpu.memory_space<vmem>>, %arg17: memref<1x64xf32, #tpu.memory_space<vmem>>, %arg18: memref<192x64xf32, #tpu.memory_space<vmem>>, %arg19: memref<1x64xf32, #tpu.memory_space<vmem>>, %arg20: memref<128x64xf32, #tpu.memory_space<vmem>>, %arg21: memref<1x64xf32, #tpu.memory_space<vmem>>, %arg22: memref<1216x128xf32, #tpu.memory_space<vmem>>, %arg23: memref<1x128xf32, #tpu.memory_space<vmem>>, %arg24: memref<1x8x128xf32, #tpu.memory_space<vmem>>, %arg25: memref<168x128xf32, #tpu.memory_space<vmem>>, %arg26: memref<168x256xf32, #tpu.memory_space<vmem>>, %arg27: memref<168x256xf32, #tpu.memory_space<vmem>>, %arg28: memref<168x128xf32, #tpu.memory_space<vmem>>, %arg29: memref<168x128xf32, #tpu.memory_space<vmem>>, %arg30: memref<168x64xf32, #tpu.memory_space<vmem>>) attributes {dimension_semantics = [#tpu.dimension_semantics<parallel>], iteration_bounds = array<i64: 1>, scalar_prefetch = 0 : i64, scratch_operands = 6 : i64, tpu.core_type = #tpu.core_type<tc>, window_params = [{transform_indices = @transform_0, window_bounds = array<i64: 1, 184, 1>}, {pipeline_mode = #tpu.pipeline_mode<synchronous>, transform_indices = @transform_1, window_bounds = array<i64: 5, 128>}, {pipeline_mode = #tpu.pipeline_mode<synchronous>, transform_indices = @transform_2, window_bounds = array<i64: 1, 128>}, {pipeline_mode = #tpu.pipeline_mode<synchronous>, transform_indices = @transform_3, window_bounds = array<i64: 384, 256>}, {pipeline_mode = #tpu.pipeline_mode<synchronous>, transform_indices = @transform_4, window_bounds = array<i64: 1, 256>}, {pipeline_mode = #tpu.pipeline_mode<synchronous>, transform_indices = @transform_5, window_bounds = array<i64: 768, 256>}, {pipeline_mode = #tpu.pipeline_mode<synchronous>, transform_indices = @transform_6, window_bounds = array<i64: 1, 256>}, {pipeline_mode = #tpu.pipeline_mode<synchronous>, transform_indices = @transform_7, window_bounds = array<i64: 128, 256>}, {pipeline_mode = #tpu.pipeline_mode<synchronous>, transform_indices = @transform_8, window_bounds = array<i64: 1, 256>}, {pipeline_mode = #tpu.pipeline_mode<synchronous>, transform_indices = @transform_9, window_bounds = array<i64: 768, 128>}, {pipeline_mode = #tpu.pipeline_mode<synchronous>, transform_indices = @transform_10, window_bounds = array<i64: 1, 128>}, {pipeline_mode = #tpu.pipeline_mode<synchronous>, transform_indices = @transform_11, window_bounds = array<i64: 384, 128>}, {pipeline_mode = #tpu.pipeline_mode<synchronous>, transform_indices = @transform_12, window_bounds = array<i64: 1, 128>}, {pipeline_mode = #tpu.pipeline_mode<synchronous>, transform_indices = @transform_13, window_bounds = array<i64: 256, 128>}, {pipeline_mode = #tpu.pipeline_mode<synchronous>, transform_indices = @transform_14, window_bounds = array<i64: 1, 128>}, {pipeline_mode = #tpu.pipeline_mode<synchronous>, transform_indices = @transform_15, window_bounds = array<i64: 384, 64>}, {pipeline_mode = #tpu.pipeline_mode<synchronous>, transform_indices = @transform_16, window_bounds = array<i64: 1, 64>}, {pipeline_mode = #tpu.pipeline_mode<synchronous>, transform_indices = @transform_17, window_bounds = array<i64: 192, 64>}, {pipeline_mode = #tpu.pipeline_mode<synchronous>, transform_indices = @transform_18, window_bounds = array<i64: 1, 64>}, {pipeline_mode = #tpu.pipeline_mode<synchronous>, transform_indices = @transform_19, window_bounds = array<i64: 128, 64>}, {pipeline_mode = #tpu.pipeline_mode<synchronous>, transform_indices = @transform_20, window_bounds = array<i64: 1, 64>}, {pipeline_mode = #tpu.pipeline_mode<synchronous>, transform_indices = @transform_21, window_bounds = array<i64: 1216, 128>}, {pipeline_mode = #tpu.pipeline_mode<synchronous>, transform_indices = @transform_22, window_bounds = array<i64: 1, 128>}, {transform_indices = @transform_23, window_bounds = array<i64: 1, 8, 128>}]} {
    %c0 = arith.constant 0 : index
    %c0_0 = arith.constant 0 : index
    %c0_1 = arith.constant 0 : index
    %0 = vector.load %arg1[%c0, %c0_0, %c0_1] : memref<1x184x1xf32, #tpu.memory_space<vmem>>, vector<1x152x1xf32>
    %1 = vector.shape_cast %0 : vector<1x152x1xf32> to vector<152x1xf32>
    %c0_2 = arith.constant 0 : index
    %c0_3 = arith.constant 0 : index
    %2 = vector.load %arg2[%c0_2, %c0_3] : memref<5x128xf32, #tpu.memory_space<vmem>>, vector<1x128xf32>
    %3 = vector.broadcast %1 : vector<152x1xf32> to vector<152x128xf32>
    %4 = vector.broadcast %2 : vector<1x128xf32> to vector<152x128xf32>
    %5 = arith.mulf %3, %4 : vector<152x128xf32>
    %c0_4 = arith.constant 0 : index
    %c8 = arith.constant 8 : index
    %c0_5 = arith.constant 0 : index
    %6 = vector.load %arg1[%c0_4, %c8, %c0_5] : memref<1x184x1xf32, #tpu.memory_space<vmem>>, vector<1x152x1xf32>
    %7 = vector.shape_cast %6 : vector<1x152x1xf32> to vector<152x1xf32>
    %c1 = arith.constant 1 : index
    %c0_6 = arith.constant 0 : index
    %8 = vector.load %arg2[%c1, %c0_6] : memref<5x128xf32, #tpu.memory_space<vmem>>, vector<1x128xf32>
    %9 = vector.broadcast %7 : vector<152x1xf32> to vector<152x128xf32>
    %10 = vector.broadcast %8 : vector<1x128xf32> to vector<152x128xf32>
    %11 = arith.mulf %9, %10 : vector<152x128xf32>
    %12 = arith.addf %5, %11 : vector<152x128xf32>
    %c0_7 = arith.constant 0 : index
    %c16 = arith.constant 16 : index
    %c0_8 = arith.constant 0 : index
    %13 = vector.load %arg1[%c0_7, %c16, %c0_8] : memref<1x184x1xf32, #tpu.memory_space<vmem>>, vector<1x152x1xf32>
    %14 = vector.shape_cast %13 : vector<1x152x1xf32> to vector<152x1xf32>
    %c2 = arith.constant 2 : index
    %c0_9 = arith.constant 0 : index
    %15 = vector.load %arg2[%c2, %c0_9] : memref<5x128xf32, #tpu.memory_space<vmem>>, vector<1x128xf32>
    %16 = vector.broadcast %14 : vector<152x1xf32> to vector<152x128xf32>
    %17 = vector.broadcast %15 : vector<1x128xf32> to vector<152x128xf32>
    %18 = arith.mulf %16, %17 : vector<152x128xf32>
    %19 = arith.addf %12, %18 : vector<152x128xf32>
    %c0_10 = arith.constant 0 : index
    %c24 = arith.constant 24 : index
    %c0_11 = arith.constant 0 : index
    %20 = vector.load %arg1[%c0_10, %c24, %c0_11] : memref<1x184x1xf32, #tpu.memory_space<vmem>>, vector<1x152x1xf32>
    %21 = vector.shape_cast %20 : vector<1x152x1xf32> to vector<152x1xf32>
    %c3 = arith.constant 3 : index
    %c0_12 = arith.constant 0 : index
    %22 = vector.load %arg2[%c3, %c0_12] : memref<5x128xf32, #tpu.memory_space<vmem>>, vector<1x128xf32>
    %23 = vector.broadcast %21 : vector<152x1xf32> to vector<152x128xf32>
    %24 = vector.broadcast %22 : vector<1x128xf32> to vector<152x128xf32>
    %25 = arith.mulf %23, %24 : vector<152x128xf32>
    %26 = arith.addf %19, %25 : vector<152x128xf32>
    %c0_13 = arith.constant 0 : index
    %c32 = arith.constant 32 : index
    %c0_14 = arith.constant 0 : index
    %27 = vector.load %arg1[%c0_13, %c32, %c0_14] : memref<1x184x1xf32, #tpu.memory_space<vmem>>, vector<1x152x1xf32>
    %28 = vector.shape_cast %27 : vector<1x152x1xf32> to vector<152x1xf32>
    %c4 = arith.constant 4 : index
    %c0_15 = arith.constant 0 : index
    %29 = vector.load %arg2[%c4, %c0_15] : memref<5x128xf32, #tpu.memory_space<vmem>>, vector<1x128xf32>
    %30 = vector.broadcast %28 : vector<152x1xf32> to vector<152x128xf32>
    %31 = vector.broadcast %29 : vector<1x128xf32> to vector<152x128xf32>
    %32 = arith.mulf %30, %31 : vector<152x128xf32>
    %33 = arith.addf %26, %32 : vector<152x128xf32>
    %cst = arith.constant 0.000000e+00 : f32
    %34 = vector.broadcast %cst : f32 to vector<8x128xf32>
    %c0_16 = arith.constant 0 : index
    %c0_17 = arith.constant 0 : index
    %35 = vector.load %arg25[%c0_16, %c0_17] : memref<168x128xf32, #tpu.memory_space<vmem>>, vector<8x128xf32>
    tpu.vector_store %arg25[%c0_16, %c0_17], %34 {strides = array<i32>} : memref<168x128xf32, #tpu.memory_space<vmem>>, vector<8x128xf32>,
    %cst_18 = arith.constant 0.000000e+00 : f32
    %36 = vector.broadcast %cst_18 : f32 to vector<8x128xf32>
    %c160 = arith.constant 160 : index
    %c0_19 = arith.constant 0 : index
    %37 = vector.load %arg25[%c160, %c0_19] : memref<168x128xf32, #tpu.memory_space<vmem>>, vector<8x128xf32>
    tpu.vector_store %arg25[%c160, %c0_19], %36 {strides = array<i32>} : memref<168x128xf32, #tpu.memory_space<vmem>>, vector<8x128xf32>,
    %c0_20 = arith.constant 0 : index
    %c0_21 = arith.constant 0 : index
    %38 = vector.load %arg3[%c0_20, %c0_21] : memref<1x128xf32, #tpu.memory_space<vmem>>, vector<1x128xf32>
    %39 = vector.broadcast %38 : vector<1x128xf32> to vector<152x128xf32>
    %40 = arith.addf %33, %39 : vector<152x128xf32>
    %cst_22 = arith.constant 0.000000e+00 : f32
    %41 = vector.broadcast %cst_22 : f32 to vector<152x128xf32>
    %42 = arith.cmpf oge, %40, %41 : vector<152x128xf32>
    %cst_23 = arith.constant 4.000000e-01 : f32
    %43 = vector.broadcast %cst_23 : f32 to vector<152x128xf32>
    %44 = arith.mulf %43, %40 : vector<152x128xf32>
    %45 = arith.select %42, %40, %44 : vector<152x128xi1>, vector<152x128xf32>
    %c8_24 = arith.constant 8 : index
    %c0_25 = arith.constant 0 : index
    %46 = vector.load %arg25[%c8_24, %c0_25] : memref<168x128xf32, #tpu.memory_space<vmem>>, vector<152x128xf32>
    tpu.vector_store %arg25[%c8_24, %c0_25], %45 {strides = array<i32>} : memref<168x128xf32, #tpu.memory_space<vmem>>, vector<152x128xf32>,
    %cst_26 = arith.constant 0.000000e+00 : f32
    %47 = vector.broadcast %cst_26 : f32 to vector<8x256xf32>
    %c0_27 = arith.constant 0 : index
    %c0_28 = arith.constant 0 : index
    %48 = vector.load %arg27[%c0_27, %c0_28] : memref<168x256xf32, #tpu.memory_space<vmem>>, vector<8x256xf32>
    tpu.vector_store %arg27[%c0_27, %c0_28], %47 {strides = array<i32>} : memref<168x256xf32, #tpu.memory_space<vmem>>, vector<8x256xf32>,
    %cst_29 = arith.constant 0.000000e+00 : f32
    %49 = vector.broadcast %cst_29 : f32 to vector<8x256xf32>
    %c160_30 = arith.constant 160 : index
    %c0_31 = arith.constant 0 : index
    %50 = vector.load %arg27[%c160_30, %c0_31] : memref<168x256xf32, #tpu.memory_space<vmem>>, vector<8x256xf32>
    tpu.vector_store %arg27[%c160_30, %c0_31], %49 {strides = array<i32>} : memref<168x256xf32, #tpu.memory_space<vmem>>, vector<8x256xf32>,
    %cst_32 = arith.constant 0.000000e+00 : f32
    %51 = vector.broadcast %cst_32 : f32 to vector<8x256xf32>
    %c0_33 = arith.constant 0 : index
    %c0_34 = arith.constant 0 : index
    %52 = vector.load %arg26[%c0_33, %c0_34] : memref<168x256xf32, #tpu.memory_space<vmem>>, vector<8x256xf32>
    tpu.vector_store %arg26[%c0_33, %c0_34], %51 {strides = array<i32>} : memref<168x256xf32, #tpu.memory_space<vmem>>, vector<8x256xf32>,
    %cst_35 = arith.constant 0.000000e+00 : f32
    %53 = vector.broadcast %cst_35 : f32 to vector<8x256xf32>
    %c160_36 = arith.constant 160 : index
    %c0_37 = arith.constant 0 : index
    %54 = vector.load %arg26[%c160_36, %c0_37] : memref<168x256xf32, #tpu.memory_space<vmem>>, vector<8x256xf32>
    tpu.vector_store %arg26[%c160_36, %c0_37], %53 {strides = array<i32>} : memref<168x256xf32, #tpu.memory_space<vmem>>, vector<8x256xf32>,
    %c0_38 = arith.constant 0 : index
    %c0_39 = arith.constant 0 : index
    %55 = vector.load %arg25[%c0_38, %c0_39] : memref<168x128xf32, #tpu.memory_space<vmem>>, vector<152x128xf32>
    %c0_40 = arith.constant 0 : index
    %c0_41 = arith.constant 0 : index
    %56 = vector.load %arg4[%c0_40, %c0_41] : memref<384x256xf32, #tpu.memory_space<vmem>>, vector<128x256xf32>
    %cst_42 = arith.constant dense<0.000000e+00> : vector<152x256xf32>
    %57 = tpu.matmul %55, %56, %cst_42 {dimension_numbers = #tpu.dot_dimension_numbers<[1], [0], [0], [1], [0, 0, 1, 1], [], []>} : vector<152x128xf32>, vector<128x256xf32>, vector<152x256xf32> -> vector<152x256xf32>
    %c8_43 = arith.constant 8 : index
    %c0_44 = arith.constant 0 : index
    %58 = vector.load %arg25[%c8_43, %c0_44] : memref<168x128xf32, #tpu.memory_space<vmem>>, vector<152x128xf32>
    %c128 = arith.constant 128 : index
    %c0_45 = arith.constant 0 : index
    %59 = vector.load %arg4[%c128, %c0_45] : memref<384x256xf32, #tpu.memory_space<vmem>>, vector<128x256xf32>
    %cst_46 = arith.constant dense<0.000000e+00> : vector<152x256xf32>
    %60 = tpu.matmul %58, %59, %cst_46 {dimension_numbers = #tpu.dot_dimension_numbers<[1], [0], [0], [1], [0, 0, 1, 1], [], []>} : vector<152x128xf32>, vector<128x256xf32>, vector<152x256xf32> -> vector<152x256xf32>
    %61 = arith.addf %57, %60 : vector<152x256xf32>
    %c16_47 = arith.constant 16 : index
    %c0_48 = arith.constant 0 : index
    %62 = vector.load %arg25[%c16_47, %c0_48] : memref<168x128xf32, #tpu.memory_space<vmem>>, vector<152x128xf32>
    %c256 = arith.constant 256 : index
    %c0_49 = arith.constant 0 : index
    %63 = vector.load %arg4[%c256, %c0_49] : memref<384x256xf32, #tpu.memory_space<vmem>>, vector<128x256xf32>
    %cst_50 = arith.constant dense<0.000000e+00> : vector<152x256xf32>
    %64 = tpu.matmul %62, %63, %cst_50 {dimension_numbers = #tpu.dot_dimension_numbers<[1], [0], [0], [1], [0, 0, 1, 1], [], []>} : vector<152x128xf32>, vector<128x256xf32>, vector<152x256xf32> -> vector<152x256xf32>
    %65 = arith.addf %61, %64 : vector<152x256xf32>
    %c0_51 = arith.constant 0 : index
    %c0_52 = arith.constant 0 : index
    %66 = vector.load %arg5[%c0_51, %c0_52] : memref<1x256xf32, #tpu.memory_space<vmem>>, vector<1x256xf32>
    %67 = vector.broadcast %66 : vector<1x256xf32> to vector<152x256xf32>
    %68 = arith.addf %65, %67 : vector<152x256xf32>
    %cst_53 = arith.constant 0.000000e+00 : f32
    %69 = vector.broadcast %cst_53 : f32 to vector<152x256xf32>
    %70 = arith.cmpf oge, %68, %69 : vector<152x256xf32>
    %cst_54 = arith.constant 4.000000e-01 : f32
    %71 = vector.broadcast %cst_54 : f32 to vector<152x256xf32>
    %72 = arith.mulf %71, %68 : vector<152x256xf32>
    %73 = arith.select %70, %68, %72 : vector<152x256xi1>, vector<152x256xf32>
    %c8_55 = arith.constant 8 : index
    %c0_56 = arith.constant 0 : index
    %74 = vector.load %arg26[%c8_55, %c0_56] : memref<168x256xf32, #tpu.memory_space<vmem>>, vector<152x256xf32>
    tpu.vector_store %arg26[%c8_55, %c0_56], %73 {strides = array<i32>} : memref<168x256xf32, #tpu.memory_space<vmem>>, vector<152x256xf32>,
    %c0_57 = arith.constant 0 : index
    %c0_58 = arith.constant 0 : index
    %75 = vector.load %arg26[%c0_57, %c0_58] : memref<168x256xf32, #tpu.memory_space<vmem>>, vector<152x256xf32>
    %c0_59 = arith.constant 0 : index
    %c0_60 = arith.constant 0 : index
    %76 = vector.load %arg6[%c0_59, %c0_60] : memref<768x256xf32, #tpu.memory_space<vmem>>, vector<256x256xf32>
    %cst_61 = arith.constant dense<0.000000e+00> : vector<152x256xf32>
    %77 = tpu.matmul %75, %76, %cst_61 {dimension_numbers = #tpu.dot_dimension_numbers<[1], [0], [0], [1], [0, 0, 1, 1], [], []>} : vector<152x256xf32>, vector<256x256xf32>, vector<152x256xf32> -> vector<152x256xf32>
    %c8_62 = arith.constant 8 : index
    %c0_63 = arith.constant 0 : index
    %78 = vector.load %arg26[%c8_62, %c0_63] : memref<168x256xf32, #tpu.memory_space<vmem>>, vector<152x256xf32>
    %c256_64 = arith.constant 256 : index
    %c0_65 = arith.constant 0 : index
    %79 = vector.load %arg6[%c256_64, %c0_65] : memref<768x256xf32, #tpu.memory_space<vmem>>, vector<256x256xf32>
    %cst_66 = arith.constant dense<0.000000e+00> : vector<152x256xf32>
    %80 = tpu.matmul %78, %79, %cst_66 {dimension_numbers = #tpu.dot_dimension_numbers<[1], [0], [0], [1], [0, 0, 1, 1], [], []>} : vector<152x256xf32>, vector<256x256xf32>, vector<152x256xf32> -> vector<152x256xf32>
    %81 = arith.addf %77, %80 : vector<152x256xf32>
    %c16_67 = arith.constant 16 : index
    %c0_68 = arith.constant 0 : index
    %82 = vector.load %arg26[%c16_67, %c0_68] : memref<168x256xf32, #tpu.memory_space<vmem>>, vector<152x256xf32>
    %c512 = arith.constant 512 : index
    %c0_69 = arith.constant 0 : index
    %83 = vector.load %arg6[%c512, %c0_69] : memref<768x256xf32, #tpu.memory_space<vmem>>, vector<256x256xf32>
    %cst_70 = arith.constant dense<0.000000e+00> : vector<152x256xf32>
    %84 = tpu.matmul %82, %83, %cst_70 {dimension_numbers = #tpu.dot_dimension_numbers<[1], [0], [0], [1], [0, 0, 1, 1], [], []>} : vector<152x256xf32>, vector<256x256xf32>, vector<152x256xf32> -> vector<152x256xf32>
    %85 = arith.addf %81, %84 : vector<152x256xf32>
    %c0_71 = arith.constant 0 : index
    %c0_72 = arith.constant 0 : index
    %86 = vector.load %arg7[%c0_71, %c0_72] : memref<1x256xf32, #tpu.memory_space<vmem>>, vector<1x256xf32>
    %87 = vector.broadcast %86 : vector<1x256xf32> to vector<152x256xf32>
    %88 = arith.addf %85, %87 : vector<152x256xf32>
    %c8_73 = arith.constant 8 : index
    %c0_74 = arith.constant 0 : index
    %89 = vector.load %arg25[%c8_73, %c0_74] : memref<168x128xf32, #tpu.memory_space<vmem>>, vector<152x128xf32>
    %c0_75 = arith.constant 0 : index
    %c0_76 = arith.constant 0 : index
    %90 = vector.load %arg8[%c0_75, %c0_76] : memref<128x256xf32, #tpu.memory_space<vmem>>, vector<128x256xf32>
    %cst_77 = arith.constant dense<0.000000e+00> : vector<152x256xf32>
    %91 = tpu.matmul %89, %90, %cst_77 {dimension_numbers = #tpu.dot_dimension_numbers<[1], [0], [0], [1], [0, 0, 1, 1], [], []>} : vector<152x128xf32>, vector<128x256xf32>, vector<152x256xf32> -> vector<152x256xf32>
    %c0_78 = arith.constant 0 : index
    %c0_79 = arith.constant 0 : index
    %92 = vector.load %arg9[%c0_78, %c0_79] : memref<1x256xf32, #tpu.memory_space<vmem>>, vector<1x256xf32>
    %93 = vector.broadcast %92 : vector<1x256xf32> to vector<152x256xf32>
    %94 = arith.addf %91, %93 : vector<152x256xf32>
    %95 = arith.addf %88, %94 : vector<152x256xf32>
    %cst_80 = arith.constant 0.000000e+00 : f32
    %96 = vector.broadcast %cst_80 : f32 to vector<152x256xf32>
    %97 = arith.maximumf %95, %96 : vector<152x256xf32>
    %c8_81 = arith.constant 8 : index
    %c0_82 = arith.constant 0 : index
    %98 = vector.load %arg27[%c8_81, %c0_82] : memref<168x256xf32, #tpu.memory_space<vmem>>, vector<152x256xf32>
    tpu.vector_store %arg27[%c8_81, %c0_82], %97 {strides = array<i32>} : memref<168x256xf32, #tpu.memory_space<vmem>>, vector<152x256xf32>,
    %cst_83 = arith.constant 0.000000e+00 : f32
    %99 = vector.broadcast %cst_83 : f32 to vector<8x128xf32>
    %c0_84 = arith.constant 0 : index
    %c0_85 = arith.constant 0 : index
    %100 = vector.load %arg29[%c0_84, %c0_85] : memref<168x128xf32, #tpu.memory_space<vmem>>, vector<8x128xf32>
    tpu.vector_store %arg29[%c0_84, %c0_85], %99 {strides = array<i32>} : memref<168x128xf32, #tpu.memory_space<vmem>>, vector<8x128xf32>,
    %cst_86 = arith.constant 0.000000e+00 : f32
    %101 = vector.broadcast %cst_86 : f32 to vector<8x128xf32>
    %c160_87 = arith.constant 160 : index
    %c0_88 = arith.constant 0 : index
    %102 = vector.load %arg29[%c160_87, %c0_88] : memref<168x128xf32, #tpu.memory_space<vmem>>, vector<8x128xf32>
    tpu.vector_store %arg29[%c160_87, %c0_88], %101 {strides = array<i32>} : memref<168x128xf32, #tpu.memory_space<vmem>>, vector<8x128xf32>,
    %cst_89 = arith.constant 0.000000e+00 : f32
    %103 = vector.broadcast %cst_89 : f32 to vector<8x128xf32>
    %c0_90 = arith.constant 0 : index
    %c0_91 = arith.constant 0 : index
    %104 = vector.load %arg28[%c0_90, %c0_91] : memref<168x128xf32, #tpu.memory_space<vmem>>, vector<8x128xf32>
    tpu.vector_store %arg28[%c0_90, %c0_91], %103 {strides = array<i32>} : memref<168x128xf32, #tpu.memory_space<vmem>>, vector<8x128xf32>,
    %cst_92 = arith.constant 0.000000e+00 : f32
    %105 = vector.broadcast %cst_92 : f32 to vector<8x128xf32>
    %c160_93 = arith.constant 160 : index
    %c0_94 = arith.constant 0 : index
    %106 = vector.load %arg28[%c160_93, %c0_94] : memref<168x128xf32, #tpu.memory_space<vmem>>, vector<8x128xf32>
    tpu.vector_store %arg28[%c160_93, %c0_94], %105 {strides = array<i32>} : memref<168x128xf32, #tpu.memory_space<vmem>>, vector<8x128xf32>,
    %c0_95 = arith.constant 0 : index
    %c0_96 = arith.constant 0 : index
    %107 = vector.load %arg27[%c0_95, %c0_96] : memref<168x256xf32, #tpu.memory_space<vmem>>, vector<152x256xf32>
    %c0_97 = arith.constant 0 : index
    %c0_98 = arith.constant 0 : index
    %108 = vector.load %arg10[%c0_97, %c0_98] : memref<768x128xf32, #tpu.memory_space<vmem>>, vector<256x128xf32>
    %cst_99 = arith.constant dense<0.000000e+00> : vector<152x128xf32>
    %109 = tpu.matmul %107, %108, %cst_99 {dimension_numbers = #tpu.dot_dimension_numbers<[1], [0], [0], [1], [0, 0, 1, 1], [], []>} : vector<152x256xf32>, vector<256x128xf32>, vector<152x128xf32> -> vector<152x128xf32>
    %c8_100 = arith.constant 8 : index
    %c0_101 = arith.constant 0 : index
    %110 = vector.load %arg27[%c8_100, %c0_101] : memref<168x256xf32, #tpu.memory_space<vmem>>, vector<152x256xf32>
    %c256_102 = arith.constant 256 : index
    %c0_103 = arith.constant 0 : index
    %111 = vector.load %arg10[%c256_102, %c0_103] : memref<768x128xf32, #tpu.memory_space<vmem>>, vector<256x128xf32>
    %cst_104 = arith.constant dense<0.000000e+00> : vector<152x128xf32>
    %112 = tpu.matmul %110, %111, %cst_104 {dimension_numbers = #tpu.dot_dimension_numbers<[1], [0], [0], [1], [0, 0, 1, 1], [], []>} : vector<152x256xf32>, vector<256x128xf32>, vector<152x128xf32> -> vector<152x128xf32>
    %113 = arith.addf %109, %112 : vector<152x128xf32>
    %c16_105 = arith.constant 16 : index
    %c0_106 = arith.constant 0 : index
    %114 = vector.load %arg27[%c16_105, %c0_106] : memref<168x256xf32, #tpu.memory_space<vmem>>, vector<152x256xf32>
    %c512_107 = arith.constant 512 : index
    %c0_108 = arith.constant 0 : index
    %115 = vector.load %arg10[%c512_107, %c0_108] : memref<768x128xf32, #tpu.memory_space<vmem>>, vector<256x128xf32>
    %cst_109 = arith.constant dense<0.000000e+00> : vector<152x128xf32>
    %116 = tpu.matmul %114, %115, %cst_109 {dimension_numbers = #tpu.dot_dimension_numbers<[1], [0], [0], [1], [0, 0, 1, 1], [], []>} : vector<152x256xf32>, vector<256x128xf32>, vector<152x128xf32> -> vector<152x128xf32>
    %117 = arith.addf %113, %116 : vector<152x128xf32>
    %c0_110 = arith.constant 0 : index
    %c0_111 = arith.constant 0 : index
    %118 = vector.load %arg11[%c0_110, %c0_111] : memref<1x128xf32, #tpu.memory_space<vmem>>, vector<1x128xf32>
    %119 = vector.broadcast %118 : vector<1x128xf32> to vector<152x128xf32>
    %120 = arith.addf %117, %119 : vector<152x128xf32>
    %cst_112 = arith.constant 0.000000e+00 : f32
    %121 = vector.broadcast %cst_112 : f32 to vector<152x128xf32>
    %122 = arith.cmpf oge, %120, %121 : vector<152x128xf32>
    %cst_113 = arith.constant 4.000000e-01 : f32
    %123 = vector.broadcast %cst_113 : f32 to vector<152x128xf32>
    %124 = arith.mulf %123, %120 : vector<152x128xf32>
    %125 = arith.select %122, %120, %124 : vector<152x128xi1>, vector<152x128xf32>
    %c8_114 = arith.constant 8 : index
    %c0_115 = arith.constant 0 : index
    %126 = vector.load %arg28[%c8_114, %c0_115] : memref<168x128xf32, #tpu.memory_space<vmem>>, vector<152x128xf32>
    tpu.vector_store %arg28[%c8_114, %c0_115], %125 {strides = array<i32>} : memref<168x128xf32, #tpu.memory_space<vmem>>, vector<152x128xf32>,
    %c0_116 = arith.constant 0 : index
    %c0_117 = arith.constant 0 : index
    %127 = vector.load %arg28[%c0_116, %c0_117] : memref<168x128xf32, #tpu.memory_space<vmem>>, vector<152x128xf32>
    %c0_118 = arith.constant 0 : index
    %c0_119 = arith.constant 0 : index
    %128 = vector.load %arg12[%c0_118, %c0_119] : memref<384x128xf32, #tpu.memory_space<vmem>>, vector<128x128xf32>
    %cst_120 = arith.constant dense<0.000000e+00> : vector<152x128xf32>
    %129 = tpu.matmul %127, %128, %cst_120 {dimension_numbers = #tpu.dot_dimension_numbers<[1], [0], [0], [1], [0, 0, 1, 1], [], []>} : vector<152x128xf32>, vector<128x128xf32>, vector<152x128xf32> -> vector<152x128xf32>
    %c8_121 = arith.constant 8 : index
    %c0_122 = arith.constant 0 : index
    %130 = vector.load %arg28[%c8_121, %c0_122] : memref<168x128xf32, #tpu.memory_space<vmem>>, vector<152x128xf32>
    %c128_123 = arith.constant 128 : index
    %c0_124 = arith.constant 0 : index
    %131 = vector.load %arg12[%c128_123, %c0_124] : memref<384x128xf32, #tpu.memory_space<vmem>>, vector<128x128xf32>
    %cst_125 = arith.constant dense<0.000000e+00> : vector<152x128xf32>
    %132 = tpu.matmul %130, %131, %cst_125 {dimension_numbers = #tpu.dot_dimension_numbers<[1], [0], [0], [1], [0, 0, 1, 1], [], []>} : vector<152x128xf32>, vector<128x128xf32>, vector<152x128xf32> -> vector<152x128xf32>
    %133 = arith.addf %129, %132 : vector<152x128xf32>
    %c16_126 = arith.constant 16 : index
    %c0_127 = arith.constant 0 : index
    %134 = vector.load %arg28[%c16_126, %c0_127] : memref<168x128xf32, #tpu.memory_space<vmem>>, vector<152x128xf32>
    %c256_128 = arith.constant 256 : index
    %c0_129 = arith.constant 0 : index
    %135 = vector.load %arg12[%c256_128, %c0_129] : memref<384x128xf32, #tpu.memory_space<vmem>>, vector<128x128xf32>
    %cst_130 = arith.constant dense<0.000000e+00> : vector<152x128xf32>
    %136 = tpu.matmul %134, %135, %cst_130 {dimension_numbers = #tpu.dot_dimension_numbers<[1], [0], [0], [1], [0, 0, 1, 1], [], []>} : vector<152x128xf32>, vector<128x128xf32>, vector<152x128xf32> -> vector<152x128xf32>
    %137 = arith.addf %133, %136 : vector<152x128xf32>
    %c0_131 = arith.constant 0 : index
    %c0_132 = arith.constant 0 : index
    %138 = vector.load %arg13[%c0_131, %c0_132] : memref<1x128xf32, #tpu.memory_space<vmem>>, vector<1x128xf32>
    %139 = vector.broadcast %138 : vector<1x128xf32> to vector<152x128xf32>
    %140 = arith.addf %137, %139 : vector<152x128xf32>
    %c8_133 = arith.constant 8 : index
    %c0_134 = arith.constant 0 : index
    %141 = vector.load %arg27[%c8_133, %c0_134] : memref<168x256xf32, #tpu.memory_space<vmem>>, vector<152x256xf32>
    %c0_135 = arith.constant 0 : index
    %c0_136 = arith.constant 0 : index
    %142 = vector.load %arg14[%c0_135, %c0_136] : memref<256x128xf32, #tpu.memory_space<vmem>>, vector<256x128xf32>
    %cst_137 = arith.constant dense<0.000000e+00> : vector<152x128xf32>
    %143 = tpu.matmul %141, %142, %cst_137 {dimension_numbers = #tpu.dot_dimension_numbers<[1], [0], [0], [1], [0, 0, 1, 1], [], []>} : vector<152x256xf32>, vector<256x128xf32>, vector<152x128xf32> -> vector<152x128xf32>
    %c0_138 = arith.constant 0 : index
    %c0_139 = arith.constant 0 : index
    %144 = vector.load %arg15[%c0_138, %c0_139] : memref<1x128xf32, #tpu.memory_space<vmem>>, vector<1x128xf32>
    %145 = vector.broadcast %144 : vector<1x128xf32> to vector<152x128xf32>
    %146 = arith.addf %143, %145 : vector<152x128xf32>
    %147 = arith.addf %140, %146 : vector<152x128xf32>
    %cst_140 = arith.constant 0.000000e+00 : f32
    %148 = vector.broadcast %cst_140 : f32 to vector<152x128xf32>
    %149 = arith.maximumf %147, %148 : vector<152x128xf32>
    %c8_141 = arith.constant 8 : index
    %c0_142 = arith.constant 0 : index
    %150 = vector.load %arg29[%c8_141, %c0_142] : memref<168x128xf32, #tpu.memory_space<vmem>>, vector<152x128xf32>
    tpu.vector_store %arg29[%c8_141, %c0_142], %149 {strides = array<i32>} : memref<168x128xf32, #tpu.memory_space<vmem>>, vector<152x128xf32>,
    %cst_143 = arith.constant 0.000000e+00 : f32
    %151 = vector.broadcast %cst_143 : f32 to vector<8x64xf32>
    %c0_144 = arith.constant 0 : index
    %c0_145 = arith.constant 0 : index
    %152 = vector.load %arg30[%c0_144, %c0_145] : memref<168x64xf32, #tpu.memory_space<vmem>>, vector<8x64xf32>
    tpu.vector_store %arg30[%c0_144, %c0_145], %151 {strides = array<i32>} : memref<168x64xf32, #tpu.memory_space<vmem>>, vector<8x64xf32>,
    %cst_146 = arith.constant 0.000000e+00 : f32
    %153 = vector.broadcast %cst_146 : f32 to vector<8x64xf32>
    %c160_147 = arith.constant 160 : index
    %c0_148 = arith.constant 0 : index
    %154 = vector.load %arg30[%c160_147, %c0_148] : memref<168x64xf32, #tpu.memory_space<vmem>>, vector<8x64xf32>
    tpu.vector_store %arg30[%c160_147, %c0_148], %153 {strides = array<i32>} : memref<168x64xf32, #tpu.memory_space<vmem>>, vector<8x64xf32>,
    %c0_149 = arith.constant 0 : index
    %c0_150 = arith.constant 0 : index
    %155 = vector.load %arg29[%c0_149, %c0_150] : memref<168x128xf32, #tpu.memory_space<vmem>>, vector<152x128xf32>
    %c0_151 = arith.constant 0 : index
    %c0_152 = arith.constant 0 : index
    %156 = vector.load %arg16[%c0_151, %c0_152] : memref<384x64xf32, #tpu.memory_space<vmem>>, vector<128x64xf32>
    %cst_153 = arith.constant dense<0.000000e+00> : vector<152x64xf32>
    %157 = tpu.matmul %155, %156, %cst_153 {dimension_numbers = #tpu.dot_dimension_numbers<[1], [0], [0], [1], [0, 0, 1, 1], [], []>} : vector<152x128xf32>, vector<128x64xf32>, vector<152x64xf32> -> vector<152x64xf32>
    %c8_154 = arith.constant 8 : index
    %c0_155 = arith.constant 0 : index
    %158 = vector.load %arg29[%c8_154, %c0_155] : memref<168x128xf32, #tpu.memory_space<vmem>>, vector<152x128xf32>
    %c128_156 = arith.constant 128 : index
    %c0_157 = arith.constant 0 : index
    %159 = vector.load %arg16[%c128_156, %c0_157] : memref<384x64xf32, #tpu.memory_space<vmem>>, vector<128x64xf32>
    %cst_158 = arith.constant dense<0.000000e+00> : vector<152x64xf32>
    %160 = tpu.matmul %158, %159, %cst_158 {dimension_numbers = #tpu.dot_dimension_numbers<[1], [0], [0], [1], [0, 0, 1, 1], [], []>} : vector<152x128xf32>, vector<128x64xf32>, vector<152x64xf32> -> vector<152x64xf32>
    %161 = arith.addf %157, %160 : vector<152x64xf32>
    %c16_159 = arith.constant 16 : index
    %c0_160 = arith.constant 0 : index
    %162 = vector.load %arg29[%c16_159, %c0_160] : memref<168x128xf32, #tpu.memory_space<vmem>>, vector<152x128xf32>
    %c256_161 = arith.constant 256 : index
    %c0_162 = arith.constant 0 : index
    %163 = vector.load %arg16[%c256_161, %c0_162] : memref<384x64xf32, #tpu.memory_space<vmem>>, vector<128x64xf32>
    %cst_163 = arith.constant dense<0.000000e+00> : vector<152x64xf32>
    %164 = tpu.matmul %162, %163, %cst_163 {dimension_numbers = #tpu.dot_dimension_numbers<[1], [0], [0], [1], [0, 0, 1, 1], [], []>} : vector<152x128xf32>, vector<128x64xf32>, vector<152x64xf32> -> vector<152x64xf32>
    %165 = arith.addf %161, %164 : vector<152x64xf32>
    %c0_164 = arith.constant 0 : index
    %c0_165 = arith.constant 0 : index
    %166 = vector.load %arg17[%c0_164, %c0_165] : memref<1x64xf32, #tpu.memory_space<vmem>>, vector<1x64xf32>
    %167 = vector.broadcast %166 : vector<1x64xf32> to vector<152x64xf32>
    %168 = arith.addf %165, %167 : vector<152x64xf32>
    %cst_166 = arith.constant 0.000000e+00 : f32
    %169 = vector.broadcast %cst_166 : f32 to vector<152x64xf32>
    %170 = arith.cmpf oge, %168, %169 : vector<152x64xf32>
    %cst_167 = arith.constant 4.000000e-01 : f32
    %171 = vector.broadcast %cst_167 : f32 to vector<152x64xf32>
    %172 = arith.mulf %171, %168 : vector<152x64xf32>
    %173 = arith.select %170, %168, %172 : vector<152x64xi1>, vector<152x64xf32>
    %c8_168 = arith.constant 8 : index
    %c0_169 = arith.constant 0 : index
    %174 = vector.load %arg30[%c8_168, %c0_169] : memref<168x64xf32, #tpu.memory_space<vmem>>, vector<152x64xf32>
    tpu.vector_store %arg30[%c8_168, %c0_169], %173 {strides = array<i32>} : memref<168x64xf32, #tpu.memory_space<vmem>>, vector<152x64xf32>,
    %c0_170 = arith.constant 0 : index
    %c0_171 = arith.constant 0 : index
    %175 = vector.load %arg30[%c0_170, %c0_171] : memref<168x64xf32, #tpu.memory_space<vmem>>, vector<152x64xf32>
    %c0_172 = arith.constant 0 : index
    %c0_173 = arith.constant 0 : index
    %176 = vector.load %arg18[%c0_172, %c0_173] : memref<192x64xf32, #tpu.memory_space<vmem>>, vector<64x64xf32>
    %cst_174 = arith.constant dense<0.000000e+00> : vector<152x64xf32>
    %177 = tpu.matmul %175, %176, %cst_174 {dimension_numbers = #tpu.dot_dimension_numbers<[1], [0], [0], [1], [0, 0, 1, 1], [], []>} : vector<152x64xf32>, vector<64x64xf32>, vector<152x64xf32> -> vector<152x64xf32>
    %c8_175 = arith.constant 8 : index
    %c0_176 = arith.constant 0 : index
    %178 = vector.load %arg30[%c8_175, %c0_176] : memref<168x64xf32, #tpu.memory_space<vmem>>, vector<152x64xf32>
    %c64 = arith.constant 64 : index
    %c0_177 = arith.constant 0 : index
    %179 = vector.load %arg18[%c64, %c0_177] : memref<192x64xf32, #tpu.memory_space<vmem>>, vector<64x64xf32>
    %cst_178 = arith.constant dense<0.000000e+00> : vector<152x64xf32>
    %180 = tpu.matmul %178, %179, %cst_178 {dimension_numbers = #tpu.dot_dimension_numbers<[1], [0], [0], [1], [0, 0, 1, 1], [], []>} : vector<152x64xf32>, vector<64x64xf32>, vector<152x64xf32> -> vector<152x64xf32>
    %181 = arith.addf %177, %180 : vector<152x64xf32>
    %c16_179 = arith.constant 16 : index
    %c0_180 = arith.constant 0 : index
    %182 = vector.load %arg30[%c16_179, %c0_180] : memref<168x64xf32, #tpu.memory_space<vmem>>, vector<152x64xf32>
    %c128_181 = arith.constant 128 : index
    %c0_182 = arith.constant 0 : index
    %183 = vector.load %arg18[%c128_181, %c0_182] : memref<192x64xf32, #tpu.memory_space<vmem>>, vector<64x64xf32>
    %cst_183 = arith.constant dense<0.000000e+00> : vector<152x64xf32>
    %184 = tpu.matmul %182, %183, %cst_183 {dimension_numbers = #tpu.dot_dimension_numbers<[1], [0], [0], [1], [0, 0, 1, 1], [], []>} : vector<152x64xf32>, vector<64x64xf32>, vector<152x64xf32> -> vector<152x64xf32>
    %185 = arith.addf %181, %184 : vector<152x64xf32>
    %c0_184 = arith.constant 0 : index
    %c0_185 = arith.constant 0 : index
    %186 = vector.load %arg19[%c0_184, %c0_185] : memref<1x64xf32, #tpu.memory_space<vmem>>, vector<1x64xf32>
    %187 = vector.broadcast %186 : vector<1x64xf32> to vector<152x64xf32>
    %188 = arith.addf %185, %187 : vector<152x64xf32>
    %c8_186 = arith.constant 8 : index
    %c0_187 = arith.constant 0 : index
    %189 = vector.load %arg29[%c8_186, %c0_187] : memref<168x128xf32, #tpu.memory_space<vmem>>, vector<152x128xf32>
    %c0_188 = arith.constant 0 : index
    %c0_189 = arith.constant 0 : index
    %190 = vector.load %arg20[%c0_188, %c0_189] : memref<128x64xf32, #tpu.memory_space<vmem>>, vector<128x64xf32>
    %cst_190 = arith.constant dense<0.000000e+00> : vector<152x64xf32>
    %191 = tpu.matmul %189, %190, %cst_190 {dimension_numbers = #tpu.dot_dimension_numbers<[1], [0], [0], [1], [0, 0, 1, 1], [], []>} : vector<152x128xf32>, vector<128x64xf32>, vector<152x64xf32> -> vector<152x64xf32>
    %c0_191 = arith.constant 0 : index
    %c0_192 = arith.constant 0 : index
    %192 = vector.load %arg21[%c0_191, %c0_192] : memref<1x64xf32, #tpu.memory_space<vmem>>, vector<1x64xf32>
    %193 = vector.broadcast %192 : vector<1x64xf32> to vector<152x64xf32>
    %194 = arith.addf %191, %193 : vector<152x64xf32>
    %195 = arith.addf %188, %194 : vector<152x64xf32>
    %cst_193 = arith.constant 0.000000e+00 : f32
    %196 = vector.broadcast %cst_193 : f32 to vector<152x64xf32>
    %197 = arith.maximumf %195, %196 : vector<152x64xf32>
    %cst_194 = arith.constant 0.000000e+00 : f32
    %198 = vector.broadcast %cst_194 : f32 to vector<8x128xf32>
    %199 = vector.extract_strided_slice %197 {offsets = [0, 0], sizes = [8, 64], strides = [1, 1]} : vector<152x64xf32> to vector<8x64xf32>
    %c0_195 = arith.constant 0 : index
    %c0_196 = arith.constant 0 : index
    %200 = vector.load %arg22[%c0_195, %c0_196] : memref<1216x128xf32, #tpu.memory_space<vmem>>, vector<64x128xf32>
    %cst_197 = arith.constant dense<0.000000e+00> : vector<8x128xf32>
    %201 = tpu.matmul %199, %200, %cst_197 {dimension_numbers = #tpu.dot_dimension_numbers<[1], [0], [0], [1], [0, 0, 1, 1], [], []>} : vector<8x64xf32>, vector<64x128xf32>, vector<8x128xf32> -> vector<8x128xf32>
    %202 = arith.addf %198, %201 : vector<8x128xf32>
    %203 = vector.extract_strided_slice %197 {offsets = [8, 0], sizes = [8, 64], strides = [1, 1]} : vector<152x64xf32> to vector<8x64xf32>
    %c64_198 = arith.constant 64 : index
    %c0_199 = arith.constant 0 : index
    %204 = vector.load %arg22[%c64_198, %c0_199] : memref<1216x128xf32, #tpu.memory_space<vmem>>, vector<64x128xf32>
    %cst_200 = arith.constant dense<0.000000e+00> : vector<8x128xf32>
    %205 = tpu.matmul %203, %204, %cst_200 {dimension_numbers = #tpu.dot_dimension_numbers<[1], [0], [0], [1], [0, 0, 1, 1], [], []>} : vector<8x64xf32>, vector<64x128xf32>, vector<8x128xf32> -> vector<8x128xf32>
    %206 = arith.addf %202, %205 : vector<8x128xf32>
    %207 = vector.extract_strided_slice %197 {offsets = [16, 0], sizes = [8, 64], strides = [1, 1]} : vector<152x64xf32> to vector<8x64xf32>
    %c128_201 = arith.constant 128 : index
    %c0_202 = arith.constant 0 : index
    %208 = vector.load %arg22[%c128_201, %c0_202] : memref<1216x128xf32, #tpu.memory_space<vmem>>, vector<64x128xf32>
    %cst_203 = arith.constant dense<0.000000e+00> : vector<8x128xf32>
    %209 = tpu.matmul %207, %208, %cst_203 {dimension_numbers = #tpu.dot_dimension_numbers<[1], [0], [0], [1], [0, 0, 1, 1], [], []>} : vector<8x64xf32>, vector<64x128xf32>, vector<8x128xf32> -> vector<8x128xf32>
    %210 = arith.addf %206, %209 : vector<8x128xf32>
    %211 = vector.extract_strided_slice %197 {offsets = [24, 0], sizes = [8, 64], strides = [1, 1]} : vector<152x64xf32> to vector<8x64xf32>
    %c192 = arith.constant 192 : index
    %c0_204 = arith.constant 0 : index
    %212 = vector.load %arg22[%c192, %c0_204] : memref<1216x128xf32, #tpu.memory_space<vmem>>, vector<64x128xf32>
    %cst_205 = arith.constant dense<0.000000e+00> : vector<8x128xf32>
    %213 = tpu.matmul %211, %212, %cst_205 {dimension_numbers = #tpu.dot_dimension_numbers<[1], [0], [0], [1], [0, 0, 1, 1], [], []>} : vector<8x64xf32>, vector<64x128xf32>, vector<8x128xf32> -> vector<8x128xf32>
    %214 = arith.addf %210, %213 : vector<8x128xf32>
    %215 = vector.extract_strided_slice %197 {offsets = [32, 0], sizes = [8, 64], strides = [1, 1]} : vector<152x64xf32> to vector<8x64xf32>
    %c256_206 = arith.constant 256 : index
    %c0_207 = arith.constant 0 : index
    %216 = vector.load %arg22[%c256_206, %c0_207] : memref<1216x128xf32, #tpu.memory_space<vmem>>, vector<64x128xf32>
    %cst_208 = arith.constant dense<0.000000e+00> : vector<8x128xf32>
    %217 = tpu.matmul %215, %216, %cst_208 {dimension_numbers = #tpu.dot_dimension_numbers<[1], [0], [0], [1], [0, 0, 1, 1], [], []>} : vector<8x64xf32>, vector<64x128xf32>, vector<8x128xf32> -> vector<8x128xf32>
    %218 = arith.addf %214, %217 : vector<8x128xf32>
    %219 = vector.extract_strided_slice %197 {offsets = [40, 0], sizes = [8, 64], strides = [1, 1]} : vector<152x64xf32> to vector<8x64xf32>
    %c320 = arith.constant 320 : index
    %c0_209 = arith.constant 0 : index
    %220 = vector.load %arg22[%c320, %c0_209] : memref<1216x128xf32, #tpu.memory_space<vmem>>, vector<64x128xf32>
    %cst_210 = arith.constant dense<0.000000e+00> : vector<8x128xf32>
    %221 = tpu.matmul %219, %220, %cst_210 {dimension_numbers = #tpu.dot_dimension_numbers<[1], [0], [0], [1], [0, 0, 1, 1], [], []>} : vector<8x64xf32>, vector<64x128xf32>, vector<8x128xf32> -> vector<8x128xf32>
    %222 = arith.addf %218, %221 : vector<8x128xf32>
    %223 = vector.extract_strided_slice %197 {offsets = [48, 0], sizes = [8, 64], strides = [1, 1]} : vector<152x64xf32> to vector<8x64xf32>
    %c384 = arith.constant 384 : index
    %c0_211 = arith.constant 0 : index
    %224 = vector.load %arg22[%c384, %c0_211] : memref<1216x128xf32, #tpu.memory_space<vmem>>, vector<64x128xf32>
    %cst_212 = arith.constant dense<0.000000e+00> : vector<8x128xf32>
    %225 = tpu.matmul %223, %224, %cst_212 {dimension_numbers = #tpu.dot_dimension_numbers<[1], [0], [0], [1], [0, 0, 1, 1], [], []>} : vector<8x64xf32>, vector<64x128xf32>, vector<8x128xf32> -> vector<8x128xf32>
    %226 = arith.addf %222, %225 : vector<8x128xf32>
    %227 = vector.extract_strided_slice %197 {offsets = [56, 0], sizes = [8, 64], strides = [1, 1]} : vector<152x64xf32> to vector<8x64xf32>
    %c448 = arith.constant 448 : index
    %c0_213 = arith.constant 0 : index
    %228 = vector.load %arg22[%c448, %c0_213] : memref<1216x128xf32, #tpu.memory_space<vmem>>, vector<64x128xf32>
    %cst_214 = arith.constant dense<0.000000e+00> : vector<8x128xf32>
    %229 = tpu.matmul %227, %228, %cst_214 {dimension_numbers = #tpu.dot_dimension_numbers<[1], [0], [0], [1], [0, 0, 1, 1], [], []>} : vector<8x64xf32>, vector<64x128xf32>, vector<8x128xf32> -> vector<8x128xf32>
    %230 = arith.addf %226, %229 : vector<8x128xf32>
    %231 = vector.extract_strided_slice %197 {offsets = [64, 0], sizes = [8, 64], strides = [1, 1]} : vector<152x64xf32> to vector<8x64xf32>
    %c512_215 = arith.constant 512 : index
    %c0_216 = arith.constant 0 : index
    %232 = vector.load %arg22[%c512_215, %c0_216] : memref<1216x128xf32, #tpu.memory_space<vmem>>, vector<64x128xf32>
    %cst_217 = arith.constant dense<0.000000e+00> : vector<8x128xf32>
    %233 = tpu.matmul %231, %232, %cst_217 {dimension_numbers = #tpu.dot_dimension_numbers<[1], [0], [0], [1], [0, 0, 1, 1], [], []>} : vector<8x64xf32>, vector<64x128xf32>, vector<8x128xf32> -> vector<8x128xf32>
    %234 = arith.addf %230, %233 : vector<8x128xf32>
    %235 = vector.extract_strided_slice %197 {offsets = [72, 0], sizes = [8, 64], strides = [1, 1]} : vector<152x64xf32> to vector<8x64xf32>
    %c576 = arith.constant 576 : index
    %c0_218 = arith.constant 0 : index
    %236 = vector.load %arg22[%c576, %c0_218] : memref<1216x128xf32, #tpu.memory_space<vmem>>, vector<64x128xf32>
    %cst_219 = arith.constant dense<0.000000e+00> : vector<8x128xf32>
    %237 = tpu.matmul %235, %236, %cst_219 {dimension_numbers = #tpu.dot_dimension_numbers<[1], [0], [0], [1], [0, 0, 1, 1], [], []>} : vector<8x64xf32>, vector<64x128xf32>, vector<8x128xf32> -> vector<8x128xf32>
    %238 = arith.addf %234, %237 : vector<8x128xf32>
    %239 = vector.extract_strided_slice %197 {offsets = [80, 0], sizes = [8, 64], strides = [1, 1]} : vector<152x64xf32> to vector<8x64xf32>
    %c640 = arith.constant 640 : index
    %c0_220 = arith.constant 0 : index
    %240 = vector.load %arg22[%c640, %c0_220] : memref<1216x128xf32, #tpu.memory_space<vmem>>, vector<64x128xf32>
    %cst_221 = arith.constant dense<0.000000e+00> : vector<8x128xf32>
    %241 = tpu.matmul %239, %240, %cst_221 {dimension_numbers = #tpu.dot_dimension_numbers<[1], [0], [0], [1], [0, 0, 1, 1], [], []>} : vector<8x64xf32>, vector<64x128xf32>, vector<8x128xf32> -> vector<8x128xf32>
    %242 = arith.addf %238, %241 : vector<8x128xf32>
    %243 = vector.extract_strided_slice %197 {offsets = [88, 0], sizes = [8, 64], strides = [1, 1]} : vector<152x64xf32> to vector<8x64xf32>
    %c704 = arith.constant 704 : index
    %c0_222 = arith.constant 0 : index
    %244 = vector.load %arg22[%c704, %c0_222] : memref<1216x128xf32, #tpu.memory_space<vmem>>, vector<64x128xf32>
    %cst_223 = arith.constant dense<0.000000e+00> : vector<8x128xf32>
    %245 = tpu.matmul %243, %244, %cst_223 {dimension_numbers = #tpu.dot_dimension_numbers<[1], [0], [0], [1], [0, 0, 1, 1], [], []>} : vector<8x64xf32>, vector<64x128xf32>, vector<8x128xf32> -> vector<8x128xf32>
    %246 = arith.addf %242, %245 : vector<8x128xf32>
    %247 = vector.extract_strided_slice %197 {offsets = [96, 0], sizes = [8, 64], strides = [1, 1]} : vector<152x64xf32> to vector<8x64xf32>
    %c768 = arith.constant 768 : index
    %c0_224 = arith.constant 0 : index
    %248 = vector.load %arg22[%c768, %c0_224] : memref<1216x128xf32, #tpu.memory_space<vmem>>, vector<64x128xf32>
    %cst_225 = arith.constant dense<0.000000e+00> : vector<8x128xf32>
    %249 = tpu.matmul %247, %248, %cst_225 {dimension_numbers = #tpu.dot_dimension_numbers<[1], [0], [0], [1], [0, 0, 1, 1], [], []>} : vector<8x64xf32>, vector<64x128xf32>, vector<8x128xf32> -> vector<8x128xf32>
    %250 = arith.addf %246, %249 : vector<8x128xf32>
    %251 = vector.extract_strided_slice %197 {offsets = [104, 0], sizes = [8, 64], strides = [1, 1]} : vector<152x64xf32> to vector<8x64xf32>
    %c832 = arith.constant 832 : index
    %c0_226 = arith.constant 0 : index
    %252 = vector.load %arg22[%c832, %c0_226] : memref<1216x128xf32, #tpu.memory_space<vmem>>, vector<64x128xf32>
    %cst_227 = arith.constant dense<0.000000e+00> : vector<8x128xf32>
    %253 = tpu.matmul %251, %252, %cst_227 {dimension_numbers = #tpu.dot_dimension_numbers<[1], [0], [0], [1], [0, 0, 1, 1], [], []>} : vector<8x64xf32>, vector<64x128xf32>, vector<8x128xf32> -> vector<8x128xf32>
    %254 = arith.addf %250, %253 : vector<8x128xf32>
    %255 = vector.extract_strided_slice %197 {offsets = [112, 0], sizes = [8, 64], strides = [1, 1]} : vector<152x64xf32> to vector<8x64xf32>
    %c896 = arith.constant 896 : index
    %c0_228 = arith.constant 0 : index
    %256 = vector.load %arg22[%c896, %c0_228] : memref<1216x128xf32, #tpu.memory_space<vmem>>, vector<64x128xf32>
    %cst_229 = arith.constant dense<0.000000e+00> : vector<8x128xf32>
    %257 = tpu.matmul %255, %256, %cst_229 {dimension_numbers = #tpu.dot_dimension_numbers<[1], [0], [0], [1], [0, 0, 1, 1], [], []>} : vector<8x64xf32>, vector<64x128xf32>, vector<8x128xf32> -> vector<8x128xf32>
    %258 = arith.addf %254, %257 : vector<8x128xf32>
    %259 = vector.extract_strided_slice %197 {offsets = [120, 0], sizes = [8, 64], strides = [1, 1]} : vector<152x64xf32> to vector<8x64xf32>
    %c960 = arith.constant 960 : index
    %c0_230 = arith.constant 0 : index
    %260 = vector.load %arg22[%c960, %c0_230] : memref<1216x128xf32, #tpu.memory_space<vmem>>, vector<64x128xf32>
    %cst_231 = arith.constant dense<0.000000e+00> : vector<8x128xf32>
    %261 = tpu.matmul %259, %260, %cst_231 {dimension_numbers = #tpu.dot_dimension_numbers<[1], [0], [0], [1], [0, 0, 1, 1], [], []>} : vector<8x64xf32>, vector<64x128xf32>, vector<8x128xf32> -> vector<8x128xf32>
    %262 = arith.addf %258, %261 : vector<8x128xf32>
    %263 = vector.extract_strided_slice %197 {offsets = [128, 0], sizes = [8, 64], strides = [1, 1]} : vector<152x64xf32> to vector<8x64xf32>
    %c1024 = arith.constant 1024 : index
    %c0_232 = arith.constant 0 : index
    %264 = vector.load %arg22[%c1024, %c0_232] : memref<1216x128xf32, #tpu.memory_space<vmem>>, vector<64x128xf32>
    %cst_233 = arith.constant dense<0.000000e+00> : vector<8x128xf32>
    %265 = tpu.matmul %263, %264, %cst_233 {dimension_numbers = #tpu.dot_dimension_numbers<[1], [0], [0], [1], [0, 0, 1, 1], [], []>} : vector<8x64xf32>, vector<64x128xf32>, vector<8x128xf32> -> vector<8x128xf32>
    %266 = arith.addf %262, %265 : vector<8x128xf32>
    %267 = vector.extract_strided_slice %197 {offsets = [136, 0], sizes = [8, 64], strides = [1, 1]} : vector<152x64xf32> to vector<8x64xf32>
    %c1088 = arith.constant 1088 : index
    %c0_234 = arith.constant 0 : index
    %268 = vector.load %arg22[%c1088, %c0_234] : memref<1216x128xf32, #tpu.memory_space<vmem>>, vector<64x128xf32>
    %cst_235 = arith.constant dense<0.000000e+00> : vector<8x128xf32>
    %269 = tpu.matmul %267, %268, %cst_235 {dimension_numbers = #tpu.dot_dimension_numbers<[1], [0], [0], [1], [0, 0, 1, 1], [], []>} : vector<8x64xf32>, vector<64x128xf32>, vector<8x128xf32> -> vector<8x128xf32>
    %270 = arith.addf %266, %269 : vector<8x128xf32>
    %271 = vector.extract_strided_slice %197 {offsets = [144, 0], sizes = [8, 64], strides = [1, 1]} : vector<152x64xf32> to vector<8x64xf32>
    %c1152 = arith.constant 1152 : index
    %c0_236 = arith.constant 0 : index
    %272 = vector.load %arg22[%c1152, %c0_236] : memref<1216x128xf32, #tpu.memory_space<vmem>>, vector<64x128xf32>
    %cst_237 = arith.constant dense<0.000000e+00> : vector<8x128xf32>
    %273 = tpu.matmul %271, %272, %cst_237 {dimension_numbers = #tpu.dot_dimension_numbers<[1], [0], [0], [1], [0, 0, 1, 1], [], []>} : vector<8x64xf32>, vector<64x128xf32>, vector<8x128xf32> -> vector<8x128xf32>
    %274 = arith.addf %270, %273 : vector<8x128xf32>
    %c0_238 = arith.constant 0 : index
    %c0_239 = arith.constant 0 : index
    %275 = vector.load %arg23[%c0_238, %c0_239] : memref<1x128xf32, #tpu.memory_space<vmem>>, vector<1x128xf32>
    %276 = vector.broadcast %275 : vector<1x128xf32> to vector<8x128xf32>
    %277 = arith.addf %274, %276 : vector<8x128xf32>
    %cst_240 = arith.constant 0.000000e+00 : f32
    %278 = vector.broadcast %cst_240 : f32 to vector<8x128xf32>
    %279 = arith.subf %278, %277 : vector<8x128xf32>
    %280 = math.exp %279 : vector<8x128xf32>
    %cst_241 = arith.constant 1.000000e+00 : f32
    %281 = vector.broadcast %cst_241 : f32 to vector<8x128xf32>
    %282 = arith.addf %281, %280 : vector<8x128xf32>
    %283 = tpu.reciprocal %282 {approx = true} : vector<8x128xf32> -> vector<8x128xf32>
    %cst_242 = arith.constant 1.000000e+00 : f32
    %284 = vector.broadcast %cst_242 : f32 to vector<8x128xf32>
    %285 = arith.minimumf %283, %284 : vector<8x128xf32>
    %c0_243 = arith.constant 0 : index
    %c0_244 = arith.constant 0 : index
    %c0_245 = arith.constant 0 : index
    %286 = vector.load %arg24[%c0_243, %c0_244, %c0_245] : memref<1x8x128xf32, #tpu.memory_space<vmem>>, vector<1x8x128xf32>
    %287 = vector.shape_cast %286 : vector<1x8x128xf32> to vector<8x128xf32>
    %288 = vector.shape_cast %285 : vector<8x128xf32> to vector<1x8x128xf32>
    tpu.vector_store %arg24[%c0_243, %c0_244, %c0_245], %288 {strides = array<i32>} : memref<1x8x128xf32, #tpu.memory_space<vmem>>, vector<1x8x128xf32>,
    return
  }
  func.func @transform_0(%arg0: i32) -> (i32, i32, i32) {
    %c0_i32 = arith.constant 0 : i32
    %c0_i32_0 = arith.constant 0 : i32
    %c0_i32_1 = arith.constant 0 : i32
    return %arg0, %c0_i32, %c0_i32_0 : i32, i32, i32
  }
  func.func @transform_1(%arg0: i32) -> (i32, i32) {
    %c0_i32 = arith.constant 0 : i32
    %c0_i32_0 = arith.constant 0 : i32
    %c0_i32_1 = arith.constant 0 : i32
    return %c0_i32, %c0_i32_0 : i32, i32
  }
  func.func @transform_2(%arg0: i32) -> (i32, i32) {
    %c0_i32 = arith.constant 0 : i32
    %c0_i32_0 = arith.constant 0 : i32
    %c0_i32_1 = arith.constant 0 : i32
    return %c0_i32, %c0_i32_0 : i32, i32
  }
  func.func @transform_3(%arg0: i32) -> (i32, i32) {
    %c0_i32 = arith.constant 0 : i32
    %c0_i32_0 = arith.constant 0 : i32
    %c0_i32_1 = arith.constant 0 : i32
    return %c0_i32, %c0_i32_0 : i32, i32
  }
  func.func @transform_4(%arg0: i32) -> (i32, i32) {
    %c0_i32 = arith.constant 0 : i32
    %c0_i32_0 = arith.constant 0 : i32
    %c0_i32_1 = arith.constant 0 : i32
    return %c0_i32, %c0_i32_0 : i32, i32
  }
  func.func @transform_5(%arg0: i32) -> (i32, i32) {
    %c0_i32 = arith.constant 0 : i32
    %c0_i32_0 = arith.constant 0 : i32
    %c0_i32_1 = arith.constant 0 : i32
    return %c0_i32, %c0_i32_0 : i32, i32
  }
  func.func @transform_6(%arg0: i32) -> (i32, i32) {
    %c0_i32 = arith.constant 0 : i32
    %c0_i32_0 = arith.constant 0 : i32
    %c0_i32_1 = arith.constant 0 : i32
    return %c0_i32, %c0_i32_0 : i32, i32
  }
  func.func @transform_7(%arg0: i32) -> (i32, i32) {
    %c0_i32 = arith.constant 0 : i32
    %c0_i32_0 = arith.constant 0 : i32
    %c0_i32_1 = arith.constant 0 : i32
    return %c0_i32, %c0_i32_0 : i32, i32
  }
  func.func @transform_8(%arg0: i32) -> (i32, i32) {
    %c0_i32 = arith.constant 0 : i32
    %c0_i32_0 = arith.constant 0 : i32
    %c0_i32_1 = arith.constant 0 : i32
    return %c0_i32, %c0_i32_0 : i32, i32
  }
  func.func @transform_9(%arg0: i32) -> (i32, i32) {
    %c0_i32 = arith.constant 0 : i32
    %c0_i32_0 = arith.constant 0 : i32
    %c0_i32_1 = arith.constant 0 : i32
    return %c0_i32, %c0_i32_0 : i32, i32
  }
  func.func @transform_10(%arg0: i32) -> (i32, i32) {
    %c0_i32 = arith.constant 0 : i32
    %c0_i32_0 = arith.constant 0 : i32
    %c0_i32_1 = arith.constant 0 : i32
    return %c0_i32, %c0_i32_0 : i32, i32
  }
  func.func @transform_11(%arg0: i32) -> (i32, i32) {
    %c0_i32 = arith.constant 0 : i32
    %c0_i32_0 = arith.constant 0 : i32
    %c0_i32_1 = arith.constant 0 : i32
    return %c0_i32, %c0_i32_0 : i32, i32
  }
  func.func @transform_12(%arg0: i32) -> (i32, i32) {
    %c0_i32 = arith.constant 0 : i32
    %c0_i32_0 = arith.constant 0 : i32
    %c0_i32_1 = arith.constant 0 : i32
    return %c0_i32, %c0_i32_0 : i32, i32
  }
  func.func @transform_13(%arg0: i32) -> (i32, i32) {
    %c0_i32 = arith.constant 0 : i32
    %c0_i32_0 = arith.constant 0 : i32
    %c0_i32_1 = arith.constant 0 : i32
    return %c0_i32, %c0_i32_0 : i32, i32
  }
  func.func @transform_14(%arg0: i32) -> (i32, i32) {
    %c0_i32 = arith.constant 0 : i32
    %c0_i32_0 = arith.constant 0 : i32
    %c0_i32_1 = arith.constant 0 : i32
    return %c0_i32, %c0_i32_0 : i32, i32
  }
  func.func @transform_15(%arg0: i32) -> (i32, i32) {
    %c0_i32 = arith.constant 0 : i32
    %c0_i32_0 = arith.constant 0 : i32
    %c0_i32_1 = arith.constant 0 : i32
    return %c0_i32, %c0_i32_0 : i32, i32
  }
  func.func @transform_16(%arg0: i32) -> (i32, i32) {
    %c0_i32 = arith.constant 0 : i32
    %c0_i32_0 = arith.constant 0 : i32
    %c0_i32_1 = arith.constant 0 : i32
    return %c0_i32, %c0_i32_0 : i32, i32
  }
  func.func @transform_17(%arg0: i32) -> (i32, i32) {
    %c0_i32 = arith.constant 0 : i32
    %c0_i32_0 = arith.constant 0 : i32
    %c0_i32_1 = arith.constant 0 : i32
    return %c0_i32, %c0_i32_0 : i32, i32
  }
  func.func @transform_18(%arg0: i32) -> (i32, i32) {
    %c0_i32 = arith.constant 0 : i32
    %c0_i32_0 = arith.constant 0 : i32
    %c0_i32_1 = arith.constant 0 : i32
    return %c0_i32, %c0_i32_0 : i32, i32
  }
  func.func @transform_19(%arg0: i32) -> (i32, i32) {
    %c0_i32 = arith.constant 0 : i32
    %c0_i32_0 = arith.constant 0 : i32
    %c0_i32_1 = arith.constant 0 : i32
    return %c0_i32, %c0_i32_0 : i32, i32
  }
  func.func @transform_20(%arg0: i32) -> (i32, i32) {
    %c0_i32 = arith.constant 0 : i32
    %c0_i32_0 = arith.constant 0 : i32
    %c0_i32_1 = arith.constant 0 : i32
    return %c0_i32, %c0_i32_0 : i32, i32
  }
  func.func @transform_21(%arg0: i32) -> (i32, i32) {
    %c0_i32 = arith.constant 0 : i32
    %c0_i32_0 = arith.constant 0 : i32
    %c0_i32_1 = arith.constant 0 : i32
    return %c0_i32, %c0_i32_0 : i32, i32
  }
  func.func @transform_22(%arg0: i32) -> (i32, i32) {
    %c0_i32 = arith.constant 0 : i32
    %c0_i32_0 = arith.constant 0 : i32
    %c0_i32_1 = arith.constant 0 : i32
    return %c0_i32, %c0_i32_0 : i32, i32
  }
  func.func @transform_23(%arg0: i32) -> (i32, i32, i32) {
    %c0_i32 = arith.constant 0 : i32
    %c0_i32_0 = arith.constant 0 : i32
    %c0_i32_1 = arith.constant 0 : i32
    return %arg0, %c0_i32, %c0_i32_0 : i32, i32, i32
  }
}

</mosaic_0001>

<bundles_post_ra>
// kernel: resnet_forward.1
= control target key start
LH: loop header
LB: loop body
LE: loop exit
PB: predicated region body
PF: predicated region fallthrough
CT: control target
= control target key end

     0   :  { %s14822_s0 = inlined_call_operand.vmem [shape: f32[1,184,1], index: 0, kind: input, shape index: {}]   ;;  %s14823_s1 = inlined_call_operand.vmem [shape: f32[5,128], index: 1, kind: input, shape index: {}]   ;;  %s14824_s2 = inlined_call_operand.vmem [shape: f32[1,128], index: 2, kind: input, shape index: {}]   ;;  %s14825_s3 = inlined_call_operand.hbm [shape: f32[384,256], index: 3, kind: input, shape index: {}]   ;;  %s14826_s4 = inlined_call_operand.vmem [shape: f32[1,256], index: 4, kind: input, shape index: {}]   ;;  %s14827_s5 = inlined_call_operand.hbm [shape: f32[768,256], index: 5, kind: input, shape index: {}]   ;;  %s14828_s6 = inlined_call_operand.vmem [shape: f32[1,256], index: 6, kind: input, shape index: {}]   ;;  %s14829_s7 = inlined_call_operand.hbm [shape: f32[128,256], index: 7, kind: input, shape index: {}]   ;;  %s14830_s8 = inlined_call_operand.vmem [shape: f32[1,256], index: 8, kind: input, shape index: {}]   ;;  %s14831_s9 = inlined_call_operand.hbm [shape: f32[768,128], index: 9, kind: input, shape index: {}]   ;;  %s14832_s10 = inlined_call_operand.vmem [shape: f32[1,128], index: 10, kind: input, shape index: {}]   ;;  %s14833_s11 = inlined_call_operand.hbm [shape: f32[384,128], index: 11, kind: input, shape index: {}]   ;;  %s14834_s12 = inlined_call_operand.vmem [shape: f32[1,128], index: 12, kind: input, shape index: {}]   ;;  %s14835_s13 = inlined_call_operand.hbm [shape: f32[256,128], index: 13, kind: input, shape index: {}]   ;;  %s14836_s14 = inlined_call_operand.vmem [shape: f32[1,128], index: 14, kind: input, shape index: {}]   ;;  %s14837_s15 = inlined_call_operand.vmem [shape: f32[384,64], index: 15, kind: input, shape index: {}]   ;;  %s14838_s16 = inlined_call_operand.vmem [shape: f32[1,64], index: 16, kind: input, shape index: {}]   ;;  %s14839_s17 = inlined_call_operand.vmem [shape: f32[192,64], index: 17, kind: input, shape index: {}]   ;;  %s14840_s18 = inlined_call_operand.vmem [shape: f32[1,64], index: 18, kind: input, shape index: {}]   ;;  %s14841_s19 = inlined_call_operand.vmem [shape: f32[128,64], index: 19, kind: input, shape index: {}]   ;;  %s14842_s20 = inlined_call_operand.vmem [shape: f32[1,64], index: 20, kind: input, shape index: {}]   ;;  %s14843_s21 = inlined_call_operand.vmem [shape: f32[1216,128], index: 21, kind: input, shape index: {}]   ;;  %s14844_s22 = inlined_call_operand.vmem [shape: f32[1,128], index: 22, kind: input, shape index: {}]   ;;  %s14845_s23 = inlined_call_operand.vmem [shape: f32[1,8,128], index: 23, kind: output, shape index: {}]  }
   0x1   :  { %14905 = sst [smem:[#allocation51_spill]] %s14822_s0 }
   0x2   :  { %14906 = sst [smem:[#allocation52_spill]] %s14823_s1 }
   0x3   :  { %14907 = sst [smem:[#allocation53_spill]] %s14824_s2 }
   0x4   :  { %14908 = sst [smem:[#allocation54_spill]] %s14825_s3 }
   0x5   :  { %14909 = sst [smem:[#allocation55_spill]] %s14826_s4 }
   0x6   :  { %14910 = sst [smem:[#allocation56_spill]] %s14827_s5 }
   0x7   :  { %14911 = sst [smem:[#allocation57_spill]] %s14828_s6 }
   0x8   :  { %14912 = sst [smem:[#allocation58_spill]] %s14829_s7 }
   0x9   :  { %14913 = sst [smem:[#allocation59_spill]] %s14844_s22 }
   0xa   :  { %14914 = sst [smem:[#allocation60_spill]] %s14845_s23 }
   0xb   :  { %28 = vsyncpa [#allocation9], 0 }
   0xc   :  { %29 = vsyncpa [#allocation11], 0 }
   0xd   :  { %30 = vsyncpa [#allocation14], 0 }
   0xe   :  { %31 = vsyncpa [#allocation17], 0  ;;  %s11560_s4 = smov [#allocation10]   ;;  %s11561_s24 = smov [#allocation13]  }
   0xf   :  { %s57_s30 = sshll.u32 %s11560_s4, 4  ;;  %s85_s25 = sshll.u32 %s11561_s24, 4  ;;  %s58_s30 = int_to_ptr.vmem [resolvable:$true] %s57_s30  ;;  %s11694_s25 = int_to_ptr.vmem [resolvable:$true] %s85_s25 }
  0x10   :  { %s14915_s26 = sld [smem:[#allocation56_spill]] }
  0x16   :  { %s11420_s2 = scalar_lea.hbm %s14915_s26, 24576 }
  0x17   :  { %p11421_p0 = scmp.ne.s32.totalorder %s14915_s26, %s11420_s2  ;;  %p11424_p1 = scmp.lt.u32.totalorder %s11420_s2, %s14915_s26 }
  0x19   :  { %p11426_p2 = pnand %p11424_p1, %p11421_p0 }
  0x1b   :  { %11429 = shalt.err (!%p11426_p2)
}
  0x1c   :  { %s11430_s29 = scalar_lea.vmem %s58_s30, 24576  ;;  %p11435_p4 = scmp.lt.s32.totalorder %s58_s30, %s58_s30 }
  0x1d   :  { %p11431_p3 = scmp.ne.s32.totalorder %s58_s30, %s11430_s29  ;;  %p11436_p5 = scmp.lt.s32.totalorder %s11430_s29, %s11430_s29 }
  0x1f   :  { %p11437_p6 = por %p11436_p5, %p11435_p4 }
  0x21   :  { %p11438_p7 = pnand %p11437_p6, %p11431_p3 }
  0x23   :  { %11441 = shalt.err (!%p11438_p7)
}
  0x24   :  { %s14851_s3 = smov 256   ;;  %s14853_s0 = smov 16  }
  0x25   :  { %63 = dma.hbm_to_vmem [thread:$0]  %s14915_s26, 24576, %s58_s30, [#allocation11], %s14851_s3, %s14851_s3, %s14853_s0  }
  0x26   :  { %s11442_s2 = scalar_lea.hbm %s14831_s9, 12288 }
  0x27   :  { %p11443_p8 = scmp.ne.s32.totalorder %s14831_s9, %s11442_s2  ;;  %p11446_p9 = scmp.lt.u32.totalorder %s11442_s2, %s14831_s9 }
  0x29   :  { %p11448_p10 = pnand %p11446_p9, %p11443_p8 }
  0x2b   :  { %11451 = shalt.err (!%p11448_p10)
}
  0x2c   :  { %s11452_s29 = scalar_lea.vmem %s11694_s25, 12288  ;;  %p11457_p12 = scmp.lt.s32.totalorder %s11694_s25, %s11694_s25 }
  0x2d   :  { %p11453_p11 = scmp.ne.s32.totalorder %s11694_s25, %s11452_s29  ;;  %p11458_p13 = scmp.lt.s32.totalorder %s11452_s29, %s11452_s29 }
  0x2f   :  { %p11459_p0 = por %p11458_p13, %p11457_p12 }
  0x31   :  { %p11460_p1 = pnand %p11459_p0, %p11453_p11 }
  0x33   :  { %11463 = shalt.err (!%p11460_p1)
}
  0x34   :  { %s14855_s30 = smov 128   ;;  %s11565_s26 = smov 8  }
  0x35   :  { %91 = dma.hbm_to_vmem [thread:$0]  %s14831_s9, 12288, %s11694_s25, [#allocation14], %s14855_s30, %s14855_s30, %s11565_s26  }
  0x36   :  { %s11566_s5 = smov [#allocation8]   ;;  %s11567_s2 = smov [#allocation12]  }
  0x37   :  { %s43_s1 = sshll.u32 %s11566_s5, 4  ;;  %s71_s6 = sshll.u32 %s11567_s2, 4  ;;  %s44_s1 = int_to_ptr.vmem [resolvable:$true] %s43_s1  ;;  %s11731_s6 = int_to_ptr.vmem [resolvable:$true] %s71_s6 }
  0x38   :  { %s14916_s28 = sld [smem:[#allocation54_spill]] }
  0x3e   :  { %s11464_s29 = scalar_lea.hbm %s14916_s28, 12288 }
  0x3f   :  { %p11465_p2 = scmp.ne.s32.totalorder %s14916_s28, %s11464_s29  ;;  %p11468_p3 = scmp.lt.u32.totalorder %s11464_s29, %s14916_s28 }
  0x41   :  { %p11470_p4 = pnand %p11468_p3, %p11465_p2 }
  0x43   :  { %11473 = shalt.err (!%p11470_p4)
}
  0x44   :  { %s11474_s9 = scalar_lea.vmem %s44_s1, 12288  ;;  %p11479_p6 = scmp.lt.s32.totalorder %s44_s1, %s44_s1 }
  0x45   :  { %p11475_p5 = scmp.ne.s32.totalorder %s44_s1, %s11474_s9  ;;  %p11480_p7 = scmp.lt.s32.totalorder %s11474_s9, %s11474_s9 }
  0x47   :  { %p11481_p8 = por %p11480_p7, %p11479_p6 }
  0x49   :  { %p11482_p9 = pnand %p11481_p8, %p11475_p5 }
  0x4b   :  { %11485 = shalt.err (!%p11482_p9)
}
  0x4c   :  { %s14917_s25 = smov 16   ;;  %s14918_s4 = smov 256  }
  0x4d   :  { %49 = dma.hbm_to_vmem [thread:$0]  %s14916_s28, 12288, %s44_s1, [#allocation9], %s14918_s4, %s14918_s4, %s14917_s25  }
  0x4e   :  { %s14919_s22 = sld [smem:[#allocation58_spill]] }
  0x54   :  { %s11486_s23 = scalar_lea.hbm %s14919_s22, 4096 }
  0x55   :  { %p11487_p10 = scmp.ne.s32.totalorder %s14919_s22, %s11486_s23  ;;  %p11490_p11 = scmp.lt.u32.totalorder %s11486_s23, %s14919_s22 }
  0x57   :  { %p11492_p12 = pnand %p11490_p11, %p11487_p10 }
  0x59   :  { %11495 = shalt.err (!%p11492_p12)
}
  0x5a   :  { %s11496_s9 = scalar_lea.vmem %s11731_s6, 4096  ;;  %p11501_p0 = scmp.lt.s32.totalorder %s11731_s6, %s11731_s6 }
  0x5b   :  { %p11497_p13 = scmp.ne.s32.totalorder %s11731_s6, %s11496_s9  ;;  %p11502_p1 = scmp.lt.s32.totalorder %s11496_s9, %s11496_s9 }
  0x5d   :  { %p11503_p2 = por %p11502_p1, %p11501_p0 }
  0x5f   :  { %p11504_p3 = pnand %p11503_p2, %p11497_p13 }
  0x61   :  { %11507 = shalt.err (!%p11504_p3)
}
  0x62   :  { %77 = dma.hbm_to_vmem [thread:$0]  %s14919_s22, 4096, %s11731_s6, [#allocation11], %s14918_s4, %s14918_s4, %s14917_s25  }
  0x63   :  { %s11568_s24 = smov [#allocation15]   ;;  %s11569_s3 = smov [#allocation16]  }
  0x64   :  { %s99_s5 = sshll.u32 %s11568_s24, 4  ;;  %s113_s0 = sshll.u32 %s11569_s3, 4  ;;  %s100_s5 = int_to_ptr.vmem [resolvable:$true] %s99_s5  ;;  %s11768_s0 = int_to_ptr.vmem [resolvable:$true] %s113_s0 }
  0x65   :  { %s11508_s27 = scalar_lea.hbm %s14833_s11, 6144 }
  0x66   :  { %p11509_p4 = scmp.ne.s32.totalorder %s14833_s11, %s11508_s27  ;;  %p11512_p5 = scmp.lt.u32.totalorder %s11508_s27, %s14833_s11 }
  0x68   :  { %p11514_p6 = pnand %p11512_p5, %p11509_p4 }
  0x6a   :  { %11517 = shalt.err (!%p11514_p6)
}
  0x6b   :  { %s11518_s6 = scalar_lea.vmem %s100_s5, 6144  ;;  %p11523_p8 = scmp.lt.s32.totalorder %s100_s5, %s100_s5 }
  0x6c   :  { %p11519_p7 = scmp.ne.s32.totalorder %s100_s5, %s11518_s6  ;;  %p11524_p9 = scmp.lt.s32.totalorder %s11518_s6, %s11518_s6 }
  0x6e   :  { %p11525_p10 = por %p11524_p9, %p11523_p8 }
  0x70   :  { %p11526_p11 = pnand %p11525_p10, %p11519_p7 }
  0x72   :  { %11529 = shalt.err (!%p11526_p11)
}
  0x73   :  { %s14920_s25 = smov 128   ;;  %s11530_s30 = scalar_lea.hbm %s14835_s13, 4096 }
  0x74   :  { %105 = dma.hbm_to_vmem [thread:$0]  %s14833_s11, 6144, %s100_s5, [#allocation14], %s14920_s25, %s14920_s25, %s11565_s26  }
  0x75   :  { %p11531_p12 = scmp.ne.s32.totalorder %s14835_s13, %s11530_s30  ;;  %p11534_p13 = scmp.lt.u32.totalorder %s11530_s30, %s14835_s13 }
  0x77   :  { %p11536_p0 = pnand %p11534_p13, %p11531_p12 }
  0x79   :  { %11539 = shalt.err (!%p11536_p0)
}
  0x7a   :  { %s11540_s27 = scalar_lea.vmem %s11768_s0, 4096  ;;  %p11545_p2 = scmp.lt.s32.totalorder %s11768_s0, %s11768_s0 }
  0x7b   :  { %p11541_p1 = scmp.ne.s32.totalorder %s11768_s0, %s11540_s27  ;;  %p11546_p3 = scmp.lt.s32.totalorder %s11540_s27, %s11540_s27 }
  0x7d   :  { %p11547_p4 = por %p11546_p3, %p11545_p2 }
  0x7f   :  { %p11548_p5 = pnand %p11547_p4, %p11541_p1 }
  0x81   :  { %11551 = shalt.err (!%p11548_p5)
}
  0x82   :  { %119 = dma.hbm_to_vmem [thread:$0]  %s14835_s13, 4096, %s11768_s0, [#allocation17], %s14920_s25, %s14920_s25, %s11565_s26  }
  0x83   :  { %11552 = dma.done.wait [#allocation9], 12288  }
  0x84   :  { %11553 = vsyncadd [#allocation9], 4294955008 }
  0x85   :  { %11554 = dma.done.wait [#allocation11], 28672  }
  0x86   :  { %11555 = vsyncadd [#allocation11], 4294938624 }
  0x87   :  { %11556 = dma.done.wait [#allocation14], 18432  }
  0x88   :  { %11557 = vsyncadd [#allocation14], 4294948864 }
  0x89   :  { %11558 = dma.done.wait [#allocation17], 4096  }
  0x8a   :  { %11559 = vsyncadd [#allocation17], 4294963200  ;;  %v11570_v0 = vmov 0   ;;  %s14921_s9 = sld [smem:[#allocation51_spill]]  ;;  %v1087_v5 = vld [vmem:[#allocation8 + $0x108] sm:$0xff]  ;;  %v1089_v6 = vld [vmem:[#allocation8 + $0x118] sm:$0xff] }
  0x8b   :  { %11415 = vset.pattern.permute.xlu1 %v11570_v0  ;;  %11414 = vset.pattern.permute.xlu0 %v11570_v0  ;;  %v1086_v7 = vld [vmem:[#allocation8 + $0x100] sm:$0xff]  ;;  %v9886_v8 = vpack.c.bf16 %v1089_v6, %v1087_v5  ;;  %v1088_v9 = vld [vmem:[#allocation8 + $0x110] sm:$0xff]  ;;  %v1091_v10 = vld [vmem:[#allocation8 + $0x128] sm:$0xff]  ;;  %v14857_v39 = vmov 0.0   ;;  %s14922_s2 = sld [smem:[#allocation52_spill]]  ;;  %s14923_s1 = sld [smem:[#allocation53_spill]] }
  0x8c   :  { %v1093_v11 = vld [vmem:[#allocation8 + $0x138] sm:$0xff]  ;;  %v9888_v12 = vpack.c.bf16 %v1088_v9, %v1086_v7  ;;  %v1090_v14 = vld [vmem:[#allocation8 + $0x120] sm:$0xff]  ;;  %v1092_v15 = vld [vmem:[#allocation8 + $0x130] sm:$0xff]  ;;  %1182 = vmatprep.mubr.f32.mxu0 %v14857_v39  ;;  %s14936_s13 = sld [smem:[#allocation55_spill]]  ;;  %s14950_s25 = sld [smem:[#allocation57_spill]] }
  0x8d   :  { %v9890_v13 = vpack.c.bf16 %v1093_v11, %v1091_v10  ;;  %9887 = vmatprep.subr.bf16.mxu0 %v9886_v8  ;;  %v1095_v16 = vld [vmem:[#allocation8 + $0x148] sm:$0xff]  ;;  %v1097_v17 = vld [vmem:[#allocation8 + $0x158] sm:$0xff]  ;;  %v9892_v19 = vpack.c.bf16 %v1092_v15, %v1090_v14  ;;  %v1094_v21 = vld [vmem:[#allocation8 + $0x140] sm:$0xff] }
  0x8e   :  { %9889 = vmatpush1.bf16.msra.mxu0 %v9888_v12  ;;  %v9894_v20 = vpack.c.bf16 %v1097_v17, %v1095_v16  ;;  %v1096_v22 = vld [vmem:[#allocation8 + $0x150] sm:$0xff]  ;;  %v1099_v23 = vld [vmem:[#allocation8 + $0x168] sm:$0xff]  ;;  %v1101_v24 = vld [vmem:[#allocation8 + $0x178] sm:$0xff] }
  0x8f   :  { %9891 = vmatprep.subr.bf16.mxu0 %v9890_v13  ;;  %v9896_v25 = vpack.c.bf16 %v1096_v22, %v1094_v21  ;;  %v9898_v26 = vpack.c.bf16 %v1101_v24, %v1099_v23  ;;  %v1098_v27 = vld [vmem:[#allocation8 + $0x160] sm:$0xff]  ;;  %v1100_v28 = vld [vmem:[#allocation8 + $0x170] sm:$0xff]  ;;  %v1103_v29 = vld [vmem:[#allocation8 + $0x188] sm:$0xff] }
  0x90   :  { %v451_v1 = vld [vmem:[%s14921_s9 + $0x10] sm:$0xff]  ;;  %v156_v2 = vld [vmem:[%s14921_s9] sm:$0xff]  ;;  %v157_v3 = vld [vmem:[%s14921_s9 + $0x8] sm:$0xff]  ;;  %v9900_v31 = vpack.c.bf16 %v1100_v28, %v1098_v27 }
  0x91   :  { %473 = vperm.xlu1 %11415, %v451_v1   ;;  %178 = vperm.xlu0 %11414, %v156_v2   ;;  %v608_v4 = vld [vmem:[%s14921_s9 + $0x18] sm:$0xff]  ;;  %v11820_v18 = vld [vmem:[%s14921_s9 + $0x20] sm:$0xff]  ;;  %v1102_v33 = vld [vmem:[#allocation8 + $0x180] sm:$0xff] }
  0x92   :  { %9893 = vmatpush1.bf16.msra.mxu0 %v9892_v19  ;;  %v1105_v30 = vld [vmem:[#allocation8 + $0x198] sm:$0xff]  ;;  %v1104_v34 = vld [vmem:[#allocation8 + $0x190] sm:$0xff]  ;;  %v1107_v35 = vld [vmem:[#allocation8 + $0x1a8] sm:$0xff] }
  0x93   :  { %9895 = vmatprep.subr.bf16.mxu0 %v9894_v20  ;;  %v9902_v32 = vpack.c.bf16 %v1105_v30, %v1103_v29  ;;  %v1109_v36 = vld [vmem:[#allocation8 + $0x1b8] sm:$0xff]  ;;  %v766_v37 = vld [vmem:[%s14921_s9 + $0x28] sm:$0xff]  ;;  %v9904_v38 = vpack.c.bf16 %v1104_v34, %v1102_v33  ;;  %v1108_v42 = vld [vmem:[#allocation8 + $0x1b0] sm:$0xff] }
  0x94   :  { %v9906_v40 = vpack.c.bf16 %v1109_v36, %v1107_v35  ;;  %v1106_v41 = vld [vmem:[#allocation8 + $0x1a0] sm:$0xff]  ;;  %v1111_v43 = vld [vmem:[#allocation8 + $0x1c8] sm:$0xff]  ;;  %v1113_v44 = vld [vmem:[#allocation8 + $0x1d8] sm:$0xff] }
  0x95   :  { %183 = vperm.xlu1 %11415, %v157_v3   ;;  %316 = vperm.xlu0 %11414, %v157_v3   ;;  %v9908_v45 = vpack.c.bf16 %v1108_v42, %v1106_v41  ;;  %v9910_v46 = vpack.c.bf16 %v1113_v44, %v1111_v43  ;;  %v1110_v47 = vld [vmem:[#allocation8 + $0x1c0] sm:$0xff]  ;;  %v1112_v48 = vld [vmem:[#allocation8 + $0x1d0] sm:$0xff]  ;;  %v1115_v49 = vld [vmem:[#allocation8 + $0x1e8] sm:$0xff] }
  0x96   :  { %9897 = vmatpush1.bf16.msra.mxu0 %v9896_v25  ;;  %v1117_v50 = vld [vmem:[#allocation8 + $0x1f8] sm:$0xff]  ;;  %v767_v51 = vld [vmem:[%s14921_s9 + $0x30] sm:$0xff]  ;;  %v9912_v52 = vpack.c.bf16 %v1112_v48, %v1110_v47  ;;  %v1114_v54 = vld [vmem:[#allocation8 + $0x1e0] sm:$0xff] }
  0x97   :  { %9899 = vmatprep.subr.bf16.mxu0 %v9898_v26  ;;  %v9914_v53 = vpack.c.bf16 %v1117_v50, %v1115_v49  ;;  %v1116_v55 = vld [vmem:[#allocation8 + $0x1f0] sm:$0xff]  ;;  %v769_v58 = vld [vmem:[%s14921_s9 + $0x40] sm:$0xff]  ;;  %v770_v59 = vld [vmem:[%s14921_s9 + $0x48] sm:$0xff] }
  0x98   :  { %v9916_v56 = vpack.c.bf16 %v1116_v55, %v1114_v54  ;;  %v768_v57 = vld [vmem:[%s14921_s9 + $0x38] sm:$0xff]  ;;  %v771_v60 = vld [vmem:[%s14921_s9 + $0x50] sm:$0xff]  ;;  %v773_v62 = vld [vmem:[%s14921_s9 + $0x60] sm:$0xff] }
  0x99   :  { %630 = vperm.xlu1 %11415, %v608_v4   ;;  %321 = vperm.xlu0 %11414, %v451_v1   ;;  %v772_v61 = vld [vmem:[%s14921_s9 + $0x58] sm:$0xff]  ;;  %v774_v63 = vld [vmem:[%s14921_s9 + $0x68] sm:$0xff]  ;;  %v775_v0 = vld [vmem:[%s14921_s9 + $0x70] sm:$0xff] }
  0x9a   :  { %9901 = vmatpush1.bf16.msra.mxu0 %v9900_v31  ;;  %v1056_v5 = vld [vmem:[#allocation8 + $0x18] sm:$0xff]  ;;  %v11907_v28 = vld [vmem:[%s14921_s9 + $0x88] sm:$0xff]  ;;  %v1055_v31 = vld [vmem:[#allocation8 + $0x10] sm:$0xff] }
  0x9b   :  { %9903 = vmatprep.subr.bf16.mxu0 %v9902_v32  ;;  %v11864_v6 = vld [vmem:[%s14922_s2] ss:$0 sm:$0xff]  ;;  %v11869_v7 = vld [vmem:[%s14922_s2 + $0x1] ss:$0 sm:$0xff]  ;;  %v11879_v10 = vld [vmem:[%s14922_s2 + $0x2] ss:$0 sm:$0xff] }
  0x9c   :  { %v11874_v8 = vld [vmem:[%s14921_s9 + $0x80] sm:$0xff]  ;;  %v1053_v30 = vld [vmem:[#allocation8] sm:$0xff]  ;;  %v1058_v36 = vld [vmem:[#allocation8 + $0x28] sm:$0xff] }
  0x9d   :  { %787 = vperm.xlu1 %11415, %v11820_v18   ;;  %478 = vperm.xlu0 %11414, %v608_v4   ;;  %v11887_v15 = vld [vmem:[%s14922_s2 + $0x3] ss:$0 sm:$0xff]  ;;  %v11894_v22 = vld [vmem:[%s14922_s2 + $0x4] ss:$0 sm:$0xff]  ;;  %v11902_v27 = vld [vmem:[%s14923_s1] ss:$0 sm:$0xff] }
  0x9e   :  { %9905 = vmatpush1.bf16.msra.mxu0 %v9904_v38  ;;  %v9920_v38 = vpack.c.bf16 %v1055_v31, %v1053_v30  ;;  %v1059_v47 = vld [vmem:[#allocation8 + $0x30] sm:$0xff]  ;;  %v1070_v31 = vld [vmem:[#allocation8 + $0x88] sm:$0xff] }
  0x9f   :  { %9907 = vmatprep.subr.bf16.mxu0 %v9906_v40 }
  0xa1   :  { %326 = vperm.xlu1 %11415, %v608_v4   ;;  %188 = vperm.xlu0 %11414, %v451_v1   ;;  %v776_v1 = vld [vmem:[%s14921_s9 + $0x78] sm:$0xff] }
  0xa2   :  { %9909 = vmatpush1.bf16.msra.mxu0 %v9908_v45 }
  0xa3   :  { %9911 = vmatprep.subr.bf16.mxu0 %v9910_v46  ;;  %v1057_v46 = vld [vmem:[#allocation8 + $0x20] sm:$0xff] }
  0xa4   :  { %v9924_v55 = vpack.c.bf16 %v1059_v47, %v1057_v46 }
  0xa5   :  { %483 = vperm.xlu1 %11415, %v11820_v18   ;;  %635 = vperm.xlu0 %11414, %v11820_v18  }
  0xa6   :  { %9913 = vmatpush1.bf16.msra.mxu0 %v9912_v52  ;;  %v1064_v52 = vld [vmem:[#allocation8 + $0x58] sm:$0xff] }
  0xa7   :  { %9915 = vmatprep.subr.bf16.mxu0 %v9914_v53  ;;  %v11923_v53 = vld [vmem:[%s14921_s9 + $0x90] sm:$0xff] }
  0xa9   :  { %193 = vperm.xlu1 %11415, %v608_v4   ;;  %792 = vperm.xlu0 %11414, %v766_v37   ;;  %v1054_v4 = vld [vmem:[#allocation8 + $0x8] sm:$0xff] }
  0xaa   :  { %9917 = vmatpush1.bf16.msra.mxu0 %v9916_v56  ;;  %v9918_v9 = vpack.c.bf16 %v1056_v5, %v1054_v4 }
  0xac   :  { %9919 = vmatprep.subr.bf16.mxu0 %v9918_v9 }
  0xad   :  { %640 = vperm.xlu1 %11415, %v766_v37   ;;  %331 = vperm.xlu0 %11414, %v11820_v18  }
  0xb1   :  { %797 = vperm.xlu1 %11415, %v767_v51   ;;  %488 = vperm.xlu0 %11414, %v766_v37  }
  0xb5   :  { %336 = vperm.xlu1 %11415, %v766_v37   ;;  %198 = vperm.xlu0 %11414, %v11820_v18  }
  0xb9   :  { %493 = vperm.xlu1 %11415, %v767_v51   ;;  %645 = vperm.xlu0 %11414, %v767_v51  }
  0xbd   :  { %203 = vperm.xlu1 %11415, %v766_v37   ;;  %802 = vperm.xlu0 %11414, %v768_v57   ;;  %v1060_v37 = vld [vmem:[#allocation8 + $0x38] sm:$0xff] }
  0xbe   :  { %v9922_v45 = vpack.c.bf16 %v1060_v37, %v1058_v36 }
  0xc1   :  { %650 = vperm.xlu1 %11415, %v768_v57   ;;  %341 = vperm.xlu0 %11414, %v767_v51  }
  0xc5   :  { %807 = vperm.xlu1 %11415, %v769_v58   ;;  %498 = vperm.xlu0 %11414, %v768_v57  }
  0xc9   :  { %346 = vperm.xlu1 %11415, %v768_v57   ;;  %208 = vperm.xlu0 %11414, %v767_v51   ;;  %v1062_v51 = vld [vmem:[#allocation8 + $0x48] sm:$0xff] }
  0xcd   :  { %503 = vperm.xlu1 %11415, %v769_v58   ;;  %655 = vperm.xlu0 %11414, %v769_v58  }
  0xd1   :  { %213 = vperm.xlu1 %11415, %v768_v57   ;;  %812 = vperm.xlu0 %11414, %v770_v59  }
  0xd5   :  { %660 = vperm.xlu1 %11415, %v770_v59   ;;  %351 = vperm.xlu0 %11414, %v769_v58  }
  0xd9   :  { %817 = vperm.xlu1 %11415, %v771_v60   ;;  %508 = vperm.xlu0 %11414, %v770_v59  }
  0xdd   :  { %356 = vperm.xlu1 %11415, %v770_v59   ;;  %218 = vperm.xlu0 %11414, %v769_v58  }
  0xe1   :  { %513 = vperm.xlu1 %11415, %v771_v60   ;;  %665 = vperm.xlu0 %11414, %v771_v60  }
  0xe5   :  { %223 = vperm.xlu1 %11415, %v770_v59   ;;  %822 = vperm.xlu0 %11414, %v772_v61   ;;  %v9926_v59 = vpack.c.bf16 %v1064_v52, %v1062_v51 }
  0xe9   :  { %670 = vperm.xlu1 %11415, %v772_v61   ;;  %361 = vperm.xlu0 %11414, %v771_v60  }
  0xed   :  { %827 = vperm.xlu1 %11415, %v773_v62   ;;  %518 = vperm.xlu0 %11414, %v772_v61  }
  0xf1   :  { %366 = vperm.xlu1 %11415, %v772_v61   ;;  %228 = vperm.xlu0 %11414, %v771_v60   ;;  %v1061_v60 = vld [vmem:[#allocation8 + $0x40] sm:$0xff] }
  0xf5   :  { %523 = vperm.xlu1 %11415, %v773_v62   ;;  %675 = vperm.xlu0 %11414, %v773_v62  }
  0xf9   :  { %233 = vperm.xlu1 %11415, %v772_v61   ;;  %832 = vperm.xlu0 %11414, %v774_v63   ;;  %v1063_v61 = vld [vmem:[#allocation8 + $0x50] sm:$0xff] }
  0xfd   :  { %680 = vperm.xlu1 %11415, %v774_v63   ;;  %371 = vperm.xlu0 %11414, %v773_v62  }
 0x101   :  { %837 = vperm.xlu1 %11415, %v775_v0   ;;  %528 = vperm.xlu0 %11414, %v774_v63  }
 0x105   :  { %376 = vperm.xlu1 %11415, %v774_v63   ;;  %238 = vperm.xlu0 %11414, %v773_v62  }
 0x109   :  { %533 = vperm.xlu1 %11415, %v775_v0   ;;  %685 = vperm.xlu0 %11414, %v775_v0  }
 0x10d   :  { %243 = vperm.xlu1 %11415, %v774_v63   ;;  %842 = vperm.xlu0 %11414, %v776_v1  }
 0x110   :  { %v474_v2 = vpop.permute.xlu1 %473  ;;  %v179_v3 = vpop.permute.xlu0 %178 }
 0x111   :  { %690 = vperm.xlu1 %11415, %v776_v1   ;;  %381 = vperm.xlu0 %11414, %v775_v0   ;;  %v275_v13 = vmul.f32 %v11864_v6, %v179_v3  ;;  %v570_v16 = vmul.f32 %v11879_v10, %v474_v2  ;;  %v9928_v3 = vpack.c.bf16 %v1063_v61, %v1061_v60 }
 0x114   :  { %v184_v11 = vpop.permute.xlu1 %183  ;;  %v317_v12 = vpop.permute.xlu0 %316 }
 0x115   :  { %v413_v14 = vmul.f32 %v11869_v7, %v317_v12  ;;  %847 = vperm.xlu1 %11415, %v11874_v8   ;;  %538 = vperm.xlu0 %11414, %v776_v1   ;;  %v276_v40 = vmul.f32 %v11864_v6, %v184_v11 }
 0x117   :  { %v432_v17 = vadd.f32 %v413_v14, %v275_v13  ;;  %v1066_v13 = vld [vmem:[#allocation8 + $0x68] sm:$0xff]  ;;  %v1068_v14 = vld [vmem:[#allocation8 + $0x78] sm:$0xff] }
 0x118   :  { %v631_v18 = vpop.permute.xlu1 %630  ;;  %v322_v19 = vpop.permute.xlu0 %321 }
 0x119   :  { %v589_v20 = vadd.f32 %v570_v16, %v432_v17  ;;  %v727_v21 = vmul.f32 %v11887_v15, %v631_v18  ;;  %386 = vperm.xlu1 %11415, %v776_v1   ;;  %248 = vperm.xlu0 %11414, %v775_v0   ;;  %v414_v34 = vmul.f32 %v11869_v7, %v322_v19  ;;  %v1065_v16 = vld [vmem:[#allocation8 + $0x60] sm:$0xff]  ;;  %v1067_v18 = vld [vmem:[#allocation8 + $0x70] sm:$0xff] }
 0x11a   :  { %v9930_v17 = vpack.c.bf16 %v1068_v14, %v1066_v13 }
 0x11b   :  { %v746_v25 = vadd.f32 %v727_v21, %v589_v20  ;;  %v433_v48 = vadd.f32 %v414_v34, %v276_v40  ;;  %v1071_v40 = vld [vmem:[#allocation8 + $0x90] sm:$0xff] }
 0x11c   :  { %v788_v23 = vpop.permute.xlu1 %787  ;;  %v479_v24 = vpop.permute.xlu0 %478 }
 0x11d   :  { %v884_v26 = vmul.f32 %v11894_v22, %v788_v23  ;;  %543 = vperm.xlu1 %11415, %v11874_v8   ;;  %695 = vperm.xlu0 %11414, %v11874_v8   ;;  %v571_v41 = vmul.f32 %v11879_v10, %v479_v24  ;;  %v9932_v24 = vpack.c.bf16 %v1067_v18, %v1065_v16 }
 0x11f   :  { %v903_v29 = vadd.f32 %v884_v26, %v746_v25  ;;  %v590_v54 = vadd.f32 %v571_v41, %v433_v48 }
 0x120   :  { %v327_v32 = vpop.permute.xlu1 %326  ;;  %v189_v33 = vpop.permute.xlu0 %188 }
 0x121   :  { %v931_v35 = vadd.f32 %v11902_v27, %v903_v29  ;;  %253 = vperm.xlu1 %11415, %v776_v1   ;;  %852 = vperm.xlu0 %11414, %v11907_v28   ;;  %v415_v56 = vmul.f32 %v11869_v7, %v327_v32  ;;  %v277_v62 = vmul.f32 %v11864_v6, %v189_v33  ;;  %v780_v29 = vld [vmem:[%s14921_s9 + $0x98] sm:$0xff]  ;;  %v1072_v32 = vld [vmem:[#allocation8 + $0x98] sm:$0xff] }
 0x123   :  { %vm950_vm0 = vcmp.ge.f32.partialorder %v931_v35, 0.0  ;;  %v969_v42 = vmul.f32 0.4, %v931_v35  ;;  %v434_v9 = vadd.f32 %v415_v56, %v277_v62 }
 0x124   :  { %v484_v43 = vpop.permute.xlu1 %483  ;;  %v636_v44 = vpop.permute.xlu0 %635 }
 0x125   :  { %v728_v49 = vmul.f32 %v11887_v15, %v636_v44  ;;  %700 = vperm.xlu1 %11415, %v11907_v28   ;;  %391 = vperm.xlu0 %11414, %v11874_v8   ;;  %v11917_v50 = vsel %vm950_vm0, %v931_v35, %v969_v42  ;;  %v572_v1 = vmul.f32 %v11879_v10, %v484_v43 }
 0x126   :  { %1183 = vmatmul.mubr.f32.vlgmr.msra.gmra.mrb[0].mxu0 %v11917_v50  ;;  %v9934_v35 = vpack.c.bf16 %v1072_v32, %v1070_v31 }
 0x127   :  { %1188 = vmatprep.mubr.f32.mxu0 %v14857_v39  ;;  %9921 = vmatpush1.bf16.msra.mxu0 %v9920_v38  ;;  %v747_v63 = vadd.f32 %v728_v49, %v590_v54  ;;  %v591_v19 = vadd.f32 %v572_v1, %v434_v9  ;;  %v1069_v38 = vld [vmem:[#allocation8 + $0x80] sm:$0xff]  ;;  %v781_v49 = vld [vmem:[%s14921_s9 + $0xa0] sm:$0xff]  ;;  %v1075_v9 = vld [vmem:[#allocation8 + $0xb0] sm:$0xff] }
 0x128   :  { %v194_v57 = vpop.permute.xlu1 %193  ;;  %v793_v58 = vpop.permute.xlu0 %792  ;;  %9923 = vmatprep.subr.bf16.mxu0 %v9922_v45  ;;  %v9936_v41 = vpack.c.bf16 %v1071_v40, %v1069_v38 }
 0x129   :  { %v885_v0 = vmul.f32 %v11894_v22, %v793_v58  ;;  %857 = vperm.xlu1 %11415, %v11923_v53   ;;  %548 = vperm.xlu0 %11414, %v11907_v28   ;;  %v278_v42 = vmul.f32 %v11864_v6, %v194_v57 }
 0x12b   :  { %v904_v2 = vadd.f32 %v885_v0, %v747_v63  ;;  %9925 = vmatpush1.bf16.msra.mxu0 %v9924_v55 }
 0x12c   :  { %v641_v4 = vpop.permute.xlu1 %640  ;;  %v332_v5 = vpop.permute.xlu0 %331  ;;  %9927 = vmatprep.subr.bf16.mxu0 %v9926_v59 }
 0x12d   :  { %v932_v11 = vadd.f32 %v11902_v27, %v904_v2  ;;  %v729_v12 = vmul.f32 %v11887_v15, %v641_v4  ;;  %396 = vperm.xlu1 %11415, %v11907_v28   ;;  %258 = vperm.xlu0 %11414, %v11874_v8   ;;  %v416_v36 = vmul.f32 %v11869_v7, %v332_v5  ;;  %v1074_v2 = vld [vmem:[#allocation8 + $0xa8] sm:$0xff]  ;;  %v1073_v4 = vld [vmem:[#allocation8 + $0xa0] sm:$0xff] }
 0x12e   :  { %v9940_v16 = vpack.c.bf16 %v1075_v9, %v1073_v4  ;;  %v1496_v4 = vld [vmem:[#allocation8 + $0x208] sm:$0xff] }
 0x12f   :  { %vm951_vm1 = vcmp.ge.f32.partialorder %v932_v11, 0.0  ;;  %v970_v20 = vmul.f32 0.4, %v932_v11  ;;  %9929 = vmatpush1.bf16.msra.mxu0 %v9928_v3  ;;  %v748_v25 = vadd.f32 %v729_v12, %v591_v19  ;;  %v435_v47 = vadd.f32 %v416_v36, %v278_v42  ;;  %v1076_v3 = vld [vmem:[#allocation8 + $0xb8] sm:$0xff] }
 0x130   :  { %v798_v21 = vpop.permute.xlu1 %797  ;;  %v489_v23 = vpop.permute.xlu0 %488  ;;  %9931 = vmatprep.subr.bf16.mxu0 %v9930_v17  ;;  %v9938_v5 = vpack.c.bf16 %v1076_v3, %v1074_v2 }
 0x131   :  { %v886_v26 = vmul.f32 %v11894_v22, %v798_v21  ;;  %553 = vperm.xlu1 %11415, %v11923_v53   ;;  %705 = vperm.xlu0 %11414, %v11923_v53   ;;  %v11939_v8 = vsel %vm951_vm1, %v932_v11, %v970_v20  ;;  %v573_v43 = vmul.f32 %v11879_v10, %v489_v23  ;;  %v1078_v21 = vld [vmem:[#allocation8 + $0xc8] sm:$0xff]  ;;  %v1080_v23 = vld [vmem:[#allocation8 + $0xd8] sm:$0xff] }
 0x132   :  { %1189 = vmatmul.mubr.f32.gmra.mrb[2].mxu0 %v11939_v8 }
 0x133   :  { %v905_v30 = vadd.f32 %v886_v26, %v748_v25  ;;  %1194 = vmatprep.mubr.f32.mxu0 %v14857_v39  ;;  %9933 = vmatpush1.bf16.msra.mxu0 %v9932_v24  ;;  %v592_v51 = vadd.f32 %v573_v43, %v435_v47  ;;  %v1077_v24 = vld [vmem:[#allocation8 + $0xc0] sm:$0xff] }
 0x134   :  { %v337_v33 = vpop.permute.xlu1 %336  ;;  %v199_v34 = vpop.permute.xlu0 %198  ;;  %9935 = vmatprep.subr.bf16.mxu0 %v9934_v35 }
 0x135   :  { %v933_v37 = vadd.f32 %v11902_v27, %v905_v30  ;;  %263 = vperm.xlu1 %11415, %v11907_v28   ;;  %862 = vperm.xlu0 %11414, %v780_v29   ;;  %v417_v52 = vmul.f32 %v11869_v7, %v337_v33  ;;  %v279_v56 = vmul.f32 %v11864_v6, %v199_v34  ;;  %v1079_v30 = vld [vmem:[#allocation8 + $0xd0] sm:$0xff]  ;;  %v783_v33 = vld [vmem:[%s14921_s9 + $0xb0] sm:$0xff] }
 0x136   :  { %v9944_v34 = vpack.c.bf16 %v1079_v30, %v1077_v24 }
 0x137   :  { %vm952_vm2 = vcmp.ge.f32.partialorder %v933_v37, 0.0  ;;  %v971_v44 = vmul.f32 0.4, %v933_v37  ;;  %9937 = vmatpush1.bf16.msra.mxu0 %v9936_v41  ;;  %v436_v63 = vadd.f32 %v417_v52, %v279_v56  ;;  %v1082_v52 = vld [vmem:[#allocation8 + $0xe8] sm:$0xff] }
 0x138   :  { %v494_v45 = vpop.permute.xlu1 %493  ;;  %v646_v46 = vpop.permute.xlu0 %645  ;;  %9939 = vmatprep.subr.bf16.mxu0 %v9938_v5  ;;  %v1498_v5 = vld [vmem:[#allocation8 + $0x218] sm:$0xff] }
 0x139   :  { %v730_v48 = vmul.f32 %v11887_v15, %v646_v46  ;;  %710 = vperm.xlu1 %11415, %v780_v29   ;;  %401 = vperm.xlu0 %11414, %v11923_v53   ;;  %v11953_v28 = vsel %vm952_vm2, %v933_v37, %v971_v44  ;;  %v574_v59 = vmul.f32 %v11879_v10, %v494_v45 }
 0x13a   :  { %1195 = vmatmul.mubr.f32.gmra.mrb[4].mxu0 %v11953_v28 }
 0x13b   :  { %1200 = vmatprep.mubr.f32.mxu0 %v14857_v39  ;;  %v749_v57 = vadd.f32 %v730_v48, %v592_v51  ;;  %v593_v11 = vadd.f32 %v574_v59, %v436_v63  ;;  %9941 = vmatpush1.bf16.msra.mxu0 %v9940_v16 }
 0x13c   :  { %v204_v54 = vpop.permute.xlu1 %203  ;;  %v803_v55 = vpop.permute.xlu0 %802 }
 0x13d   :  { %v887_v58 = vmul.f32 %v11894_v22, %v803_v55  ;;  %867 = vperm.xlu1 %11415, %v781_v49   ;;  %558 = vperm.xlu0 %11414, %v780_v29   ;;  %v280_v35 = vmul.f32 %v11864_v6, %v204_v54  ;;  %v1084_v54 = vld [vmem:[#allocation8 + $0xf8] sm:$0xff]  ;;  %v1081_v55 = vld [vmem:[#allocation8 + $0xe0] sm:$0xff] }
 0x13e   :  { %v9946_v56 = vpack.c.bf16 %v1084_v54, %v1082_v52 }
 0x13f   :  { %v906_v60 = vadd.f32 %v887_v58, %v749_v57  ;;  %v1083_v57 = vld [vmem:[#allocation8 + $0xf0] sm:$0xff] }
 0x140   :  { %v651_v61 = vpop.permute.xlu1 %650  ;;  %v342_v62 = vpop.permute.xlu0 %341 }
 0x141   :  { %v934_v0 = vadd.f32 %v11902_v27, %v906_v60  ;;  %v731_v1 = vmul.f32 %v11887_v15, %v651_v61  ;;  %406 = vperm.xlu1 %11415, %v780_v29   ;;  %268 = vperm.xlu0 %11414, %v11923_v53   ;;  %v626_v53 = vld [vmem:[%s14921_s9 + $0xa8] sm:$0xff]  ;;  %v9942_v29 = vpack.c.bf16 %v1080_v23, %v1078_v21 }
 0x142   :  { %v418_v31 = vmul.f32 %v11869_v7, %v342_v62  ;;  %v9948_v60 = vpack.c.bf16 %v1083_v57, %v1081_v55 }
 0x143   :  { %vm953_vm3 = vcmp.ge.f32.partialorder %v934_v0, 0.0  ;;  %v972_v12 = vmul.f32 0.4, %v934_v0  ;;  %v750_v17 = vadd.f32 %v731_v1, %v593_v11  ;;  %9943 = vmatprep.subr.bf16.mxu0 %v9942_v29 }
 0x144   :  { %v808_v13 = vpop.permute.xlu1 %807  ;;  %v499_v14 = vpop.permute.xlu0 %498  ;;  %9945 = vmatpush1.bf16.msra.mxu0 %v9944_v34  ;;  %v437_v41 = vadd.f32 %v418_v31, %v280_v35 }
 0x145   :  { %v888_v18 = vmul.f32 %v11894_v22, %v808_v13  ;;  %563 = vperm.xlu1 %11415, %v781_v49   ;;  %715 = vperm.xlu0 %11414, %v781_v49   ;;  %v11968_v19 = vsel %vm953_vm3, %v934_v0, %v972_v12  ;;  %v575_v36 = vmul.f32 %v11879_v10, %v499_v14 }
 0x146   :  { %1201 = vmatmul.mubr.f32.gmra.mrb[6].mxu0 %v11968_v19  ;;  %9947 = vmatprep.subr.bf16.mxu0 %v9946_v56  ;;  %v9950_v12 = vpack.c.bf16 %v1498_v5, %v1496_v4 }
 0x147   :  { %v907_v20 = vadd.f32 %v888_v18, %v750_v17  ;;  %1206 = vmatprep.mubr.f32.mxu0 %v14857_v39  ;;  %v594_v44 = vadd.f32 %v575_v36, %v437_v41 }
 0x148   :  { %v347_v25 = vpop.permute.xlu1 %346  ;;  %v209_v26 = vpop.permute.xlu0 %208  ;;  %9949 = vmatpush1.bf16.msra.mxu0 %v9948_v60 }
 0x149   :  { %v935_v32 = vadd.f32 %v11902_v27, %v907_v20  ;;  %720 = vperm.xlu1 %11415, %v626_v53   ;;  %872 = vperm.xlu0 %11414, %v626_v53   ;;  %v419_v47 = vmul.f32 %v11869_v7, %v347_v25  ;;  %v281_v48 = vmul.f32 %v11864_v6, %v209_v26 }
 0x14a   :  { %9951 = vmatprep.subr.bf16.mxu0 %v9950_v12 }
 0x14b   :  { %vm954_vm4 = vcmp.ge.f32.partialorder %v935_v32, 0.0  ;;  %v973_v37 = vmul.f32 0.4, %v935_v32  ;;  %v438_v63 = vadd.f32 %v419_v47, %v281_v48 }
 0x14c   :  { %v504_v38 = vpop.permute.xlu1 %503  ;;  %v656_v40 = vpop.permute.xlu0 %655 }
 0x14d   :  { %v732_v42 = vmul.f32 %v11887_v15, %v656_v40  ;;  %877 = vperm.xlu0 %11414, %v783_v33   ;;  %v11983_v43 = vsel %vm954_vm4, %v935_v32, %v973_v37  ;;  %v576_v58 = vmul.f32 %v11879_v10, %v504_v38 }
 0x14e   :  { %1207 = vmatmul.mubr.f32.gmra.mrb[8].mxu0 %v11983_v43 }
 0x14f   :  { %1212 = vmatprep.mubr.f32.mxu0 %v14857_v39  ;;  %v751_v49 = vadd.f32 %v732_v42, %v594_v44  ;;  %v595_v2 = vadd.f32 %v576_v58, %v438_v63 }
 0x150   :  { %v214_v45 = vpop.permute.xlu1 %213  ;;  %v813_v46 = vpop.permute.xlu0 %812 }
 0x151   :  { %v889_v51 = vmul.f32 %v11894_v22, %v813_v46  ;;  %v282_v23 = vmul.f32 %v11864_v6, %v214_v45 }
 0x153   :  { %v908_v59 = vadd.f32 %v889_v51, %v751_v49 }
 0x154   :  { %v661_v61 = vpop.permute.xlu1 %660  ;;  %v352_v62 = vpop.permute.xlu0 %351 }
 0x155   :  { %v936_v0 = vadd.f32 %v11902_v27, %v908_v59  ;;  %v733_v1 = vmul.f32 %v11887_v15, %v661_v61  ;;  %v420_v20 = vmul.f32 %v11869_v7, %v352_v62 }
 0x157   :  { %vm955_vm5 = vcmp.ge.f32.partialorder %v936_v0, 0.0  ;;  %v974_v3 = vmul.f32 0.4, %v936_v0  ;;  %v752_v13 = vadd.f32 %v733_v1, %v595_v2  ;;  %v439_v30 = vadd.f32 %v420_v20, %v282_v23 }
 0x158   :  { %v818_v9 = vpop.permute.xlu1 %817  ;;  %v509_v11 = vpop.permute.xlu0 %508 }
 0x159   :  { %v890_v14 = vmul.f32 %v11894_v22, %v818_v9  ;;  %v11994_v16 = vsel %vm955_vm5, %v936_v0, %v974_v3  ;;  %v577_v24 = vmul.f32 %v11879_v10, %v509_v11 }
 0x15a   :  { %1213 = vmatmul.mubr.f32.gmra.mrb[10].mxu0 %v11994_v16 }
 0x15b   :  { %v909_v17 = vadd.f32 %v890_v14, %v752_v13  ;;  %1218 = vmatprep.mubr.f32.mxu0 %v14857_v39  ;;  %v596_v33 = vadd.f32 %v577_v24, %v439_v30 }
 0x15c   :  { %v357_v18 = vpop.permute.xlu1 %356  ;;  %v219_v53 = vpop.permute.xlu0 %218 }
 0x15d   :  { %v937_v21 = vadd.f32 %v11902_v27, %v909_v17  ;;  %v421_v36 = vmul.f32 %v11869_v7, %v357_v18  ;;  %v283_v37 = vmul.f32 %v11864_v6, %v219_v53 }
 0x15f   :  { %vm956_vm6 = vcmp.ge.f32.partialorder %v937_v21, 0.0  ;;  %v975_v25 = vmul.f32 0.4, %v937_v21  ;;  %v440_v46 = vadd.f32 %v421_v36, %v283_v37 }
 0x160   :  { %v514_v26 = vpop.permute.xlu1 %513  ;;  %v666_v29 = vpop.permute.xlu0 %665 }
 0x161   :  { %v734_v31 = vmul.f32 %v11887_v15, %v666_v29  ;;  %v12003_v32 = vsel %vm956_vm6, %v937_v21, %v975_v25  ;;  %v578_v41 = vmul.f32 %v11879_v10, %v514_v26 }
 0x162   :  { %1219 = vmatmul.mubr.f32.gmra.mrb[12].mxu0 %v12003_v32 }
 0x163   :  { %1224 = vmatprep.mubr.f32.mxu0 %v14857_v39  ;;  %v753_v38 = vadd.f32 %v734_v31, %v596_v33  ;;  %v597_v49 = vadd.f32 %v578_v41, %v440_v46 }
 0x164   :  { %v224_v34 = vpop.permute.xlu1 %223  ;;  %v823_v35 = vpop.permute.xlu0 %822 }
 0x165   :  { %v891_v40 = vmul.f32 %v11894_v22, %v823_v35  ;;  %v284_v63 = vmul.f32 %v11864_v6, %v224_v34 }
 0x167   :  { %v910_v42 = vadd.f32 %v891_v40, %v753_v38 }
 0x168   :  { %v671_v44 = vpop.permute.xlu1 %670  ;;  %v362_v45 = vpop.permute.xlu0 %361 }
 0x169   :  { %v938_v47 = vadd.f32 %v11902_v27, %v910_v42  ;;  %v735_v48 = vmul.f32 %v11887_v15, %v671_v44  ;;  %v422_v61 = vmul.f32 %v11869_v7, %v362_v45 }
 0x16b   :  { %vm957_vm7 = vcmp.ge.f32.partialorder %v938_v47, 0.0  ;;  %v976_v51 = vmul.f32 0.4, %v938_v47  ;;  %v754_v55 = vadd.f32 %v735_v48, %v597_v49  ;;  %v441_v4 = vadd.f32 %v422_v61, %v284_v63 }
 0x16c   :  { %v828_v52 = vpop.permute.xlu1 %827  ;;  %v519_v54 = vpop.permute.xlu0 %518 }
 0x16d   :  { %v892_v56 = vmul.f32 %v11894_v22, %v828_v52  ;;  %v12014_v57 = vsel %vm957_vm7, %v938_v47, %v976_v51  ;;  %v579_v0 = vmul.f32 %v11879_v10, %v519_v54 }
 0x16e   :  { %1225 = vmatmul.mubr.f32.gmra.mrb[14].mxu0 %v12014_v57 }
 0x16f   :  { %v911_v58 = vadd.f32 %v892_v56, %v754_v55  ;;  %1230 = vmatprep.mubr.f32.mxu0 %v14857_v39  ;;  %v598_v11 = vadd.f32 %v579_v0, %v441_v4 }
 0x170   :  { %v367_v59 = vpop.permute.xlu1 %366  ;;  %v229_v60 = vpop.permute.xlu0 %228 }
 0x171   :  { %v939_v62 = vadd.f32 %v11902_v27, %v911_v58  ;;  %v423_v14 = vmul.f32 %v11869_v7, %v367_v59  ;;  %v285_v17 = vmul.f32 %v11864_v6, %v229_v60 }
 0x173   :  { %vm958_vm8 = vcmp.ge.f32.partialorder %v939_v62, 0.0  ;;  %v977_v1 = vmul.f32 0.4, %v939_v62  ;;  %v442_v25 = vadd.f32 %v423_v14, %v285_v17 }
 0x174   :  { %v524_v2 = vpop.permute.xlu1 %523  ;;  %v676_v3 = vpop.permute.xlu0 %675 }
 0x175   :  { %v736_v5 = vmul.f32 %v11887_v15, %v676_v3  ;;  %v12023_v9 = vsel %vm958_vm8, %v939_v62, %v977_v1  ;;  %v580_v20 = vmul.f32 %v11879_v10, %v524_v2 }
 0x176   :  { %14924 = vst [vmem:[#allocation22_spill] sm:$0xff] %v12023_v9  ;;  %1231 = vmatmul.mubr.f32.gmra.mrb[16].mxu0 %v12023_v9 }
 0x177   :  { %1236 = vmatprep.mubr.f32.mxu0 %v14857_v39  ;;  %v755_v18 = vadd.f32 %v736_v5, %v598_v11  ;;  %v599_v30 = vadd.f32 %v580_v20, %v442_v25 }
 0x178   :  { %v234_v12 = vpop.permute.xlu1 %233  ;;  %v833_v13 = vpop.permute.xlu0 %832 }
 0x179   :  { %v893_v53 = vmul.f32 %v11894_v22, %v833_v13  ;;  %v286_v45 = vmul.f32 %v11864_v6, %v234_v12 }
 0x17b   :  { %v912_v21 = vadd.f32 %v893_v53, %v755_v18 }
 0x17c   :  { %v681_v23 = vpop.permute.xlu1 %680  ;;  %v372_v24 = vpop.permute.xlu0 %371 }
 0x17d   :  { %v940_v26 = vadd.f32 %v11902_v27, %v912_v21  ;;  %v737_v29 = vmul.f32 %v11887_v15, %v681_v23  ;;  %v424_v42 = vmul.f32 %v11869_v7, %v372_v24 }
 0x17f   :  { %vm959_vm9 = vcmp.ge.f32.partialorder %v940_v26, 0.0  ;;  %v978_v31 = vmul.f32 0.4, %v940_v26  ;;  %v756_v35 = vadd.f32 %v737_v29, %v599_v30  ;;  %v443_v51 = vadd.f32 %v424_v42, %v286_v45 }
 0x180   :  { %v838_v33 = vpop.permute.xlu1 %837  ;;  %v529_v34 = vpop.permute.xlu0 %528 }
 0x181   :  { %v894_v36 = vmul.f32 %v11894_v22, %v838_v33  ;;  %v12034_v37 = vsel %vm959_vm9, %v940_v26, %v978_v31  ;;  %v581_v46 = vmul.f32 %v11879_v10, %v529_v34 }
 0x182   :  { %14925 = vst [vmem:[#allocation23_spill] sm:$0xff] %v12034_v37  ;;  %1237 = vmatmul.mubr.f32.gmra.mrb[18].mxu0 %v12034_v37 }
 0x183   :  { %v913_v38 = vadd.f32 %v894_v36, %v756_v35  ;;  %1242 = vmatprep.mubr.f32.mxu0 %v14857_v39  ;;  %v600_v55 = vadd.f32 %v581_v46, %v443_v51 }
 0x184   :  { %v377_v40 = vpop.permute.xlu1 %376  ;;  %v239_v41 = vpop.permute.xlu0 %238 }
 0x185   :  { %v941_v44 = vadd.f32 %v11902_v27, %v913_v38  ;;  %v425_v59 = vmul.f32 %v11869_v7, %v377_v40  ;;  %v287_v60 = vmul.f32 %v11864_v6, %v239_v41 }
 0x187   :  { %vm960_vm10 = vcmp.ge.f32.partialorder %v941_v44, 0.0  ;;  %v979_v47 = vmul.f32 0.4, %v941_v44  ;;  %v444_v3 = vadd.f32 %v425_v59, %v287_v60 }
 0x188   :  { %v534_v48 = vpop.permute.xlu1 %533  ;;  %v686_v49 = vpop.permute.xlu0 %685 }
 0x189   :  { %v738_v52 = vmul.f32 %v11887_v15, %v686_v49  ;;  %v12043_v54 = vsel %vm960_vm10, %v941_v44, %v979_v47  ;;  %v582_v63 = vmul.f32 %v11879_v10, %v534_v48 }
 0x18a   :  { %14926 = vst [vmem:[#allocation24_spill] sm:$0xff] %v12043_v54  ;;  %1243 = vmatmul.mubr.f32.gmra.mrb[20].mxu0 %v12043_v54 }
 0x18b   :  { %1248 = vmatprep.mubr.f32.mxu0 %v14857_v39  ;;  %v757_v61 = vadd.f32 %v738_v52, %v600_v55  ;;  %v601_v11 = vadd.f32 %v582_v63, %v444_v3 }
 0x18c   :  { %v244_v56 = vpop.permute.xlu1 %243  ;;  %v843_v58 = vpop.permute.xlu0 %842 }
 0x18d   :  { %v895_v62 = vmul.f32 %v11894_v22, %v843_v58  ;;  %v288_v26 = vmul.f32 %v11864_v6, %v244_v56 }
 0x18f   :  { %v914_v0 = vadd.f32 %v895_v62, %v757_v61 }
 0x190   :  { %v691_v1 = vpop.permute.xlu1 %690  ;;  %v382_v2 = vpop.permute.xlu0 %381 }
 0x191   :  { %v942_v4 = vadd.f32 %v11902_v27, %v914_v0  ;;  %v739_v5 = vmul.f32 %v11887_v15, %v691_v1  ;;  %v426_v24 = vmul.f32 %v11869_v7, %v382_v2 }
 0x193   :  { %vm961_vm11 = vcmp.ge.f32.partialorder %v942_v4, 0.0  ;;  %v980_v12 = vmul.f32 0.4, %v942_v4  ;;  %v758_v17 = vadd.f32 %v739_v5, %v601_v11  ;;  %v445_v34 = vadd.f32 %v426_v24, %v288_v26 }
 0x194   :  { %v848_v13 = vpop.permute.xlu1 %847  ;;  %v539_v14 = vpop.permute.xlu0 %538 }
 0x195   :  { %v896_v18 = vmul.f32 %v11894_v22, %v848_v13  ;;  %v12054_v53 = vsel %vm961_vm11, %v942_v4, %v980_v12  ;;  %v583_v29 = vmul.f32 %v11879_v10, %v539_v14 }
 0x196   :  { %14927 = vst [vmem:[#allocation25_spill] sm:$0xff] %v12054_v53  ;;  %1249 = vmatmul.mubr.f32.gmra.mrb[22].mxu0 %v12054_v53 }
 0x197   :  { %v915_v20 = vadd.f32 %v896_v18, %v758_v17  ;;  %1254 = vmatprep.mubr.f32.mxu0 %v14857_v39  ;;  %v602_v38 = vadd.f32 %v583_v29, %v445_v34 }
 0x198   :  { %v387_v21 = vpop.permute.xlu1 %386  ;;  %v249_v23 = vpop.permute.xlu0 %248 }
 0x199   :  { %v943_v25 = vadd.f32 %v11902_v27, %v915_v20  ;;  %v427_v42 = vmul.f32 %v11869_v7, %v387_v21  ;;  %v289_v44 = vmul.f32 %v11864_v6, %v249_v23 }
 0x19b   :  { %vm962_vm12 = vcmp.ge.f32.partialorder %v943_v25, 0.0  ;;  %v981_v30 = vmul.f32 0.4, %v943_v25  ;;  %v446_v52 = vadd.f32 %v427_v42, %v289_v44 }
 0x19c   :  { %v544_v31 = vpop.permute.xlu1 %543  ;;  %v696_v33 = vpop.permute.xlu0 %695 }
 0x19d   :  { %v740_v35 = vmul.f32 %v11887_v15, %v696_v33  ;;  %v12063_v36 = vsel %vm962_vm12, %v943_v25, %v981_v30  ;;  %v584_v47 = vmul.f32 %v11879_v10, %v544_v31 }
 0x19e   :  { %14928 = vst [vmem:[#allocation26_spill] sm:$0xff] %v12063_v36  ;;  %1255 = vmatmul.mubr.f32.gmra.mrb[24].mxu0 %v12063_v36 }
 0x19f   :  { %1260 = vmatprep.mubr.f32.mxu0 %v14857_v39  ;;  %v759_v45 = vadd.f32 %v740_v35, %v602_v38  ;;  %v603_v58 = vadd.f32 %v584_v47, %v446_v52 }
 0x1a0   :  { %v254_v40 = vpop.permute.xlu1 %253  ;;  %v853_v41 = vpop.permute.xlu0 %852 }
 0x1a1   :  { %v897_v46 = vmul.f32 %v11894_v22, %v853_v41  ;;  %v290_v11 = vmul.f32 %v11864_v6, %v254_v40 }
 0x1a3   :  { %v916_v48 = vadd.f32 %v897_v46, %v759_v45 }
 0x1a4   :  { %v701_v49 = vpop.permute.xlu1 %700  ;;  %v392_v51 = vpop.permute.xlu0 %391 }
 0x1a5   :  { %v944_v55 = vadd.f32 %v11902_v27, %v916_v48  ;;  %v741_v56 = vmul.f32 %v11887_v15, %v701_v49  ;;  %v428_v4 = vmul.f32 %v11869_v7, %v392_v51 }
 0x1a7   :  { %vm963_vm13 = vcmp.ge.f32.partialorder %v944_v55, 0.0  ;;  %v982_v59 = vmul.f32 0.4, %v944_v55  ;;  %v760_v62 = vadd.f32 %v741_v56, %v603_v58  ;;  %v447_v18 = vadd.f32 %v428_v4, %v290_v11 }
 0x1a8   :  { %v858_v60 = vpop.permute.xlu1 %857  ;;  %v549_v61 = vpop.permute.xlu0 %548 }
 0x1a9   :  { %v898_v63 = vmul.f32 %v11894_v22, %v858_v60  ;;  %v12074_v0 = vsel %vm963_vm13, %v944_v55, %v982_v59  ;;  %v585_v12 = vmul.f32 %v11879_v10, %v549_v61 }
 0x1aa   :  { %14929 = vst [vmem:[#allocation27_spill] sm:$0xff] %v12074_v0  ;;  %1261 = vmatmul.mubr.f32.gmra.mrb[26].mxu0 %v12074_v0 }
 0x1ab   :  { %v917_v1 = vadd.f32 %v898_v63, %v760_v62  ;;  %1266 = vmatprep.mubr.f32.mxu0 %v14857_v39  ;;  %v604_v23 = vadd.f32 %v585_v12, %v447_v18 }
 0x1ac   :  { %v397_v2 = vpop.permute.xlu1 %396  ;;  %v259_v3 = vpop.permute.xlu0 %258 }
 0x1ad   :  { %v945_v5 = vadd.f32 %v11902_v27, %v917_v1  ;;  %v429_v26 = vmul.f32 %v11869_v7, %v397_v2  ;;  %v291_v29 = vmul.f32 %v11864_v6, %v259_v3 }
 0x1af   :  { %vm964_vm14 = vcmp.ge.f32.partialorder %v945_v5, 0.0  ;;  %v983_v13 = vmul.f32 0.4, %v945_v5  ;;  %v448_v40 = vadd.f32 %v429_v26, %v291_v29 }
 0x1b0   :  { %v554_v14 = vpop.permute.xlu1 %553  ;;  %v706_v17 = vpop.permute.xlu0 %705 }
 0x1b1   :  { %v742_v20 = vmul.f32 %v11887_v15, %v706_v17  ;;  %v12083_v21 = vsel %vm964_vm14, %v945_v5, %v983_v13  ;;  %v586_v33 = vmul.f32 %v11879_v10, %v554_v14 }
 0x1b2   :  { %14930 = vst [vmem:[#allocation28_spill] sm:$0xff] %v12083_v21  ;;  %1267 = vmatmul.mubr.f32.gmra.mrb[28].mxu0 %v12083_v21 }
 0x1b3   :  { %1272 = vmatprep.mubr.f32.mxu0 %v14857_v39  ;;  %v761_v30 = vadd.f32 %v742_v20, %v604_v23  ;;  %v605_v44 = vadd.f32 %v586_v33, %v448_v40 }
 0x1b4   :  { %v264_v24 = vpop.permute.xlu1 %263  ;;  %v863_v25 = vpop.permute.xlu0 %862 }
 0x1b5   :  { %v899_v31 = vmul.f32 %v11894_v22, %v863_v25  ;;  %v292_v60 = vmul.f32 %v11864_v6, %v264_v24 }
 0x1b7   :  { %v918_v34 = vadd.f32 %v899_v31, %v761_v30 }
 0x1b8   :  { %v711_v35 = vpop.permute.xlu1 %710  ;;  %v402_v38 = vpop.permute.xlu0 %401 }
 0x1b9   :  { %v946_v41 = vadd.f32 %v11902_v27, %v918_v34  ;;  %v743_v42 = vmul.f32 %v11887_v15, %v711_v35  ;;  %v430_v55 = vmul.f32 %v11869_v7, %v402_v38  ;;  %v1495_v35 = vld [vmem:[#allocation8 + $0x200] sm:$0xff]  ;;  %v1497_v38 = vld [vmem:[#allocation8 + $0x210] sm:$0xff] }
 0x1bb   :  { %vm965_vm15 = vcmp.ge.f32.partialorder %v946_v41, 0.0  ;;  %v984_v45 = vmul.f32 0.4, %v946_v41  ;;  %v762_v48 = vadd.f32 %v743_v42, %v605_v44  ;;  %v449_v63 = vadd.f32 %v430_v55, %v292_v60  ;;  %v1502_v42 = vld [vmem:[#allocation8 + $0x238] sm:$0xff]  ;;  %v1499_v44 = vld [vmem:[#allocation8 + $0x220] sm:$0xff]  ;;  %v1505_v55 = vld [vmem:[#allocation8 + $0x250] sm:$0xff] }
 0x1bc   :  { %v868_v46 = vpop.permute.xlu1 %867  ;;  %v559_v47 = vpop.permute.xlu0 %558 }
 0x1bd   :  { %v900_v49 = vmul.f32 %v11894_v22, %v868_v46  ;;  %v12094_v51 = vsel %vm965_vm15, %v946_v41, %v984_v45  ;;  %v587_v61 = vmul.f32 %v11879_v10, %v559_v47  ;;  %v1500_v41 = vld [vmem:[#allocation8 + $0x228] sm:$0xff]  ;;  %v1501_v45 = vld [vmem:[#allocation8 + $0x230] sm:$0xff]  ;;  %v1506_v47 = vld [vmem:[#allocation8 + $0x258] sm:$0xff] }
 0x1be   :  { %14931 = vst [vmem:[#allocation29_spill] sm:$0xff] %v12094_v51  ;;  %1273 = vmatmul.mubr.f32.gmra.mrb[30].mxu0 %v12094_v51  ;;  %v1504_v46 = vld [vmem:[#allocation8 + $0x248] sm:$0xff] }
 0x1bf   :  { %v919_v52 = vadd.f32 %v900_v49, %v762_v48  ;;  %1278 = vmatprep.mubr.f32.mxu0 %v14857_v39  ;;  %v606_v12 = vadd.f32 %v587_v61, %v449_v63  ;;  %v9956_v48 = vpack.c.bf16 %v1501_v45, %v1499_v44  ;;  %v9958_v49 = vpack.c.bf16 %v1506_v47, %v1504_v46  ;;  %v1507_v61 = vld [vmem:[#allocation8 + $0x260] sm:$0xff]  ;;  %v1512_v63 = vld [vmem:[#allocation8 + $0x288] sm:$0xff]  ;;  %v1525_v44 = vld [vmem:[#allocation8 + $0x2f0] sm:$0xff] }
 0x1c0   :  { %v407_v56 = vpop.permute.xlu1 %406  ;;  %v269_v58 = vpop.permute.xlu0 %268  ;;  %v2054_v47 = vld [vmem:[#allocation10 + $0x220] sm:$0xff] }
 0x1c1   :  { %v947_v59 = vadd.f32 %v11902_v27, %v919_v52  ;;  %v431_v3 = vmul.f32 %v11869_v7, %v407_v56  ;;  %v293_v4 = vmul.f32 %v11864_v6, %v269_v58  ;;  %v1503_v52 = vld [vmem:[#allocation8 + $0x240] sm:$0xff]  ;;  %v1508_v56 = vld [vmem:[#allocation8 + $0x268] sm:$0xff]  ;;  %v1510_v58 = vld [vmem:[#allocation8 + $0x278] sm:$0xff] }
 0x1c2   :  { %v9962_v60 = vpack.c.bf16 %v1510_v58, %v1508_v56  ;;  %v2058_v58 = vld [vmem:[#allocation10 + $0x240] sm:$0xff] }
 0x1c3   :  { %vm966_vm0 = vcmp.ge.f32.partialorder %v947_v59, 0.0  ;;  %v985_v62 = vmul.f32 0.4, %v947_v59  ;;  %v450_v18 = vadd.f32 %v431_v3, %v293_v4  ;;  %v1511_v4 = vld [vmem:[#allocation8 + $0x280] sm:$0xff] }
 0x1c4   :  { %v564_v1 = vpop.permute.xlu1 %563  ;;  %v716_v2 = vpop.permute.xlu0 %715 }
 0x1c5   :  { %v744_v5 = vmul.f32 %v11887_v15, %v716_v2  ;;  %v12105_v11 = vsel %vm966_vm0, %v947_v59, %v985_v62  ;;  %v588_v13 = vmul.f32 %v11879_v10, %v564_v1  ;;  %v9960_v59 = vpack.c.bf16 %v1505_v55, %v1503_v52  ;;  %v1509_v62 = vld [vmem:[#allocation8 + $0x270] sm:$0xff]  ;;  %v1514_v1 = vld [vmem:[#allocation8 + $0x298] sm:$0xff] }
 0x1c6   :  { %14932 = vst [vmem:[#allocation30_spill] sm:$0xff] %v12105_v11  ;;  %1279 = vmatmul.mubr.f32.gmra.mrb[32].mxu0 %v12105_v11  ;;  %v9964_v2 = vpack.c.bf16 %v1509_v62, %v1507_v61  ;;  %v9966_v3 = vpack.c.bf16 %v1514_v1, %v1512_v63  ;;  %v2061_v52 = vld [vmem:[#allocation10 + $0x258] sm:$0xff]  ;;  %v2063_v61 = vld [vmem:[#allocation10 + $0x268] sm:$0xff] }
 0x1c7   :  { %1284 = vmatprep.mubr.f32.mxu0 %v14857_v39  ;;  %v763_v20 = vadd.f32 %v744_v5, %v606_v12  ;;  %v607_v6 = vadd.f32 %v588_v13, %v450_v18  ;;  %v1513_v5 = vld [vmem:[#allocation8 + $0x290] sm:$0xff]  ;;  %v1516_v12 = vld [vmem:[#allocation8 + $0x2a8] sm:$0xff]  ;;  %v1518_v13 = vld [vmem:[#allocation8 + $0x2b8] sm:$0xff] }
 0x1c8   :  { %v721_v14 = vpop.permute.xlu1 %720  ;;  %v873_v17 = vpop.permute.xlu0 %872  ;;  %v1515_v18 = vld [vmem:[#allocation8 + $0x2a0] sm:$0xff]  ;;  %v2065_v62 = vld [vmem:[#allocation10 + $0x278] sm:$0xff] }
 0x1c9   :  { %v745_v23 = vmul.f32 %v11887_v15, %v721_v14  ;;  %v901_v7 = vmul.f32 %v11894_v22, %v873_v17  ;;  %v9968_v14 = vpack.c.bf16 %v1513_v5, %v1511_v4  ;;  %v9970_v17 = vpack.c.bf16 %v1518_v13, %v1516_v12  ;;  %v2067_v4 = vld [vmem:[#allocation10 + $0x288] sm:$0xff]  ;;  %v2069_v5 = vld [vmem:[#allocation10 + $0x298] sm:$0xff] }
 0x1ca   :  { %v9994_v1 = vpack.c.bf16 %v2065_v62, %v2063_v61  ;;  %v9998_v13 = vpack.c.bf16 %v2069_v5, %v2067_v4 }
 0x1cb   :  { %v920_v24 = vadd.f32 %v901_v7, %v763_v20  ;;  %v764_v26 = vadd.f32 %v745_v23, %v607_v6  ;;  %v1517_v20 = vld [vmem:[#allocation8 + $0x2b0] sm:$0xff]  ;;  %v1520_v23 = vld [vmem:[#allocation8 + $0x2c8] sm:$0xff]  ;;  %v1522_v7 = vld [vmem:[#allocation8 + $0x2d8] sm:$0xff] }
 0x1cc   :  { %v878_v25 = vpop.permute.xlu0 %877  ;;  %v9972_v6 = vpack.c.bf16 %v1517_v20, %v1515_v18  ;;  %v2071_v18 = vld [vmem:[#allocation10 + $0x2a8] sm:$0xff]  ;;  %v2073_v20 = vld [vmem:[#allocation10 + $0x2b8] sm:$0xff] }
 0x1cd   :  { %v948_v29 = vadd.f32 %v11902_v27, %v920_v24  ;;  %v902_v30 = vmul.f32 %v11894_v22, %v878_v25  ;;  %v9952_v22 = vpack.c.bf16 %v1497_v38, %v1495_v35  ;;  %v9974_v24 = vpack.c.bf16 %v1522_v7, %v1520_v23  ;;  %v1519_v25 = vld [vmem:[#allocation8 + $0x2c0] sm:$0xff] }
 0x1ce   :  { %v10002_v7 = vpack.c.bf16 %v2073_v20, %v2071_v18 }
 0x1cf   :  { %v921_v31 = vadd.f32 %v902_v30, %v764_v26  ;;  %vm967_vm1 = vcmp.ge.f32.partialorder %v948_v29, 0.0  ;;  %v986_v10 = vmul.f32 0.4, %v948_v29  ;;  %v1521_v26 = vld [vmem:[#allocation8 + $0x2d0] sm:$0xff]  ;;  %v1526_v30 = vld [vmem:[#allocation8 + $0x2f8] sm:$0xff] }
 0x1d0   :  { %v9976_v35 = vpack.c.bf16 %v1521_v26, %v1519_v25  ;;  %v2075_v25 = vld [vmem:[#allocation10 + $0x2c8] sm:$0xff]  ;;  %v2077_v26 = vld [vmem:[#allocation10 + $0x2d8] sm:$0xff] }
 0x1d1   :  { %v949_v33 = vadd.f32 %v11902_v27, %v921_v31  ;;  %v12115_v34 = vsel %vm967_vm1, %v948_v29, %v986_v10  ;;  %v9954_v27 = vpack.c.bf16 %v1502_v42, %v1500_v41  ;;  %v1524_v29 = vld [vmem:[#allocation8 + $0x2e8] sm:$0xff]  ;;  %v1523_v31 = vld [vmem:[#allocation8 + $0x2e0] sm:$0xff]  ;;  %v2052_v41 = vld [vmem:[#allocation10 + $0x210] sm:$0xff] }
 0x1d2   :  { %14933 = vst [vmem:[#allocation31_spill] sm:$0xff] %v12115_v34  ;;  %1285 = vmatmul.mubr.f32.gmra.mrb[34].mxu0 %v12115_v34  ;;  %v2051_v10 = vld [vmem:[#allocation10 + $0x208] sm:$0xff]  ;;  %v9980_v56 = vpack.c.bf16 %v1525_v44, %v1523_v31  ;;  %v2074_v31 = vld [vmem:[#allocation10 + $0x2c0] sm:$0xff] }
 0x1d3   :  { %1290 = vmatprep.mubr.f32.mxu0 %v14857_v39  ;;  %vm968_vm2 = vcmp.ge.f32.partialorder %v949_v33, 0.0  ;;  %v987_v15 = vmul.f32 0.4, %v949_v33  ;;  %v2055_v42 = vld [vmem:[#allocation10 + $0x228] sm:$0xff] }
 0x1d5   :  { %v12119_v40 = vsel %vm968_vm2, %v949_v33, %v987_v15  ;;  %v2053_v33 = vld [vmem:[#allocation10 + $0x218] sm:$0xff]  ;;  %v2050_v15 = vld [vmem:[#allocation10 + $0x200] sm:$0xff] }
 0x1d6   :  { %14934 = vst [vmem:[#allocation32_spill] sm:$0xff] %v12119_v40  ;;  %1291 = vmatmul.mubr.f32.gmra.mrb[36].mxu0 %v12119_v40  ;;  %v9982_v38 = vpack.c.bf16 %v2053_v33, %v2051_v10  ;;  %v9984_v45 = vpack.c.bf16 %v2052_v41, %v2050_v15  ;;  %v2076_v10 = vld [vmem:[#allocation10 + $0x2d0] sm:$0xff]  ;;  %v2079_v33 = vld [vmem:[#allocation10 + $0x2e8] sm:$0xff]  ;;  %v2081_v15 = vld [vmem:[#allocation10 + $0x2f8] sm:$0xff] }
 0x1d7   :  { %1361 = vmatprep.mubr.f32.mxu0 %v14857_v39  ;;  %v2078_v41 = vld [vmem:[#allocation10 + $0x2e0] sm:$0xff] }
 0x1d8   :  { %9983 = vmatprep.subr.bf16.mxu1 %v9982_v38  ;;  %v10010_v38 = vpack.c.bf16 %v2081_v15, %v2079_v33 }
 0x1d9   :  { %9985 = vmatpush1.bf16.msra.mxu1 %v9984_v45 }
 0x1da   :  { %1362 = vmatmul.mubr.f32.vlgmr.msra.gmra.mrb[0].mxu0 %v14857_v39 }
 0x1db   :  { %9953 = vmatpush1.bf16.msra.mxu0 %v9952_v22  ;;  %1367 = vmatprep.mubr.f32.mxu0 %v14857_v39  ;;  %v2057_v22 = vld [vmem:[#allocation10 + $0x238] sm:$0xff] }
 0x1dc   :  { %9955 = vmatprep.subr.bf16.mxu0 %v9954_v27  ;;  %v9978_v27 = vpack.c.bf16 %v1526_v30, %v1524_v29  ;;  %v9986_v46 = vpack.c.bf16 %v2057_v22, %v2055_v42  ;;  %v10006_v30 = vpack.c.bf16 %v2077_v26, %v2075_v25  ;;  %v2080_v42 = vld [vmem:[#allocation10 + $0x2f0] sm:$0xff]  ;;  %v2083_v22 = vld [vmem:[#allocation10 + $0x308] sm:$0xff] }
 0x1dd   :  { %v10012_v44 = vpack.c.bf16 %v2080_v42, %v2078_v41  ;;  %v2111_v42 = vld [vmem:[#allocation10 + $0x3e8] sm:$0xff] }
 0x1de   :  { %1368 = vmatmul.mubr.f32.gmra.mrb[2].mxu0 %v11917_v50  ;;  %9987 = vmatprep.subr.bf16.mxu1 %v9986_v46  ;;  %v2082_v46 = vld [vmem:[#allocation10 + $0x300] sm:$0xff] }
 0x1df   :  { %1373 = vmatprep.mubr.f32.mxu0 %v14857_v39  ;;  %9957 = vmatpush1.bf16.msra.mxu0 %v9956_v48  ;;  %v2056_v48 = vld [vmem:[#allocation10 + $0x230] sm:$0xff] }
 0x1e0   :  { %9959 = vmatprep.subr.bf16.mxu0 %v9958_v49  ;;  %v2059_v49 = vld [vmem:[#allocation10 + $0x248] sm:$0xff]  ;;  %v9988_v55 = vpack.c.bf16 %v2056_v48, %v2054_v47  ;;  %v2084_v47 = vld [vmem:[#allocation10 + $0x310] sm:$0xff] }
 0x1e1   :  { %v2087_v48 = vld [vmem:[#allocation10 + $0x328] sm:$0xff] }
 0x1e2   :  { %1374 = vmatmul.mubr.f32.gmra.mrb[4].mxu0 %v11939_v8  ;;  %9989 = vmatpush1.bf16.msra.mxu1 %v9988_v55 }
 0x1e3   :  { %1379 = vmatprep.mubr.f32.mxu0 %v14857_v39  ;;  %9961 = vmatpush1.bf16.msra.mxu0 %v9960_v59  ;;  %v2060_v59 = vld [vmem:[#allocation10 + $0x250] sm:$0xff] }
 0x1e4   :  { %9963 = vmatprep.subr.bf16.mxu0 %v9962_v60  ;;  %v9990_v60 = vpack.c.bf16 %v2061_v52, %v2059_v49  ;;  %v9992_v63 = vpack.c.bf16 %v2060_v59, %v2058_v58  ;;  %v2089_v49 = vld [vmem:[#allocation10 + $0x338] sm:$0xff]  ;;  %v10016_v52 = vpack.c.bf16 %v2084_v47, %v2082_v46  ;;  %v2088_v58 = vld [vmem:[#allocation10 + $0x330] sm:$0xff]  ;;  %v2091_v59 = vld [vmem:[#allocation10 + $0x348] sm:$0xff] }
 0x1e5   :  { %v10018_v55 = vpack.c.bf16 %v2089_v49, %v2087_v48  ;;  %v1985_v47 = vld [vmem:[#allocation10 + $0x8] sm:$0xff]  ;;  %v1987_v48 = vld [vmem:[#allocation10 + $0x18] sm:$0xff] }
 0x1e6   :  { %1380 = vmatmul.mubr.f32.gmra.mrb[6].mxu0 %v11953_v28  ;;  %9991 = vmatprep.subr.bf16.mxu1 %v9990_v60  ;;  %v2093_v60 = vld [vmem:[#allocation10 + $0x358] sm:$0xff]  ;;  %v10046_v49 = vpack.c.bf16 %v1987_v48, %v1985_v47  ;;  %v1997_v48 = vld [vmem:[#allocation10 + $0x68] sm:$0xff] }
 0x1e7   :  { %1385 = vmatprep.mubr.f32.mxu0 %v14857_v39  ;;  %9965 = vmatpush1.bf16.msra.mxu0 %v9964_v2  ;;  %v2062_v2 = vld [vmem:[#allocation10 + $0x260] sm:$0xff]  ;;  %v10022_v62 = vpack.c.bf16 %v2093_v60, %v2091_v59 }
 0x1e8   :  { %9967 = vmatprep.subr.bf16.mxu0 %v9966_v3  ;;  %v2064_v3 = vld [vmem:[#allocation10 + $0x270] sm:$0xff]  ;;  %9993 = vmatpush1.bf16.msra.mxu1 %v9992_v63  ;;  %v2090_v63 = vld [vmem:[#allocation10 + $0x340] sm:$0xff] }
 0x1e9   :  { %v9996_v12 = vpack.c.bf16 %v2064_v3, %v2062_v2  ;;  %9995 = vmatprep.subr.bf16.mxu1 %v9994_v1  ;;  %v2092_v1 = vld [vmem:[#allocation10 + $0x350] sm:$0xff]  ;;  %v2095_v2 = vld [vmem:[#allocation10 + $0x368] sm:$0xff]  ;;  %v2097_v3 = vld [vmem:[#allocation10 + $0x378] sm:$0xff] }
 0x1ea   :  { %1386 = vmatmul.mubr.f32.gmra.mrb[8].mxu0 %v11968_v19  ;;  %v10024_v4 = vpack.c.bf16 %v2092_v1, %v2090_v63  ;;  %v10026_v5 = vpack.c.bf16 %v2097_v3, %v2095_v2  ;;  %v1984_v3 = vld [vmem:[#allocation10] sm:$0xff] }
 0x1eb   :  { %1391 = vmatprep.mubr.f32.mxu0 %v14857_v39  ;;  %9969 = vmatpush1.bf16.msra.mxu0 %v9968_v14  ;;  %v2066_v14 = vld [vmem:[#allocation10 + $0x280] sm:$0xff] }
 0x1ec   :  { %9971 = vmatprep.subr.bf16.mxu0 %v9970_v17  ;;  %v2068_v17 = vld [vmem:[#allocation10 + $0x290] sm:$0xff]  ;;  %9997 = vmatpush1.bf16.msra.mxu1 %v9996_v12  ;;  %v2094_v12 = vld [vmem:[#allocation10 + $0x360] sm:$0xff] }
 0x1ed   :  { %v10000_v23 = vpack.c.bf16 %v2068_v17, %v2066_v14  ;;  %9999 = vmatprep.subr.bf16.mxu1 %v9998_v13  ;;  %v2096_v13 = vld [vmem:[#allocation10 + $0x370] sm:$0xff]  ;;  %v2099_v14 = vld [vmem:[#allocation10 + $0x388] sm:$0xff]  ;;  %v2101_v17 = vld [vmem:[#allocation10 + $0x398] sm:$0xff] }
 0x1ee   :  { %1392 = vmatmul.mubr.f32.gmra.mrb[10].mxu0 %v11983_v43  ;;  %v10028_v18 = vpack.c.bf16 %v2096_v13, %v2094_v12  ;;  %v10030_v20 = vpack.c.bf16 %v2101_v17, %v2099_v14  ;;  %v1989_v12 = vld [vmem:[#allocation10 + $0x28] sm:$0xff]  ;;  %v1991_v13 = vld [vmem:[#allocation10 + $0x38] sm:$0xff] }
 0x1ef   :  { %1397 = vmatprep.mubr.f32.mxu0 %v14857_v39  ;;  %9973 = vmatpush1.bf16.msra.mxu0 %v9972_v6  ;;  %v2070_v6 = vld [vmem:[#allocation10 + $0x2a0] sm:$0xff] }
 0x1f0   :  { %9975 = vmatprep.subr.bf16.mxu0 %v9974_v24  ;;  %v2072_v24 = vld [vmem:[#allocation10 + $0x2b0] sm:$0xff]  ;;  %10001 = vmatpush1.bf16.msra.mxu1 %v10000_v23  ;;  %v2098_v23 = vld [vmem:[#allocation10 + $0x380] sm:$0xff] }
 0x1f1   :  { %v10004_v29 = vpack.c.bf16 %v2072_v24, %v2070_v6  ;;  %10003 = vmatprep.subr.bf16.mxu1 %v10002_v7  ;;  %v2100_v7 = vld [vmem:[#allocation10 + $0x390] sm:$0xff]  ;;  %v2103_v6 = vld [vmem:[#allocation10 + $0x3a8] sm:$0xff]  ;;  %v2105_v24 = vld [vmem:[#allocation10 + $0x3b8] sm:$0xff] }
 0x1f2   :  { %1398 = vmatmul.mubr.f32.gmra.mrb[12].mxu0 %v11994_v16  ;;  %v10032_v25 = vpack.c.bf16 %v2100_v7, %v2098_v23  ;;  %v10034_v26 = vpack.c.bf16 %v2105_v24, %v2103_v6  ;;  %v10050_v24 = vpack.c.bf16 %v1991_v13, %v1989_v12 }
 0x1f3   :  { %1403 = vmatprep.mubr.f32.mxu0 %v14857_v39  ;;  %9977 = vmatpush1.bf16.msra.mxu0 %v9976_v35  ;;  %v10008_v35 = vpack.c.bf16 %v2076_v10, %v2074_v31  ;;  %v2107_v31 = vld [vmem:[#allocation10 + $0x3c8] sm:$0xff]  ;;  %v2109_v10 = vld [vmem:[#allocation10 + $0x3d8] sm:$0xff] }
 0x1f4   :  { %9979 = vmatprep.subr.bf16.mxu0 %v9978_v27  ;;  %10005 = vmatpush1.bf16.msra.mxu1 %v10004_v29  ;;  %v2085_v27 = vld [vmem:[#allocation10 + $0x318] sm:$0xff]  ;;  %v2102_v29 = vld [vmem:[#allocation10 + $0x3a0] sm:$0xff]  ;;  %v10038_v15 = vpack.c.bf16 %v2109_v10, %v2107_v31  ;;  %v1993_v31 = vld [vmem:[#allocation10 + $0x48] sm:$0xff] }
 0x1f5   :  { %10007 = vmatprep.subr.bf16.mxu1 %v10006_v30  ;;  %v10014_v45 = vpack.c.bf16 %v2085_v27, %v2083_v22  ;;  %v2104_v30 = vld [vmem:[#allocation10 + $0x3b0] sm:$0xff]  ;;  %v2113_v22 = vld [vmem:[#allocation10 + $0x3f8] sm:$0xff] }
 0x1f6   :  { %1404 = vmatmul.mubr.f32.gmra.mrb[14].mxu0 %v12003_v32  ;;  %v10036_v33 = vpack.c.bf16 %v2104_v30, %v2102_v29  ;;  %v10042_v27 = vpack.c.bf16 %v2113_v22, %v2111_v42  ;;  %v1995_v10 = vld [vmem:[#allocation10 + $0x58] sm:$0xff] }
 0x1f7   :  { %1409 = vmatprep.mubr.f32.mxu0 %v14857_v39  ;;  %9981 = vmatpush1.bf16.msra.mxu0 %v9980_v56  ;;  %v2086_v56 = vld [vmem:[#allocation10 + $0x320] sm:$0xff] }
 0x1f8   :  { %10009 = vmatpush1.bf16.msra.mxu1 %v10008_v35  ;;  %v10020_v61 = vpack.c.bf16 %v2088_v58, %v2086_v56  ;;  %v2106_v35 = vld [vmem:[#allocation10 + $0x3c0] sm:$0xff]  ;;  %v1744_v58 = vld [vmem:[%s14936_s13] sm:$0x3] }
 0x1f9   :  { %10011 = vmatprep.subr.bf16.mxu1 %v10010_v38  ;;  %v2108_v38 = vld [vmem:[#allocation10 + $0x3d0] sm:$0xff] }
 0x1fa   :  { %1410 = vmatmul.mubr.f32.gmra.mrb[16].mxu0 %v12014_v57  ;;  %v10040_v41 = vpack.c.bf16 %v2108_v38, %v2106_v35 }
 0x1fb   :  { %1415 = vmatprep.mubr.f32.mxu0 %v14857_v39 }
 0x1fc   :  { %10013 = vmatpush1.bf16.msra.mxu1 %v10012_v44  ;;  %v2110_v44 = vld [vmem:[#allocation10 + $0x3e0] sm:$0xff] }
 0x1fd   :  { %10015 = vmatprep.subr.bf16.mxu1 %v10014_v45  ;;  %v2112_v45 = vld [vmem:[#allocation10 + $0x3f0] sm:$0xff] }
 0x1fe   :  { %1416 = vmatmul.mubr.f32.gmra.mrb[18].mxu0 %v12023_v9  ;;  %v10044_v46 = vpack.c.bf16 %v2112_v45, %v2110_v44  ;;  %v1992_v44 = vld [vmem:[#allocation10 + $0x40] sm:$0xff]  ;;  %v1994_v45 = vld [vmem:[#allocation10 + $0x50] sm:$0xff] }
 0x1ff   :  { %1421 = vmatprep.mubr.f32.mxu0 %v14857_v39 }
 0x200   :  { %10017 = vmatpush1.bf16.msra.mxu1 %v10016_v52  ;;  %v1746_v52 = vlaneseq }
 0x201   :  { %10019 = vmatprep.subr.bf16.mxu1 %v10018_v55 }
 0x202   :  { %1422 = vmatmul.mubr.f32.gmra.mrb[20].mxu0 %v12034_v37  ;;  %v1747_v55 = vshrl.u32 %v1746_v52, 7 }
 0x203   :  { %1427 = vmatprep.mubr.f32.mxu0 %v14857_v39 }
 0x204   :  { %10021 = vmatpush1.bf16.msra.mxu1 %v10020_v61  ;;  %v12198_v56 = vsub.s32 0, %v1747_v55  ;;  %v12203_v59 = vsub.s32 1, %v1747_v55 }
 0x205   :  { %10023 = vmatprep.subr.bf16.mxu1 %v10022_v62 }
 0x206   :  { %1428 = vmatmul.mubr.f32.gmra.mrb[22].mxu0 %v12043_v54  ;;  %14935 = vst [vmem:[#allocation33_spill] sm:$0xff] %v12198_v56  ;;  %14937 = vst [vmem:[#allocation34_spill] sm:$0xff] %v12203_v59  ;;  %v12206_v60 = vrot.slane %v1744_v58, %v12198_v56  ;;  %v12209_v61 = vrot.slane %v1744_v58, %v12203_v59  ;;  %v2035_v56 = vld [vmem:[#allocation10 + $0x198] sm:$0xff] }
 0x207   :  { %1433 = vmatprep.mubr.f32.mxu0 %v14857_v39 }
 0x208   :  { %10025 = vmatpush1.bf16.msra.mxu1 %v10024_v4  ;;  %v1986_v4 = vld [vmem:[#allocation10 + $0x10] sm:$0xff] }
 0x209   :  { %10027 = vmatprep.subr.bf16.mxu1 %v10026_v5  ;;  %v10048_v23 = vpack.c.bf16 %v1986_v4, %v1984_v3  ;;  %v1996_v4 = vld [vmem:[#allocation10 + $0x60] sm:$0xff] }
 0x20a   :  { %1434 = vmatmul.mubr.f32.gmra.mrb[24].mxu0 %v12054_v53 }
 0x20b   :  { %1439 = vmatprep.mubr.f32.mxu0 %v14857_v39 }
 0x20c   :  { %10029 = vmatpush1.bf16.msra.mxu1 %v10028_v18 }
 0x20d   :  { %10031 = vmatprep.subr.bf16.mxu1 %v10030_v20 }
 0x20e   :  { %1440 = vmatmul.mubr.f32.gmra.mrb[26].mxu0 %v12063_v36 }
 0x20f   :  { %1445 = vmatprep.mubr.f32.mxu0 %v14857_v39 }
 0x210   :  { %10033 = vmatpush1.bf16.msra.mxu1 %v10032_v25  ;;  %v1988_v25 = vld [vmem:[#allocation10 + $0x20] sm:$0xff] }
 0x211   :  { %10035 = vmatprep.subr.bf16.mxu1 %v10034_v26  ;;  %v1990_v26 = vld [vmem:[#allocation10 + $0x30] sm:$0xff] }
 0x212   :  { %1446 = vmatmul.mubr.f32.gmra.mrb[28].mxu0 %v12074_v0 }
 0x213   :  { %1451 = vmatprep.mubr.f32.mxu0 %v14857_v39 }
 0x214   :  { %10037 = vmatpush1.bf16.msra.mxu1 %v10036_v33 }
 0x215   :  { %10039 = vmatprep.subr.bf16.mxu1 %v10038_v15 }
 0x216   :  { %1452 = vmatmul.mubr.f32.gmra.mrb[30].mxu0 %v12083_v21 }
 0x217   :  { %1457 = vmatprep.mubr.f32.mxu0 %v14857_v39 }
 0x218   :  { %10041 = vmatpush1.bf16.msra.mxu1 %v10040_v41  ;;  %v10052_v41 = vpack.c.bf16 %v1990_v26, %v1988_v25 }
 0x219   :  { %10043 = vmatprep.subr.bf16.mxu1 %v10042_v27  ;;  %v10054_v27 = vpack.c.bf16 %v1995_v10, %v1993_v31  ;;  %v2000_v31 = vld [vmem:[#allocation10 + $0x80] sm:$0xff]  ;;  %v2002_v10 = vld [vmem:[#allocation10 + $0x90] sm:$0xff] }
 0x21a   :  { %1458 = vmatmul.mubr.f32.gmra.mrb[32].mxu0 %v12094_v51 }
 0x21b   :  { %1463 = vmatprep.mubr.f32.mxu0 %v14857_v39 }
 0x21c   :  { %10045 = vmatpush1.bf16.msra.mxu1 %v10044_v46 }
 0x21d   :  { %10047 = vmatprep.subr.bf16.mxu1 %v10046_v49  ;;  %v1999_v49 = vld [vmem:[#allocation10 + $0x78] sm:$0xff] }
 0x21e   :  { %1464 = vmatmul.mubr.f32.gmra.mrb[34].mxu0 %v12105_v11  ;;  %v10058_v3 = vpack.c.bf16 %v1999_v49, %v1997_v48 }
 0x21f   :  { %1469 = vmatprep.mubr.f32.mxu0 %v14857_v39 }
 0x222   :  { %1470 = vmatmul.mubr.f32.gmra.mrb[36].mxu0 %v12115_v34 }
 0x223   :  { %1591 = vmatprep.mubr.f32.mxu0 %v14857_v39 }
 0x226   :  { %1592 = vmatmul.mubr.f32.vlgmr.msra.gmra.mrb[0].mxu0 %v11939_v8 }
 0x227   :  { %1597 = vmatprep.mubr.f32.mxu0 %v14857_v39 }
 0x22a   :  { %1598 = vmatmul.mubr.f32.gmra.mrb[2].mxu0 %v11953_v28 }
 0x22b   :  { %1603 = vmatprep.mubr.f32.mxu0 %v14857_v39 }
 0x22e   :  { %1604 = vmatmul.mubr.f32.gmra.mrb[4].mxu0 %v11968_v19 }
 0x22f   :  { %1609 = vmatprep.mubr.f32.mxu0 %v14857_v39 }
 0x232   :  { %1610 = vmatmul.mubr.f32.gmra.mrb[6].mxu0 %v11983_v43 }
 0x233   :  { %1615 = vmatprep.mubr.f32.mxu0 %v14857_v39 }
 0x236   :  { %1616 = vmatmul.mubr.f32.gmra.mrb[8].mxu0 %v11994_v16 }
 0x237   :  { %1621 = vmatprep.mubr.f32.mxu0 %v14857_v39 }
 0x23a   :  { %1622 = vmatmul.mubr.f32.gmra.mrb[10].mxu0 %v12003_v32 }
 0x23b   :  { %1627 = vmatprep.mubr.f32.mxu0 %v14857_v39 }
 0x23e   :  { %1628 = vmatmul.mubr.f32.gmra.mrb[12].mxu0 %v12014_v57 }
 0x23f   :  { %1633 = vmatprep.mubr.f32.mxu0 %v14857_v39 }
 0x242   :  { %1634 = vmatmul.mubr.f32.gmra.mrb[14].mxu0 %v12023_v9  ;;  %v2529_v9 = vld [vmem:[#allocation10 + $0x498] sm:$0xff] }
 0x243   :  { %1639 = vmatprep.mubr.f32.mxu0 %v14857_v39 }
 0x246   :  { %1640 = vmatmul.mubr.f32.gmra.mrb[16].mxu0 %v12034_v37  ;;  %v2525_v37 = vld [vmem:[#allocation10 + $0x478] sm:$0xff] }
 0x247   :  { %1645 = vmatprep.mubr.f32.mxu0 %v14857_v39 }
 0x24a   :  { %1646 = vmatmul.mubr.f32.gmra.mrb[18].mxu0 %v12043_v54 }
 0x24b   :  { %1651 = vmatprep.mubr.f32.mxu0 %v14857_v39 }
 0x24e   :  { %1652 = vmatmul.mubr.f32.gmra.mrb[20].mxu0 %v12054_v53  ;;  %v2513_v53 = vld [vmem:[#allocation10 + $0x418] sm:$0xff] }
 0x24f   :  { %1657 = vmatprep.mubr.f32.mxu0 %v14857_v39 }
 0x252   :  { %1658 = vmatmul.mubr.f32.gmra.mrb[22].mxu0 %v12063_v36 }
 0x253   :  { %1663 = vmatprep.mubr.f32.mxu0 %v14857_v39 }
 0x256   :  { %1664 = vmatmul.mubr.f32.gmra.mrb[24].mxu0 %v12074_v0  ;;  %v2047_v0 = vld [vmem:[#allocation10 + $0x1f8] sm:$0xff] }
 0x257   :  { %1669 = vmatprep.mubr.f32.mxu0 %v14857_v39 }
 0x25a   :  { %1670 = vmatmul.mubr.f32.gmra.mrb[26].mxu0 %v12083_v21 }
 0x25b   :  { %1675 = vmatprep.mubr.f32.mxu0 %v14857_v39 }
 0x25e   :  { %1676 = vmatmul.mubr.f32.gmra.mrb[28].mxu0 %v12094_v51  ;;  %v2043_v51 = vld [vmem:[#allocation10 + $0x1d8] sm:$0xff] }
 0x25f   :  { %1681 = vmatprep.mubr.f32.mxu0 %v14857_v39 }
 0x262   :  { %1682 = vmatmul.mubr.f32.gmra.mrb[30].mxu0 %v12105_v11 }
 0x263   :  { %1687 = vmatprep.mubr.f32.mxu0 %v14857_v39 }
 0x266   :  { %1688 = vmatmul.mubr.f32.gmra.mrb[32].mxu0 %v12115_v34  ;;  %v2039_v34 = vld [vmem:[#allocation10 + $0x1b8] sm:$0xff] }
 0x267   :  { %1693 = vmatprep.mubr.f32.mxu0 %v14857_v39 }
 0x26a   :  { %1694 = vmatmul.mubr.f32.gmra.mrb[34].mxu0 %v12119_v40 }
 0x26b   :  { %1699 = vmatprep.mubr.f32.mxu0 %v14857_v39 }
 0x26e   :  { %1700 = vmatmul.mubr.f32.gmra.mrb[36].mxu0 %v14857_v39  ;;  %v2031_v39 = vld [vmem:[#allocation10 + $0x178] sm:$0xff] }
 0x2f9   :  { %v1593_v62 = vpop.f32.mrb[0].mxu0 }
 0x2fa   :  { %v1756_v63 = vadd.f32 %v12206_v60, %v1593_v62  ;;  %v1595_v1 = vpop.f32.mrb[1].mxu0 }
 0x2fb   :  { %v1757_v2 = vadd.f32 %v12209_v61, %v1595_v1 }
 0x2fc   :  { %v1832_v5 = vmul.f32 0.4, %v1756_v63  ;;  %vm1794_vm4 = vcmp.ge.f32.partialorder %v1756_v63, 0.0 }
 0x2fd   :  { %v1599_v14 = vpop.f32.mrb[2].mxu0  ;;  %vm1795_vm3 = vcmp.ge.f32.partialorder %v1757_v2, 0.0  ;;  %v1833_v17 = vmul.f32 0.4, %v1757_v2 }
 0x2fe   :  { %v1758_v18 = vadd.f32 %v12206_v60, %v1599_v14  ;;  %v1601_v20 = vpop.f32.mrb[3].mxu0  ;;  %v12218_v30 = vsel %vm1794_vm4, %v1756_v63, %v1832_v5  ;;  %v10056_v63 = vpack.c.bf16 %v1994_v45, %v1992_v44  ;;  %v1998_v5 = vld [vmem:[#allocation10 + $0x70] sm:$0xff]  ;;  %v2001_v14 = vld [vmem:[#allocation10 + $0x88] sm:$0xff]  ;;  %v10064_v45 = vpack.c.bf16 %v2002_v10, %v2000_v31  ;;  %v2015_v31 = vld [vmem:[#allocation10 + $0xf8] sm:$0xff] }
 0x2ff   :  { %v1759_v7 = vadd.f32 %v12209_v61, %v1601_v20  ;;  %v12215_v6 = vsel %vm1795_vm3, %v1757_v2, %v1833_v17  ;;  %v2003_v17 = vld [vmem:[#allocation10 + $0x98] sm:$0xff] }
 0x300   :  { %v1834_v29 = vmul.f32 0.4, %v1758_v18  ;;  %2178 = vmatprep.mubr.f32.mxu1 %v12215_v6  ;;  %vm1796_vm6 = vcmp.ge.f32.partialorder %v1758_v18, 0.0 }
 0x301   :  { %v1835_v33 = vmul.f32 0.4, %v1759_v7  ;;  %v1605_v15 = vpop.f32.mrb[4].mxu0  ;;  %2179 = vmatmul.mubr.f32.vlgmr.msra.gmra.mrb[0].mxu1 %v12218_v30  ;;  %vm1797_vm5 = vcmp.ge.f32.partialorder %v1759_v7, 0.0 }
 0x302   :  { %v1760_v35 = vadd.f32 %v12206_v60, %v1605_v15  ;;  %10049 = vmatpush1.bf16.msra.mxu1 %v10048_v23  ;;  %v1607_v38 = vpop.f32.mrb[5].mxu0  ;;  %v12226_v47 = vsel %vm1796_vm6, %v1758_v18, %v1834_v29  ;;  %v10062_v29 = vpack.c.bf16 %v2003_v17, %v2001_v14 }
 0x303   :  { %v1761_v42 = vadd.f32 %v12209_v61, %v1607_v38  ;;  %v12223_v22 = vsel %vm1797_vm5, %v1759_v7, %v1835_v33  ;;  %10051 = vmatprep.subr.bf16.mxu1 %v10050_v24  ;;  %v10060_v24 = vpack.c.bf16 %v1998_v5, %v1996_v4  ;;  %v2007_v38 = vld [vmem:[#allocation10 + $0xb8] sm:$0xff] }
 0x304   :  { %v1836_v46 = vmul.f32 0.4, %v1760_v35  ;;  %2184 = vmatprep.mubr.f32.mxu1 %v12223_v22  ;;  %vm1798_vm8 = vcmp.ge.f32.partialorder %v1760_v35, 0.0 }
 0x305   :  { %v1837_v52 = vmul.f32 0.4, %v1761_v42  ;;  %v1611_v55 = vpop.f32.mrb[6].mxu0  ;;  %2185 = vmatmul.mubr.f32.gmra.mrb[2].mxu1 %v12226_v47  ;;  %vm1799_vm7 = vcmp.ge.f32.partialorder %v1761_v42, 0.0 }
 0x306   :  { %v1762_v58 = vadd.f32 %v12206_v60, %v1611_v55  ;;  %v1613_v62 = vpop.f32.mrb[7].mxu0  ;;  %10053 = vmatpush1.bf16.msra.mxu1 %v10052_v41  ;;  %v12234_v13 = vsel %vm1798_vm8, %v1760_v35, %v1836_v46  ;;  %v2005_v35 = vld [vmem:[#allocation10 + $0xa8] sm:$0xff]  ;;  %v2006_v55 = vld [vmem:[#allocation10 + $0xb0] sm:$0xff] }
 0x307   :  { %v1763_v1 = vadd.f32 %v12209_v61, %v1613_v62  ;;  %v12231_v2 = vsel %vm1799_vm7, %v1761_v42, %v1837_v52  ;;  %10055 = vmatprep.subr.bf16.mxu1 %v10054_v27  ;;  %v10066_v49 = vpack.c.bf16 %v2007_v38, %v2005_v35  ;;  %v2004_v52 = vld [vmem:[#allocation10 + $0xa0] sm:$0xff] }
 0x308   :  { %v1838_v12 = vmul.f32 0.4, %v1762_v58  ;;  %2190 = vmatprep.mubr.f32.mxu1 %v12231_v2  ;;  %vm1800_vm10 = vcmp.ge.f32.partialorder %v1762_v58, 0.0  ;;  %v10068_v14 = vpack.c.bf16 %v2006_v55, %v2004_v52  ;;  %v2017_v55 = vld [vmem:[#allocation10 + $0x108] sm:$0xff] }
 0x309   :  { %v1839_v18 = vmul.f32 0.4, %v1763_v1  ;;  %v1617_v20 = vpop.f32.mrb[8].mxu0  ;;  %2191 = vmatmul.mubr.f32.gmra.mrb[4].mxu1 %v12234_v13  ;;  %vm1801_vm9 = vcmp.ge.f32.partialorder %v1763_v1, 0.0 }
 0x30a   :  { %v1764_v23 = vadd.f32 %v12206_v60, %v1617_v20  ;;  %v1619_v7 = vpop.f32.mrb[9].mxu0  ;;  %10057 = vmatpush1.bf16.msra.mxu1 %v10056_v63  ;;  %v12242_v15 = vsel %vm1800_vm10, %v1762_v58, %v1838_v12  ;;  %v2009_v63 = vld [vmem:[#allocation10 + $0xc8] sm:$0xff] }
 0x30b   :  { %v1765_v25 = vadd.f32 %v12209_v61, %v1619_v7  ;;  %v12239_v26 = vsel %vm1801_vm9, %v1763_v1, %v1839_v18  ;;  %10059 = vmatprep.subr.bf16.mxu1 %v10058_v3  ;;  %v2011_v1 = vld [vmem:[#allocation10 + $0xd8] sm:$0xff]  ;;  %v2010_v7 = vld [vmem:[#allocation10 + $0xd0] sm:$0xff] }
 0x30c   :  { %v1840_v33 = vmul.f32 0.4, %v1764_v23  ;;  %2196 = vmatprep.mubr.f32.mxu1 %v12239_v26  ;;  %vm1802_vm12 = vcmp.ge.f32.partialorder %v1764_v23, 0.0  ;;  %v10070_v20 = vpack.c.bf16 %v2011_v1, %v2009_v63 }
 0x30d   :  { %v1841_v41 = vmul.f32 0.4, %v1765_v25  ;;  %v1623_v42 = vpop.f32.mrb[10].mxu0  ;;  %2197 = vmatmul.mubr.f32.gmra.mrb[6].mxu1 %v12242_v15  ;;  %vm1803_vm11 = vcmp.ge.f32.partialorder %v1765_v25, 0.0 }
 0x30e   :  { %v1766_v27 = vadd.f32 %v12206_v60, %v1623_v42  ;;  %v1625_v44 = vpop.f32.mrb[11].mxu0  ;;  %10061 = vmatpush1.bf16.msra.mxu1 %v10060_v24  ;;  %v12250_v62 = vsel %vm1802_vm12, %v1764_v23, %v1840_v33  ;;  %v2008_v23 = vld [vmem:[#allocation10 + $0xc0] sm:$0xff] }
 0x30f   :  { %v1767_v46 = vadd.f32 %v12209_v61, %v1625_v44  ;;  %v12247_v48 = vsel %vm1803_vm11, %v1765_v25, %v1841_v41  ;;  %10063 = vmatprep.subr.bf16.mxu1 %v10062_v29  ;;  %v2013_v29 = vld [vmem:[#allocation10 + $0xe8] sm:$0xff]  ;;  %v10072_v41 = vpack.c.bf16 %v2010_v7, %v2008_v23  ;;  %v2018_v23 = vld [vmem:[#allocation10 + $0x110] sm:$0xff] }
 0x310   :  { %v1842_v58 = vmul.f32 0.4, %v1766_v27  ;;  %2202 = vmatprep.mubr.f32.mxu1 %v12247_v48  ;;  %vm1804_vm14 = vcmp.ge.f32.partialorder %v1766_v27, 0.0 }
 0x311   :  { %v1843_v3 = vmul.f32 0.4, %v1767_v46  ;;  %v1629_v4 = vpop.f32.mrb[12].mxu0  ;;  %2203 = vmatmul.mubr.f32.gmra.mrb[8].mxu1 %v12250_v62  ;;  %vm1805_vm13 = vcmp.ge.f32.partialorder %v1767_v46, 0.0 }
 0x312   :  { %v1768_v5 = vadd.f32 %v12206_v60, %v1629_v4  ;;  %v1631_v12 = vpop.f32.mrb[13].mxu0  ;;  %10065 = vmatpush1.bf16.msra.mxu1 %v10064_v45  ;;  %v12258_v25 = vsel %vm1804_vm14, %v1766_v27, %v1842_v58  ;;  %v10074_v27 = vpack.c.bf16 %v2015_v31, %v2013_v29  ;;  %v2012_v45 = vld [vmem:[#allocation10 + $0xe0] sm:$0xff]  ;;  %v2019_v58 = vld [vmem:[#allocation10 + $0x118] sm:$0xff]  ;;  %v2021_v29 = vld [vmem:[#allocation10 + $0x128] sm:$0xff] }
 0x313   :  { %v1769_v17 = vadd.f32 %v12209_v61, %v1631_v12  ;;  %v12255_v18 = vsel %vm1805_vm13, %v1767_v46, %v1843_v3  ;;  %10067 = vmatprep.subr.bf16.mxu1 %v10066_v49  ;;  %v2014_v46 = vld [vmem:[#allocation10 + $0xf0] sm:$0xff]  ;;  %v2023_v31 = vld [vmem:[#allocation10 + $0x138] sm:$0xff] }
 0x314   :  { %v1844_v24 = vmul.f32 0.4, %v1768_v5  ;;  %2208 = vmatprep.mubr.f32.mxu1 %v12255_v18  ;;  %vm1806_vm0 = vcmp.ge.f32.partialorder %v1768_v5, 0.0  ;;  %v10076_v12 = vpack.c.bf16 %v2014_v46, %v2012_v45  ;;  %v2020_v46 = vld [vmem:[#allocation10 + $0x120] sm:$0xff] }
 0x315   :  { %v1845_v10 = vmul.f32 0.4, %v1769_v17  ;;  %v1635_v33 = vpop.f32.mrb[14].mxu0  ;;  %2209 = vmatmul.mubr.f32.gmra.mrb[10].mxu1 %v12258_v25  ;;  %vm1807_vm15 = vcmp.ge.f32.partialorder %v1769_v17, 0.0 }
 0x316   :  { %v1770_v35 = vadd.f32 %v12206_v60, %v1635_v33  ;;  %v1637_v38 = vpop.f32.mrb[15].mxu0  ;;  %10069 = vmatpush1.bf16.msra.mxu1 %v10068_v14  ;;  %v12266_v52 = vsel %vm1806_vm0, %v1768_v5, %v1844_v24  ;;  %v10078_v5 = vpack.c.bf16 %v2019_v58, %v2017_v55 }
 0x317   :  { %v1771_v42 = vadd.f32 %v12209_v61, %v1637_v38  ;;  %v12263_v44 = vsel %vm1807_vm15, %v1769_v17, %v1845_v10  ;;  %10071 = vmatprep.subr.bf16.mxu1 %v10070_v20  ;;  %v2016_v20 = vld [vmem:[#allocation10 + $0x100] sm:$0xff] }
 0x318   :  { %v1846_v49 = vmul.f32 0.4, %v1770_v35  ;;  %2214 = vmatprep.mubr.f32.mxu1 %v12263_v44  ;;  %vm1808_vm2 = vcmp.ge.f32.partialorder %v1770_v35, 0.0 }
 0x319   :  { %v1847_v63 = vmul.f32 0.4, %v1771_v42  ;;  %v1641_v1 = vpop.f32.mrb[16].mxu0  ;;  %2215 = vmatmul.mubr.f32.gmra.mrb[12].mxu1 %v12266_v52  ;;  %vm1809_vm1 = vcmp.ge.f32.partialorder %v1771_v42, 0.0 }
 0x31a   :  { %v1772_v3 = vadd.f32 %v12206_v60, %v1641_v1  ;;  %v1643_v4 = vpop.f32.mrb[17].mxu0  ;;  %10073 = vmatpush1.bf16.msra.mxu1 %v10072_v41  ;;  %v12274_v24 = vsel %vm1808_vm2, %v1770_v35, %v1846_v49  ;;  %v10082_v35 = vpack.c.bf16 %v2023_v31, %v2021_v29  ;;  %v2022_v49 = vld [vmem:[#allocation10 + $0x130] sm:$0xff]  ;;  %v2027_v1 = vld [vmem:[#allocation10 + $0x158] sm:$0xff] }
 0x31b   :  { %v1773_v14 = vadd.f32 %v12209_v61, %v1643_v4  ;;  %v12271_v17 = vsel %vm1809_vm1, %v1771_v42, %v1847_v63  ;;  %10075 = vmatprep.subr.bf16.mxu1 %v10074_v27  ;;  %v10080_v42 = vpack.c.bf16 %v2018_v23, %v2016_v20  ;;  %v2025_v63 = vld [vmem:[#allocation10 + $0x148] sm:$0xff]  ;;  %v2026_v29 = vld [vmem:[#allocation10 + $0x150] sm:$0xff] }
 0x31c   :  { %v1848_v7 = vmul.f32 0.4, %v1772_v3  ;;  %2220 = vmatprep.mubr.f32.mxu1 %v12271_v17  ;;  %vm1810_vm4 = vcmp.ge.f32.partialorder %v1772_v3, 0.0 }
 0x31d   :  { %v1849_v10 = vmul.f32 0.4, %v1773_v14  ;;  %v1647_v33 = vpop.f32.mrb[18].mxu0  ;;  %2221 = vmatmul.mubr.f32.gmra.mrb[14].mxu1 %v12274_v24  ;;  %vm1811_vm3 = vcmp.ge.f32.partialorder %v1773_v14, 0.0 }
 0x31e   :  { %v1774_v38 = vadd.f32 %v12206_v60, %v1647_v33  ;;  %v1649_v41 = vpop.f32.mrb[19].mxu0  ;;  %10077 = vmatpush1.bf16.msra.mxu1 %v10076_v12  ;;  %v12282_v58 = vsel %vm1810_vm4, %v1772_v3, %v1848_v7  ;;  %v10086_v3 = vpack.c.bf16 %v2027_v1, %v2025_v63  ;;  %v2024_v7 = vld [vmem:[#allocation10 + $0x140] sm:$0xff]  ;;  %v2030_v63 = vld [vmem:[#allocation10 + $0x170] sm:$0xff] }
 0x31f   :  { %v1775_v27 = vadd.f32 %v12209_v61, %v1649_v41  ;;  %v12279_v45 = vsel %vm1811_vm3, %v1773_v14, %v1849_v10  ;;  %10079 = vmatprep.subr.bf16.mxu1 %v10078_v5  ;;  %v10084_v5 = vpack.c.bf16 %v2022_v49, %v2020_v46  ;;  %v2029_v41 = vld [vmem:[#allocation10 + $0x168] sm:$0xff] }
 0x320   :  { %v1850_v55 = vmul.f32 0.4, %v1774_v38  ;;  %2226 = vmatprep.mubr.f32.mxu1 %v12279_v45  ;;  %vm1812_vm6 = vcmp.ge.f32.partialorder %v1774_v38, 0.0 }
 0x321   :  { %v1851_v4 = vmul.f32 0.4, %v1775_v27  ;;  %v1653_v33 = vpop.f32.mrb[20].mxu0  ;;  %2227 = vmatmul.mubr.f32.gmra.mrb[16].mxu1 %v12282_v58  ;;  %vm1813_vm5 = vcmp.ge.f32.partialorder %v1775_v27, 0.0 }
 0x322   :  { %v1776_v12 = vadd.f32 %v12206_v60, %v1653_v33  ;;  %v1655_v14 = vpop.f32.mrb[21].mxu0  ;;  %10081 = vmatpush1.bf16.msra.mxu1 %v10080_v42  ;;  %v12290_v10 = vsel %vm1812_vm6, %v1774_v38, %v1850_v55  ;;  %v10090_v38 = vpack.c.bf16 %v2031_v39, %v2029_v41  ;;  %v2028_v55 = vld [vmem:[#allocation10 + $0x160] sm:$0xff] }
 0x323   :  { %v1777_v20 = vadd.f32 %v12209_v61, %v1655_v14  ;;  %v12287_v23 = vsel %vm1813_vm5, %v1775_v27, %v1851_v4  ;;  %10083 = vmatprep.subr.bf16.mxu1 %v10082_v35  ;;  %v10088_v35 = vpack.c.bf16 %v2026_v29, %v2024_v7  ;;  %v2033_v14 = vld [vmem:[#allocation10 + $0x188] sm:$0xff]  ;;  %v10092_v39 = vpack.c.bf16 %v2030_v63, %v2028_v55  ;;  %v2032_v7 = vld [vmem:[#allocation10 + $0x180] sm:$0xff]  ;;  %v2034_v29 = vld [vmem:[#allocation10 + $0x190] sm:$0xff] }
 0x324   :  { %v1852_v31 = vmul.f32 0.4, %v1776_v12  ;;  %2232 = vmatprep.mubr.f32.mxu1 %v12287_v23  ;;  %vm1814_vm8 = vcmp.ge.f32.partialorder %v1776_v12, 0.0  ;;  %v2036_v55 = vld [vmem:[#allocation10 + $0x1a0] sm:$0xff]  ;;  %v2038_v63 = vld [vmem:[#allocation10 + $0x1b0] sm:$0xff] }
 0x325   :  { %v1853_v59 = vmul.f32 0.4, %v1777_v20  ;;  %v1659_v33 = vpop.f32.mrb[22].mxu0  ;;  %2233 = vmatmul.mubr.f32.gmra.mrb[18].mxu1 %v12290_v10  ;;  %vm1815_vm7 = vcmp.ge.f32.partialorder %v1777_v20, 0.0 }
 0x326   :  { %v1778_v42 = vadd.f32 %v12206_v60, %v1659_v33  ;;  %v1661_v27 = vpop.f32.mrb[23].mxu0  ;;  %10085 = vmatpush1.bf16.msra.mxu1 %v10084_v5  ;;  %v12298_v4 = vsel %vm1814_vm8, %v1776_v12, %v1852_v31  ;;  %v10094_v12 = vpack.c.bf16 %v2035_v56, %v2033_v14  ;;  %v10096_v56 = vpack.c.bf16 %v2034_v29, %v2032_v7  ;;  %v2040_v7 = vld [vmem:[#allocation10 + $0x1c0] sm:$0xff]  ;;  %v2042_v29 = vld [vmem:[#allocation10 + $0x1d0] sm:$0xff] }
 0x327   :  { %v1779_v46 = vadd.f32 %v12209_v61, %v1661_v27  ;;  %v12295_v49 = vsel %vm1815_vm7, %v1777_v20, %v1853_v59  ;;  %10087 = vmatprep.subr.bf16.mxu1 %v10086_v3  ;;  %v2037_v27 = vld [vmem:[#allocation10 + $0x1a8] sm:$0xff] }
 0x328   :  { %v1854_v1 = vmul.f32 0.4, %v1778_v42  ;;  %2238 = vmatprep.mubr.f32.mxu1 %v12295_v49  ;;  %vm1816_vm10 = vcmp.ge.f32.partialorder %v1778_v42, 0.0 }
 0x329   :  { %v1855_v40 = vmul.f32 0.4, %v1779_v46  ;;  %v1665_v33 = vpop.f32.mrb[24].mxu0  ;;  %2239 = vmatmul.mubr.f32.gmra.mrb[20].mxu1 %v12298_v4  ;;  %vm1817_vm9 = vcmp.ge.f32.partialorder %v1779_v46, 0.0 }
 0x32a   :  { %v1780_v59 = vadd.f32 %v12206_v60, %v1665_v33  ;;  %v1667_v5 = vpop.f32.mrb[25].mxu0  ;;  %10089 = vmatpush1.bf16.msra.mxu1 %v10088_v35  ;;  %v12306_v41 = vsel %vm1816_vm10, %v1778_v42, %v1854_v1  ;;  %v10098_v42 = vpack.c.bf16 %v2039_v34, %v2037_v27  ;;  %v10100_v34 = vpack.c.bf16 %v2038_v63, %v2036_v55  ;;  %v2044_v55 = vld [vmem:[#allocation10 + $0x1e0] sm:$0xff]  ;;  %v2046_v63 = vld [vmem:[#allocation10 + $0x1f0] sm:$0xff] }
 0x32b   :  { %v1781_v20 = vadd.f32 %v12209_v61, %v1667_v5  ;;  %v12303_v3 = vsel %vm1817_vm9, %v1779_v46, %v1855_v40  ;;  %10091 = vmatprep.subr.bf16.mxu1 %v10090_v38  ;;  %v2041_v5 = vld [vmem:[#allocation10 + $0x1c8] sm:$0xff]  ;;  %vm11573_vm9 = vmmov 0  }
 0x32c   :  { %v1856_v31 = vmul.f32 0.4, %v1780_v59  ;;  %2244 = vmatprep.mubr.f32.mxu1 %v12303_v3  ;;  %vm1818_vm12 = vcmp.ge.f32.partialorder %v1780_v59, 0.0 }
 0x32d   :  { %v1857_v11 = vmul.f32 0.4, %v1781_v20  ;;  %v1671_v33 = vpop.f32.mrb[26].mxu0  ;;  %2245 = vmatmul.mubr.f32.gmra.mrb[22].mxu1 %v12306_v41  ;;  %vm1819_vm11 = vcmp.ge.f32.partialorder %v1781_v20, 0.0 }
 0x32e   :  { %v1782_v40 = vadd.f32 %v12206_v60, %v1671_v33  ;;  %v1673_v35 = vpop.f32.mrb[27].mxu0  ;;  %10093 = vmatpush1.bf16.msra.mxu1 %v10092_v39  ;;  %v12314_v14 = vsel %vm1818_vm12, %v1780_v59, %v1856_v31  ;;  %v10102_v59 = vpack.c.bf16 %v2043_v51, %v2041_v5  ;;  %v10104_v51 = vpack.c.bf16 %v2042_v29, %v2040_v7 }
 0x32f   :  { %v1783_v46 = vadd.f32 %v12209_v61, %v1673_v35  ;;  %v12311_v38 = vsel %vm1819_vm11, %v1781_v20, %v1857_v11  ;;  %10095 = vmatprep.subr.bf16.mxu1 %v10094_v12  ;;  %v2045_v35 = vld [vmem:[#allocation10 + $0x1e8] sm:$0xff] }
 0x330   :  { %v1858_v1 = vmul.f32 0.4, %v1782_v40  ;;  %2250 = vmatprep.mubr.f32.mxu1 %v12311_v38  ;;  %vm1820_vm14 = vcmp.ge.f32.partialorder %v1782_v40, 0.0 }
 0x331   :  { %v1859_v21 = vmul.f32 0.4, %v1783_v46  ;;  %v1677_v33 = vpop.f32.mrb[28].mxu0  ;;  %2251 = vmatmul.mubr.f32.gmra.mrb[24].mxu1 %v12314_v14  ;;  %vm1821_vm13 = vcmp.ge.f32.partialorder %v1783_v46, 0.0 }
 0x332   :  { %v1784_v11 = vadd.f32 %v12206_v60, %v1677_v33  ;;  %v1679_v39 = vpop.f32.mrb[29].mxu0  ;;  %10097 = vmatpush1.bf16.msra.mxu1 %v10096_v56  ;;  %v12322_v27 = vsel %vm1820_vm14, %v1782_v40, %v1858_v1  ;;  %v10106_v40 = vpack.c.bf16 %v2047_v0, %v2045_v35  ;;  %v10108_v0 = vpack.c.bf16 %v2046_v63, %v2044_v55 }
 0x333   :  { %v1785_v20 = vadd.f32 %v12209_v61, %v1679_v39  ;;  %v12319_v12 = vsel %vm1821_vm13, %v1783_v46, %v1859_v21  ;;  %10099 = vmatprep.subr.bf16.mxu1 %v10098_v42  ;;  %v2511_v39 = vld [vmem:[#allocation10 + $0x408] sm:$0xff] }
 0x334   :  { %v1860_v31 = vmul.f32 0.4, %v1784_v11  ;;  %2256 = vmatprep.mubr.f32.mxu1 %v12319_v12  ;;  %vm1822_vm0 = vcmp.ge.f32.partialorder %v1784_v11, 0.0 }
 0x335   :  { %v1861_v36 = vmul.f32 0.4, %v1785_v20  ;;  %v1683_v33 = vpop.f32.mrb[30].mxu0  ;;  %2257 = vmatmul.mubr.f32.gmra.mrb[26].mxu1 %v12322_v27  ;;  %vm1823_vm15 = vcmp.ge.f32.partialorder %v1785_v20, 0.0 }
 0x336   :  { %v1786_v21 = vadd.f32 %v12206_v60, %v1683_v33  ;;  %v1685_v56 = vpop.f32.mrb[31].mxu0  ;;  %10101 = vmatpush1.bf16.msra.mxu1 %v10100_v34  ;;  %v12330_v5 = vsel %vm1822_vm0, %v1784_v11, %v1860_v31  ;;  %v10110_v11 = vpack.c.bf16 %v2513_v53, %v2511_v39 }
 0x337   :  { %v1787_v46 = vadd.f32 %v12209_v61, %v1685_v56  ;;  %v12327_v42 = vsel %vm1823_vm15, %v1785_v20, %v1861_v36  ;;  %10103 = vmatprep.subr.bf16.mxu1 %v10102_v59 }
 0x338   :  { %v1862_v1 = vmul.f32 0.4, %v1786_v21  ;;  %2262 = vmatprep.mubr.f32.mxu1 %v12327_v42  ;;  %vm1824_vm2 = vcmp.ge.f32.partialorder %v1786_v21, 0.0 }
 0x339   :  { %v1863_v54 = vmul.f32 0.4, %v1787_v46  ;;  %v1689_v33 = vpop.f32.mrb[32].mxu0  ;;  %2263 = vmatmul.mubr.f32.gmra.mrb[28].mxu1 %v12330_v5  ;;  %vm1825_vm1 = vcmp.ge.f32.partialorder %v1787_v46, 0.0 }
 0x33a   :  { %v1788_v36 = vadd.f32 %v12206_v60, %v1689_v33  ;;  %v1691_v34 = vpop.f32.mrb[33].mxu0  ;;  %10105 = vmatpush1.bf16.msra.mxu1 %v10104_v51  ;;  %v12338_v29 = vsel %vm1824_vm2, %v1786_v21, %v1862_v1 }
 0x33b   :  { %v1789_v20 = vadd.f32 %v12209_v61, %v1691_v34  ;;  %v12335_v59 = vsel %vm1825_vm1, %v1787_v46, %v1863_v54  ;;  %10107 = vmatprep.subr.bf16.mxu1 %v10106_v40 }
 0x33c   :  { %v1864_v7 = vmul.f32 0.4, %v1788_v36  ;;  %2268 = vmatprep.mubr.f32.mxu1 %v12335_v59  ;;  %vm1826_vm4 = vcmp.ge.f32.partialorder %v1788_v36, 0.0 }
 0x33d   :  { %v1865_v31 = vmul.f32 0.4, %v1789_v20  ;;  %v1695_v35 = vpop.f32.mrb[34].mxu0  ;;  %2269 = vmatmul.mubr.f32.gmra.mrb[30].mxu1 %v12338_v29  ;;  %vm1827_vm3 = vcmp.ge.f32.partialorder %v1789_v20, 0.0 }
 0x33e   :  { %v1790_v56 = vadd.f32 %v12206_v60, %v1695_v35  ;;  %v1697_v51 = vpop.f32.mrb[35].mxu0  ;;  %10109 = vmatpush1.bf16.msra.mxu1 %v10108_v0  ;;  %v12346_v21 = vsel %vm1826_vm4, %v1788_v36, %v1864_v7  ;;  %v2512_v7 = vld [vmem:[#allocation10 + $0x410] sm:$0xff]  ;;  %v14938_v35 = vmov 0.0  }
 0x33f   :  { %v1791_v54 = vadd.f32 %v12209_v61, %v1697_v51  ;;  %v12343_v46 = vsel %vm1827_vm3, %v1789_v20, %v1865_v31  ;;  %10111 = vmatprep.subr.bf16.mxu1 %v10110_v11  ;;  %v2510_v11 = vld [vmem:[#allocation10 + $0x400] sm:$0xff]  ;;  %v2517_v31 = vld [vmem:[#allocation10 + $0x438] sm:$0xff] }
 0x340   :  { %v1866_v53 = vmul.f32 0.4, %v1790_v56  ;;  %2274 = vmatprep.mubr.f32.mxu1 %v12343_v46  ;;  %vm1828_vm6 = vcmp.ge.f32.partialorder %v1790_v56, 0.0 }
 0x341   :  { %v1867_v40 = vmul.f32 0.4, %v1791_v54  ;;  %v1701_v55 = vpop.f32.mrb[36].mxu0  ;;  %2275 = vmatmul.mubr.f32.gmra.mrb[32].mxu1 %v12346_v21  ;;  %vm1829_vm5 = vcmp.ge.f32.partialorder %v1791_v54, 0.0 }
 0x342   :  { %v1792_v63 = vadd.f32 %v12206_v60, %v1701_v55  ;;  %v1703_v1 = vpop.f32.mrb[37].mxu0  ;;  %v12354_v0 = vsel %vm1828_vm6, %v1790_v56, %v1866_v53  ;;  %v10112_v56 = vpack.c.bf16 %v2512_v7, %v2510_v11  ;;  %v2516_v53 = vld [vmem:[#allocation10 + $0x430] sm:$0xff]  ;;  %v2521_v55 = vld [vmem:[#allocation10 + $0x458] sm:$0xff] }
 0x343   :  { %v1793_v39 = vadd.f32 %v12209_v61, %v1703_v1  ;;  %v12351_v33 = vsel %vm1829_vm5, %v1791_v54, %v1867_v40  ;;  %v2515_v61 = vld [vmem:[#allocation10 + $0x428] sm:$0xff]  ;;  %v2514_v54 = vld [vmem:[#allocation10 + $0x420] sm:$0xff] }
 0x344   :  { %v1868_v34 = vmul.f32 0.4, %v1792_v63  ;;  %2280 = vmatprep.mubr.f32.mxu1 %v12351_v33  ;;  %vm1830_vm8 = vcmp.ge.f32.partialorder %v1792_v63, 0.0  ;;  %v10114_v51 = vpack.c.bf16 %v2517_v31, %v2515_v61  ;;  %v2519_v40 = vld [vmem:[#allocation10 + $0x448] sm:$0xff]  ;;  %v10116_v1 = vpack.c.bf16 %v2516_v53, %v2514_v54  ;;  %v2522_v61 = vld [vmem:[#allocation10 + $0x460] sm:$0xff]  ;;  %v2524_v31 = vld [vmem:[#allocation10 + $0x470] sm:$0xff] }
 0x345   :  { %v1869_v36 = vmul.f32 0.4, %v1793_v39  ;;  %2281 = vmatmul.mubr.f32.gmra.mrb[34].mxu1 %v12354_v0  ;;  %vm1831_vm7 = vcmp.ge.f32.partialorder %v1793_v39, 0.0  ;;  %v2526_v54 = vld [vmem:[#allocation10 + $0x480] sm:$0xff]  ;;  %v2531_v53 = vld [vmem:[#allocation10 + $0x4a8] sm:$0xff] }
 0x346   :  { %v12360_v60 = vsel %vm1830_vm8, %v1792_v63, %v1868_v34  ;;  %v10118_v63 = vpack.c.bf16 %v2521_v55, %v2519_v40  ;;  %v2520_v34 = vld [vmem:[#allocation10 + $0x450] sm:$0xff]  ;;  %v2533_v40 = vld [vmem:[#allocation10 + $0x4b8] sm:$0xff] }
 0x347   :  { %v12357_v20 = vsel %vm1831_vm7, %v1793_v39, %v1869_v36  ;;  %v2518_v39 = vld [vmem:[#allocation10 + $0x440] sm:$0xff]  ;;  %v2523_v36 = vld [vmem:[#allocation10 + $0x468] sm:$0xff]  ;;  %v10130_v55 = vpack.c.bf16 %v2533_v40, %v2531_v53  ;;  %v2545_v53 = vld [vmem:[#allocation10 + $0x518] sm:$0xff] }
 0x348   :  { %2286 = vmatprep.mubr.f32.mxu1 %v12357_v20  ;;  %v10120_v11 = vpack.c.bf16 %v2520_v34, %v2518_v39  ;;  %v10122_v7 = vpack.c.bf16 %v2525_v37, %v2523_v36  ;;  %v2535_v39 = vld [vmem:[#allocation10 + $0x4c8] sm:$0xff]  ;;  %v2537_v34 = vld [vmem:[#allocation10 + $0x4d8] sm:$0xff] }
 0x349   :  { %2287 = vmatmul.mubr.f32.gmra.mrb[36].mxu1 %v12360_v60  ;;  %v10134_v36 = vpack.c.bf16 %v2537_v34, %v2535_v39  ;;  %v2549_v39 = vld [vmem:[#allocation10 + $0x538] sm:$0xff] }
 0x34a   :  { %2357 = vmatprep.mubr.f32.mxu1 %v14938_v35 }
 0x34d   :  { %2358 = vmatmul.mubr.f32.vlgmr.msra.gmra.mrb[0].mxu1 %v14938_v35 }
 0x34e   :  { %10113 = vmatpush1.bf16.msra.mxu1 %v10112_v56  ;;  %2363 = vmatprep.mubr.f32.mxu1 %v12215_v6  ;;  %v2527_v56 = vld [vmem:[#allocation10 + $0x488] sm:$0xff]  ;;  %v10124_v6 = vpack.c.bf16 %v2524_v31, %v2522_v61  ;;  %v2541_v31 = vld [vmem:[#allocation10 + $0x4f8] sm:$0xff] }
 0x34f   :  { %10115 = vmatprep.subr.bf16.mxu1 %v10114_v51  ;;  %v10126_v51 = vpack.c.bf16 %v2529_v9, %v2527_v56  ;;  %v2539_v61 = vld [vmem:[#allocation10 + $0x4e8] sm:$0xff] }
 0x351   :  { %2364 = vmatmul.mubr.f32.gmra.mrb[2].mxu1 %v12218_v30  ;;  %v2528_v30 = vld [vmem:[#allocation10 + $0x490] sm:$0xff] }
 0x352   :  { %2369 = vmatprep.mubr.f32.mxu1 %v12223_v22  ;;  %10117 = vmatpush1.bf16.msra.mxu1 %v10116_v1  ;;  %v10128_v37 = vpack.c.bf16 %v2528_v30, %v2526_v54  ;;  %v2530_v1 = vld [vmem:[#allocation10 + $0x4a0] sm:$0xff]  ;;  %v2540_v54 = vld [vmem:[#allocation10 + $0x4f0] sm:$0xff]  ;;  %v2543_v30 = vld [vmem:[#allocation10 + $0x508] sm:$0xff] }
 0x353   :  { %10119 = vmatprep.subr.bf16.mxu1 %v10118_v63  ;;  %v2532_v63 = vld [vmem:[#allocation10 + $0x4b0] sm:$0xff] }
 0x354   :  { %v10132_v9 = vpack.c.bf16 %v2532_v63, %v2530_v1  ;;  %v2544_v1 = vld [vmem:[#allocation10 + $0x510] sm:$0xff]  ;;  %v2547_v63 = vld [vmem:[#allocation10 + $0x528] sm:$0xff] }
 0x355   :  { %2370 = vmatmul.mubr.f32.gmra.mrb[4].mxu1 %v12226_v47 }
 0x356   :  { %2375 = vmatprep.mubr.f32.mxu1 %v12231_v2  ;;  %10121 = vmatpush1.bf16.msra.mxu1 %v10120_v11  ;;  %v2534_v11 = vld [vmem:[#allocation10 + $0x4c0] sm:$0xff] }
 0x357   :  { %10123 = vmatprep.subr.bf16.mxu1 %v10122_v7  ;;  %v2536_v7 = vld [vmem:[#allocation10 + $0x4d0] sm:$0xff] }
 0x358   :  { %v10136_v56 = vpack.c.bf16 %v2536_v7, %v2534_v11  ;;  %v2548_v11 = vld [vmem:[#allocation10 + $0x530] sm:$0xff]  ;;  %v2551_v7 = vld [vmem:[#allocation10 + $0x548] sm:$0xff] }
 0x359   :  { %2376 = vmatmul.mubr.f32.gmra.mrb[6].mxu1 %v12234_v13 }
 0x35a   :  { %2381 = vmatprep.mubr.f32.mxu1 %v12239_v26  ;;  %10125 = vmatpush1.bf16.msra.mxu1 %v10124_v6  ;;  %v10138_v6 = vpack.c.bf16 %v2541_v31, %v2539_v61  ;;  %v2553_v61 = vld [vmem:[#allocation10 + $0x558] sm:$0xff] }
 0x35b   :  { %10127 = vmatprep.subr.bf16.mxu1 %v10126_v51  ;;  %v2538_v51 = vld [vmem:[#allocation10 + $0x4e0] sm:$0xff] }
 0x35c   :  { %v10140_v40 = vpack.c.bf16 %v2540_v54, %v2538_v51  ;;  %v2552_v51 = vld [vmem:[#allocation10 + $0x550] sm:$0xff]  ;;  %v2555_v54 = vld [vmem:[#allocation10 + $0x568] sm:$0xff] }
 0x35d   :  { %2382 = vmatmul.mubr.f32.gmra.mrb[8].mxu1 %v12242_v15 }
 0x35e   :  { %2387 = vmatprep.mubr.f32.mxu1 %v12247_v48  ;;  %10129 = vmatpush1.bf16.msra.mxu1 %v10128_v37  ;;  %v10142_v37 = vpack.c.bf16 %v2545_v53, %v2543_v30  ;;  %v2557_v30 = vld [vmem:[#allocation10 + $0x578] sm:$0xff] }
 0x35f   :  { %10131 = vmatprep.subr.bf16.mxu1 %v10130_v55  ;;  %v2542_v55 = vld [vmem:[#allocation10 + $0x500] sm:$0xff] }
 0x360   :  { %v10144_v34 = vpack.c.bf16 %v2544_v1, %v2542_v55  ;;  %v2556_v55 = vld [vmem:[#allocation10 + $0x570] sm:$0xff]  ;;  %v2559_v1 = vld [vmem:[#allocation10 + $0x588] sm:$0xff] }
 0x361   :  { %2388 = vmatmul.mubr.f32.gmra.mrb[10].mxu1 %v12250_v62 }
 0x362   :  { %2393 = vmatprep.mubr.f32.mxu1 %v12255_v18  ;;  %10133 = vmatpush1.bf16.msra.mxu1 %v10132_v9  ;;  %v10146_v9 = vpack.c.bf16 %v2549_v39, %v2547_v63  ;;  %v2561_v63 = vld [vmem:[#allocation10 + $0x598] sm:$0xff] }
 0x363   :  { %10135 = vmatprep.subr.bf16.mxu1 %v10134_v36  ;;  %v2546_v36 = vld [vmem:[#allocation10 + $0x520] sm:$0xff] }
 0x364   :  { %v10148_v31 = vpack.c.bf16 %v2548_v11, %v2546_v36  ;;  %v2560_v36 = vld [vmem:[#allocation10 + $0x590] sm:$0xff]  ;;  %v2563_v11 = vld [vmem:[#allocation10 + $0x5a8] sm:$0xff] }
 0x365   :  { %2394 = vmatmul.mubr.f32.gmra.mrb[12].mxu1 %v12258_v25 }
 0x366   :  { %2399 = vmatprep.mubr.f32.mxu1 %v12263_v44  ;;  %10137 = vmatpush1.bf16.msra.mxu1 %v10136_v56  ;;  %v10150_v56 = vpack.c.bf16 %v2553_v61, %v2551_v7  ;;  %v2565_v7 = vld [vmem:[#allocation10 + $0x5b8] sm:$0xff] }
 0x367   :  { %10139 = vmatprep.subr.bf16.mxu1 %v10138_v6  ;;  %v2550_v6 = vld [vmem:[#allocation10 + $0x540] sm:$0xff] }
 0x368   :  { %v10152_v53 = vpack.c.bf16 %v2552_v51, %v2550_v6  ;;  %v2564_v6 = vld [vmem:[#allocation10 + $0x5b0] sm:$0xff]  ;;  %v2567_v51 = vld [vmem:[#allocation10 + $0x5c8] sm:$0xff] }
 0x369   :  { %2400 = vmatmul.mubr.f32.gmra.mrb[14].mxu1 %v12266_v52 }
 0x36a   :  { %2405 = vmatprep.mubr.f32.mxu1 %v12271_v17  ;;  %10141 = vmatpush1.bf16.msra.mxu1 %v10140_v40  ;;  %v10154_v40 = vpack.c.bf16 %v2557_v30, %v2555_v54  ;;  %v2569_v54 = vld [vmem:[#allocation10 + $0x5d8] sm:$0xff] }
 0x36b   :  { %10143 = vmatprep.subr.bf16.mxu1 %v10142_v37  ;;  %v2554_v37 = vld [vmem:[#allocation10 + $0x560] sm:$0xff] }
 0x36c   :  { %v10156_v39 = vpack.c.bf16 %v2556_v55, %v2554_v37  ;;  %v2568_v37 = vld [vmem:[#allocation10 + $0x5d0] sm:$0xff]  ;;  %v2571_v55 = vld [vmem:[#allocation10 + $0x5e8] sm:$0xff] }
 0x36d   :  { %2406 = vmatmul.mubr.f32.gmra.mrb[16].mxu1 %v12274_v24 }
 0x36e   :  { %2411 = vmatprep.mubr.f32.mxu1 %v12279_v45  ;;  %10145 = vmatpush1.bf16.msra.mxu1 %v10144_v34  ;;  %v10158_v34 = vpack.c.bf16 %v2561_v63, %v2559_v1  ;;  %v2573_v1 = vld [vmem:[#allocation10 + $0x5f8] sm:$0xff] }
 0x36f   :  { %10147 = vmatprep.subr.bf16.mxu1 %v10146_v9  ;;  %v2558_v9 = vld [vmem:[#allocation10 + $0x580] sm:$0xff] }
 0x370   :  { %v10160_v61 = vpack.c.bf16 %v2560_v36, %v2558_v9  ;;  %v2572_v9 = vld [vmem:[#allocation10 + $0x5f0] sm:$0xff]  ;;  %v2861_v36 = vld [vmem:[#allocation12 + $0x8] sm:$0xff] }
 0x371   :  { %2412 = vmatmul.mubr.f32.gmra.mrb[18].mxu1 %v12282_v58 }
 0x372   :  { %2417 = vmatprep.mubr.f32.mxu1 %v12287_v23  ;;  %10149 = vmatpush1.bf16.msra.mxu1 %v10148_v31  ;;  %v10162_v31 = vpack.c.bf16 %v2565_v7, %v2563_v11  ;;  %v2863_v11 = vld [vmem:[#allocation12 + $0x18] sm:$0xff] }
 0x373   :  { %10151 = vmatprep.subr.bf16.mxu1 %v10150_v56  ;;  %v2562_v56 = vld [vmem:[#allocation10 + $0x5a0] sm:$0xff] }
 0x374   :  { %v10164_v30 = vpack.c.bf16 %v2564_v6, %v2562_v56  ;;  %v2862_v56 = vld [vmem:[#allocation12 + $0x10] sm:$0xff]  ;;  %v2865_v6 = vld [vmem:[#allocation12 + $0x28] sm:$0xff] }
 0x375   :  { %2418 = vmatmul.mubr.f32.gmra.mrb[20].mxu1 %v12290_v10 }
 0x376   :  { %2423 = vmatprep.mubr.f32.mxu1 %v12295_v49  ;;  %10153 = vmatpush1.bf16.msra.mxu1 %v10152_v53  ;;  %v10166_v53 = vpack.c.bf16 %v2569_v54, %v2567_v51  ;;  %v2867_v51 = vld [vmem:[#allocation12 + $0x38] sm:$0xff] }
 0x377   :  { %10155 = vmatprep.subr.bf16.mxu1 %v10154_v40  ;;  %v2566_v40 = vld [vmem:[#allocation10 + $0x5c0] sm:$0xff] }
 0x378   :  { %v10168_v63 = vpack.c.bf16 %v2568_v37, %v2566_v40  ;;  %v2866_v40 = vld [vmem:[#allocation12 + $0x30] sm:$0xff]  ;;  %v2869_v37 = vld [vmem:[#allocation12 + $0x48] sm:$0xff] }
 0x379   :  { %2424 = vmatmul.mubr.f32.gmra.mrb[22].mxu1 %v12298_v4 }
 0x37a   :  { %2429 = vmatprep.mubr.f32.mxu1 %v12303_v3  ;;  %10157 = vmatpush1.bf16.msra.mxu1 %v10156_v39  ;;  %v10170_v39 = vpack.c.bf16 %v2573_v1, %v2571_v55  ;;  %v2871_v55 = vld [vmem:[#allocation12 + $0x58] sm:$0xff] }
 0x37b   :  { %10159 = vmatprep.subr.bf16.mxu1 %v10158_v34  ;;  %v2570_v34 = vld [vmem:[#allocation10 + $0x5e0] sm:$0xff] }
 0x37c   :  { %v10172_v7 = vpack.c.bf16 %v2572_v9, %v2570_v34  ;;  %v2870_v34 = vld [vmem:[#allocation12 + $0x50] sm:$0xff]  ;;  %v2873_v9 = vld [vmem:[#allocation12 + $0x68] sm:$0xff] }
 0x37d   :  { %2430 = vmatmul.mubr.f32.gmra.mrb[24].mxu1 %v12306_v41 }
 0x37e   :  { %2435 = vmatprep.mubr.f32.mxu1 %v12311_v38  ;;  %10161 = vmatpush1.bf16.msra.mxu1 %v10160_v61  ;;  %v10174_v61 = vpack.c.bf16 %v2863_v11, %v2861_v36  ;;  %v2875_v36 = vld [vmem:[#allocation12 + $0x78] sm:$0xff] }
 0x37f   :  { %10163 = vmatprep.subr.bf16.mxu1 %v10162_v31  ;;  %v2860_v31 = vld [vmem:[#allocation12] sm:$0xff]  ;;  %v10186_v11 = vpack.c.bf16 %v2875_v36, %v2873_v9  ;;  %v3275_v9 = vld [vmem:[#allocation13 + $0x110] sm:$0xff] }
 0x380   :  { %v10176_v54 = vpack.c.bf16 %v2862_v56, %v2860_v31  ;;  %v2879_v31 = vld [vmem:[#allocation12 + $0x98] sm:$0xff] }
 0x381   :  { %2436 = vmatmul.mubr.f32.gmra.mrb[26].mxu1 %v12314_v14 }
 0x382   :  { %2441 = vmatprep.mubr.f32.mxu1 %v12319_v12  ;;  %10165 = vmatpush1.bf16.msra.mxu1 %v10164_v30  ;;  %v10178_v30 = vpack.c.bf16 %v2867_v51, %v2865_v6  ;;  %v2876_v6 = vld [vmem:[#allocation12 + $0x80] sm:$0xff]  ;;  %v2881_v51 = vld [vmem:[#allocation12 + $0xa8] sm:$0xff] }
 0x383   :  { %10167 = vmatprep.subr.bf16.mxu1 %v10166_v53  ;;  %v2864_v53 = vld [vmem:[#allocation12 + $0x20] sm:$0xff] }
 0x384   :  { %v10180_v1 = vpack.c.bf16 %v2866_v40, %v2864_v53  ;;  %v2880_v53 = vld [vmem:[#allocation12 + $0xa0] sm:$0xff]  ;;  %v2885_v40 = vld [vmem:[#allocation12 + $0xc8] sm:$0xff] }
 0x385   :  { %2442 = vmatmul.mubr.f32.gmra.mrb[28].mxu1 %v12322_v27 }
 0x386   :  { %2447 = vmatprep.mubr.f32.mxu1 %v12327_v42  ;;  %10169 = vmatpush1.bf16.msra.mxu1 %v10168_v63  ;;  %v10182_v63 = vpack.c.bf16 %v2871_v55, %v2869_v37 }
 0x387   :  { %10171 = vmatprep.subr.bf16.mxu1 %v10170_v39  ;;  %v2868_v39 = vld [vmem:[#allocation12 + $0x40] sm:$0xff] }
 0x389   :  { %2448 = vmatmul.mubr.f32.gmra.mrb[30].mxu1 %v12330_v5 }
 0x38a   :  { %2453 = vmatprep.mubr.f32.mxu1 %v12335_v59  ;;  %10173 = vmatpush1.bf16.msra.mxu1 %v10172_v7  ;;  %v2872_v7 = vld [vmem:[#allocation12 + $0x60] sm:$0xff] }
 0x38b   :  { %10175 = vmatprep.subr.bf16.mxu1 %v10174_v61  ;;  %v2877_v61 = vld [vmem:[#allocation12 + $0x88] sm:$0xff] }
 0x38c   :  { %v10190_v56 = vpack.c.bf16 %v2879_v31, %v2877_v61  ;;  %v3278_v31 = vld [vmem:[#allocation13 + $0x128] sm:$0xff] }
 0x38d   :  { %2454 = vmatmul.mubr.f32.gmra.mrb[32].mxu1 %v12338_v29 }
 0x38e   :  { %2459 = vmatprep.mubr.f32.mxu1 %v12343_v46 }
 0x391   :  { %2460 = vmatmul.mubr.f32.gmra.mrb[34].mxu1 %v12346_v21 }
 0x392   :  { %2465 = vmatprep.mubr.f32.mxu1 %v12351_v33 }
 0x395   :  { %2466 = vmatmul.mubr.f32.gmra.mrb[36].mxu1 %v12354_v0 }
 0x396   :  { %2638 = vmatprep.mubr.f32.mxu1 %v12223_v22  ;;  %v10184_v22 = vpack.c.bf16 %v2870_v34, %v2868_v39  ;;  %v3273_v39 = vld [vmem:[#allocation13 + $0x100] sm:$0xff]  ;;  %v3274_v34 = vld [vmem:[#allocation13 + $0x108] sm:$0xff] }
 0x399   :  { %2639 = vmatmul.mubr.f32.vlgmr.msra.gmra.mrb[0].mxu1 %v12226_v47  ;;  %v2874_v47 = vld [vmem:[#allocation12 + $0x70] sm:$0xff] }
 0x39a   :  { %10177 = vmatpush1.bf16.msra.mxu1 %v10176_v54  ;;  %2644 = vmatprep.mubr.f32.mxu1 %v12231_v2  ;;  %v10188_v2 = vpack.c.bf16 %v2874_v47, %v2872_v7  ;;  %v2890_v7 = vld [vmem:[#allocation12 + $0xf0] sm:$0xff]  ;;  %v14874_v47 = vmov 0.0|0.0  }
 0x39b   :  { %10179 = vmatprep.subr.bf16.mxu1 %v10178_v30  ;;  %10206 = vmatprep.subr.bf16.mxu0 %v14874_v47 }
 0x39d   :  { %2645 = vmatmul.mubr.f32.gmra.mrb[2].mxu1 %v12234_v13  ;;  %v2878_v13 = vld [vmem:[#allocation12 + $0x90] sm:$0xff] }
 0x39e   :  { %2650 = vmatprep.mubr.f32.mxu1 %v12239_v26  ;;  %10181 = vmatpush1.bf16.msra.mxu1 %v10180_v1  ;;  %v2883_v26 = vld [vmem:[#allocation12 + $0xb8] sm:$0xff]  ;;  %v10192_v54 = vpack.c.bf16 %v2878_v13, %v2876_v6  ;;  %v2884_v1 = vld [vmem:[#allocation12 + $0xc0] sm:$0xff]  ;;  %v3282_v13 = vld [vmem:[#allocation13 + $0x148] sm:$0xff] }
 0x39f   :  { %10183 = vmatprep.subr.bf16.mxu1 %v10182_v63  ;;  %v10194_v30 = vpack.c.bf16 %v2883_v26, %v2881_v51  ;;  %v2889_v63 = vld [vmem:[#allocation12 + $0xe8] sm:$0xff]  ;;  %v3280_v6 = vld [vmem:[#allocation13 + $0x138] sm:$0xff] }
 0x3a0   :  { %v3284_v51 = vld [vmem:[#allocation13 + $0x158] sm:$0xff] }
 0x3a1   :  { %2651 = vmatmul.mubr.f32.gmra.mrb[4].mxu1 %v12242_v15  ;;  %v2882_v15 = vld [vmem:[#allocation12 + $0xb0] sm:$0xff] }
 0x3a2   :  { %2656 = vmatprep.mubr.f32.mxu1 %v12247_v48  ;;  %10185 = vmatpush1.bf16.msra.mxu1 %v10184_v22  ;;  %v2887_v48 = vld [vmem:[#allocation12 + $0xd8] sm:$0xff]  ;;  %v10196_v37 = vpack.c.bf16 %v2882_v15, %v2880_v53  ;;  %v3290_v53 = vld [vmem:[#allocation13 + $0x188] sm:$0xff] }
 0x3a3   :  { %10187 = vmatprep.subr.bf16.mxu1 %v10186_v11  ;;  %v10198_v55 = vpack.c.bf16 %v2887_v48, %v2885_v40  ;;  %v3276_v22 = vld [vmem:[#allocation13 + $0x118] sm:$0xff]  ;;  %v2888_v11 = vld [vmem:[#allocation12 + $0xe0] sm:$0xff]  ;;  %v3294_v40 = vld [vmem:[#allocation13 + $0x1a8] sm:$0xff] }
 0x3a4   :  { %v10210_v61 = vpack.c.bf16 %v3276_v22, %v3275_v9  ;;  %v3292_v15 = vld [vmem:[#allocation13 + $0x198] sm:$0xff]  ;;  %v3667_v9 = vld [vmem:[#allocation13 + $0x220] sm:$0xff] }
 0x3a5   :  { %2657 = vmatmul.mubr.f32.gmra.mrb[6].mxu1 %v12250_v62  ;;  %v2886_v62 = vld [vmem:[#allocation12 + $0xd0] sm:$0xff]  ;;  %v3296_v48 = vld [vmem:[#allocation13 + $0x1b8] sm:$0xff] }
 0x3a6   :  { %2662 = vmatprep.mubr.f32.mxu1 %v12255_v18  ;;  %10189 = vmatpush1.bf16.msra.mxu1 %v10188_v2  ;;  %v2891_v18 = vld [vmem:[#allocation12 + $0xf8] sm:$0xff]  ;;  %v10200_v36 = vpack.c.bf16 %v2886_v62, %v2884_v1  ;;  %v3664_v1 = vld [vmem:[#allocation13 + $0x208] sm:$0xff]  ;;  %v3301_v62 = vld [vmem:[#allocation13 + $0x1e0] sm:$0xff] }
 0x3a7   :  { %10191 = vmatprep.subr.bf16.mxu1 %v10190_v56  ;;  %v3279_v56 = vld [vmem:[#allocation13 + $0x130] sm:$0xff]  ;;  %v3670_v22 = vld [vmem:[#allocation13 + $0x238] sm:$0xff] }
 0x3a9   :  { %2663 = vmatmul.mubr.f32.gmra.mrb[8].mxu1 %v12258_v25  ;;  %v10207_v25 = vpack.c.bf16 %v3274_v34, %v3273_v39 }
 0x3aa   :  { %2668 = vmatprep.mubr.f32.mxu1 %v12263_v44  ;;  %10193 = vmatpush1.bf16.msra.mxu1 %v10192_v54  ;;  %v10202_v44 = vpack.c.bf16 %v2891_v18, %v2889_v63  ;;  %v3286_v54 = vld [vmem:[#allocation13 + $0x168] sm:$0xff]  ;;  %v3666_v18 = vld [vmem:[#allocation13 + $0x218] sm:$0xff] }
 0x3ab   :  { %10195 = vmatprep.subr.bf16.mxu1 %v10194_v30  ;;  %10208 = vmatpush1.bf16.msra.mxu0 %v10207_v25  ;;  %v3288_v30 = vld [vmem:[#allocation13 + $0x178] sm:$0xff] }
 0x3ac   :  { %10209 = vmatprep.subr.bf16.mxu0 %v14874_v47 }
 0x3ad   :  { %2669 = vmatmul.mubr.f32.gmra.mrb[10].mxu1 %v12266_v52  ;;  %v3277_v52 = vld [vmem:[#allocation13 + $0x120] sm:$0xff] }
 0x3ae   :  { %2674 = vmatprep.mubr.f32.mxu1 %v12271_v17  ;;  %10197 = vmatpush1.bf16.msra.mxu1 %v10196_v37  ;;  %v10204_v17 = vpack.c.bf16 %v2890_v7, %v2888_v11  ;;  %v10213_v2 = vpack.c.bf16 %v3278_v31, %v3277_v52  ;;  %v3298_v37 = vld [vmem:[#allocation13 + $0x1c8] sm:$0xff]  ;;  %v3671_v11 = vld [vmem:[#allocation13 + $0x240] sm:$0xff]  ;;  %v3674_v52 = vld [vmem:[#allocation13 + $0x258] sm:$0xff] }
 0x3af   :  { %10199 = vmatprep.subr.bf16.mxu1 %v10198_v55  ;;  %10211 = vmatpush1.bf16.msra.mxu0 %v10210_v61  ;;  %v3300_v55 = vld [vmem:[#allocation13 + $0x1d8] sm:$0xff]  ;;  %v3673_v61 = vld [vmem:[#allocation13 + $0x250] sm:$0xff]  ;;  %v3675_v31 = vld [vmem:[#allocation13 + $0x260] sm:$0xff] }
 0x3b0   :  { %10212 = vmatprep.subr.bf16.mxu0 %v14874_v47 }
 0x3b1   :  { %2675 = vmatmul.mubr.f32.gmra.mrb[12].mxu1 %v12274_v24  ;;  %v10216_v24 = vpack.c.bf16 %v3280_v6, %v3279_v56  ;;  %v3678_v56 = vld [vmem:[#allocation13 + $0x278] sm:$0xff]  ;;  %v3679_v6 = vld [vmem:[#allocation13 + $0x280] sm:$0xff] }
 0x3b2   :  { %2680 = vmatprep.mubr.f32.mxu1 %v12279_v45  ;;  %10201 = vmatpush1.bf16.msra.mxu1 %v10200_v36  ;;  %v3281_v45 = vld [vmem:[#allocation13 + $0x140] sm:$0xff]  ;;  %v3668_v36 = vld [vmem:[#allocation13 + $0x228] sm:$0xff] }
 0x3b3   :  { %10203 = vmatprep.subr.bf16.mxu1 %v10202_v44  ;;  %10214 = vmatpush1.bf16.msra.mxu0 %v10213_v2  ;;  %v10309_v25 = vpack.c.bf16 %v3668_v36, %v3667_v9  ;;  %v3677_v2 = vld [vmem:[#allocation13 + $0x270] sm:$0xff] }
 0x3b4   :  { %10215 = vmatprep.subr.bf16.mxu0 %v14874_v47 }
 0x3b5   :  { %2681 = vmatmul.mubr.f32.gmra.mrb[14].mxu1 %v12282_v58  ;;  %v10219_v58 = vpack.c.bf16 %v3282_v13, %v3281_v45  ;;  %v3681_v45 = vld [vmem:[#allocation13 + $0x290] sm:$0xff]  ;;  %v3682_v13 = vld [vmem:[#allocation13 + $0x298] sm:$0xff] }
 0x3b6   :  { %2686 = vmatprep.mubr.f32.mxu1 %v12287_v23  ;;  %10205 = vmatpush1.bf16.msra.mxu1 %v10204_v17  ;;  %v3283_v23 = vld [vmem:[#allocation13 + $0x150] sm:$0xff]  ;;  %v3676_v17 = vld [vmem:[#allocation13 + $0x268] sm:$0xff] }
 0x3b7   :  { %10302 = vmatprep.subr.bf16.mxu1 %v14874_v47  ;;  %10217 = vmatpush1.bf16.msra.mxu0 %v10216_v24  ;;  %v10222_v26 = vpack.c.bf16 %v3284_v51, %v3283_v23  ;;  %v3680_v24 = vld [vmem:[#allocation13 + $0x288] sm:$0xff]  ;;  %v3683_v23 = vld [vmem:[#allocation13 + $0x2a0] sm:$0xff] }
 0x3b8   :  { %10218 = vmatprep.subr.bf16.mxu0 %v14874_v47  ;;  %v3684_v51 = vld [vmem:[#allocation13 + $0x2a8] sm:$0xff] }
 0x3b9   :  { %2687 = vmatmul.mubr.f32.gmra.mrb[16].mxu1 %v12290_v10  ;;  %v3285_v10 = vld [vmem:[#allocation13 + $0x160] sm:$0xff] }
 0x3ba   :  { %2692 = vmatprep.mubr.f32.mxu1 %v12295_v49  ;;  %v10225_v49 = vpack.c.bf16 %v3286_v54, %v3285_v10  ;;  %v3685_v10 = vld [vmem:[#allocation13 + $0x2b0] sm:$0xff]  ;;  %v3686_v54 = vld [vmem:[#allocation13 + $0x2b8] sm:$0xff] }
 0x3bb   :  { %10220 = vmatpush1.bf16.msra.mxu0 %v10219_v58  ;;  %v14939_v58 = vld [vmem:[#allocation22_spill] sm:$0xff] }
 0x3bc   :  { %10221 = vmatprep.subr.bf16.mxu0 %v14874_v47 }
 0x3bd   :  { %2693 = vmatmul.mubr.f32.gmra.mrb[18].mxu1 %v12298_v4  ;;  %v3287_v4 = vld [vmem:[#allocation13 + $0x170] sm:$0xff] }
 0x3be   :  { %2698 = vmatprep.mubr.f32.mxu1 %v12303_v3  ;;  %v10228_v3 = vpack.c.bf16 %v3288_v30, %v3287_v4  ;;  %v10336_v4 = vpack.c.bf16 %v3686_v54, %v3685_v10  ;;  %v3687_v30 = vld [vmem:[#allocation13 + $0x2c0] sm:$0xff] }
 0x3bf   :  { %10223 = vmatpush1.bf16.msra.mxu0 %v10222_v26  ;;  %v14940_v26 = vld [vmem:[#allocation23_spill] sm:$0xff] }
 0x3c0   :  { %10224 = vmatprep.subr.bf16.mxu0 %v14874_v47 }
 0x3c1   :  { %2699 = vmatmul.mubr.f32.gmra.mrb[20].mxu1 %v12306_v41  ;;  %v3289_v41 = vld [vmem:[#allocation13 + $0x180] sm:$0xff] }
 0x3c2   :  { %2704 = vmatprep.mubr.f32.mxu1 %v12311_v38  ;;  %v10231_v38 = vpack.c.bf16 %v3290_v53, %v3289_v41  ;;  %v14942_v41 = vld [vmem:[#allocation25_spill] sm:$0xff] }
 0x3c3   :  { %10226 = vmatpush1.bf16.msra.mxu0 %v10225_v49  ;;  %v14941_v49 = vld [vmem:[#allocation24_spill] sm:$0xff] }
 0x3c4   :  { %10227 = vmatprep.subr.bf16.mxu0 %v14874_v47 }
 0x3c5   :  { %2705 = vmatmul.mubr.f32.gmra.mrb[22].mxu1 %v12314_v14  ;;  %v3291_v14 = vld [vmem:[#allocation13 + $0x190] sm:$0xff] }
 0x3c6   :  { %2710 = vmatprep.mubr.f32.mxu1 %v12319_v12  ;;  %v10234_v12 = vpack.c.bf16 %v3292_v15, %v3291_v14  ;;  %v14944_v14 = vld [vmem:[#allocation27_spill] sm:$0xff]  ;;  %v14945_v15 = vld [vmem:[#allocation28_spill] sm:$0xff] }
 0x3c7   :  { %10229 = vmatpush1.bf16.msra.mxu0 %v10228_v3  ;;  %v3688_v3 = vld [vmem:[#allocation13 + $0x2c8] sm:$0xff] }
 0x3c8   :  { %10230 = vmatprep.subr.bf16.mxu0 %v14874_v47  ;;  %v10339_v53 = vpack.c.bf16 %v3688_v3, %v3687_v30  ;;  %v3245_v3 = vld [vmem:[#allocation13 + $0x30] sm:$0xff] }
 0x3c9   :  { %2711 = vmatmul.mubr.f32.gmra.mrb[24].mxu1 %v12322_v27  ;;  %v3293_v27 = vld [vmem:[#allocation13 + $0x1a0] sm:$0xff] }
 0x3ca   :  { %2716 = vmatprep.mubr.f32.mxu1 %v12327_v42  ;;  %v10237_v42 = vpack.c.bf16 %v3294_v40, %v3293_v27  ;;  %v14947_v27 = vld [vmem:[#allocation30_spill] sm:$0xff]  ;;  %v14948_v40 = vld [vmem:[#allocation31_spill] sm:$0xff] }
 0x3cb   :  { %10232 = vmatpush1.bf16.msra.mxu0 %v10231_v38  ;;  %v14943_v38 = vld [vmem:[#allocation26_spill] sm:$0xff] }
 0x3cc   :  { %10233 = vmatprep.subr.bf16.mxu0 %v14874_v47 }
 0x3cd   :  { %2717 = vmatmul.mubr.f32.gmra.mrb[26].mxu1 %v12330_v5  ;;  %v3295_v5 = vld [vmem:[#allocation13 + $0x1b0] sm:$0xff] }
 0x3ce   :  { %2722 = vmatprep.mubr.f32.mxu1 %v12335_v59  ;;  %v10240_v59 = vpack.c.bf16 %v3296_v48, %v3295_v5  ;;  %v3689_v5 = vld [vmem:[#allocation13 + $0x2d0] sm:$0xff]  ;;  %v3690_v48 = vld [vmem:[#allocation13 + $0x2d8] sm:$0xff] }
 0x3cf   :  { %10235 = vmatpush1.bf16.msra.mxu0 %v10234_v12  ;;  %v14946_v12 = vld [vmem:[#allocation29_spill] sm:$0xff] }
 0x3d0   :  { %10236 = vmatprep.subr.bf16.mxu0 %v14874_v47 }
 0x3d1   :  { %2723 = vmatmul.mubr.f32.gmra.mrb[28].mxu1 %v12338_v29  ;;  %v3297_v29 = vld [vmem:[#allocation13 + $0x1c0] sm:$0xff] }
 0x3d2   :  { %2728 = vmatprep.mubr.f32.mxu1 %v12343_v46  ;;  %v10243_v46 = vpack.c.bf16 %v3298_v37, %v3297_v29  ;;  %v3303_v29 = vld [vmem:[#allocation13 + $0x1f0] sm:$0xff]  ;;  %v3304_v37 = vld [vmem:[#allocation13 + $0x1f8] sm:$0xff] }
 0x3d3   :  { %10238 = vmatpush1.bf16.msra.mxu0 %v10237_v42  ;;  %v14949_v42 = vld [vmem:[#allocation32_spill] sm:$0xff] }
 0x3d4   :  { %10239 = vmatprep.subr.bf16.mxu0 %v14874_v47 }
 0x3d5   :  { %2729 = vmatmul.mubr.f32.gmra.mrb[30].mxu1 %v12346_v21  ;;  %v3299_v21 = vld [vmem:[#allocation13 + $0x1d0] sm:$0xff] }
 0x3d6   :  { %2734 = vmatprep.mubr.f32.mxu1 %v12351_v33  ;;  %v3663_v33 = vld [vmem:[#allocation13 + $0x200] sm:$0xff] }
 0x3d7   :  { %10241 = vmatpush1.bf16.msra.mxu0 %v10240_v59  ;;  %v10303_v63 = vpack.c.bf16 %v3664_v1, %v3663_v33  ;;  %v10342_v59 = vpack.c.bf16 %v3690_v48, %v3689_v5  ;;  %v3693_v1 = vld [vmem:[#allocation13 + $0x2f0] sm:$0xff]  ;;  %v3248_v5 = vld [vmem:[#allocation13 + $0x48] sm:$0xff] }
 0x3d8   :  { %10242 = vmatprep.subr.bf16.mxu0 %v14874_v47 }
 0x3d9   :  { %2735 = vmatmul.mubr.f32.gmra.mrb[32].mxu1 %v12354_v0  ;;  %v10246_v0 = vpack.c.bf16 %v3300_v55, %v3299_v21  ;;  %v10252_v21 = vpack.c.bf16 %v3304_v37, %v3303_v29  ;;  %v3692_v55 = vld [vmem:[#allocation13 + $0x2e8] sm:$0xff] }
 0x3da   :  { %2740 = vmatprep.mubr.f32.mxu1 %v12357_v20  ;;  %v3302_v20 = vld [vmem:[#allocation13 + $0x1e8] sm:$0xff] }
 0x3db   :  { %10244 = vmatpush1.bf16.msra.mxu0 %v10243_v46  ;;  %v10249_v39 = vpack.c.bf16 %v3302_v20, %v3301_v62  ;;  %v3691_v46 = vld [vmem:[#allocation13 + $0x2e0] sm:$0xff]  ;;  %v2791_v20 = vld [vmem:[%s14950_s25] sm:$0x3] }
 0x3dc   :  { %10245 = vmatprep.subr.bf16.mxu0 %v14874_v47  ;;  %v10345_v33 = vpack.c.bf16 %v3692_v55, %v3691_v46 }
 0x3dd   :  { %2741 = vmatmul.mubr.f32.gmra.mrb[34].mxu1 %v12360_v60  ;;  %v3665_v60 = vld [vmem:[#allocation13 + $0x210] sm:$0xff] }
 0x3de   :  { %2746 = vmatprep.mubr.f32.mxu1 %v14938_v35  ;;  %v10306_v34 = vpack.c.bf16 %v3666_v18, %v3665_v60  ;;  %v14951_v60 = vld [vmem:[#allocation33_spill] sm:$0xff] }
 0x3df   :  { %10247 = vmatpush1.bf16.msra.mxu0 %v10246_v0  ;;  %v3694_v0 = vld [vmem:[#allocation13 + $0x2f8] sm:$0xff]  ;;  %v2796_v18 = vrot.slane %v2791_v20, %v14951_v60 }
 0x3e0   :  { %10248 = vmatprep.subr.bf16.mxu0 %v14874_v47  ;;  %v10348_v62 = vpack.c.bf16 %v3694_v0, %v3693_v1  ;;  %v3250_v1 = vld [vmem:[#allocation13 + $0x58] sm:$0xff] }
 0x3e1   :  { %2747 = vmatmul.mubr.f32.gmra.mrb[36].mxu1 %v14938_v35 }
 0x3e2   :  { %2968 = vmatprep.mubr.f32.mxu1 %v14938_v35 }
 0x3e3   :  { %10250 = vmatpush1.bf16.msra.mxu0 %v10249_v39 }
 0x3e4   :  { %10251 = vmatprep.subr.bf16.mxu0 %v14874_v47 }
 0x3e5   :  { %2969 = vmatmul.mubr.f32.vlgmr.msra.gmra.mrb[0].mxu1 %v11917_v50  ;;  %v3669_v50 = vld [vmem:[#allocation13 + $0x230] sm:$0xff] }
 0x3e6   :  { %2974 = vmatprep.mubr.f32.mxu1 %v14938_v35  ;;  %10304 = vmatpush1.bf16.msra.mxu1 %v10303_v63  ;;  %v10312_v44 = vpack.c.bf16 %v3670_v22, %v3669_v50  ;;  %v2892_v63 = vld [vmem:[%s14830_s8] sm:$0x3] }
 0x3e7   :  { %10305 = vmatprep.subr.bf16.mxu1 %v14874_v47  ;;  %10253 = vmatpush1.bf16.msra.mxu0 %v10252_v21  ;;  %v2897_v39 = vrot.slane %v2892_v63, %v14951_v60 }
 0x3e8   :  { %10254 = vmatprep.subr.bf16.mxu0 %v14874_v47 }
 0x3e9   :  { %2975 = vmatmul.mubr.f32.gmra.mrb[2].mxu1 %v11939_v8  ;;  %v3672_v8 = vld [vmem:[#allocation13 + $0x248] sm:$0xff] }
 0x3ea   :  { %2980 = vmatprep.mubr.f32.mxu1 %v14938_v35  ;;  %10307 = vmatpush1.bf16.msra.mxu1 %v10306_v34  ;;  %v10315_v7 = vpack.c.bf16 %v3672_v8, %v3671_v11  ;;  %v14952_v34 = vld [vmem:[#allocation34_spill] sm:$0xff] }
 0x3eb   :  { %10308 = vmatprep.subr.bf16.mxu1 %v14874_v47  ;;  %v2800_v9 = vrot.slane %v2791_v20, %v14952_v34  ;;  %v2901_v36 = vrot.slane %v2892_v63, %v14952_v34  ;;  %v3239_v8 = vld [vmem:[#allocation13] sm:$0xff] }
 0x3ec   :  { %v3251_v34 = vld [vmem:[#allocation13 + $0x60] sm:$0xff] }
 0x3ed   :  { %2981 = vmatmul.mubr.f32.gmra.mrb[4].mxu1 %v11953_v28  ;;  %v10318_v28 = vpack.c.bf16 %v3674_v52, %v3673_v61  ;;  %v12523_v50 = vadd.f32 %v2901_v36, %v2800_v9  ;;  %v3252_v9 = vld [vmem:[#allocation13 + $0x68] sm:$0xff] }
 0x3ee   :  { %2986 = vmatprep.mubr.f32.mxu1 %v14938_v35  ;;  %10310 = vmatpush1.bf16.msra.mxu1 %v10309_v25  ;;  %v12521_v25 = vadd.f32 %v2897_v39, %v2796_v18 }
 0x3ef   :  { %10311 = vmatprep.subr.bf16.mxu1 %v14874_v47 }
 0x3f1   :  { %2987 = vmatmul.mubr.f32.gmra.mrb[6].mxu1 %v11968_v19  ;;  %v10321_v19 = vpack.c.bf16 %v3676_v17, %v3675_v31 }
 0x3f2   :  { %2992 = vmatprep.mubr.f32.mxu1 %v14938_v35  ;;  %10313 = vmatpush1.bf16.msra.mxu1 %v10312_v44 }
 0x3f3   :  { %10314 = vmatprep.subr.bf16.mxu1 %v14874_v47 }
 0x3f5   :  { %2993 = vmatmul.mubr.f32.gmra.mrb[8].mxu1 %v11983_v43  ;;  %v10324_v43 = vpack.c.bf16 %v3678_v56, %v3677_v2  ;;  %v3241_v56 = vld [vmem:[#allocation13 + $0x10] sm:$0xff] }
 0x3f6   :  { %2998 = vmatprep.mubr.f32.mxu1 %v14938_v35  ;;  %10316 = vmatpush1.bf16.msra.mxu1 %v10315_v7  ;;  %v3240_v7 = vld [vmem:[#allocation13 + $0x8] sm:$0xff] }
 0x3f7   :  { %10317 = vmatprep.subr.bf16.mxu1 %v14874_v47  ;;  %v10255_v31 = vpack.c.bf16 %v3240_v7, %v3239_v8 }
 0x3f9   :  { %2999 = vmatmul.mubr.f32.gmra.mrb[10].mxu1 %v11994_v16  ;;  %v10327_v16 = vpack.c.bf16 %v3680_v24, %v3679_v6 }
 0x3fa   :  { %3004 = vmatprep.mubr.f32.mxu1 %v14938_v35  ;;  %10319 = vmatpush1.bf16.msra.mxu1 %v10318_v28 }
 0x3fb   :  { %10320 = vmatprep.subr.bf16.mxu1 %v14874_v47 }
 0x3fd   :  { %3005 = vmatmul.mubr.f32.gmra.mrb[12].mxu1 %v12003_v32  ;;  %v10330_v32 = vpack.c.bf16 %v3682_v13, %v3681_v45 }
 0x3fe   :  { %3010 = vmatprep.mubr.f32.mxu1 %v14938_v35  ;;  %10322 = vmatpush1.bf16.msra.mxu1 %v10321_v19 }
 0x3ff   :  { %10323 = vmatprep.subr.bf16.mxu1 %v14874_v47 }
 0x401   :  { %3011 = vmatmul.mubr.f32.gmra.mrb[14].mxu1 %v12014_v57  ;;  %v10333_v57 = vpack.c.bf16 %v3684_v51, %v3683_v23  ;;  %v3243_v23 = vld [vmem:[#allocation13 + $0x20] sm:$0xff]  ;;  %v3244_v51 = vld [vmem:[#allocation13 + $0x28] sm:$0xff] }
 0x402   :  { %3016 = vmatprep.mubr.f32.mxu1 %v14938_v35  ;;  %10325 = vmatpush1.bf16.msra.mxu1 %v10324_v43  ;;  %v3242_v43 = vld [vmem:[#allocation13 + $0x18] sm:$0xff]  ;;  %v10261_v54 = vpack.c.bf16 %v3244_v51, %v3243_v23 }
 0x403   :  { %10326 = vmatprep.subr.bf16.mxu1 %v14874_v47  ;;  %v10258_v45 = vpack.c.bf16 %v3242_v43, %v3241_v56 }
 0x405   :  { %3017 = vmatmul.mubr.f32.gmra.mrb[16].mxu1 %v14939_v58 }
 0x406   :  { %3022 = vmatprep.mubr.f32.mxu1 %v14938_v35  ;;  %10328 = vmatpush1.bf16.msra.mxu1 %v10327_v16 }
 0x407   :  { %10329 = vmatprep.subr.bf16.mxu1 %v14874_v47 }
 0x409   :  { %3023 = vmatmul.mubr.f32.gmra.mrb[18].mxu1 %v14940_v26 }
 0x40a   :  { %3028 = vmatprep.mubr.f32.mxu1 %v14938_v35  ;;  %10331 = vmatpush1.bf16.msra.mxu1 %v10330_v32 }
 0x40b   :  { %10332 = vmatprep.subr.bf16.mxu1 %v14874_v47 }
 0x40d   :  { %3029 = vmatmul.mubr.f32.gmra.mrb[20].mxu1 %v14941_v49 }
 0x40e   :  { %3034 = vmatprep.mubr.f32.mxu1 %v14938_v35  ;;  %10334 = vmatpush1.bf16.msra.mxu1 %v10333_v57 }
 0x40f   :  { %10335 = vmatprep.subr.bf16.mxu1 %v14874_v47 }
 0x411   :  { %3035 = vmatmul.mubr.f32.gmra.mrb[22].mxu1 %v14942_v41  ;;  %v3246_v41 = vld [vmem:[#allocation13 + $0x38] sm:$0xff] }
 0x412   :  { %3040 = vmatprep.mubr.f32.mxu1 %v14938_v35  ;;  %10337 = vmatpush1.bf16.msra.mxu1 %v10336_v4 }
 0x413   :  { %10338 = vmatprep.subr.bf16.mxu1 %v14874_v47 }
 0x415   :  { %3041 = vmatmul.mubr.f32.gmra.mrb[24].mxu1 %v14943_v38 }
 0x416   :  { %3046 = vmatprep.mubr.f32.mxu1 %v14938_v35  ;;  %10340 = vmatpush1.bf16.msra.mxu1 %v10339_v53 }
 0x417   :  { %10341 = vmatprep.subr.bf16.mxu1 %v14874_v47 }
 0x419   :  { %3047 = vmatmul.mubr.f32.gmra.mrb[26].mxu1 %v14944_v14 }
 0x41a   :  { %3052 = vmatprep.mubr.f32.mxu1 %v14938_v35  ;;  %10343 = vmatpush1.bf16.msra.mxu1 %v10342_v59 }
 0x41b   :  { %10344 = vmatprep.subr.bf16.mxu1 %v14874_v47 }
 0x41d   :  { %3053 = vmatmul.mubr.f32.gmra.mrb[28].mxu1 %v14945_v15  ;;  %v10264_v15 = vpack.c.bf16 %v3246_v41, %v3245_v3  ;;  %v3257_v3 = vld [vmem:[#allocation13 + $0x90] sm:$0xff]  ;;  %v3258_v41 = vld [vmem:[#allocation13 + $0x98] sm:$0xff] }
 0x41e   :  { %3058 = vmatprep.mubr.f32.mxu1 %v14938_v35  ;;  %10346 = vmatpush1.bf16.msra.mxu1 %v10345_v33  ;;  %v3249_v33 = vld [vmem:[#allocation13 + $0x50] sm:$0xff] }
 0x41f   :  { %10347 = vmatprep.subr.bf16.mxu1 %v14874_v47  ;;  %v10270_v63 = vpack.c.bf16 %v3250_v1, %v3249_v33 }
 0x421   :  { %3059 = vmatmul.mubr.f32.gmra.mrb[30].mxu1 %v14946_v12 }
 0x422   :  { %3064 = vmatprep.mubr.f32.mxu1 %v14938_v35  ;;  %10349 = vmatpush1.bf16.msra.mxu1 %v10348_v62 }
 0x423   :  { %10470 = vmatprep.subr.bf16.mxu1 %v14874_v47 }
 0x425   :  { %3065 = vmatmul.mubr.f32.gmra.mrb[32].mxu1 %v14947_v27 }
 0x426   :  { %3070 = vmatprep.mubr.f32.mxu1 %v14938_v35 }
 0x429   :  { %3071 = vmatmul.mubr.f32.gmra.mrb[34].mxu1 %v14948_v40 }
 0x42a   :  { %3076 = vmatprep.mubr.f32.mxu1 %v14938_v35 }
 0x42d   :  { %3077 = vmatmul.mubr.f32.gmra.mrb[36].mxu1 %v14949_v42  ;;  %v3247_v42 = vld [vmem:[#allocation13 + $0x40] sm:$0xff] }
 0x42e   :  { %v10267_v37 = vpack.c.bf16 %v3248_v5, %v3247_v42 }
 0x4b8   :  { %v2970_v22 = vpop.f32.mrb[0].mxu1 }
 0x4b9   :  { %v10831_v44 = vadd.f32 %v12521_v25, %v2970_v22  ;;  %v2972_v11 = vpop.f32.mrb[1].mxu1 }
 0x4ba   :  { %v10833_v61 = vadd.f32 %v12523_v50, %v2972_v11  ;;  %v10273_v11 = vpack.c.bf16 %v3252_v9, %v3251_v34 }
 0x4bb   :  { %v12529_v17 = vmax.f32 %v10831_v44, 0.0 }
 0x4bc   :  { %v12527_v52 = vmax.f32 %v10833_v61, 0.0  ;;  %v2976_v28 = vpop.f32.mrb[2].mxu1 }
 0x4bd   :  { %v10835_v19 = vadd.f32 %v12521_v25, %v2976_v28  ;;  %v2978_v2 = vpop.f32.mrb[3].mxu1  ;;  %v3253_v28 = vld [vmem:[#allocation13 + $0x70] sm:$0xff] }
 0x4be   :  { %v10837_v6 = vadd.f32 %v12523_v50, %v2978_v2  ;;  %3369 = vmatprep.mubr.f32.mxu0 %v12527_v52 }
 0x4bf   :  { %3370 = vmatmul.mubr.f32.vlgmr.msra.gmra.mrb[38].mxu0 %v12529_v17  ;;  %v12537_v13 = vmax.f32 %v10835_v19, 0.0 }
 0x4c0   :  { %v12535_v24 = vmax.f32 %v10837_v6, 0.0  ;;  %10256 = vmatpush1.bf16.msra.mxu0 %v10255_v31  ;;  %v2982_v16 = vpop.f32.mrb[4].mxu1  ;;  %v3254_v31 = vld [vmem:[#allocation13 + $0x78] sm:$0xff] }
 0x4c1   :  { %v10839_v58 = vadd.f32 %v12521_v25, %v2982_v16  ;;  %v2984_v32 = vpop.f32.mrb[5].mxu1  ;;  %10257 = vmatprep.subr.bf16.mxu0 %v14874_v47  ;;  %v10276_v43 = vpack.c.bf16 %v3254_v31, %v3253_v28  ;;  %v3264_v28 = vld [vmem:[#allocation13 + $0xc8] sm:$0xff] }
 0x4c2   :  { %v10841_v26 = vadd.f32 %v12523_v50, %v2984_v32  ;;  %3374 = vmatprep.mubr.f32.mxu0 %v12535_v24  ;;  %3759 = vmatprep.mubr.f32.mxu1 %v12535_v24  ;;  %v3256_v32 = vld [vmem:[#allocation13 + $0x88] sm:$0xff] }
 0x4c3   :  { %3375 = vmatmul.mubr.f32.gmra.mrb[40].mxu0 %v12537_v13  ;;  %3760 = vmatmul.mubr.f32.vlgmr.msra.gmra.mrb[38].mxu1 %v12537_v13  ;;  %v12548_v49 = vmax.f32 %v10839_v58, 0.0  ;;  %v3255_v58 = vld [vmem:[#allocation13 + $0x80] sm:$0xff] }
 0x4c4   :  { %v12546_v57 = vmax.f32 %v10841_v26, 0.0  ;;  %v2988_v10 = vpop.f32.mrb[6].mxu1  ;;  %10259 = vmatpush1.bf16.msra.mxu0 %v10258_v45 }
 0x4c5   :  { %v10843_v4 = vadd.f32 %v12521_v25, %v2988_v10  ;;  %v2990_v30 = vpop.f32.mrb[7].mxu1  ;;  %10260 = vmatprep.subr.bf16.mxu0 %v14874_v47  ;;  %v10279_v10 = vpack.c.bf16 %v3256_v32, %v3255_v58  ;;  %v3265_v32 = vld [vmem:[#allocation13 + $0xd0] sm:$0xff] }
 0x4c6   :  { %v10845_v53 = vadd.f32 %v12523_v50, %v2990_v30  ;;  %3379 = vmatprep.mubr.f32.mxu0 %v12546_v57  ;;  %3764 = vmatprep.mubr.f32.mxu1 %v12546_v57 }
 0x4c7   :  { %3380 = vmatmul.mubr.f32.gmra.mrb[42].mxu0 %v12548_v49  ;;  %3765 = vmatmul.mubr.f32.gmra.mrb[40].mxu1 %v12548_v49  ;;  %v12559_v12 = vmax.f32 %v10843_v4, 0.0 }
 0x4c8   :  { %v12557_v38 = vmax.f32 %v10845_v53, 0.0  ;;  %v2994_v14 = vpop.f32.mrb[8].mxu1  ;;  %10262 = vmatpush1.bf16.msra.mxu0 %v10261_v54 }
 0x4c9   :  { %v10847_v27 = vadd.f32 %v12521_v25, %v2994_v14  ;;  %v2996_v40 = vpop.f32.mrb[9].mxu1  ;;  %10263 = vmatprep.subr.bf16.mxu0 %v14874_v47 }
 0x4ca   :  { %v10849_v48 = vadd.f32 %v12523_v50, %v2996_v40  ;;  %3384 = vmatprep.mubr.f32.mxu0 %v12557_v38  ;;  %3769 = vmatprep.mubr.f32.mxu1 %v12557_v38 }
 0x4cb   :  { %3385 = vmatmul.mubr.f32.gmra.mrb[44].mxu0 %v12559_v12  ;;  %3770 = vmatmul.mubr.f32.gmra.mrb[42].mxu1 %v12559_v12  ;;  %v12570_v46 = vmax.f32 %v10847_v27, 0.0  ;;  %v10282_v27 = vpack.c.bf16 %v3258_v41, %v3257_v3 }
 0x4cc   :  { %v12568_v59 = vmax.f32 %v10849_v48, 0.0  ;;  %v3000_v29 = vpop.f32.mrb[10].mxu1  ;;  %10265 = vmatpush1.bf16.msra.mxu0 %v10264_v15  ;;  %v3259_v48 = vld [vmem:[#allocation13 + $0xa0] sm:$0xff] }
 0x4cd   :  { %14953 = vst [vmem:[#allocation22_spill] sm:$0xff] %v12570_v46  ;;  %v10851_v21 = vadd.f32 %v12521_v25, %v3000_v29  ;;  %v3002_v55 = vpop.f32.mrb[11].mxu1  ;;  %10266 = vmatprep.subr.bf16.mxu0 %v14874_v47  ;;  %v3260_v29 = vld [vmem:[#allocation13 + $0xa8] sm:$0xff] }
 0x4ce   :  { %v10853_v0 = vadd.f32 %v12523_v50, %v3002_v55  ;;  %3389 = vmatprep.mubr.f32.mxu0 %v12568_v59  ;;  %3774 = vmatprep.mubr.f32.mxu1 %v12568_v59  ;;  %v10285_v33 = vpack.c.bf16 %v3260_v29, %v3259_v48 }
 0x4cf   :  { %3390 = vmatmul.mubr.f32.gmra.mrb[46].mxu0 %v12570_v46  ;;  %3775 = vmatmul.mubr.f32.gmra.mrb[44].mxu1 %v12570_v46  ;;  %v12581_v60 = vmax.f32 %v10851_v21, 0.0 }
 0x4d0   :  { %v12579_v62 = vmax.f32 %v10853_v0, 0.0  ;;  %v3006_v20 = vpop.f32.mrb[12].mxu1  ;;  %10268 = vmatpush1.bf16.msra.mxu0 %v10267_v37 }
 0x4d1   :  { %14955 = vst [vmem:[#allocation24_spill] sm:$0xff] %v12581_v60  ;;  %v10855_v18 = vadd.f32 %v12521_v25, %v3006_v20  ;;  %v3008_v39 = vpop.f32.mrb[13].mxu1  ;;  %10269 = vmatprep.subr.bf16.mxu0 %v14874_v47 }
 0x4d2   :  { %14954 = vst [vmem:[#allocation23_spill] sm:$0xff] %v12579_v62  ;;  %v10857_v36 = vadd.f32 %v12523_v50, %v3008_v39  ;;  %3394 = vmatprep.mubr.f32.mxu0 %v12579_v62  ;;  %3779 = vmatprep.mubr.f32.mxu1 %v12579_v62 }
 0x4d3   :  { %3395 = vmatmul.mubr.f32.gmra.mrb[48].mxu0 %v12581_v60  ;;  %3780 = vmatmul.mubr.f32.gmra.mrb[46].mxu1 %v12581_v60  ;;  %v12592_v8 = vmax.f32 %v10855_v18, 0.0  ;;  %v3262_v18 = vld [vmem:[#allocation13 + $0xb8] sm:$0xff] }
 0x4d4   :  { %v12590_v22 = vmax.f32 %v10857_v36, 0.0  ;;  %v3012_v44 = vpop.f32.mrb[14].mxu1  ;;  %10271 = vmatpush1.bf16.msra.mxu0 %v10270_v63  ;;  %v3261_v63 = vld [vmem:[#allocation13 + $0xb0] sm:$0xff] }
 0x4d5   :  { %14957 = vst [vmem:[#allocation26_spill] sm:$0xff] %v12592_v8  ;;  %v10859_v7 = vadd.f32 %v12521_v25, %v3012_v44  ;;  %v3014_v61 = vpop.f32.mrb[15].mxu1  ;;  %10272 = vmatprep.subr.bf16.mxu0 %v14874_v47  ;;  %v10288_v36 = vpack.c.bf16 %v3262_v18, %v3261_v63 }
 0x4d6   :  { %14956 = vst [vmem:[#allocation25_spill] sm:$0xff] %v12590_v22  ;;  %v10861_v19 = vadd.f32 %v12523_v50, %v3014_v61  ;;  %3399 = vmatprep.mubr.f32.mxu0 %v12590_v22  ;;  %3784 = vmatprep.mubr.f32.mxu1 %v12590_v22  ;;  %v3263_v61 = vld [vmem:[#allocation13 + $0xc0] sm:$0xff] }
 0x4d7   :  { %3400 = vmatmul.mubr.f32.gmra.mrb[50].mxu0 %v12592_v8  ;;  %3785 = vmatmul.mubr.f32.gmra.mrb[48].mxu1 %v12592_v8  ;;  %v12603_v6 = vmax.f32 %v10859_v7, 0.0 }
 0x4d8   :  { %v12601_v2 = vmax.f32 %v10861_v19, 0.0  ;;  %v3018_v56 = vpop.f32.mrb[16].mxu1  ;;  %10274 = vmatpush1.bf16.msra.mxu0 %v10273_v11 }
 0x4d9   :  { %14959 = vst [vmem:[#allocation28_spill] sm:$0xff] %v12603_v6  ;;  %v10863_v16 = vadd.f32 %v12521_v25, %v3018_v56  ;;  %v3020_v45 = vpop.f32.mrb[17].mxu1  ;;  %10275 = vmatprep.subr.bf16.mxu0 %v14874_v47 }
 0x4da   :  { %14958 = vst [vmem:[#allocation27_spill] sm:$0xff] %v12601_v2  ;;  %v10865_v23 = vadd.f32 %v12523_v50, %v3020_v45  ;;  %3404 = vmatprep.mubr.f32.mxu0 %v12601_v2  ;;  %3789 = vmatprep.mubr.f32.mxu1 %v12601_v2 }
 0x4db   :  { %3405 = vmatmul.mubr.f32.gmra.mrb[52].mxu0 %v12603_v6  ;;  %3790 = vmatmul.mubr.f32.gmra.mrb[50].mxu1 %v12603_v6  ;;  %v12614_v54 = vmax.f32 %v10863_v16, 0.0 }
 0x4dc   :  { %v12612_v51 = vmax.f32 %v10865_v23, 0.0  ;;  %v3024_v26 = vpop.f32.mrb[18].mxu1  ;;  %10277 = vmatpush1.bf16.msra.mxu0 %v10276_v43  ;;  %v10291_v43 = vpack.c.bf16 %v3264_v28, %v3263_v61  ;;  %v3266_v23 = vld [vmem:[#allocation13 + $0xd8] sm:$0xff] }
 0x4dd   :  { %14961 = vst [vmem:[#allocation30_spill] sm:$0xff] %v12614_v54  ;;  %v10867_v4 = vadd.f32 %v12521_v25, %v3024_v26  ;;  %v3026_v30 = vpop.f32.mrb[19].mxu1  ;;  %10278 = vmatprep.subr.bf16.mxu0 %v14874_v47 }
 0x4de   :  { %14960 = vst [vmem:[#allocation29_spill] sm:$0xff] %v12612_v51  ;;  %v10869_v53 = vadd.f32 %v12523_v50, %v3026_v30  ;;  %3409 = vmatprep.mubr.f32.mxu0 %v12612_v51  ;;  %3794 = vmatprep.mubr.f32.mxu1 %v12612_v51  ;;  %v10294_v30 = vpack.c.bf16 %v3266_v23, %v3265_v32 }
 0x4df   :  { %3410 = vmatmul.mubr.f32.gmra.mrb[54].mxu0 %v12614_v54  ;;  %3795 = vmatmul.mubr.f32.gmra.mrb[52].mxu1 %v12614_v54  ;;  %v12625_v40 = vmax.f32 %v10867_v4, 0.0 }
 0x4e0   :  { %v12623_v14 = vmax.f32 %v10869_v53, 0.0  ;;  %v3030_v15 = vpop.f32.mrb[20].mxu1  ;;  %10280 = vmatpush1.bf16.msra.mxu0 %v10279_v10 }
 0x4e1   :  { %14963 = vst [vmem:[#allocation32_spill] sm:$0xff] %v12625_v40  ;;  %v10871_v42 = vadd.f32 %v12521_v25, %v3030_v15  ;;  %v3032_v5 = vpop.f32.mrb[21].mxu1  ;;  %10281 = vmatprep.subr.bf16.mxu0 %v14874_v47  ;;  %v3267_v15 = vld [vmem:[#allocation13 + $0xe0] sm:$0xff] }
 0x4e2   :  { %14962 = vst [vmem:[#allocation31_spill] sm:$0xff] %v12623_v14  ;;  %v10873_v37 = vadd.f32 %v12523_v50, %v3032_v5  ;;  %3414 = vmatprep.mubr.f32.mxu0 %v12623_v14  ;;  %3799 = vmatprep.mubr.f32.mxu1 %v12623_v14 }
 0x4e3   :  { %3415 = vmatmul.mubr.f32.gmra.mrb[56].mxu0 %v12625_v40  ;;  %3800 = vmatmul.mubr.f32.gmra.mrb[54].mxu1 %v12625_v40  ;;  %v12636_v1 = vmax.f32 %v10871_v42, 0.0 }
 0x4e4   :  { %v12634_v21 = vmax.f32 %v10873_v37, 0.0  ;;  %v3036_v55 = vpop.f32.mrb[22].mxu1  ;;  %10283 = vmatpush1.bf16.msra.mxu0 %v10282_v27  ;;  %v3268_v27 = vld [vmem:[#allocation13 + $0xe8] sm:$0xff] }
 0x4e5   :  { %14965 = vst [vmem:[#allocation34_spill] sm:$0xff] %v12636_v1  ;;  %v10875_v0 = vadd.f32 %v12521_v25, %v3036_v55  ;;  %v3038_v20 = vpop.f32.mrb[23].mxu1  ;;  %10284 = vmatprep.subr.bf16.mxu0 %v14874_v47  ;;  %v10297_v29 = vpack.c.bf16 %v3268_v27, %v3267_v15 }
 0x4e6   :  { %14964 = vst [vmem:[#allocation33_spill] sm:$0xff] %v12634_v21  ;;  %v10877_v39 = vadd.f32 %v12523_v50, %v3038_v20  ;;  %3419 = vmatprep.mubr.f32.mxu0 %v12634_v21  ;;  %3804 = vmatprep.mubr.f32.mxu1 %v12634_v21  ;;  %v3270_v20 = vld [vmem:[#allocation13 + $0xf8] sm:$0xff] }
 0x4e7   :  { %3420 = vmatmul.mubr.f32.gmra.mrb[58].mxu0 %v12636_v1  ;;  %3805 = vmatmul.mubr.f32.gmra.mrb[56].mxu1 %v12636_v1  ;;  %v12647_v44 = vmax.f32 %v10875_v0, 0.0  ;;  %v3269_v0 = vld [vmem:[#allocation13 + $0xf0] sm:$0xff] }
 0x4e8   :  { %v12645_v34 = vmax.f32 %v10877_v39, 0.0  ;;  %v3042_v9 = vpop.f32.mrb[24].mxu1  ;;  %10286 = vmatpush1.bf16.msra.mxu0 %v10285_v33 }
 0x4e9   :  { %14967 = vst [vmem:[#allocation36_spill] sm:$0xff] %v12647_v44  ;;  %v10879_v11 = vadd.f32 %v12521_v25, %v3042_v9  ;;  %v3044_v7 = vpop.f32.mrb[25].mxu1  ;;  %10287 = vmatprep.subr.bf16.mxu0 %v14874_v47  ;;  %v10300_v9 = vpack.c.bf16 %v3270_v20, %v3269_v0  ;;  %v4018_v20 = vld [vmem:[#allocation15 + $0xb0] sm:$0xff] }
 0x4ea   :  { %14966 = vst [vmem:[#allocation35_spill] sm:$0xff] %v12645_v34  ;;  %v10881_v31 = vadd.f32 %v12523_v50, %v3044_v7  ;;  %3424 = vmatprep.mubr.f32.mxu0 %v12645_v34  ;;  %3809 = vmatprep.mubr.f32.mxu1 %v12645_v34 }
 0x4eb   :  { %3425 = vmatmul.mubr.f32.gmra.mrb[60].mxu0 %v12647_v44  ;;  %3810 = vmatmul.mubr.f32.gmra.mrb[58].mxu1 %v12647_v44  ;;  %v12658_v16 = vmax.f32 %v10879_v11, 0.0 }
 0x4ec   :  { %v12656_v19 = vmax.f32 %v10881_v31, 0.0  ;;  %v3048_v56 = vpop.f32.mrb[26].mxu1  ;;  %10289 = vmatpush1.bf16.msra.mxu0 %v10288_v36 }
 0x4ed   :  { %14969 = vst [vmem:[#allocation38_spill] sm:$0xff] %v12658_v16  ;;  %v10883_v45 = vadd.f32 %v12521_v25, %v3048_v56  ;;  %v3050_v58 = vpop.f32.mrb[27].mxu1  ;;  %10290 = vmatprep.subr.bf16.mxu0 %v14874_v47 }
 0x4ee   :  { %14968 = vst [vmem:[#allocation37_spill] sm:$0xff] %v12656_v19  ;;  %v10885_v26 = vadd.f32 %v12523_v50, %v3050_v58  ;;  %3429 = vmatprep.mubr.f32.mxu0 %v12656_v19  ;;  %3814 = vmatprep.mubr.f32.mxu1 %v12656_v19 }
 0x4ef   :  { %3430 = vmatmul.mubr.f32.gmra.mrb[62].mxu0 %v12658_v16  ;;  %3815 = vmatmul.mubr.f32.gmra.mrb[60].mxu1 %v12658_v16  ;;  %v12669_v3 = vmax.f32 %v10883_v45, 0.0 }
 0x4f0   :  { %v12667_v10 = vmax.f32 %v10885_v26, 0.0  ;;  %v3054_v4 = vpop.f32.mrb[28].mxu1  ;;  %10292 = vmatpush1.bf16.msra.mxu0 %v10291_v43 }
 0x4f1   :  { %14971 = vst [vmem:[#allocation40_spill] sm:$0xff] %v12669_v3  ;;  %v10887_v41 = vadd.f32 %v12521_v25, %v3054_v4  ;;  %v3056_v53 = vpop.f32.mrb[29].mxu1  ;;  %10293 = vmatprep.subr.bf16.mxu0 %v14874_v47 }
 0x4f2   :  { %14970 = vst [vmem:[#allocation39_spill] sm:$0xff] %v12667_v10  ;;  %v10889_v42 = vadd.f32 %v12523_v50, %v3056_v53  ;;  %3434 = vmatprep.mubr.f32.mxu0 %v12667_v10  ;;  %3819 = vmatprep.mubr.f32.mxu1 %v12667_v10 }
 0x4f3   :  { %3435 = vmatmul.mubr.f32.gmra.mrb[64].mxu0 %v12669_v3  ;;  %3820 = vmatmul.mubr.f32.gmra.mrb[62].mxu1 %v12669_v3  ;;  %v12680_v37 = vmax.f32 %v10887_v41, 0.0 }
 0x4f4   :  { %v12678_v5 = vmax.f32 %v10889_v42, 0.0  ;;  %v3060_v48 = vpop.f32.mrb[30].mxu1  ;;  %10295 = vmatpush1.bf16.msra.mxu0 %v10294_v30  ;;  %v4014_v42 = vld [vmem:[#allocation15 + $0x90] sm:$0xff] }
 0x4f5   :  { %14973 = vst [vmem:[#allocation42_spill] sm:$0xff] %v12680_v37  ;;  %v10891_v55 = vadd.f32 %v12521_v25, %v3060_v48  ;;  %v3062_v33 = vpop.f32.mrb[31].mxu1  ;;  %10296 = vmatprep.subr.bf16.mxu0 %v14874_v47  ;;  %v4015_v48 = vld [vmem:[#allocation15 + $0x98] sm:$0xff] }
 0x4f6   :  { %14972 = vst [vmem:[#allocation41_spill] sm:$0xff] %v12678_v5  ;;  %v10893_v63 = vadd.f32 %v12523_v50, %v3062_v33  ;;  %3439 = vmatprep.mubr.f32.mxu0 %v12678_v5  ;;  %3824 = vmatprep.mubr.f32.mxu1 %v12678_v5  ;;  %v4017_v33 = vld [vmem:[#allocation15 + $0xa8] sm:$0xff] }
 0x4f7   :  { %3440 = vmatmul.mubr.f32.gmra.mrb[66].mxu0 %v12680_v37  ;;  %3825 = vmatmul.mubr.f32.gmra.mrb[64].mxu1 %v12680_v37  ;;  %v12691_v36 = vmax.f32 %v10891_v55, 0.0  ;;  %v4016_v55 = vld [vmem:[#allocation15 + $0xa0] sm:$0xff] }
 0x4f8   :  { %v12689_v18 = vmax.f32 %v10893_v63, 0.0  ;;  %v3066_v39 = vpop.f32.mrb[32].mxu1  ;;  %10298 = vmatpush1.bf16.msra.mxu0 %v10297_v29  ;;  %v10354_v29 = vpack.c.bf16 %v4015_v48, %v4014_v42  ;;  %v10357_v0 = vpack.c.bf16 %v4017_v33, %v4016_v55  ;;  %v4019_v63 = vld [vmem:[#allocation15 + $0xb8] sm:$0xff] }
 0x4f9   :  { %14975 = vst [vmem:[#allocation44_spill] sm:$0xff] %v12691_v36  ;;  %v10895_v11 = vadd.f32 %v12521_v25, %v3066_v39  ;;  %v3068_v7 = vpop.f32.mrb[33].mxu1  ;;  %10299 = vmatprep.subr.bf16.mxu0 %v14874_v47  ;;  %v10360_v39 = vpack.c.bf16 %v4019_v63, %v4018_v20 }
 0x4fa   :  { %14974 = vst [vmem:[#allocation43_spill] sm:$0xff] %v12689_v18  ;;  %v10897_v61 = vadd.f32 %v12523_v50, %v3068_v7  ;;  %3444 = vmatprep.mubr.f32.mxu0 %v12689_v18  ;;  %3829 = vmatprep.mubr.f32.mxu1 %v12689_v18 }
 0x4fb   :  { %3445 = vmatmul.mubr.f32.gmra.mrb[68].mxu0 %v12691_v36  ;;  %3830 = vmatmul.mubr.f32.gmra.mrb[66].mxu1 %v12691_v36  ;;  %v12702_v56 = vmax.f32 %v10895_v11, 0.0  ;;  %v4021_v11 = vld [vmem:[#allocation15 + $0xc8] sm:$0xff] }
 0x4fc   :  { %v12700_v28 = vmax.f32 %v10897_v61, 0.0  ;;  %v3072_v31 = vpop.f32.mrb[34].mxu1  ;;  %10301 = vmatpush1.bf16.msra.mxu0 %v10300_v9  ;;  %v4020_v9 = vld [vmem:[#allocation15 + $0xc0] sm:$0xff]  ;;  %v4022_v61 = vld [vmem:[#allocation15 + $0xd0] sm:$0xff] }
 0x4fd   :  { %14977 = vst [vmem:[#allocation46_spill] sm:$0xff] %v12702_v56  ;;  %v10899_v43 = vadd.f32 %v12521_v25, %v3072_v31  ;;  %v3074_v45 = vpop.f32.mrb[35].mxu1  ;;  %10350 = vmatprep.subr.bf16.mxu0 %v14874_v47  ;;  %v10363_v7 = vpack.c.bf16 %v4021_v11, %v4020_v9  ;;  %v4023_v31 = vld [vmem:[#allocation15 + $0xd8] sm:$0xff] }
 0x4fe   :  { %14976 = vst [vmem:[#allocation45_spill] sm:$0xff] %v12700_v28  ;;  %v10901_v58 = vadd.f32 %v12523_v50, %v3074_v45  ;;  %3449 = vmatprep.mubr.f32.mxu0 %v12700_v28  ;;  %3834 = vmatprep.mubr.f32.mxu1 %v12700_v28  ;;  %v4024_v45 = vld [vmem:[#allocation15 + $0xe0] sm:$0xff] }
 0x4ff   :  { %3450 = vmatmul.mubr.f32.gmra.mrb[70].mxu0 %v12702_v56  ;;  %3835 = vmatmul.mubr.f32.gmra.mrb[68].mxu1 %v12702_v56  ;;  %v12713_v26 = vmax.f32 %v10899_v43, 0.0  ;;  %v10366_v43 = vpack.c.bf16 %v4023_v31, %v4022_v61 }
 0x500   :  { %v12711_v32 = vmax.f32 %v10901_v58, 0.0  ;;  %v3078_v23 = vpop.f32.mrb[36].mxu1  ;;  %v4025_v58 = vld [vmem:[#allocation15 + $0xe8] sm:$0xff] }
 0x501   :  { %14979 = vst [vmem:[#allocation48_spill] sm:$0xff] %v12713_v26  ;;  %v10903_v4 = vadd.f32 %v12521_v25, %v3078_v23  ;;  %v3080_v30 = vpop.f32.mrb[37].mxu1  ;;  %v4012_v25 = vld [vmem:[#allocation15 + $0x80] sm:$0xff]  ;;  %v10369_v23 = vpack.c.bf16 %v4025_v58, %v4024_v45 }
 0x502   :  { %14978 = vst [vmem:[#allocation47_spill] sm:$0xff] %v12711_v32  ;;  %v10905_v41 = vadd.f32 %v12523_v50, %v3080_v30  ;;  %3454 = vmatprep.mubr.f32.mxu0 %v12711_v32  ;;  %3839 = vmatprep.mubr.f32.mxu1 %v12711_v32  ;;  %v4013_v50 = vld [vmem:[#allocation15 + $0x88] sm:$0xff]  ;;  %v4027_v30 = vld [vmem:[#allocation15 + $0xf8] sm:$0xff] }
 0x503   :  { %3455 = vmatmul.mubr.f32.gmra.mrb[72].mxu0 %v12713_v26  ;;  %3840 = vmatmul.mubr.f32.gmra.mrb[70].mxu1 %v12713_v26  ;;  %v12723_v15 = vmax.f32 %v10903_v4, 0.0  ;;  %v10351_v27 = vpack.c.bf16 %v4013_v50, %v4012_v25  ;;  %v4026_v4 = vld [vmem:[#allocation15 + $0xf0] sm:$0xff] }
 0x504   :  { %v12721_v53 = vmax.f32 %v10905_v41, 0.0  ;;  %v10372_v41 = vpack.c.bf16 %v4027_v30, %v4026_v4 }
 0x505   :  { %14981 = vst [vmem:[#allocation50_spill] sm:$0xff] %v12723_v15 }
 0x506   :  { %14980 = vst [vmem:[#allocation49_spill] sm:$0xff] %v12721_v53  ;;  %3459 = vmatprep.mubr.f32.mxu0 %v12721_v53  ;;  %3844 = vmatprep.mubr.f32.mxu1 %v12721_v53 }
 0x507   :  { %3460 = vmatmul.mubr.f32.gmra.mrb[74].mxu0 %v12723_v15  ;;  %3845 = vmatmul.mubr.f32.gmra.mrb[72].mxu1 %v12723_v15 }
 0x508   :  { %3529 = vmatprep.mubr.f32.mxu0 %v14938_v35  ;;  %3849 = vmatprep.mubr.f32.mxu1 %v14938_v35 }
 0x50b   :  { %3530 = vmatmul.mubr.f32.vlgmr.msra.gmra.mrb[76].mxu0 %v14938_v35  ;;  %3850 = vmatmul.mubr.f32.gmra.mrb[74].mxu1 %v14938_v35 }
 0x50c   :  { %3534 = vmatprep.mubr.f32.mxu0 %v12527_v52  ;;  %10352 = vmatpush3.bf16.msra.mxu0 %v10351_v27 }
 0x50d   :  { %10353 = vmatprep.subr.bf16.mxu0 %v14874_v47  ;;  %8982 = vmatprep.mubr.msk.f32.mxu1 %vm11573_vm9, %v14938_v35 }
 0x50f   :  { %3535 = vmatmul.mubr.f32.gmra.mrb[78].mxu0 %v12529_v17 }
 0x510   :  { %3539 = vmatprep.mubr.f32.mxu0 %v12535_v24  ;;  %10355 = vmatpush3.bf16.msra.mxu0 %v10354_v29 }
 0x511   :  { %10356 = vmatprep.subr.bf16.mxu0 %v14874_v47 }
 0x513   :  { %3540 = vmatmul.mubr.f32.gmra.mrb[80].mxu0 %v12537_v13 }
 0x514   :  { %3544 = vmatprep.mubr.f32.mxu0 %v12546_v57  ;;  %10358 = vmatpush3.bf16.msra.mxu0 %v10357_v0 }
 0x515   :  { %10359 = vmatprep.subr.bf16.mxu0 %v14874_v47 }
 0x517   :  { %3545 = vmatmul.mubr.f32.gmra.mrb[82].mxu0 %v12548_v49 }
 0x518   :  { %3549 = vmatprep.mubr.f32.mxu0 %v12557_v38  ;;  %10361 = vmatpush3.bf16.msra.mxu0 %v10360_v39 }
 0x519   :  { %10362 = vmatprep.subr.bf16.mxu0 %v14874_v47 }
 0x51b   :  { %3550 = vmatmul.mubr.f32.gmra.mrb[84].mxu0 %v12559_v12 }
 0x51c   :  { %3554 = vmatprep.mubr.f32.mxu0 %v12568_v59  ;;  %10364 = vmatpush3.bf16.msra.mxu0 %v10363_v7 }
 0x51d   :  { %10365 = vmatprep.subr.bf16.mxu0 %v14874_v47 }
 0x51f   :  { %3555 = vmatmul.mubr.f32.gmra.mrb[86].mxu0 %v12570_v46 }
 0x520   :  { %3559 = vmatprep.mubr.f32.mxu0 %v12579_v62  ;;  %10367 = vmatpush3.bf16.msra.mxu0 %v10366_v43 }
 0x521   :  { %10368 = vmatprep.subr.bf16.mxu0 %v14874_v47 }
 0x523   :  { %3560 = vmatmul.mubr.f32.gmra.mrb[88].mxu0 %v12581_v60  ;;  %v3998_v60 = vld [vmem:[#allocation15 + $0x18] sm:$0xff] }
 0x524   :  { %3564 = vmatprep.mubr.f32.mxu0 %v12590_v22  ;;  %10370 = vmatpush3.bf16.msra.mxu0 %v10369_v23 }
 0x525   :  { %10371 = vmatprep.subr.bf16.mxu0 %v14874_v47 }
 0x527   :  { %3565 = vmatmul.mubr.f32.gmra.mrb[90].mxu0 %v12592_v8 }
 0x528   :  { %3569 = vmatprep.mubr.f32.mxu0 %v12601_v2  ;;  %10373 = vmatpush3.bf16.msra.mxu0 %v10372_v41  ;;  %v3996_v2 = vld [vmem:[#allocation15 + $0x8] sm:$0xff] }
 0x529   :  { %10374 = vmatprep.subr.bf16.mxu0 %v14874_v47 }
 0x52b   :  { %3570 = vmatmul.mubr.f32.gmra.mrb[92].mxu0 %v12603_v6  ;;  %v3995_v6 = vld [vmem:[#allocation15] sm:$0xff] }
 0x52c   :  { %3574 = vmatprep.mubr.f32.mxu0 %v12612_v51 }
 0x52f   :  { %3575 = vmatmul.mubr.f32.gmra.mrb[94].mxu0 %v12614_v54 }
 0x530   :  { %3579 = vmatprep.mubr.f32.mxu0 %v12623_v14 }
 0x533   :  { %3580 = vmatmul.mubr.f32.gmra.mrb[96].mxu0 %v12625_v40 }
 0x534   :  { %3584 = vmatprep.mubr.f32.mxu0 %v12634_v21 }
 0x537   :  { %3585 = vmatmul.mubr.f32.gmra.mrb[98].mxu0 %v12636_v1 }
 0x538   :  { %3589 = vmatprep.mubr.f32.mxu0 %v12645_v34 }
 0x53b   :  { %3590 = vmatmul.mubr.f32.gmra.mrb[100].mxu0 %v12647_v44 }
 0x53c   :  { %3594 = vmatprep.mubr.f32.mxu0 %v12656_v19 }
 0x53f   :  { %3595 = vmatmul.mubr.f32.gmra.mrb[102].mxu0 %v12658_v16 }
 0x540   :  { %3599 = vmatprep.mubr.f32.mxu0 %v12667_v10 }
 0x543   :  { %3600 = vmatmul.mubr.f32.gmra.mrb[104].mxu0 %v12669_v3 }
 0x544   :  { %3604 = vmatprep.mubr.f32.mxu0 %v12678_v5 }
 0x547   :  { %3605 = vmatmul.mubr.f32.gmra.mrb[106].mxu0 %v12680_v37 }
 0x548   :  { %3609 = vmatprep.mubr.f32.mxu0 %v12689_v18 }
 0x54b   :  { %3610 = vmatmul.mubr.f32.gmra.mrb[108].mxu0 %v12691_v36 }
 0x54c   :  { %3614 = vmatprep.mubr.f32.mxu0 %v12700_v28 }
 0x54f   :  { %3615 = vmatmul.mubr.f32.gmra.mrb[110].mxu0 %v12702_v56 }
 0x550   :  { %3619 = vmatprep.mubr.f32.mxu0 %v12711_v32 }
 0x553   :  { %3620 = vmatmul.mubr.f32.gmra.mrb[112].mxu0 %v12713_v26 }
 0x554   :  { %8715 = vmatprep.mubr.msk.f32.mxu0 %vm11573_vm9, %v14938_v35 }
 0x592   :  { %v12781_v25 = vpop.f32.mrb[38].mxu0 }
 0x593   :  { %v3373_v50 = vpop.f32.mrb[39].mxu0 }
 0x596   :  { %v12783_v27 = vpop.f32.mrb[40].mxu0  ;;  %v12785_v42 = vpop.f32.mrb[38].mxu1 }
 0x597   :  { %v3378_v48 = vpop.f32.mrb[41].mxu0  ;;  %v3763_v29 = vpop.f32.mrb[39].mxu1 }
 0x59a   :  { %v12787_v55 = vpop.f32.mrb[42].mxu0  ;;  %v12789_v33 = vpop.f32.mrb[40].mxu1 }
 0x59b   :  { %v3383_v0 = vpop.f32.mrb[43].mxu0  ;;  %v3768_v20 = vpop.f32.mrb[41].mxu1 }
 0x59e   :  { %v12791_v63 = vpop.f32.mrb[44].mxu0  ;;  %v12793_v39 = vpop.f32.mrb[42].mxu1 }
 0x59f   :  { %v3388_v9 = vpop.f32.mrb[45].mxu0  ;;  %v3773_v11 = vpop.f32.mrb[43].mxu1 }
 0x5a2   :  { %v12795_v7 = vpop.f32.mrb[46].mxu0  ;;  %v12797_v61 = vpop.f32.mrb[44].mxu1 }
 0x5a3   :  { %v3393_v31 = vpop.f32.mrb[47].mxu0  ;;  %v3778_v43 = vpop.f32.mrb[45].mxu1 }
 0x5a6   :  { %v12799_v45 = vpop.f32.mrb[48].mxu0  ;;  %v12801_v58 = vpop.f32.mrb[46].mxu1 }
 0x5a7   :  { %v3398_v23 = vpop.f32.mrb[49].mxu0  ;;  %v3783_v4 = vpop.f32.mrb[47].mxu1 }
 0x5aa   :  { %v12803_v30 = vpop.f32.mrb[50].mxu0  ;;  %v12805_v41 = vpop.f32.mrb[48].mxu1 }
 0x5ab   :  { %v3403_v50 = vpop.f32.mrb[51].mxu0  ;;  %v3788_v48 = vpop.f32.mrb[49].mxu1 }
 0x5ae   :  { %v12807_v29 = vpop.f32.mrb[52].mxu0  ;;  %v12809_v0 = vpop.f32.mrb[50].mxu1 }
 0x5af   :  { %v3408_v20 = vpop.f32.mrb[53].mxu0  ;;  %v3793_v9 = vpop.f32.mrb[51].mxu1 }
 0x5b2   :  { %v12811_v11 = vpop.f32.mrb[54].mxu0  ;;  %v12813_v31 = vpop.f32.mrb[52].mxu1 }
 0x5b3   :  { %v3413_v43 = vpop.f32.mrb[55].mxu0  ;;  %v3798_v47 = vpop.f32.mrb[53].mxu1 }
 0x5b6   :  { %v12815_v23 = vpop.f32.mrb[56].mxu0  ;;  %v12817_v4 = vpop.f32.mrb[54].mxu1 }
 0x5b7   :  { %v3418_v15 = vpop.f32.mrb[57].mxu0  ;;  %v3803_v53 = vpop.f32.mrb[55].mxu1 }
 0x5ba   :  { %v12819_v50 = vpop.f32.mrb[58].mxu0  ;;  %v12821_v48 = vpop.f32.mrb[56].mxu1 }
 0x5bb   :  { %v3423_v26 = vpop.f32.mrb[59].mxu0  ;;  %v3808_v32 = vpop.f32.mrb[57].mxu1 }
 0x5be   :  { %v12823_v20 = vpop.f32.mrb[60].mxu0  ;;  %v12825_v9 = vpop.f32.mrb[58].mxu1 }
 0x5bf   :  { %v3428_v56 = vpop.f32.mrb[61].mxu0  ;;  %v3813_v28 = vpop.f32.mrb[59].mxu1 }
 0x5c2   :  { %v12827_v43 = vpop.f32.mrb[62].mxu0  ;;  %v12829_v47 = vpop.f32.mrb[60].mxu1 }
 0x5c3   :  { %v3433_v36 = vpop.f32.mrb[63].mxu0  ;;  %v3818_v18 = vpop.f32.mrb[61].mxu1 }
 0x5c6   :  { %v12831_v15 = vpop.f32.mrb[64].mxu0  ;;  %v12833_v53 = vpop.f32.mrb[62].mxu1 }
 0x5c7   :  { %v3438_v37 = vpop.f32.mrb[65].mxu0  ;;  %v3823_v5 = vpop.f32.mrb[63].mxu1 }
 0x5ca   :  { %v12835_v26 = vpop.f32.mrb[66].mxu0  ;;  %v12837_v32 = vpop.f32.mrb[64].mxu1 }
 0x5cb   :  { %v3443_v3 = vpop.f32.mrb[67].mxu0  ;;  %v3828_v10 = vpop.f32.mrb[65].mxu1 }
 0x5ce   :  { %v12839_v56 = vpop.f32.mrb[68].mxu0  ;;  %v12841_v28 = vpop.f32.mrb[66].mxu1 }
 0x5cf   :  { %v3448_v16 = vpop.f32.mrb[69].mxu0  ;;  %v3833_v19 = vpop.f32.mrb[67].mxu1 }
 0x5d2   :  { %v12843_v36 = vpop.f32.mrb[70].mxu0  ;;  %v12845_v18 = vpop.f32.mrb[68].mxu1 }
 0x5d3   :  { %v3453_v44 = vpop.f32.mrb[71].mxu0  ;;  %v3838_v34 = vpop.f32.mrb[69].mxu1 }
 0x5d4   :  { %v12861_v34 = vld [vmem:[%s14832_s10] ss:$0 sm:$0xff] }
 0x5d6   :  { %v12847_v37 = vpop.f32.mrb[72].mxu0  ;;  %v12849_v5 = vpop.f32.mrb[70].mxu1 }
 0x5d7   :  { %v3458_v1 = vpop.f32.mrb[73].mxu0  ;;  %v3843_v21 = vpop.f32.mrb[71].mxu1 }
 0x5da   :  { %v12851_v3 = vpop.f32.mrb[74].mxu0  ;;  %v12853_v10 = vpop.f32.mrb[72].mxu1 }
 0x5db   :  { %v3463_v40 = vpop.f32.mrb[75].mxu0  ;;  %v3848_v14 = vpop.f32.mrb[73].mxu1 }
 0x5de   :  { %v3531_v16 = vpop.f32.mrb[76].mxu0  ;;  %v12855_v19 = vpop.f32.mrb[74].mxu1 }
 0x5df   :  { %v3532_v54 = vadd.f32 %v3531_v16, %v12781_v25  ;;  %v3533_v51 = vpop.f32.mrb[77].mxu0  ;;  %v3853_v44 = vpop.f32.mrb[75].mxu1 }
 0x5e0   :  { %v10375_v51 = vpack.c.bf16 %v3996_v2, %v3995_v6  ;;  %v3997_v44 = vld [vmem:[#allocation15 + $0x10] sm:$0xff] }
 0x5e1   :  { %v3855_v21 = vadd.f32 %v12785_v42, %v3532_v54  ;;  %v10378_v2 = vpack.c.bf16 %v3998_v60, %v3997_v44  ;;  %v4002_v44 = vld [vmem:[#allocation15 + $0x38] sm:$0xff] }
 0x5e2   :  { %v3536_v1 = vpop.f32.mrb[78].mxu0 }
 0x5e3   :  { %v3881_v40 = vadd.f32 %v12861_v34, %v3855_v21  ;;  %v3537_v14 = vadd.f32 %v3536_v1, %v12783_v27  ;;  %v3538_v8 = vpop.f32.mrb[79].mxu0  ;;  %v3999_v21 = vld [vmem:[#allocation15 + $0x20] sm:$0xff]  ;;  %v4000_v1 = vld [vmem:[#allocation15 + $0x28] sm:$0xff] }
 0x5e5   :  { %v3919_v22 = vmul.f32 0.4, %v3881_v40  ;;  %v3856_v25 = vadd.f32 %v12789_v33, %v3537_v14  ;;  %vm3900_vm10 = vcmp.ge.f32.partialorder %v3881_v40, 0.0  ;;  %v14982_v33 = vmov 0.0|0.0  }
 0x5e6   :  { %v3541_v16 = vpop.f32.mrb[80].mxu0 }
 0x5e7   :  { %v3882_v62 = vadd.f32 %v12861_v34, %v3856_v25  ;;  %v3542_v54 = vadd.f32 %v3541_v16, %v12787_v55  ;;  %v3543_v42 = vpop.f32.mrb[81].mxu0  ;;  %v12869_v46 = vsel %vm3900_vm10, %v3881_v40, %v3919_v22  ;;  %v10381_v25 = vpack.c.bf16 %v4000_v1, %v3999_v21  ;;  %v4001_v16 = vld [vmem:[#allocation15 + $0x30] sm:$0xff]  ;;  %v4004_v21 = vld [vmem:[#allocation15 + $0x48] sm:$0xff] }
 0x5e8   :  { %8716 = vmatmul.mubr.f32.vlgmr.msra.gmra.mrb[114].mxu0 %v12869_v46 }
 0x5e9   :  { %v3857_v27 = vadd.f32 %v12793_v39, %v3542_v54  ;;  %10376 = vmatpush3.bf16.msra.mxu0 %v10375_v51  ;;  %8718 = vmatprep.mubr.msk.f32.mxu0 %vm11573_vm9, %v14938_v35  ;;  %vm3901_vm11 = vcmp.ge.f32.partialorder %v3882_v62, 0.0  ;;  %v3920_v8 = vmul.f32 0.4, %v3882_v62 }
 0x5ea   :  { %v3546_v6 = vpop.f32.mrb[82].mxu0  ;;  %10377 = vmatprep.subr.bf16.mxu0 %v14982_v33 }
 0x5eb   :  { %v3883_v55 = vadd.f32 %v12861_v34, %v3857_v27  ;;  %v3547_v22 = vadd.f32 %v3546_v6, %v12791_v63  ;;  %v3548_v40 = vpop.f32.mrb[83].mxu0  ;;  %v12878_v14 = vsel %vm3901_vm11, %v3882_v62, %v3920_v8  ;;  %v10384_v8 = vpack.c.bf16 %v4002_v44, %v4001_v16  ;;  %v4003_v6 = vld [vmem:[#allocation15 + $0x40] sm:$0xff] }
 0x5ec   :  { %8719 = vmatmul.mubr.f32.gmra.mrb[116].mxu0 %v12878_v14 }
 0x5ed   :  { %v3858_v39 = vadd.f32 %v12797_v61, %v3547_v22  ;;  %8721 = vmatprep.mubr.msk.f32.mxu0 %vm11573_vm9, %v14938_v35  ;;  %vm3902_vm12 = vcmp.ge.f32.partialorder %v3883_v55, 0.0  ;;  %v3921_v60 = vmul.f32 0.4, %v3883_v55  ;;  %10379 = vmatpush3.bf16.msra.mxu0 %v10378_v2 }
 0x5ee   :  { %v3551_v51 = vpop.f32.mrb[84].mxu0  ;;  %10380 = vmatprep.subr.bf16.mxu0 %v14982_v33 }
 0x5ef   :  { %v3884_v63 = vadd.f32 %v12861_v34, %v3858_v39  ;;  %v3552_v62 = vadd.f32 %v3551_v51, %v12795_v7  ;;  %v3553_v54 = vpop.f32.mrb[85].mxu0  ;;  %v12887_v42 = vsel %vm3902_vm12, %v3883_v55, %v3921_v60  ;;  %v10387_v39 = vpack.c.bf16 %v4004_v21, %v4003_v6  ;;  %v4006_v51 = vld [vmem:[#allocation15 + $0x58] sm:$0xff] }
 0x5f0   :  { %8722 = vmatmul.mubr.f32.gmra.mrb[118].mxu0 %v12887_v42 }
 0x5f1   :  { %v3859_v61 = vadd.f32 %v12801_v58, %v3552_v62  ;;  %8724 = vmatprep.mubr.msk.f32.mxu0 %vm11573_vm9, %v14938_v35  ;;  %vm3903_vm13 = vcmp.ge.f32.partialorder %v3884_v63, 0.0  ;;  %v3922_v27 = vmul.f32 0.4, %v3884_v63  ;;  %10382 = vmatpush3.bf16.msra.mxu0 %v10381_v25  ;;  %v4005_v25 = vld [vmem:[#allocation15 + $0x50] sm:$0xff] }
 0x5f2   :  { %v3556_v2 = vpop.f32.mrb[86].mxu0  ;;  %10383 = vmatprep.subr.bf16.mxu0 %v14982_v33  ;;  %v10390_v54 = vpack.c.bf16 %v4006_v51, %v4005_v25 }
 0x5f3   :  { %v3885_v7 = vadd.f32 %v12861_v34, %v3859_v61  ;;  %v3557_v1 = vadd.f32 %v3556_v2, %v12799_v45  ;;  %v3558_v55 = vpop.f32.mrb[87].mxu0  ;;  %v12896_v22 = vsel %vm3903_vm13, %v3884_v63, %v3922_v27  ;;  %v4007_v27 = vld [vmem:[#allocation15 + $0x60] sm:$0xff] }
 0x5f4   :  { %8725 = vmatmul.mubr.f32.gmra.mrb[120].mxu0 %v12896_v22 }
 0x5f5   :  { %v3860_v58 = vadd.f32 %v12805_v41, %v3557_v1  ;;  %8727 = vmatprep.mubr.msk.f32.mxu0 %vm11573_vm9, %v14938_v35  ;;  %vm3904_vm14 = vcmp.ge.f32.partialorder %v3885_v7, 0.0  ;;  %v3923_v40 = vmul.f32 0.4, %v3885_v7  ;;  %10385 = vmatpush3.bf16.msra.mxu0 %v10384_v8  ;;  %v4008_v8 = vld [vmem:[#allocation15 + $0x68] sm:$0xff] }
 0x5f6   :  { %v3561_v60 = vpop.f32.mrb[88].mxu0  ;;  %10386 = vmatprep.subr.bf16.mxu0 %v14982_v33  ;;  %v10393_v1 = vpack.c.bf16 %v4008_v8, %v4007_v27 }
 0x5f7   :  { %v3886_v45 = vadd.f32 %v12861_v34, %v3860_v58  ;;  %v3562_v16 = vadd.f32 %v3561_v60, %v12803_v30  ;;  %v3563_v44 = vpop.f32.mrb[89].mxu0  ;;  %v12905_v63 = vsel %vm3904_vm14, %v3885_v7, %v3923_v40  ;;  %v4009_v58 = vld [vmem:[#allocation15 + $0x70] sm:$0xff]  ;;  %v4010_v40 = vld [vmem:[#allocation15 + $0x78] sm:$0xff]  ;;  %vm4882_vm14 = vcmask 523264  }
 0x5f8   :  { %8728 = vmatmul.mubr.f32.gmra.mrb[122].mxu0 %v12905_v63  ;;  %4883 = vst.msk [vmem:[#allocation7] sm:$0xff] %vm4882_vm14, %v14938_v35  ;;  %4884 = vst.msk [vmem:[#allocation7 + $0xa0] sm:$0xff] %vm4882_vm14, %v14938_v35 }
 0x5f9   :  { %v3861_v41 = vadd.f32 %v12809_v0, %v3562_v16  ;;  %8730 = vmatprep.mubr.msk.f32.mxu0 %vm11573_vm9, %v14938_v35  ;;  %vm3905_vm15 = vcmp.ge.f32.partialorder %v3886_v45, 0.0  ;;  %v3924_v62 = vmul.f32 0.4, %v3886_v45  ;;  %10388 = vmatpush3.bf16.msra.mxu0 %v10387_v39 }
 0x5fa   :  { %v3566_v61 = vpop.f32.mrb[90].mxu0  ;;  %10389 = vmatprep.subr.bf16.mxu0 %v14982_v33 }
 0x5fb   :  { %v3887_v30 = vadd.f32 %v12861_v34, %v3861_v41  ;;  %v3567_v2 = vadd.f32 %v3566_v61, %v12807_v29  ;;  %v3568_v6 = vpop.f32.mrb[91].mxu0  ;;  %v12914_v21 = vsel %vm3905_vm15, %v3886_v45, %v3924_v62  ;;  %v10396_v45 = vpack.c.bf16 %v4010_v40, %v4009_v58 }
 0x5fc   :  { %8731 = vmatmul.mubr.f32.gmra.mrb[124].mxu0 %v12914_v21 }
 0x5fd   :  { %v3862_v0 = vadd.f32 %v12813_v31, %v3567_v2  ;;  %8733 = vmatprep.mubr.msk.f32.mxu0 %vm11573_vm9, %v14938_v35  ;;  %vm3906_vm0 = vcmp.ge.f32.partialorder %v3887_v30, 0.0  ;;  %v3925_v7 = vmul.f32 0.4, %v3887_v30  ;;  %10391 = vmatpush3.bf16.msra.mxu0 %v10390_v54 }
 0x5fe   :  { %v3571_v55 = vpop.f32.mrb[92].mxu0  ;;  %10392 = vmatprep.subr.bf16.mxu0 %v14982_v33 }
 0x5ff   :  { %v3888_v29 = vadd.f32 %v12861_v34, %v3862_v0  ;;  %v3572_v39 = vadd.f32 %v3571_v55, %v12811_v11  ;;  %v3573_v60 = vpop.f32.mrb[93].mxu0  ;;  %v12923_v25 = vsel %vm3906_vm0, %v3887_v30, %v3925_v7 }
 0x600   :  { %8734 = vmatmul.mubr.f32.gmra.mrb[126].mxu0 %v12923_v25 }
 0x601   :  { %v3863_v31 = vadd.f32 %v12817_v4, %v3572_v39  ;;  %8736 = vmatprep.mubr.msk.f32.mxu0 %vm11573_vm9, %v14938_v35  ;;  %vm3907_vm1 = vcmp.ge.f32.partialorder %v3888_v29, 0.0  ;;  %v3926_v51 = vmul.f32 0.4, %v3888_v29  ;;  %10394 = vmatpush3.bf16.msra.mxu0 %v10393_v1 }
 0x602   :  { %v3576_v16 = vpop.f32.mrb[94].mxu0  ;;  %10395 = vmatprep.subr.bf16.mxu0 %v14982_v33 }
 0x603   :  { %v3889_v44 = vadd.f32 %v12861_v34, %v3863_v31  ;;  %v3577_v11 = vadd.f32 %v3576_v16, %v12815_v23  ;;  %v3578_v41 = vpop.f32.mrb[95].mxu0  ;;  %v12932_v62 = vsel %vm3907_vm1, %v3888_v29, %v3926_v51 }
 0x604   :  { %8737 = vmatmul.mubr.f32.gmra.mrb[128].mxu0 %v12932_v62 }
 0x605   :  { %v3864_v4 = vadd.f32 %v12821_v48, %v3577_v11  ;;  %8739 = vmatprep.mubr.msk.f32.mxu0 %vm11573_vm9, %v14938_v35  ;;  %vm3908_vm2 = vcmp.ge.f32.partialorder %v3889_v44, 0.0  ;;  %v3927_v54 = vmul.f32 0.4, %v3889_v44  ;;  %10397 = vmatpush3.bf16.msra.mxu0 %v10396_v45 }
 0x606   :  { %v3581_v61 = vpop.f32.mrb[96].mxu0  ;;  %10398 = vmatprep.subr.bf16.mxu0 %v14982_v33 }
 0x607   :  { %v3890_v27 = vadd.f32 %v12861_v34, %v3864_v4  ;;  %v3582_v23 = vadd.f32 %v3581_v61, %v12819_v50  ;;  %v3583_v8 = vpop.f32.mrb[97].mxu0  ;;  %v12941_v30 = vsel %vm3908_vm2, %v3889_v44, %v3927_v54 }
 0x608   :  { %8740 = vmatmul.mubr.f32.gmra.mrb[130].mxu0 %v12941_v30 }
 0x609   :  { %v3865_v48 = vadd.f32 %v12825_v9, %v3582_v23  ;;  %8742 = vmatprep.mubr.msk.f32.mxu0 %vm11573_vm9, %v14938_v35  ;;  %vm3909_vm3 = vcmp.ge.f32.partialorder %v3890_v27, 0.0  ;;  %v3928_v2 = vmul.f32 0.4, %v3890_v27 }
 0x60a   :  { %v3586_v6 = vpop.f32.mrb[98].mxu0 }
 0x60b   :  { %v3891_v0 = vadd.f32 %v12861_v34, %v3865_v48  ;;  %v3587_v7 = vadd.f32 %v3586_v6, %v12823_v20  ;;  %v3588_v1 = vpop.f32.mrb[99].mxu0  ;;  %v12949_v55 = vsel %vm3909_vm3, %v3890_v27, %v3928_v2 }
 0x60c   :  { %8743 = vmatmul.mubr.f32.gmra.mrb[132].mxu0 %v12949_v55 }
 0x60d   :  { %v3866_v50 = vadd.f32 %v12829_v47, %v3587_v7  ;;  %8745 = vmatprep.mubr.msk.f32.mxu0 %vm11573_vm9, %v14938_v35  ;;  %vm3910_vm4 = vcmp.ge.f32.partialorder %v3891_v0, 0.0  ;;  %v3929_v9 = vmul.f32 0.4, %v3891_v0 }
 0x60e   :  { %v3591_v58 = vpop.f32.mrb[100].mxu0 }
 0x60f   :  { %v3892_v40 = vadd.f32 %v12861_v34, %v3866_v50  ;;  %v3592_v29 = vadd.f32 %v3591_v58, %v12827_v43  ;;  %v3593_v39 = vpop.f32.mrb[101].mxu0  ;;  %v12957_v60 = vsel %vm3910_vm4, %v3891_v0, %v3929_v9 }
 0x610   :  { %8746 = vmatmul.mubr.f32.gmra.mrb[134].mxu0 %v12957_v60 }
 0x611   :  { %v3867_v20 = vadd.f32 %v12833_v53, %v3592_v29  ;;  %8748 = vmatprep.mubr.msk.f32.mxu0 %vm11573_vm9, %v14938_v35  ;;  %vm3911_vm5 = vcmp.ge.f32.partialorder %v3892_v40, 0.0  ;;  %v3930_v47 = vmul.f32 0.4, %v3892_v40 }
 0x612   :  { %v3596_v31 = vpop.f32.mrb[102].mxu0 }
 0x613   :  { %v3893_v51 = vadd.f32 %v12861_v34, %v3867_v20  ;;  %v3597_v45 = vadd.f32 %v3596_v31, %v12831_v15  ;;  %v3598_v16 = vpop.f32.mrb[103].mxu0  ;;  %v12965_v44 = vsel %vm3911_vm5, %v3892_v40, %v3930_v47 }
 0x614   :  { %8749 = vmatmul.mubr.f32.gmra.mrb[136].mxu0 %v12965_v44 }
 0x615   :  { %v3868_v43 = vadd.f32 %v12837_v32, %v3597_v45  ;;  %8751 = vmatprep.mubr.msk.f32.mxu0 %vm11573_vm9, %v14938_v35  ;;  %vm3912_vm6 = vcmp.ge.f32.partialorder %v3893_v51, 0.0  ;;  %v3931_v53 = vmul.f32 0.4, %v3893_v51 }
 0x616   :  { %v3601_v11 = vpop.f32.mrb[104].mxu0 }
 0x617   :  { %v3894_v41 = vadd.f32 %v12861_v34, %v3868_v43  ;;  %v3602_v4 = vadd.f32 %v3601_v11, %v12835_v26  ;;  %v3603_v54 = vpop.f32.mrb[105].mxu0  ;;  %v12973_v61 = vsel %vm3912_vm6, %v3893_v51, %v3931_v53  ;;  %v4367_v53 = vld [vmem:[#allocation15 + $0x100] sm:$0xff]  ;;  %v4368_v11 = vld [vmem:[#allocation15 + $0x108] sm:$0xff] }
 0x618   :  { %8752 = vmatmul.mubr.f32.gmra.mrb[138].mxu0 %v12973_v61 }
 0x619   :  { %v3869_v15 = vadd.f32 %v12841_v28, %v3602_v4  ;;  %8754 = vmatprep.mubr.msk.f32.mxu0 %vm11573_vm9, %v14938_v35  ;;  %vm3913_vm7 = vcmp.ge.f32.partialorder %v3894_v41, 0.0  ;;  %v3932_v32 = vmul.f32 0.4, %v3894_v41  ;;  %v4370_v4 = vld [vmem:[#allocation15 + $0x118] sm:$0xff] }
 0x61a   :  { %v3606_v27 = vpop.f32.mrb[106].mxu0 }
 0x61b   :  { %v3895_v23 = vadd.f32 %v12861_v34, %v3869_v15  ;;  %v3607_v8 = vadd.f32 %v3606_v27, %v12839_v56  ;;  %v3608_v48 = vpop.f32.mrb[107].mxu0  ;;  %v12981_v2 = vsel %vm3913_vm7, %v3894_v41, %v3932_v32  ;;  %v4371_v15 = vld [vmem:[#allocation15 + $0x120] sm:$0xff]  ;;  %v4372_v32 = vld [vmem:[#allocation15 + $0x128] sm:$0xff] }
 0x61c   :  { %8755 = vmatmul.mubr.f32.gmra.mrb[140].mxu0 %v12981_v2  ;;  %v10405_v27 = vpack.c.bf16 %v4372_v32, %v4371_v15  ;;  %v4922_v15 = vld [vmem:[%s14837_s15 + $0x88] sm:$0xff] }
 0x61d   :  { %v3870_v26 = vadd.f32 %v12845_v18, %v3607_v8  ;;  %8757 = vmatprep.mubr.msk.f32.mxu0 %vm11573_vm9, %v14938_v35  ;;  %vm3914_vm8 = vcmp.ge.f32.partialorder %v3895_v23, 0.0  ;;  %v3933_v28 = vmul.f32 0.4, %v3895_v23  ;;  %v4374_v8 = vld [vmem:[#allocation15 + $0x138] sm:$0xff] }
 0x61e   :  { %v3611_v6 = vpop.f32.mrb[108].mxu0 }
 0x61f   :  { %v3896_v0 = vadd.f32 %v12861_v34, %v3870_v26  ;;  %v3612_v7 = vadd.f32 %v3611_v6, %v12843_v36  ;;  %v3613_v1 = vpop.f32.mrb[109].mxu0  ;;  %v12989_v50 = vsel %vm3914_vm8, %v3895_v23, %v3933_v28  ;;  %v4373_v23 = vld [vmem:[#allocation15 + $0x130] sm:$0xff]  ;;  %v4375_v26 = vld [vmem:[#allocation15 + $0x140] sm:$0xff] }
 0x620   :  { %8758 = vmatmul.mubr.f32.gmra.mrb[142].mxu0 %v12989_v50  ;;  %v10408_v48 = vpack.c.bf16 %v4374_v8, %v4373_v23  ;;  %v4377_v6 = vld [vmem:[#allocation15 + $0x150] sm:$0xff]  ;;  %v4379_v1 = vld [vmem:[#allocation15 + $0x160] sm:$0xff]  ;;  %v4641_v8 = vld [vmem:[#allocation16 + $0x78] sm:$0xff] }
 0x621   :  { %v3871_v56 = vadd.f32 %v12849_v5, %v3612_v7  ;;  %8760 = vmatprep.mubr.msk.f32.mxu0 %vm11573_vm9, %v14938_v35  ;;  %vm3915_vm10 = vcmp.ge.f32.partialorder %v3896_v0, 0.0  ;;  %v3934_v18 = vmul.f32 0.4, %v3896_v0  ;;  %v4640_v23 = vld [vmem:[#allocation16 + $0x70] sm:$0xff] }
 0x622   :  { %v3616_v9 = vpop.f32.mrb[110].mxu0 }
 0x623   :  { %v3897_v58 = vadd.f32 %v12861_v34, %v3871_v56  ;;  %v3617_v40 = vadd.f32 %v3616_v9, %v12847_v37  ;;  %v3618_v29 = vpop.f32.mrb[111].mxu0  ;;  %v12997_v39 = vsel %vm3915_vm10, %v3896_v0, %v3934_v18  ;;  %v4378_v0 = vld [vmem:[#allocation15 + $0x158] sm:$0xff]  ;;  %v4380_v56 = vld [vmem:[#allocation15 + $0x168] sm:$0xff]  ;;  %v4381_v9 = vld [vmem:[#allocation15 + $0x170] sm:$0xff] }
 0x624   :  { %8761 = vmatmul.mubr.f32.gmra.mrb[144].mxu0 %v12997_v39  ;;  %v10414_v7 = vpack.c.bf16 %v4378_v0, %v4377_v6  ;;  %v10417_v18 = vpack.c.bf16 %v4380_v56, %v4379_v1  ;;  %v4626_v29 = vld [vmem:[#allocation16] sm:$0xff]  ;;  %v4643_v0 = vld [vmem:[#allocation16 + $0x88] sm:$0xff]  ;;  %v4928_v1 = vld [vmem:[%s14837_s15 + $0xb8] sm:$0xff] }
 0x625   :  { %v3872_v36 = vadd.f32 %v12853_v10, %v3617_v40  ;;  %8763 = vmatprep.mubr.msk.f32.mxu0 %vm11573_vm9, %v14938_v35  ;;  %vm3916_vm11 = vcmp.ge.f32.partialorder %v3897_v58, 0.0  ;;  %v3935_v5 = vmul.f32 0.4, %v3897_v58  ;;  %v4642_v6 = vld [vmem:[#allocation16 + $0x80] sm:$0xff] }
 0x626   :  { %v3621_v20 = vpop.f32.mrb[112].mxu0  ;;  %v10447_v56 = vpack.c.bf16 %v4643_v0, %v4642_v6  ;;  %v15005_v6 = vld [vmem:[#allocation44_spill] sm:$0xff]  ;;  %v15006_v0 = vld [vmem:[#allocation45_spill] sm:$0xff] }
 0x627   :  { %v3898_v47 = vadd.f32 %v12861_v34, %v3872_v36  ;;  %v3622_v31 = vadd.f32 %v3621_v20, %v12851_v3  ;;  %v3623_v51 = vpop.f32.mrb[113].mxu0  ;;  %v13005_v45 = vsel %vm3916_vm11, %v3897_v58, %v3935_v5  ;;  %v4382_v58 = vld [vmem:[#allocation15 + $0x178] sm:$0xff]  ;;  %v4627_v36 = vld [vmem:[#allocation16 + $0x8] sm:$0xff]  ;;  %v4628_v20 = vld [vmem:[#allocation16 + $0x10] sm:$0xff] }
 0x628   :  { %8764 = vmatmul.mubr.f32.gmra.mrb[146].mxu0 %v13005_v45  ;;  %v10420_v40 = vpack.c.bf16 %v4382_v58, %v4381_v9  ;;  %v10423_v5 = vpack.c.bf16 %v4627_v36, %v4626_v29  ;;  %v4630_v51 = vld [vmem:[#allocation16 + $0x20] sm:$0xff]  ;;  %v4645_v9 = vld [vmem:[#allocation16 + $0x98] sm:$0xff] }
 0x629   :  { %v3873_v37 = vadd.f32 %v12855_v19, %v3622_v31  ;;  %8766 = vmatprep.mubr.msk.f32.mxu0 %vm11573_vm9, %v14938_v35  ;;  %vm3917_vm12 = vcmp.ge.f32.partialorder %v3898_v47, 0.0  ;;  %v3936_v10 = vmul.f32 0.4, %v3898_v47  ;;  %v10399_v19 = vpack.c.bf16 %v4368_v11, %v4367_v53  ;;  %v4634_v53 = vld [vmem:[#allocation16 + $0x40] sm:$0xff]  ;;  %v4929_v58 = vld [vmem:[%s14837_s15 + $0xc0] sm:$0xff] }
 0x62a   :  { %v4646_v36 = vld [vmem:[#allocation16 + $0xa0] sm:$0xff] }
 0x62b   :  { %v3899_v16 = vadd.f32 %v12861_v34, %v3873_v37  ;;  %v13012_v43 = vsel %vm3917_vm12, %v3898_v47, %v3936_v10  ;;  %v4369_v34 = vld [vmem:[#allocation15 + $0x110] sm:$0xff]  ;;  %v4629_v47 = vld [vmem:[#allocation16 + $0x18] sm:$0xff]  ;;  %v4631_v37 = vld [vmem:[#allocation16 + $0x28] sm:$0xff] }
 0x62c   :  { %8767 = vmatmul.mubr.f32.gmra.mrb[148].mxu0 %v13012_v43  ;;  %v10402_v54 = vpack.c.bf16 %v4370_v4, %v4369_v34  ;;  %v10426_v31 = vpack.c.bf16 %v4629_v47, %v4628_v20  ;;  %v10429_v10 = vpack.c.bf16 %v4631_v37, %v4630_v51  ;;  %v4638_v4 = vld [vmem:[#allocation16 + $0x60] sm:$0xff]  ;;  %v4931_v20 = vld [vmem:[%s14837_s15 + $0xd0] sm:$0xff]  ;;  %v4932_v47 = vld [vmem:[%s14837_s15 + $0xd8] sm:$0xff] }
 0x62d   :  { %8769 = vmatprep.mubr.msk.f32.mxu0 %vm11573_vm9, %v14938_v35  ;;  %vm3918_vm13 = vcmp.ge.f32.partialorder %v3899_v16, 0.0  ;;  %v3937_v3 = vmul.f32 0.4, %v3899_v16  ;;  %v4648_v51 = vld [vmem:[#allocation16 + $0xb0] sm:$0xff]  ;;  %v4649_v37 = vld [vmem:[#allocation16 + $0xb8] sm:$0xff] }
 0x62f   :  { %v13017_v41 = vsel %vm3918_vm13, %v3899_v16, %v3937_v3  ;;  %v4632_v16 = vld [vmem:[#allocation16 + $0x30] sm:$0xff] }
 0x630   :  { %8770 = vmatmul.mubr.f32.gmra.mrb[150].mxu0 %v13017_v41 }
 0x631   :  { %8804 = vmatprep.mubr.msk.f32.mxu0 %vm11573_vm9, %v14938_v35 }
 0x634   :  { %8805 = vmatmul.mubr.f32.vlgmr.msra.gmra.mrb[114].mxu0 %v14938_v35 }
 0x635   :  { %10400 = vmatpush3.bf16.msra.mxu0 %v10399_v19  ;;  %8807 = vmatprep.mubr.msk.f32.mxu0 %vm11573_vm9, %v14938_v35  ;;  %v4636_v19 = vld [vmem:[#allocation16 + $0x50] sm:$0xff] }
 0x636   :  { %10401 = vmatprep.subr.bf16.mxu0 %v14982_v33 }
 0x638   :  { %8808 = vmatmul.mubr.f32.gmra.mrb[116].mxu0 %v12869_v46  ;;  %v4376_v46 = vld [vmem:[#allocation15 + $0x148] sm:$0xff] }
 0x639   :  { %8810 = vmatprep.mubr.msk.f32.mxu0 %vm11573_vm9, %v14938_v35  ;;  %10403 = vmatpush3.bf16.msra.mxu0 %v10402_v54  ;;  %v10411_v28 = vpack.c.bf16 %v4376_v46, %v4375_v26  ;;  %v4921_v54 = vld [vmem:[%s14837_s15 + $0x80] sm:$0xff]  ;;  %v4926_v46 = vld [vmem:[%s14837_s15 + $0xa8] sm:$0xff] }
 0x63a   :  { %10404 = vmatprep.subr.bf16.mxu0 %v14982_v33  ;;  %v4925_v26 = vld [vmem:[%s14837_s15 + $0xa0] sm:$0xff] }
 0x63c   :  { %8811 = vmatmul.mubr.f32.gmra.mrb[118].mxu0 %v12878_v14 }
 0x63d   :  { %8813 = vmatprep.mubr.msk.f32.mxu0 %vm11573_vm9, %v14938_v35  ;;  %10406 = vmatpush3.bf16.msra.mxu0 %v10405_v27  ;;  %v10471_v27 = vpack.c.bf16 %v4922_v15, %v4921_v54  ;;  %v4655_v54 = vld [vmem:[#allocation16 + $0xe8] sm:$0xff]  ;;  %v4656_v15 = vld [vmem:[#allocation16 + $0xf0] sm:$0xff] }
 0x63e   :  { %10407 = vmatprep.subr.bf16.mxu0 %v14982_v33 }
 0x63f   :  { %10472 = vmatpush3.bf16.msra.mxu1 %v10471_v27  ;;  %v14997_v27 = vld [vmem:[#allocation36_spill] sm:$0xff] }
 0x640   :  { %8814 = vmatmul.mubr.f32.gmra.mrb[120].mxu0 %v12887_v42  ;;  %10473 = vmatprep.subr.bf16.mxu1 %v14982_v33 }
 0x641   :  { %8816 = vmatprep.mubr.msk.f32.mxu0 %vm11573_vm9, %v14938_v35  ;;  %10409 = vmatpush3.bf16.msra.mxu0 %v10408_v48 }
 0x642   :  { %10410 = vmatprep.subr.bf16.mxu0 %v14982_v33 }
 0x644   :  { %8817 = vmatmul.mubr.f32.gmra.mrb[122].mxu0 %v12896_v22 }
 0x645   :  { %8819 = vmatprep.mubr.msk.f32.mxu0 %vm11573_vm9, %v14938_v35  ;;  %10412 = vmatpush3.bf16.msra.mxu0 %v10411_v28  ;;  %v10444_v28 = vpack.c.bf16 %v4641_v8, %v4640_v23  ;;  %v14999_v23 = vld [vmem:[#allocation38_spill] sm:$0xff]  ;;  %v15000_v8 = vld [vmem:[#allocation39_spill] sm:$0xff] }
 0x646   :  { %10413 = vmatprep.subr.bf16.mxu0 %v14982_v33 }
 0x648   :  { %8820 = vmatmul.mubr.f32.gmra.mrb[124].mxu0 %v12905_v63 }
 0x649   :  { %8822 = vmatprep.mubr.msk.f32.mxu0 %vm11573_vm9, %v14938_v35  ;;  %10415 = vmatpush3.bf16.msra.mxu0 %v10414_v7  ;;  %v4927_v7 = vld [vmem:[%s14837_s15 + $0xb0] sm:$0xff] }
 0x64a   :  { %10416 = vmatprep.subr.bf16.mxu0 %v14982_v33 }
 0x64c   :  { %8823 = vmatmul.mubr.f32.gmra.mrb[126].mxu0 %v12914_v21 }
 0x64d   :  { %8825 = vmatprep.mubr.msk.f32.mxu0 %vm11573_vm9, %v14938_v35  ;;  %10418 = vmatpush3.bf16.msra.mxu0 %v10417_v18  ;;  %v4644_v18 = vld [vmem:[#allocation16 + $0x90] sm:$0xff] }
 0x64e   :  { %10419 = vmatprep.subr.bf16.mxu0 %v14982_v33  ;;  %v10450_v29 = vpack.c.bf16 %v4645_v9, %v4644_v18  ;;  %v15011_v18 = vld [vmem:[#allocation50_spill] sm:$0xff]  ;;  %v8104_v9 = vld [vmem:[%s14834_s12] ss:$0 sm:$0xff]  ;;  %s15012_s12 = sld [smem:[#allocation59_spill]] }
 0x650   :  { %8826 = vmatmul.mubr.f32.gmra.mrb[128].mxu0 %v12923_v25 }
 0x651   :  { %8828 = vmatprep.mubr.msk.f32.mxu0 %vm11573_vm9, %v14938_v35  ;;  %10421 = vmatpush3.bf16.msra.mxu0 %v10420_v40  ;;  %v4930_v40 = vld [vmem:[%s14837_s15 + $0xc8] sm:$0xff] }
 0x652   :  { %10422 = vmatprep.subr.bf16.mxu0 %v14982_v33 }
 0x654   :  { %8829 = vmatmul.mubr.f32.gmra.mrb[130].mxu0 %v12932_v62 }
 0x655   :  { %8831 = vmatprep.mubr.msk.f32.mxu0 %vm11573_vm9, %v14938_v35 }
 0x658   :  { %8832 = vmatmul.mubr.f32.gmra.mrb[132].mxu0 %v12941_v30 }
 0x659   :  { %8834 = vmatprep.mubr.msk.f32.mxu0 %vm11573_vm9, %v14938_v35 }
 0x65c   :  { %8835 = vmatmul.mubr.f32.gmra.mrb[134].mxu0 %v12949_v55 }
 0x65d   :  { %8837 = vmatprep.mubr.msk.f32.mxu0 %vm11573_vm9, %v14938_v35 }
 0x660   :  { %8838 = vmatmul.mubr.f32.gmra.mrb[136].mxu0 %v12957_v60 }
 0x661   :  { %8840 = vmatprep.mubr.msk.f32.mxu0 %vm11573_vm9, %v14938_v35 }
 0x664   :  { %8841 = vmatmul.mubr.f32.gmra.mrb[138].mxu0 %v12965_v44 }
 0x665   :  { %8843 = vmatprep.mubr.msk.f32.mxu0 %vm11573_vm9, %v14938_v35 }
 0x668   :  { %8844 = vmatmul.mubr.f32.gmra.mrb[140].mxu0 %v12973_v61 }
 0x669   :  { %8846 = vmatprep.mubr.msk.f32.mxu0 %vm11573_vm9, %v14938_v35 }
 0x66c   :  { %8847 = vmatmul.mubr.f32.gmra.mrb[142].mxu0 %v12981_v2 }
 0x66d   :  { %8849 = vmatprep.mubr.msk.f32.mxu0 %vm11573_vm9, %v14938_v35 }
 0x670   :  { %8850 = vmatmul.mubr.f32.gmra.mrb[144].mxu0 %v12989_v50 }
 0x671   :  { %8852 = vmatprep.mubr.msk.f32.mxu0 %vm11573_vm9, %v14938_v35 }
 0x674   :  { %8853 = vmatmul.mubr.f32.gmra.mrb[146].mxu0 %v12997_v39 }
 0x675   :  { %8855 = vmatprep.mubr.msk.f32.mxu0 %vm11573_vm9, %v14938_v35 }
 0x678   :  { %8856 = vmatmul.mubr.f32.gmra.mrb[148].mxu0 %v13005_v45 }
 0x679   :  { %8858 = vmatprep.mubr.msk.f32.mxu0 %vm11573_vm9, %v14938_v35 }
 0x67c   :  { %8859 = vmatmul.mubr.f32.gmra.mrb[150].mxu0 %v13012_v43 }
 0x67d   :  { %8893 = vmatprep.mubr.msk.f32.mxu0 %vm11573_vm9, %v14938_v35 }
 0x680   :  { %8894 = vmatmul.mubr.f32.vlgmr.msra.gmra.mrb[114].mxu0 %v12878_v14  ;;  %v4633_v14 = vld [vmem:[#allocation16 + $0x38] sm:$0xff] }
 0x681   :  { %10424 = vmatpush1.bf16.msra.mxu0 %v10423_v5  ;;  %8896 = vmatprep.mubr.msk.f32.mxu0 %vm11573_vm9, %v14938_v35  ;;  %v10432_v3 = vpack.c.bf16 %v4633_v14, %v4632_v16  ;;  %v4647_v5 = vld [vmem:[#allocation16 + $0xa8] sm:$0xff]  ;;  %v4934_v16 = vld [vmem:[%s14837_s15 + $0xe8] sm:$0xff]  ;;  %v10456_v14 = vpack.c.bf16 %v4649_v37, %v4648_v51  ;;  %v4907_v51 = vld [vmem:[%s14837_s15 + $0x18] sm:$0xff] }
 0x682   :  { %10425 = vmatprep.subr.bf16.mxu0 %v14982_v33 }
 0x684   :  { %8897 = vmatmul.mubr.f32.gmra.mrb[116].mxu0 %v12887_v42  ;;  %v4635_v42 = vld [vmem:[#allocation16 + $0x48] sm:$0xff] }
 0x685   :  { %10427 = vmatpush1.bf16.msra.mxu0 %v10426_v31  ;;  %8899 = vmatprep.mubr.msk.f32.mxu0 %vm11573_vm9, %v14938_v35  ;;  %v10435_v11 = vpack.c.bf16 %v4635_v42, %v4634_v53  ;;  %v10453_v31 = vpack.c.bf16 %v4647_v5, %v4646_v36  ;;  %v4651_v53 = vld [vmem:[#allocation16 + $0xc8] sm:$0xff] }
 0x686   :  { %10428 = vmatprep.subr.bf16.mxu0 %v14982_v33  ;;  %v4935_v42 = vld [vmem:[%s14837_s15 + $0xf0] sm:$0xff] }
 0x688   :  { %8900 = vmatmul.mubr.f32.gmra.mrb[118].mxu0 %v12896_v22  ;;  %v4637_v22 = vld [vmem:[#allocation16 + $0x58] sm:$0xff] }
 0x689   :  { %10430 = vmatpush1.bf16.msra.mxu0 %v10429_v10  ;;  %8902 = vmatprep.mubr.msk.f32.mxu0 %vm11573_vm9, %v14938_v35  ;;  %v10438_v34 = vpack.c.bf16 %v4637_v22, %v4636_v19  ;;  %v4933_v10 = vld [vmem:[%s14837_s15 + $0xe0] sm:$0xff]  ;;  %v4652_v22 = vld [vmem:[#allocation16 + $0xd0] sm:$0xff] }
 0x68a   :  { %10431 = vmatprep.subr.bf16.mxu0 %v14982_v33 }
 0x68c   :  { %8903 = vmatmul.mubr.f32.gmra.mrb[120].mxu0 %v12905_v63  ;;  %v4639_v63 = vld [vmem:[#allocation16 + $0x68] sm:$0xff] }
 0x68d   :  { %8905 = vmatprep.mubr.msk.f32.mxu0 %vm11573_vm9, %v14938_v35  ;;  %10433 = vmatpush1.bf16.msra.mxu0 %v10432_v3  ;;  %v10441_v32 = vpack.c.bf16 %v4639_v63, %v4638_v4  ;;  %v4650_v3 = vld [vmem:[#allocation16 + $0xc0] sm:$0xff] }
 0x68e   :  { %10434 = vmatprep.subr.bf16.mxu0 %v14982_v33  ;;  %v10459_v19 = vpack.c.bf16 %v4651_v53, %v4650_v3  ;;  %v4654_v63 = vld [vmem:[#allocation16 + $0xe0] sm:$0xff]  ;;  %v4908_v3 = vld [vmem:[%s14837_s15 + $0x20] sm:$0xff] }
 0x68f   :  { %v4909_v53 = vld [vmem:[%s14837_s15 + $0x28] sm:$0xff] }
 0x690   :  { %8906 = vmatmul.mubr.f32.gmra.mrb[122].mxu0 %v12914_v21  ;;  %v4923_v21 = vld [vmem:[%s14837_s15 + $0x90] sm:$0xff] }
 0x691   :  { %8908 = vmatprep.mubr.msk.f32.mxu0 %vm11573_vm9, %v14938_v35  ;;  %10436 = vmatpush1.bf16.msra.mxu0 %v10435_v11  ;;  %v4936_v11 = vld [vmem:[%s14837_s15 + $0xf8] sm:$0xff] }
 0x692   :  { %10437 = vmatprep.subr.bf16.mxu0 %v14982_v33 }
 0x694   :  { %8909 = vmatmul.mubr.f32.gmra.mrb[124].mxu0 %v12923_v25  ;;  %v4924_v25 = vld [vmem:[%s14837_s15 + $0x98] sm:$0xff] }
 0x695   :  { %8911 = vmatprep.mubr.msk.f32.mxu0 %vm11573_vm9, %v14938_v35  ;;  %10439 = vmatpush1.bf16.msra.mxu0 %v10438_v34  ;;  %v10474_v48 = vpack.c.bf16 %v4924_v25, %v4923_v21  ;;  %v4653_v34 = vld [vmem:[#allocation16 + $0xd8] sm:$0xff] }
 0x696   :  { %10440 = vmatprep.subr.bf16.mxu0 %v14982_v33  ;;  %v10462_v4 = vpack.c.bf16 %v4653_v34, %v4652_v22  ;;  %v4657_v21 = vld [vmem:[#allocation16 + $0xf8] sm:$0xff]  ;;  %v4910_v34 = vld [vmem:[%s14837_s15 + $0x30] sm:$0xff] }
 0x697   :  { %10475 = vmatpush3.bf16.msra.mxu1 %v10474_v48  ;;  %v14998_v25 = vld [vmem:[#allocation37_spill] sm:$0xff]  ;;  %v15001_v48 = vld [vmem:[#allocation40_spill] sm:$0xff] }
 0x698   :  { %8912 = vmatmul.mubr.f32.gmra.mrb[126].mxu0 %v12932_v62  ;;  %v10477_v62 = vpack.c.bf16 %v4926_v46, %v4925_v26  ;;  %10476 = vmatprep.subr.bf16.mxu1 %v14982_v33  ;;  %v15002_v26 = vld [vmem:[#allocation41_spill] sm:$0xff]  ;;  %v15003_v46 = vld [vmem:[#allocation42_spill] sm:$0xff] }
 0x699   :  { %8914 = vmatprep.mubr.msk.f32.mxu0 %vm11573_vm9, %v14938_v35  ;;  %10442 = vmatpush1.bf16.msra.mxu0 %v10441_v32  ;;  %v10468_v32 = vpack.c.bf16 %v4657_v21, %v4656_v15  ;;  %v4912_v21 = vld [vmem:[%s14837_s15 + $0x40] sm:$0xff] }
 0x69a   :  { %10443 = vmatprep.subr.bf16.mxu0 %v14982_v33 }
 0x69b   :  { %10478 = vmatpush3.bf16.msra.mxu1 %v10477_v62  ;;  %v15007_v62 = vld [vmem:[#allocation46_spill] sm:$0xff] }
 0x69c   :  { %8915 = vmatmul.mubr.f32.gmra.mrb[128].mxu0 %v12941_v30  ;;  %v10480_v30 = vpack.c.bf16 %v4928_v1, %v4927_v7  ;;  %10479 = vmatprep.subr.bf16.mxu1 %v14982_v33  ;;  %v15008_v7 = vld [vmem:[#allocation47_spill] sm:$0xff]  ;;  %v15009_v1 = vld [vmem:[#allocation48_spill] sm:$0xff] }
 0x69d   :  { %8917 = vmatprep.mubr.msk.f32.mxu0 %vm11573_vm9, %v14938_v35  ;;  %10445 = vmatpush1.bf16.msra.mxu0 %v10444_v28  ;;  %v15004_v28 = vld [vmem:[#allocation43_spill] sm:$0xff] }
 0x69e   :  { %10446 = vmatprep.subr.bf16.mxu0 %v14982_v33 }
 0x69f   :  { %10481 = vmatpush3.bf16.msra.mxu1 %v10480_v30  ;;  %v8105_v30 = vld [vmem:[%s14836_s14] ss:$0 sm:$0xff] }
 0x6a0   :  { %8918 = vmatmul.mubr.f32.gmra.mrb[130].mxu0 %v12949_v55  ;;  %v10483_v55 = vpack.c.bf16 %v4930_v40, %v4929_v58  ;;  %10482 = vmatprep.subr.bf16.mxu1 %v14982_v33  ;;  %v13260_v58 = vadd.f32 %v8105_v30, %v8104_v9  ;;  %v4904_v40 = vld [vmem:[%s14837_s15] sm:$0xff] }
 0x6a1   :  { %8920 = vmatprep.mubr.msk.f32.mxu0 %vm11573_vm9, %v14938_v35  ;;  %10448 = vmatpush1.bf16.msra.mxu0 %v10447_v56  ;;  %v15010_v56 = vld [vmem:[#allocation49_spill] sm:$0xff] }
 0x6a2   :  { %10449 = vmatprep.subr.bf16.mxu0 %v14982_v33 }
 0x6a3   :  { %10484 = vmatpush3.bf16.msra.mxu1 %v10483_v55 }
 0x6a4   :  { %8921 = vmatmul.mubr.f32.gmra.mrb[132].mxu0 %v12957_v60  ;;  %v10486_v60 = vpack.c.bf16 %v4932_v47, %v4931_v20  ;;  %10485 = vmatprep.subr.bf16.mxu1 %v14982_v33 }
 0x6a5   :  { %8923 = vmatprep.mubr.msk.f32.mxu0 %vm11573_vm9, %v14938_v35  ;;  %10451 = vmatpush1.bf16.msra.mxu0 %v10450_v29  ;;  %v4905_v29 = vld [vmem:[%s14837_s15 + $0x8] sm:$0xff] }
 0x6a6   :  { %10452 = vmatprep.subr.bf16.mxu0 %v14982_v33  ;;  %v10495_v20 = vpack.c.bf16 %v4905_v29, %v4904_v40 }
 0x6a7   :  { %10487 = vmatpush3.bf16.msra.mxu1 %v10486_v60 }
 0x6a8   :  { %8924 = vmatmul.mubr.f32.gmra.mrb[134].mxu0 %v12965_v44  ;;  %v10489_v44 = vpack.c.bf16 %v4934_v16, %v4933_v10  ;;  %10488 = vmatprep.subr.bf16.mxu1 %v14982_v33 }
 0x6a9   :  { %8926 = vmatprep.mubr.msk.f32.mxu0 %vm11573_vm9, %v14938_v35  ;;  %10454 = vmatpush1.bf16.msra.mxu0 %v10453_v31  ;;  %v4906_v31 = vld [vmem:[%s14837_s15 + $0x10] sm:$0xff] }
 0x6aa   :  { %10455 = vmatprep.subr.bf16.mxu0 %v14982_v33  ;;  %v10498_v16 = vpack.c.bf16 %v4907_v51, %v4906_v31 }
 0x6ab   :  { %10490 = vmatpush3.bf16.msra.mxu1 %v10489_v44 }
 0x6ac   :  { %8927 = vmatmul.mubr.f32.gmra.mrb[136].mxu0 %v12973_v61  ;;  %v10492_v61 = vpack.c.bf16 %v4936_v11, %v4935_v42  ;;  %10491 = vmatprep.subr.bf16.mxu1 %v14982_v33 }
 0x6ad   :  { %8929 = vmatprep.mubr.msk.f32.mxu0 %vm11573_vm9, %v14938_v35  ;;  %10457 = vmatpush1.bf16.msra.mxu0 %v10456_v14 }
 0x6ae   :  { %10458 = vmatprep.subr.bf16.mxu0 %v14982_v33 }
 0x6af   :  { %10493 = vmatpush3.bf16.msra.mxu1 %v10492_v61  ;;  %v4911_v61 = vld [vmem:[%s14837_s15 + $0x38] sm:$0xff] }
 0x6b0   :  { %8930 = vmatmul.mubr.f32.gmra.mrb[138].mxu0 %v12981_v2  ;;  %10494 = vmatprep.subr.bf16.mxu1 %v14982_v33  ;;  %v10465_v2 = vpack.c.bf16 %v4655_v54, %v4654_v63 }
 0x6b1   :  { %8932 = vmatprep.mubr.msk.f32.mxu0 %vm11573_vm9, %v14938_v35  ;;  %10460 = vmatpush1.bf16.msra.mxu0 %v10459_v19  ;;  %v10501_v19 = vpack.c.bf16 %v4909_v53, %v4908_v3 }
 0x6b2   :  { %10461 = vmatprep.subr.bf16.mxu0 %v14982_v33 }
 0x6b4   :  { %8933 = vmatmul.mubr.f32.gmra.mrb[140].mxu0 %v12989_v50  ;;  %v14983_v50 = vld [vmem:[#allocation22_spill] sm:$0xff] }
 0x6b5   :  { %8935 = vmatprep.mubr.msk.f32.mxu0 %vm11573_vm9, %v14938_v35  ;;  %10463 = vmatpush1.bf16.msra.mxu0 %v10462_v4 }
 0x6b6   :  { %10464 = vmatprep.subr.bf16.mxu0 %v14982_v33 }
 0x6b8   :  { %8936 = vmatmul.mubr.f32.gmra.mrb[142].mxu0 %v12997_v39  ;;  %v14984_v39 = vld [vmem:[#allocation23_spill] sm:$0xff] }
 0x6b9   :  { %8938 = vmatprep.mubr.msk.f32.mxu0 %vm11573_vm9, %v14938_v35  ;;  %10466 = vmatpush1.bf16.msra.mxu0 %v10465_v2  ;;  %v10504_v2 = vpack.c.bf16 %v4911_v61, %v4910_v34 }
 0x6ba   :  { %10467 = vmatprep.subr.bf16.mxu0 %v14982_v33 }
 0x6bc   :  { %8939 = vmatmul.mubr.f32.gmra.mrb[144].mxu0 %v13005_v45  ;;  %v14994_v45 = vld [vmem:[#allocation33_spill] sm:$0xff] }
 0x6bd   :  { %8941 = vmatprep.mubr.msk.f32.mxu0 %vm11573_vm9, %v14938_v35  ;;  %10469 = vmatpush1.bf16.msra.mxu0 %v10468_v32  ;;  %v4913_v32 = vld [vmem:[%s14837_s15 + $0x48] sm:$0xff] }
 0x6be   :  { %10602 = vmatprep.subr.bf16.mxu0 %v14982_v33 }
 0x6c0   :  { %8942 = vmatmul.mubr.f32.gmra.mrb[146].mxu0 %v13012_v43  ;;  %v14995_v43 = vld [vmem:[#allocation34_spill] sm:$0xff] }
 0x6c1   :  { %8944 = vmatprep.mubr.msk.f32.mxu0 %vm11573_vm9, %v14938_v35 }
 0x6c4   :  { %8945 = vmatmul.mubr.f32.gmra.mrb[148].mxu0 %v13017_v41  ;;  %v14996_v41 = vld [vmem:[#allocation35_spill] sm:$0xff] }
 0x6c5   :  { %8947 = vmatprep.mubr.msk.f32.mxu0 %vm11573_vm9, %v14938_v35 }
 0x6c8   :  { %8948 = vmatmul.mubr.f32.gmra.mrb[150].mxu0 %v14938_v35 }
 0x6c9   :  { %4729 = vmatprep.mubr.f32.mxu0 %v12527_v52  ;;  %v14985_v52 = vld [vmem:[#allocation24_spill] sm:$0xff] }
 0x6cc   :  { %4730 = vmatmul.mubr.f32.vlgmr.msra.gmra.mrb[114].mxu0 %v12529_v17  ;;  %v14986_v17 = vld [vmem:[#allocation25_spill] sm:$0xff] }
 0x6cd   :  { %4734 = vmatprep.mubr.f32.mxu0 %v12535_v24  ;;  %v14987_v24 = vld [vmem:[#allocation26_spill] sm:$0xff] }
 0x6d0   :  { %4735 = vmatmul.mubr.f32.gmra.mrb[116].mxu0 %v12537_v13  ;;  %v14988_v13 = vld [vmem:[#allocation27_spill] sm:$0xff] }
 0x6d1   :  { %4739 = vmatprep.mubr.f32.mxu0 %v12546_v57  ;;  %v14989_v57 = vld [vmem:[#allocation28_spill] sm:$0xff] }
 0x6d4   :  { %4740 = vmatmul.mubr.f32.gmra.mrb[118].mxu0 %v12548_v49  ;;  %v14990_v49 = vld [vmem:[#allocation29_spill] sm:$0xff] }
 0x6d5   :  { %4744 = vmatprep.mubr.f32.mxu0 %v12557_v38  ;;  %v14991_v38 = vld [vmem:[#allocation30_spill] sm:$0xff] }
 0x6d8   :  { %4745 = vmatmul.mubr.f32.gmra.mrb[120].mxu0 %v12559_v12  ;;  %v14992_v12 = vld [vmem:[#allocation31_spill] sm:$0xff] }
 0x6d9   :  { %4749 = vmatprep.mubr.f32.mxu0 %v12568_v59  ;;  %v14993_v59 = vld [vmem:[#allocation32_spill] sm:$0xff] }
 0x6dc   :  { %4750 = vmatmul.mubr.f32.gmra.mrb[122].mxu0 %v14983_v50 }
 0x6dd   :  { %4754 = vmatprep.mubr.f32.mxu0 %v14984_v39 }
 0x6e0   :  { %4755 = vmatmul.mubr.f32.gmra.mrb[124].mxu0 %v14985_v52 }
 0x6e1   :  { %4759 = vmatprep.mubr.f32.mxu0 %v14986_v17  ;;  %v10507_v17 = vpack.c.bf16 %v4913_v32, %v4912_v21 }
 0x6e4   :  { %4760 = vmatmul.mubr.f32.gmra.mrb[126].mxu0 %v14987_v24 }
 0x6e5   :  { %4764 = vmatprep.mubr.f32.mxu0 %v14988_v13  ;;  %v4914_v13 = vld [vmem:[%s14837_s15 + $0x50] sm:$0xff] }
 0x6e8   :  { %4765 = vmatmul.mubr.f32.gmra.mrb[128].mxu0 %v14989_v57  ;;  %v4915_v57 = vld [vmem:[%s14837_s15 + $0x58] sm:$0xff] }
 0x6e9   :  { %4769 = vmatprep.mubr.f32.mxu0 %v14990_v49 }
 0x6ec   :  { %4770 = vmatmul.mubr.f32.gmra.mrb[130].mxu0 %v14991_v38 }
 0x6ed   :  { %4774 = vmatprep.mubr.f32.mxu0 %v14992_v12 }
 0x6f0   :  { %4775 = vmatmul.mubr.f32.gmra.mrb[132].mxu0 %v14993_v59  ;;  %v10510_v59 = vpack.c.bf16 %v4915_v57, %v4914_v13 }
 0x6f1   :  { %4779 = vmatprep.mubr.f32.mxu0 %v14994_v45 }
 0x6f4   :  { %4780 = vmatmul.mubr.f32.gmra.mrb[134].mxu0 %v14995_v43  ;;  %v4916_v43 = vld [vmem:[%s14837_s15 + $0x60] sm:$0xff] }
 0x6f5   :  { %4784 = vmatprep.mubr.f32.mxu0 %v14996_v41  ;;  %v4917_v41 = vld [vmem:[%s14837_s15 + $0x68] sm:$0xff] }
 0x6f8   :  { %4785 = vmatmul.mubr.f32.gmra.mrb[136].mxu0 %v14997_v27 }
 0x6f9   :  { %4789 = vmatprep.mubr.f32.mxu0 %v14998_v25 }
 0x6fc   :  { %4790 = vmatmul.mubr.f32.gmra.mrb[138].mxu0 %v14999_v23 }
 0x6fd   :  { %4794 = vmatprep.mubr.f32.mxu0 %v15000_v8  ;;  %v10513_v8 = vpack.c.bf16 %v4917_v41, %v4916_v43 }
 0x700   :  { %4795 = vmatmul.mubr.f32.gmra.mrb[140].mxu0 %v15001_v48 }
 0x701   :  { %4799 = vmatprep.mubr.f32.mxu0 %v15002_v26  ;;  %v4918_v26 = vld [vmem:[%s14837_s15 + $0x70] sm:$0xff] }
 0x704   :  { %4800 = vmatmul.mubr.f32.gmra.mrb[142].mxu0 %v15003_v46  ;;  %v4919_v46 = vld [vmem:[%s14837_s15 + $0x78] sm:$0xff] }
 0x705   :  { %4804 = vmatprep.mubr.f32.mxu0 %v15004_v28 }
 0x708   :  { %4805 = vmatmul.mubr.f32.gmra.mrb[144].mxu0 %v15005_v6 }
 0x709   :  { %4809 = vmatprep.mubr.f32.mxu0 %v15006_v0 }
 0x70c   :  { %4810 = vmatmul.mubr.f32.gmra.mrb[146].mxu0 %v15007_v62  ;;  %v10516_v62 = vpack.c.bf16 %v4919_v46, %v4918_v26  ;;  %v5279_v26 = vld [vmem:[%s14837_s15 + $0x118] sm:$0xff] }
 0x70d   :  { %4814 = vmatprep.mubr.f32.mxu0 %v15008_v7 }
 0x710   :  { %4815 = vmatmul.mubr.f32.gmra.mrb[148].mxu0 %v15009_v1 }
 0x711   :  { %4819 = vmatprep.mubr.f32.mxu0 %v15010_v56 }
 0x714   :  { %4820 = vmatmul.mubr.f32.gmra.mrb[150].mxu0 %v15011_v18 }
 0x715   :  { %9541 = vmatprep.mubr.msk.f32.mxu0 %vm11573_vm9, %v14938_v35 }
 0x79f   :  { %v4731_v36 = vpop.f32.mrb[114].mxu0 }
 0x7a0   :  { %v10907_v5 = vadd.f32 %v13260_v58, %v4731_v36  ;;  %v4733_v55 = vpop.f32.mrb[115].mxu0 }
 0x7a2   :  { %v13269_v47 = vmax.f32 %v10907_v5, 0.0 }
 0x7a3   :  { %v4736_v37 = vpop.f32.mrb[116].mxu0 }
 0x7a4   :  { %v10909_v60 = vadd.f32 %v13260_v58, %v4736_v37  ;;  %v4738_v10 = vpop.f32.mrb[117].mxu0  ;;  %8983 = vmatmul.mubr.f32.vlgmr.msra.gmra.mrb[76].mxu1 %v13269_v47 }
 0x7a5   :  { %10496 = vmatpush3.bf16.msra.mxu1 %v10495_v20  ;;  %8985 = vmatprep.mubr.msk.f32.mxu1 %vm11573_vm9, %v14938_v35 }
 0x7a6   :  { %v13281_v14 = vmax.f32 %v10909_v60, 0.0  ;;  %10497 = vmatprep.subr.bf16.mxu1 %v14982_v33 }
 0x7a7   :  { %v4741_v44 = vpop.f32.mrb[118].mxu0 }
 0x7a8   :  { %v10911_v42 = vadd.f32 %v13260_v58, %v4741_v44  ;;  %v4743_v11 = vpop.f32.mrb[119].mxu0  ;;  %8986 = vmatmul.mubr.f32.gmra.mrb[78].mxu1 %v13281_v14 }
 0x7a9   :  { %8988 = vmatprep.mubr.msk.f32.mxu1 %vm11573_vm9, %v14938_v35  ;;  %10499 = vmatpush3.bf16.msra.mxu1 %v10498_v16 }
 0x7aa   :  { %v13294_v22 = vmax.f32 %v10911_v42, 0.0  ;;  %10500 = vmatprep.subr.bf16.mxu1 %v14982_v33 }
 0x7ab   :  { %v4746_v4 = vpop.f32.mrb[120].mxu0 }
 0x7ac   :  { %v10913_v63 = vadd.f32 %v13260_v58, %v4746_v4  ;;  %v4748_v54 = vpop.f32.mrb[121].mxu0  ;;  %8989 = vmatmul.mubr.f32.gmra.mrb[80].mxu1 %v13294_v22 }
 0x7ad   :  { %8991 = vmatprep.mubr.msk.f32.mxu1 %vm11573_vm9, %v14938_v35  ;;  %10502 = vmatpush3.bf16.msra.mxu1 %v10501_v19 }
 0x7ae   :  { %v13307_v15 = vmax.f32 %v10913_v63, 0.0  ;;  %10503 = vmatprep.subr.bf16.mxu1 %v14982_v33 }
 0x7af   :  { %v4751_v50 = vpop.f32.mrb[122].mxu0 }
 0x7b0   :  { %v10915_v39 = vadd.f32 %v13260_v58, %v4751_v50  ;;  %v4753_v52 = vpop.f32.mrb[123].mxu0  ;;  %8992 = vmatmul.mubr.f32.gmra.mrb[82].mxu1 %v13307_v15 }
 0x7b1   :  { %8994 = vmatprep.mubr.msk.f32.mxu1 %vm11573_vm9, %v14938_v35  ;;  %10505 = vmatpush3.bf16.msra.mxu1 %v10504_v2 }
 0x7b2   :  { %v13320_v24 = vmax.f32 %v10915_v39, 0.0  ;;  %10506 = vmatprep.subr.bf16.mxu1 %v14982_v33 }
 0x7b3   :  { %v4756_v49 = vpop.f32.mrb[124].mxu0 }
 0x7b4   :  { %v10917_v38 = vadd.f32 %v13260_v58, %v4756_v49  ;;  %v4758_v12 = vpop.f32.mrb[125].mxu0  ;;  %8995 = vmatmul.mubr.f32.gmra.mrb[84].mxu1 %v13320_v24 }
 0x7b5   :  { %8997 = vmatprep.mubr.msk.f32.mxu1 %vm11573_vm9, %v14938_v35  ;;  %10508 = vmatpush3.bf16.msra.mxu1 %v10507_v17 }
 0x7b6   :  { %v13333_v45 = vmax.f32 %v10917_v38, 0.0  ;;  %10509 = vmatprep.subr.bf16.mxu1 %v14982_v33 }
 0x7b7   :  { %v4761_v27 = vpop.f32.mrb[126].mxu0 }
 0x7b8   :  { %v10919_v25 = vadd.f32 %v13260_v58, %v4761_v27  ;;  %v4763_v23 = vpop.f32.mrb[127].mxu0  ;;  %8998 = vmatmul.mubr.f32.gmra.mrb[86].mxu1 %v13333_v45 }
 0x7b9   :  { %9000 = vmatprep.mubr.msk.f32.mxu1 %vm11573_vm9, %v14938_v35  ;;  %10511 = vmatpush3.bf16.msra.mxu1 %v10510_v59  ;;  %v5277_v23 = vld [vmem:[%s14837_s15 + $0x108] sm:$0xff] }
 0x7ba   :  { %v13346_v48 = vmax.f32 %v10919_v25, 0.0  ;;  %10512 = vmatprep.subr.bf16.mxu1 %v14982_v33  ;;  %v5276_v25 = vld [vmem:[%s14837_s15 + $0x100] sm:$0xff] }
 0x7bb   :  { %v4766_v28 = vpop.f32.mrb[128].mxu0 }
 0x7bc   :  { %v10921_v6 = vadd.f32 %v13260_v58, %v4766_v28  ;;  %v4768_v0 = vpop.f32.mrb[129].mxu0  ;;  %9001 = vmatmul.mubr.f32.gmra.mrb[88].mxu1 %v13346_v48  ;;  %v5280_v28 = vld [vmem:[%s14837_s15 + $0x120] sm:$0xff] }
 0x7bd   :  { %9003 = vmatprep.mubr.msk.f32.mxu1 %vm11573_vm9, %v14938_v35  ;;  %10514 = vmatpush3.bf16.msra.mxu1 %v10513_v8  ;;  %v5278_v8 = vld [vmem:[%s14837_s15 + $0x110] sm:$0xff] }
 0x7be   :  { %v13359_v7 = vmax.f32 %v10921_v6, 0.0  ;;  %10515 = vmatprep.subr.bf16.mxu1 %v14982_v33  ;;  %v10522_v46 = vpack.c.bf16 %v5279_v26, %v5278_v8  ;;  %v5281_v6 = vld [vmem:[%s14837_s15 + $0x128] sm:$0xff]  ;;  %v5608_v8 = vld [vmem:[%s14839_s17 + $0x78] sm:$0xff] }
 0x7bf   :  { %v4771_v1 = vpop.f32.mrb[130].mxu0  ;;  %v10525_v0 = vpack.c.bf16 %v5281_v6, %v5280_v28 }
 0x7c0   :  { %v10923_v56 = vadd.f32 %v13260_v58, %v4771_v1  ;;  %v4773_v18 = vpop.f32.mrb[131].mxu0  ;;  %9004 = vmatmul.mubr.f32.gmra.mrb[90].mxu1 %v13359_v7  ;;  %v5283_v1 = vld [vmem:[%s14837_s15 + $0x138] sm:$0xff] }
 0x7c1   :  { %9006 = vmatprep.mubr.msk.f32.mxu1 %vm11573_vm9, %v14938_v35  ;;  %10517 = vmatpush3.bf16.msra.mxu1 %v10516_v62  ;;  %v5282_v62 = vld [vmem:[%s14837_s15 + $0x130] sm:$0xff]  ;;  %v5284_v18 = vld [vmem:[%s14837_s15 + $0x140] sm:$0xff] }
 0x7c2   :  { %v13366_v9 = vmax.f32 %v10923_v56, 0.0  ;;  %10518 = vmatprep.subr.bf16.mxu1 %v14982_v33  ;;  %v10528_v56 = vpack.c.bf16 %v5283_v1, %v5282_v62 }
 0x7c3   :  { %v4776_v30 = vpop.f32.mrb[132].mxu0 }
 0x7c4   :  { %v10925_v40 = vadd.f32 %v13260_v58, %v4776_v30  ;;  %v4778_v29 = vpop.f32.mrb[133].mxu0  ;;  %9007 = vmatmul.mubr.f32.gmra.mrb[92].mxu1 %v13366_v9  ;;  %v5285_v30 = vld [vmem:[%s14837_s15 + $0x148] sm:$0xff] }
 0x7c5   :  { %9009 = vmatprep.mubr.msk.f32.mxu1 %vm11573_vm9, %v14938_v35  ;;  %v5286_v29 = vld [vmem:[%s14837_s15 + $0x150] sm:$0xff] }
 0x7c6   :  { %v13373_v36 = vmax.f32 %v10925_v40, 0.0  ;;  %v10531_v40 = vpack.c.bf16 %v5285_v30, %v5284_v18 }
 0x7c7   :  { %v4781_v5 = vpop.f32.mrb[134].mxu0 }
 0x7c8   :  { %v10927_v55 = vadd.f32 %v13260_v58, %v4781_v5  ;;  %v4783_v20 = vpop.f32.mrb[135].mxu0  ;;  %9010 = vmatmul.mubr.f32.gmra.mrb[94].mxu1 %v13373_v36  ;;  %v5287_v5 = vld [vmem:[%s14837_s15 + $0x158] sm:$0xff] }
 0x7c9   :  { %9012 = vmatprep.mubr.msk.f32.mxu1 %vm11573_vm9, %v14938_v35  ;;  %v5288_v20 = vld [vmem:[%s14837_s15 + $0x160] sm:$0xff] }
 0x7ca   :  { %v13379_v31 = vmax.f32 %v10927_v55, 0.0  ;;  %v10534_v55 = vpack.c.bf16 %v5287_v5, %v5286_v29 }
 0x7cb   :  { %v4786_v51 = vpop.f32.mrb[136].mxu0 }
 0x7cc   :  { %v10929_v37 = vadd.f32 %v13260_v58, %v4786_v51  ;;  %v4788_v60 = vpop.f32.mrb[137].mxu0  ;;  %9013 = vmatmul.mubr.f32.gmra.mrb[96].mxu1 %v13379_v31  ;;  %v5289_v51 = vld [vmem:[%s14837_s15 + $0x168] sm:$0xff] }
 0x7cd   :  { %9015 = vmatprep.mubr.msk.f32.mxu1 %vm11573_vm9, %v14938_v35  ;;  %v5290_v60 = vld [vmem:[%s14837_s15 + $0x170] sm:$0xff] }
 0x7ce   :  { %v13385_v10 = vmax.f32 %v10929_v37, 0.0  ;;  %v10537_v37 = vpack.c.bf16 %v5289_v51, %v5288_v20 }
 0x7cf   :  { %v4791_v16 = vpop.f32.mrb[138].mxu0 }
 0x7d0   :  { %v10931_v3 = vadd.f32 %v13260_v58, %v4791_v16  ;;  %v4793_v53 = vpop.f32.mrb[139].mxu0  ;;  %9016 = vmatmul.mubr.f32.gmra.mrb[98].mxu1 %v13385_v10  ;;  %v5291_v16 = vld [vmem:[%s14837_s15 + $0x178] sm:$0xff] }
 0x7d1   :  { %9018 = vmatprep.mubr.msk.f32.mxu1 %vm11573_vm9, %v14938_v35  ;;  %v5601_v53 = vld [vmem:[%s14839_s17 + $0x40] sm:$0xff] }
 0x7d2   :  { %v13391_v44 = vmax.f32 %v10931_v3, 0.0  ;;  %v10540_v3 = vpack.c.bf16 %v5291_v16, %v5290_v60 }
 0x7d3   :  { %v4796_v42 = vpop.f32.mrb[140].mxu0 }
 0x7d4   :  { %v10933_v11 = vadd.f32 %v13260_v58, %v4796_v42  ;;  %v4798_v19 = vpop.f32.mrb[141].mxu0  ;;  %9019 = vmatmul.mubr.f32.gmra.mrb[100].mxu1 %v13391_v44  ;;  %v5602_v42 = vld [vmem:[%s14839_s17 + $0x48] sm:$0xff] }
 0x7d5   :  { %9021 = vmatprep.mubr.msk.f32.mxu1 %vm11573_vm9, %v14938_v35  ;;  %v5603_v19 = vld [vmem:[%s14839_s17 + $0x50] sm:$0xff] }
 0x7d6   :  { %v13397_v34 = vmax.f32 %v10933_v11, 0.0  ;;  %v10543_v11 = vpack.c.bf16 %v5602_v42, %v5601_v53 }
 0x7d7   :  { %v4801_v61 = vpop.f32.mrb[142].mxu0 }
 0x7d8   :  { %v10935_v4 = vadd.f32 %v13260_v58, %v4801_v61  ;;  %v4803_v63 = vpop.f32.mrb[143].mxu0  ;;  %9022 = vmatmul.mubr.f32.gmra.mrb[102].mxu1 %v13397_v34  ;;  %v5604_v61 = vld [vmem:[%s14839_s17 + $0x58] sm:$0xff] }
 0x7d9   :  { %9024 = vmatprep.mubr.msk.f32.mxu1 %vm11573_vm9, %v14938_v35 }
 0x7da   :  { %v13403_v54 = vmax.f32 %v10935_v4, 0.0  ;;  %v10546_v4 = vpack.c.bf16 %v5604_v61, %v5603_v19 }
 0x7db   :  { %v4806_v2 = vpop.f32.mrb[144].mxu0 }
 0x7dc   :  { %v10937_v21 = vadd.f32 %v13260_v58, %v4806_v2  ;;  %v4808_v32 = vpop.f32.mrb[145].mxu0  ;;  %9025 = vmatmul.mubr.f32.gmra.mrb[104].mxu1 %v13403_v54 }
 0x7dd   :  { %9027 = vmatprep.mubr.msk.f32.mxu1 %vm11573_vm9, %v14938_v35  ;;  %v5606_v32 = vld [vmem:[%s14839_s17 + $0x68] sm:$0xff] }
 0x7de   :  { %v13409_v50 = vmax.f32 %v10937_v21, 0.0  ;;  %v5605_v21 = vld [vmem:[%s14839_s17 + $0x60] sm:$0xff] }
 0x7df   :  { %v4811_v39 = vpop.f32.mrb[146].mxu0 }
 0x7e0   :  { %v10939_v52 = vadd.f32 %v13260_v58, %v4811_v39  ;;  %v4813_v17 = vpop.f32.mrb[147].mxu0  ;;  %9028 = vmatmul.mubr.f32.gmra.mrb[106].mxu1 %v13409_v50  ;;  %v10549_v39 = vpack.c.bf16 %v5606_v32, %v5605_v21 }
 0x7e1   :  { %9030 = vmatprep.mubr.msk.f32.mxu1 %vm11573_vm9, %v14938_v35 }
 0x7e2   :  { %v13415_v13 = vmax.f32 %v10939_v52, 0.0 }
 0x7e3   :  { %v4816_v57 = vpop.f32.mrb[148].mxu0 }
 0x7e4   :  { %v10941_v49 = vadd.f32 %v13260_v58, %v4816_v57  ;;  %v4818_v38 = vpop.f32.mrb[149].mxu0  ;;  %9031 = vmatmul.mubr.f32.gmra.mrb[108].mxu1 %v13415_v13 }
 0x7e5   :  { %9033 = vmatprep.mubr.msk.f32.mxu1 %vm11573_vm9, %v14938_v35 }
 0x7e6   :  { %v13421_v12 = vmax.f32 %v10941_v49, 0.0 }
 0x7e7   :  { %v4821_v59 = vpop.f32.mrb[150].mxu0 }
 0x7e8   :  { %v10943_v43 = vadd.f32 %v13260_v58, %v4821_v59  ;;  %v4823_v41 = vpop.f32.mrb[151].mxu0  ;;  %9034 = vmatmul.mubr.f32.gmra.mrb[110].mxu1 %v13421_v12  ;;  %v10519_v58 = vpack.c.bf16 %v5277_v23, %v5276_v25 }
 0x7e9   :  { %9036 = vmatprep.mubr.msk.f32.mxu1 %vm11573_vm9, %v14938_v35 }
 0x7ea   :  { %v13427_v27 = vmax.f32 %v10943_v43, 0.0 }
 0x7ec   :  { %9037 = vmatmul.mubr.f32.gmra.mrb[112].mxu1 %v13427_v27 }
 0x7ed   :  { %9071 = vmatprep.mubr.msk.f32.mxu1 %vm11573_vm9, %v14938_v35 }
 0x7f0   :  { %9072 = vmatmul.mubr.f32.vlgmr.msra.gmra.mrb[114].mxu1 %v14938_v35 }
 0x7f1   :  { %10520 = vmatpush3.bf16.msra.mxu1 %v10519_v58  ;;  %9074 = vmatprep.mubr.msk.f32.mxu1 %vm11573_vm9, %v14938_v35  ;;  %v5607_v58 = vld [vmem:[%s14839_s17 + $0x70] sm:$0xff] }
 0x7f2   :  { %10521 = vmatprep.subr.bf16.mxu1 %v14982_v33  ;;  %v10552_v26 = vpack.c.bf16 %v5608_v8, %v5607_v58 }
 0x7f4   :  { %9075 = vmatmul.mubr.f32.gmra.mrb[116].mxu1 %v13269_v47 }
 0x7f5   :  { %9077 = vmatprep.mubr.msk.f32.mxu1 %vm11573_vm9, %v14938_v35  ;;  %10523 = vmatpush3.bf16.msra.mxu1 %v10522_v46 }
 0x7f6   :  { %10524 = vmatprep.subr.bf16.mxu1 %v14982_v33 }
 0x7f8   :  { %9078 = vmatmul.mubr.f32.gmra.mrb[118].mxu1 %v13281_v14 }
 0x7f9   :  { %9080 = vmatprep.mubr.msk.f32.mxu1 %vm11573_vm9, %v14938_v35  ;;  %10526 = vmatpush3.bf16.msra.mxu1 %v10525_v0 }
 0x7fa   :  { %10527 = vmatprep.subr.bf16.mxu1 %v14982_v33 }
 0x7fc   :  { %9081 = vmatmul.mubr.f32.gmra.mrb[120].mxu1 %v13294_v22 }
 0x7fd   :  { %9083 = vmatprep.mubr.msk.f32.mxu1 %vm11573_vm9, %v14938_v35  ;;  %10529 = vmatpush3.bf16.msra.mxu1 %v10528_v56 }
 0x7fe   :  { %10530 = vmatprep.subr.bf16.mxu1 %v14982_v33 }
 0x800   :  { %9084 = vmatmul.mubr.f32.gmra.mrb[122].mxu1 %v13307_v15 }
 0x801   :  { %9086 = vmatprep.mubr.msk.f32.mxu1 %vm11573_vm9, %v14938_v35  ;;  %10532 = vmatpush3.bf16.msra.mxu1 %v10531_v40 }
 0x802   :  { %10533 = vmatprep.subr.bf16.mxu1 %v14982_v33 }
 0x804   :  { %9087 = vmatmul.mubr.f32.gmra.mrb[124].mxu1 %v13320_v24 }
 0x805   :  { %9089 = vmatprep.mubr.msk.f32.mxu1 %vm11573_vm9, %v14938_v35  ;;  %10535 = vmatpush3.bf16.msra.mxu1 %v10534_v55 }
 0x806   :  { %10536 = vmatprep.subr.bf16.mxu1 %v14982_v33 }
 0x808   :  { %9090 = vmatmul.mubr.f32.gmra.mrb[126].mxu1 %v13333_v45 }
 0x809   :  { %9092 = vmatprep.mubr.msk.f32.mxu1 %vm11573_vm9, %v14938_v35  ;;  %10538 = vmatpush3.bf16.msra.mxu1 %v10537_v37 }
 0x80a   :  { %10539 = vmatprep.subr.bf16.mxu1 %v14982_v33 }
 0x80c   :  { %9093 = vmatmul.mubr.f32.gmra.mrb[128].mxu1 %v13346_v48 }
 0x80d   :  { %9095 = vmatprep.mubr.msk.f32.mxu1 %vm11573_vm9, %v14938_v35  ;;  %10541 = vmatpush3.bf16.msra.mxu1 %v10540_v3 }
 0x80e   :  { %10542 = vmatprep.subr.bf16.mxu1 %v14982_v33 }
 0x810   :  { %9096 = vmatmul.mubr.f32.gmra.mrb[130].mxu1 %v13359_v7 }
 0x811   :  { %9098 = vmatprep.mubr.msk.f32.mxu1 %vm11573_vm9, %v14938_v35 }
 0x814   :  { %9099 = vmatmul.mubr.f32.gmra.mrb[132].mxu1 %v13366_v9 }
 0x815   :  { %9101 = vmatprep.mubr.msk.f32.mxu1 %vm11573_vm9, %v14938_v35 }
 0x818   :  { %9102 = vmatmul.mubr.f32.gmra.mrb[134].mxu1 %v13373_v36 }
 0x819   :  { %9104 = vmatprep.mubr.msk.f32.mxu1 %vm11573_vm9, %v14938_v35 }
 0x81c   :  { %9105 = vmatmul.mubr.f32.gmra.mrb[136].mxu1 %v13379_v31 }
 0x81d   :  { %9107 = vmatprep.mubr.msk.f32.mxu1 %vm11573_vm9, %v14938_v35 }
 0x820   :  { %9108 = vmatmul.mubr.f32.gmra.mrb[138].mxu1 %v13385_v10 }
 0x821   :  { %9110 = vmatprep.mubr.msk.f32.mxu1 %vm11573_vm9, %v14938_v35 }
 0x824   :  { %9111 = vmatmul.mubr.f32.gmra.mrb[140].mxu1 %v13391_v44 }
 0x825   :  { %9113 = vmatprep.mubr.msk.f32.mxu1 %vm11573_vm9, %v14938_v35 }
 0x828   :  { %9114 = vmatmul.mubr.f32.gmra.mrb[142].mxu1 %v13397_v34 }
 0x829   :  { %9116 = vmatprep.mubr.msk.f32.mxu1 %vm11573_vm9, %v14938_v35 }
 0x82c   :  { %9117 = vmatmul.mubr.f32.gmra.mrb[144].mxu1 %v13403_v54 }
 0x82d   :  { %9119 = vmatprep.mubr.msk.f32.mxu1 %vm11573_vm9, %v14938_v35 }
 0x830   :  { %9120 = vmatmul.mubr.f32.gmra.mrb[146].mxu1 %v13409_v50 }
 0x831   :  { %9122 = vmatprep.mubr.msk.f32.mxu1 %vm11573_vm9, %v14938_v35 }
 0x834   :  { %9123 = vmatmul.mubr.f32.gmra.mrb[148].mxu1 %v13415_v13 }
 0x835   :  { %9125 = vmatprep.mubr.msk.f32.mxu1 %vm11573_vm9, %v14938_v35 }
 0x838   :  { %9126 = vmatmul.mubr.f32.gmra.mrb[150].mxu1 %v13421_v12 }
 0x839   :  { %9160 = vmatprep.mubr.msk.f32.mxu1 %vm11573_vm9, %v14938_v35 }
 0x83c   :  { %9161 = vmatmul.mubr.f32.vlgmr.msra.gmra.mrb[152].mxu1 %v13281_v14 }
 0x83d   :  { %9163 = vmatprep.mubr.msk.f32.mxu1 %vm11573_vm9, %v14938_v35  ;;  %10544 = vmatpush3.bf16.msra.mxu1 %v10543_v11 }
 0x83e   :  { %10545 = vmatprep.subr.bf16.mxu1 %v14982_v33 }
 0x840   :  { %9164 = vmatmul.mubr.f32.gmra.mrb[154].mxu1 %v13294_v22 }
 0x841   :  { %9166 = vmatprep.mubr.msk.f32.mxu1 %vm11573_vm9, %v14938_v35  ;;  %10547 = vmatpush3.bf16.msra.mxu1 %v10546_v4 }
 0x842   :  { %10548 = vmatprep.subr.bf16.mxu1 %v14982_v33 }
 0x844   :  { %9167 = vmatmul.mubr.f32.gmra.mrb[156].mxu1 %v13307_v15 }
 0x845   :  { %9169 = vmatprep.mubr.msk.f32.mxu1 %vm11573_vm9, %v14938_v35  ;;  %10550 = vmatpush3.bf16.msra.mxu1 %v10549_v39 }
 0x846   :  { %10551 = vmatprep.subr.bf16.mxu1 %v14982_v33 }
 0x848   :  { %9170 = vmatmul.mubr.f32.gmra.mrb[158].mxu1 %v13320_v24 }
 0x849   :  { %9172 = vmatprep.mubr.msk.f32.mxu1 %vm11573_vm9, %v14938_v35  ;;  %10553 = vmatpush3.bf16.msra.mxu1 %v10552_v26 }
 0x84a   :  { %10554 = vmatprep.subr.bf16.mxu1 %v14982_v33 }
 0x84c   :  { %9173 = vmatmul.mubr.f32.gmra.mrb[160].mxu1 %v13333_v45 }
 0x84d   :  { %9175 = vmatprep.mubr.msk.f32.mxu1 %vm11573_vm9, %v14938_v35 }
 0x850   :  { %9176 = vmatmul.mubr.f32.gmra.mrb[162].mxu1 %v13346_v48 }
 0x851   :  { %9178 = vmatprep.mubr.msk.f32.mxu1 %vm11573_vm9, %v14938_v35 }
 0x854   :  { %9179 = vmatmul.mubr.f32.gmra.mrb[164].mxu1 %v13359_v7 }
 0x855   :  { %9181 = vmatprep.mubr.msk.f32.mxu1 %vm11573_vm9, %v14938_v35 }
 0x858   :  { %9182 = vmatmul.mubr.f32.gmra.mrb[166].mxu1 %v13366_v9 }
 0x859   :  { %9184 = vmatprep.mubr.msk.f32.mxu1 %vm11573_vm9, %v14938_v35 }
 0x85c   :  { %9185 = vmatmul.mubr.f32.gmra.mrb[168].mxu1 %v13373_v36 }
 0x85d   :  { %9187 = vmatprep.mubr.msk.f32.mxu1 %vm11573_vm9, %v14938_v35 }
 0x860   :  { %9188 = vmatmul.mubr.f32.gmra.mrb[170].mxu1 %v13379_v31 }
 0x861   :  { %9190 = vmatprep.mubr.msk.f32.mxu1 %vm11573_vm9, %v14938_v35 }
 0x864   :  { %9191 = vmatmul.mubr.f32.gmra.mrb[172].mxu1 %v13385_v10 }
 0x865   :  { %9193 = vmatprep.mubr.msk.f32.mxu1 %vm11573_vm9, %v14938_v35 }
 0x868   :  { %9194 = vmatmul.mubr.f32.gmra.mrb[174].mxu1 %v13391_v44 }
 0x869   :  { %9196 = vmatprep.mubr.msk.f32.mxu1 %vm11573_vm9, %v14938_v35 }
 0x86c   :  { %9197 = vmatmul.mubr.f32.gmra.mrb[176].mxu1 %v13397_v34 }
 0x86d   :  { %9199 = vmatprep.mubr.msk.f32.mxu1 %vm11573_vm9, %v14938_v35 }
 0x870   :  { %9200 = vmatmul.mubr.f32.gmra.mrb[178].mxu1 %v13403_v54 }
 0x871   :  { %9202 = vmatprep.mubr.msk.f32.mxu1 %vm11573_vm9, %v14938_v35 }
 0x874   :  { %9203 = vmatmul.mubr.f32.gmra.mrb[180].mxu1 %v13409_v50 }
 0x875   :  { %9205 = vmatprep.mubr.msk.f32.mxu1 %vm11573_vm9, %v14938_v35 }
 0x877   :  { %v5003_v63 = vpop.f32.mrb[76].mxu1 }
 0x878   :  { %v8984_v2 = vpop.f32.mrb[77].mxu1  ;;  %9206 = vmatmul.mubr.f32.gmra.mrb[182].mxu1 %v13415_v13 }
 0x879   :  { %9208 = vmatprep.mubr.msk.f32.mxu1 %vm11573_vm9, %v14938_v35 }
 0x87b   :  { %v5008_v52 = vpop.f32.mrb[78].mxu1 }
 0x87c   :  { %v8987_v17 = vpop.f32.mrb[79].mxu1  ;;  %9209 = vmatmul.mubr.f32.gmra.mrb[184].mxu1 %v13421_v12 }
 0x87d   :  { %9211 = vmatprep.mubr.msk.f32.mxu1 %vm11573_vm9, %v14938_v35 }
 0x87f   :  { %v5013_v57 = vpop.f32.mrb[80].mxu1 }
 0x880   :  { %v8990_v49 = vpop.f32.mrb[81].mxu1  ;;  %9212 = vmatmul.mubr.f32.gmra.mrb[186].mxu1 %v13427_v27 }
 0x881   :  { %9214 = vmatprep.mubr.msk.f32.mxu1 %vm11573_vm9, %v14938_v35 }
 0x883   :  { %v5018_v38 = vpop.f32.mrb[82].mxu1 }
 0x884   :  { %v8993_v59 = vpop.f32.mrb[83].mxu1  ;;  %9215 = vmatmul.mubr.f32.gmra.mrb[188].mxu1 %v14938_v35 }
 0x885   :  { %9233 = vmatprep.mubr.msk.f32.mxu1 %vm11573_vm9, %v14938_v35 }
 0x887   :  { %v5023_v43 = vpop.f32.mrb[84].mxu1 }
 0x888   :  { %v8996_v41 = vpop.f32.mrb[85].mxu1 }
 0x88b   :  { %v5028_v25 = vpop.f32.mrb[86].mxu1 }
 0x88c   :  { %v8999_v23 = vpop.f32.mrb[87].mxu1 }
 0x88f   :  { %v5033_v46 = vpop.f32.mrb[88].mxu1 }
 0x890   :  { %v9002_v28 = vpop.f32.mrb[89].mxu1 }
 0x893   :  { %v5038_v6 = vpop.f32.mrb[90].mxu1 }
 0x894   :  { %v9005_v0 = vpop.f32.mrb[91].mxu1 }
 0x897   :  { %v5043_v62 = vpop.f32.mrb[92].mxu1 }
 0x898   :  { %v9008_v1 = vpop.f32.mrb[93].mxu1 }
 0x89b   :  { %v5048_v56 = vpop.f32.mrb[94].mxu1 }
 0x89c   :  { %v9011_v18 = vpop.f32.mrb[95].mxu1 }
 0x89f   :  { %v5053_v30 = vpop.f32.mrb[96].mxu1 }
 0x8a0   :  { %v9014_v40 = vpop.f32.mrb[97].mxu1 }
 0x8a3   :  { %v5058_v29 = vpop.f32.mrb[98].mxu1 }
 0x8a4   :  { %v9017_v5 = vpop.f32.mrb[99].mxu1 }
 0x8a7   :  { %v5063_v55 = vpop.f32.mrb[100].mxu1 }
 0x8a8   :  { %v9020_v20 = vpop.f32.mrb[101].mxu1 }
 0x8ab   :  { %v5068_v51 = vpop.f32.mrb[102].mxu1 }
 0x8ac   :  { %v9023_v37 = vpop.f32.mrb[103].mxu1 }
 0x8af   :  { %v5073_v60 = vpop.f32.mrb[104].mxu1 }
 0x8b0   :  { %v9026_v16 = vpop.f32.mrb[105].mxu1 }
 0x8b3   :  { %v5078_v3 = vpop.f32.mrb[106].mxu1 }
 0x8b4   :  { %v9029_v53 = vpop.f32.mrb[107].mxu1 }
 0x8b7   :  { %v5083_v42 = vpop.f32.mrb[108].mxu1 }
 0x8b8   :  { %v9032_v11 = vpop.f32.mrb[109].mxu1 }
 0x8bb   :  { %v5088_v19 = vpop.f32.mrb[110].mxu1 }
 0x8bc   :  { %v9035_v61 = vpop.f32.mrb[111].mxu1 }
 0x8bf   :  { %v5093_v4 = vpop.f32.mrb[112].mxu1 }
 0x8c0   :  { %v9038_v2 = vpop.f32.mrb[113].mxu1 }
 0x8c3   :  { %v5163_v21 = vpop.f32.mrb[114].mxu1 }
 0x8c4   :  { %v5164_v32 = vadd.f32 %v5163_v21, %v5003_v63  ;;  %v9073_v39 = vpop.f32.mrb[115].mxu1 }
 0x8c7   :  { %v5168_v17 = vpop.f32.mrb[116].mxu1 }
 0x8c8   :  { %v5169_v49 = vadd.f32 %v5168_v17, %v5008_v52  ;;  %v9076_v59 = vpop.f32.mrb[117].mxu1 }
 0x8cb   :  { %v5173_v41 = vpop.f32.mrb[118].mxu1 }
 0x8cc   :  { %v13634_v23 = vadd.f32 %v5173_v41, %v5013_v57  ;;  %v9079_v58 = vpop.f32.mrb[119].mxu1 }
 0x8cf   :  { %v5178_v8 = vpop.f32.mrb[120].mxu1 }
 0x8d0   :  { %v13636_v26 = vadd.f32 %v5178_v8, %v5018_v38  ;;  %v9082_v28 = vpop.f32.mrb[121].mxu1 }
 0x8d3   :  { %v5183_v0 = vpop.f32.mrb[122].mxu1 }
 0x8d4   :  { %v13638_v1 = vadd.f32 %v5183_v0, %v5023_v43  ;;  %v9085_v18 = vpop.f32.mrb[123].mxu1 }
 0x8d7   :  { %v5188_v40 = vpop.f32.mrb[124].mxu1 }
 0x8d8   :  { %v13640_v5 = vadd.f32 %v5188_v40, %v5028_v25  ;;  %v9088_v63 = vpop.f32.mrb[125].mxu1 }
 0x8db   :  { %v5193_v20 = vpop.f32.mrb[126].mxu1 }
 0x8dc   :  { %v13642_v37 = vadd.f32 %v5193_v20, %v5033_v46  ;;  %v9091_v52 = vpop.f32.mrb[127].mxu1 }
 0x8df   :  { %v5198_v16 = vpop.f32.mrb[128].mxu1 }
 0x8e0   :  { %v13644_v57 = vadd.f32 %v5198_v16, %v5038_v6  ;;  %v9094_v53 = vpop.f32.mrb[129].mxu1 }
 0x8e3   :  { %v5203_v11 = vpop.f32.mrb[130].mxu1 }
 0x8e4   :  { %v13646_v38 = vadd.f32 %v5203_v11, %v5043_v62  ;;  %v9097_v61 = vpop.f32.mrb[131].mxu1 }
 0x8e7   :  { %v5208_v2 = vpop.f32.mrb[132].mxu1 }
 0x8e8   :  { %v13648_v43 = vadd.f32 %v5208_v2, %v5048_v56  ;;  %v9100_v21 = vpop.f32.mrb[133].mxu1 }
 0x8eb   :  { %v5213_v39 = vpop.f32.mrb[134].mxu1 }
 0x8ec   :  { %v13650_v25 = vadd.f32 %v5213_v39, %v5053_v30  ;;  %v9103_v17 = vpop.f32.mrb[135].mxu1 }
 0x8ef   :  { %v5218_v59 = vpop.f32.mrb[136].mxu1 }
 0x8f0   :  { %v13652_v46 = vadd.f32 %v5218_v59, %v5058_v29  ;;  %v9106_v41 = vpop.f32.mrb[137].mxu1 }
 0x8f3   :  { %v5223_v58 = vpop.f32.mrb[138].mxu1 }
 0x8f4   :  { %v13654_v6 = vadd.f32 %v5223_v58, %v5063_v55  ;;  %v9109_v8 = vpop.f32.mrb[139].mxu1 }
 0x8f7   :  { %v5228_v28 = vpop.f32.mrb[140].mxu1 }
 0x8f8   :  { %v13656_v62 = vadd.f32 %v5228_v28, %v5068_v51  ;;  %v9112_v0 = vpop.f32.mrb[141].mxu1 }
 0x8fb   :  { %v5233_v18 = vpop.f32.mrb[142].mxu1 }
 0x8fc   :  { %v13658_v56 = vadd.f32 %v5233_v18, %v5073_v60  ;;  %v9115_v40 = vpop.f32.mrb[143].mxu1  ;;  %v13671_v60 = vld [vmem:[%s14838_s16] ss:$0 sm:$0xff] }
 0x8ff   :  { %v5238_v63 = vpop.f32.mrb[144].mxu1 }
 0x900   :  { %v13660_v30 = vadd.f32 %v5238_v63, %v5078_v3  ;;  %v9118_v20 = vpop.f32.mrb[145].mxu1 }
 0x903   :  { %v5243_v52 = vpop.f32.mrb[146].mxu1 }
 0x904   :  { %v13662_v29 = vadd.f32 %v5243_v52, %v5083_v42  ;;  %v9121_v16 = vpop.f32.mrb[147].mxu1 }
 0x907   :  { %v5248_v53 = vpop.f32.mrb[148].mxu1 }
 0x908   :  { %v13664_v55 = vadd.f32 %v5248_v53, %v5088_v19  ;;  %v9124_v11 = vpop.f32.mrb[149].mxu1 }
 0x909   :  { %v5594_v11 = vld [vmem:[%s14839_s17 + $0x10] sm:$0xff] }
 0x90b   :  { %v5253_v61 = vpop.f32.mrb[150].mxu1 }
 0x90c   :  { %v13666_v51 = vadd.f32 %v5253_v61, %v5093_v4  ;;  %v9127_v2 = vpop.f32.mrb[151].mxu1  ;;  %v5595_v61 = vld [vmem:[%s14839_s17 + $0x18] sm:$0xff] }
 0x90f   :  { %v5358_v21 = vpop.f32.mrb[152].mxu1 }
 0x910   :  { %v5452_v3 = vadd.f32 %v5358_v21, %v5164_v32  ;;  %v9162_v39 = vpop.f32.mrb[153].mxu1  ;;  %v5592_v32 = vld [vmem:[%s14839_s17] sm:$0xff] }
 0x912   :  { %v5478_v42 = vadd.f32 %v13671_v60, %v5452_v3 }
 0x913   :  { %v5363_v17 = vpop.f32.mrb[154].mxu1 }
 0x914   :  { %vm5497_vm15 = vcmp.ge.f32.partialorder %v5478_v42, 0.0  ;;  %v5516_v59 = vmul.f32 0.4, %v5478_v42  ;;  %v5453_v19 = vadd.f32 %v5363_v17, %v5169_v49  ;;  %v9165_v41 = vpop.f32.mrb[155].mxu1  ;;  %v5593_v49 = vld [vmem:[%s14839_s17 + $0x8] sm:$0xff] }
 0x915   :  { %v10555_v53 = vpack.c.bf16 %v5593_v49, %v5592_v32  ;;  %v5597_v41 = vld [vmem:[%s14839_s17 + $0x28] sm:$0xff]  ;;  %v5598_v49 = vld [vmem:[%s14839_s17 + $0x30] sm:$0xff] }
 0x916   :  { %v5535_v58 = vsel %vm5497_vm15, %v5478_v42, %v5516_v59  ;;  %v5479_v4 = vadd.f32 %v13671_v60, %v5453_v19  ;;  %v10558_v59 = vpack.c.bf16 %v5595_v61, %v5594_v11  ;;  %v5596_v19 = vld [vmem:[%s14839_s17 + $0x20] sm:$0xff] }
 0x917   :  { %5554 = vst.msk [vmem:[#allocation7 + $0x8] sm:$0xff] %vm4882_vm14, %v5535_v58  ;;  %v5368_v8 = vpop.f32.mrb[156].mxu1  ;;  %v10561_v32 = vpack.c.bf16 %v5597_v41, %v5596_v19 }
 0x918   :  { %vm5498_vm0 = vcmp.ge.f32.partialorder %v5479_v4, 0.0  ;;  %v5517_v28 = vmul.f32 0.4, %v5479_v4  ;;  %v5454_v0 = vadd.f32 %v5368_v8, %v13634_v23  ;;  %v9168_v18 = vpop.f32.mrb[157].mxu1 }
 0x91a   :  { %v5536_v40 = vsel %vm5498_vm0, %v5479_v4, %v5517_v28  ;;  %v5480_v63 = vadd.f32 %v13671_v60, %v5454_v0 }
 0x91b   :  { %5555 = vst.msk [vmem:[#allocation7 + $0x10] sm:$0xff] %vm4882_vm14, %v5536_v40  ;;  %v5373_v20 = vpop.f32.mrb[158].mxu1  ;;  %v5599_v40 = vld [vmem:[%s14839_s17 + $0x38] sm:$0xff] }
 0x91c   :  { %vm5499_vm1 = vcmp.ge.f32.partialorder %v5480_v63, 0.0  ;;  %v5518_v52 = vmul.f32 0.4, %v5480_v63  ;;  %v5455_v16 = vadd.f32 %v5373_v20, %v13636_v26  ;;  %v9171_v23 = vpop.f32.mrb[159].mxu1  ;;  %v10564_v11 = vpack.c.bf16 %v5599_v40, %v5598_v49 }
 0x91e   :  { %v5537_v2 = vsel %vm5499_vm1, %v5480_v63, %v5518_v52  ;;  %v5481_v21 = vadd.f32 %v13671_v60, %v5455_v16  ;;  %v13693_v3 = vld [vmem:[#allocation7 + $0x8] sm:$0xff] }
 0x91f   :  { %5556 = vst.msk [vmem:[#allocation7 + $0x18] sm:$0xff] %vm4882_vm14, %v5537_v2  ;;  %v5378_v39 = vpop.f32.mrb[160].mxu1  ;;  %9234 = vmatmul.mubr.msk.f32.vlgmr.msra.gmra.mrb[190].mxu1 %vm4882_vm14, %v13693_v3 }
 0x920   :  { %vm5500_vm2 = vcmp.ge.f32.partialorder %v5481_v21, 0.0  ;;  %v5519_v26 = vmul.f32 0.4, %v5481_v21  ;;  %v5456_v42 = vadd.f32 %v5378_v39, %v13638_v1  ;;  %10556 = vmatpush3.bf16.msra.mxu1 %v10555_v53  ;;  %v9174_v17 = vpop.f32.mrb[161].mxu1  ;;  %9236 = vmatprep.mubr.msk.f32.mxu1 %vm11573_vm9, %v14938_v35 }
 0x921   :  { %10557 = vmatprep.subr.bf16.mxu1 %v14982_v33 }
 0x922   :  { %v5538_v58 = vsel %vm5500_vm2, %v5481_v21, %v5519_v26  ;;  %v5482_v4 = vadd.f32 %v13671_v60, %v5456_v42  ;;  %v13709_v1 = vld [vmem:[#allocation7 + $0x10] sm:$0xff] }
 0x923   :  { %5557 = vst.msk [vmem:[#allocation7 + $0x20] sm:$0xff] %vm4882_vm14, %v5538_v58  ;;  %v5383_v8 = vpop.f32.mrb[162].mxu1  ;;  %9237 = vmatmul.mubr.msk.f32.gmra.mrb[192].mxu1 %vm4882_vm14, %v13709_v1 }
 0x924   :  { %vm5501_vm3 = vcmp.ge.f32.partialorder %v5482_v4, 0.0  ;;  %v5520_v28 = vmul.f32 0.4, %v5482_v4  ;;  %v5457_v0 = vadd.f32 %v5383_v8, %v13640_v5  ;;  %v9177_v18 = vpop.f32.mrb[163].mxu1  ;;  %9239 = vmatprep.mubr.msk.f32.mxu1 %vm11573_vm9, %v14938_v35  ;;  %10559 = vmatpush3.bf16.msra.mxu1 %v10558_v59 }
 0x925   :  { %10560 = vmatprep.subr.bf16.mxu1 %v14982_v33 }
 0x926   :  { %v5539_v63 = vsel %vm5501_vm3, %v5482_v4, %v5520_v28  ;;  %v5483_v20 = vadd.f32 %v13671_v60, %v5457_v0  ;;  %v13725_v5 = vld [vmem:[#allocation7 + $0x18] sm:$0xff] }
 0x927   :  { %5558 = vst.msk [vmem:[#allocation7 + $0x28] sm:$0xff] %vm4882_vm14, %v5539_v63  ;;  %v5388_v52 = vpop.f32.mrb[164].mxu1  ;;  %9240 = vmatmul.mubr.msk.f32.gmra.mrb[194].mxu1 %vm4882_vm14, %v13725_v5 }
 0x928   :  { %vm5502_vm4 = vcmp.ge.f32.partialorder %v5483_v20, 0.0  ;;  %v5521_v16 = vmul.f32 0.4, %v5483_v20  ;;  %v5458_v23 = vadd.f32 %v5388_v52, %v13642_v37  ;;  %v9180_v53 = vpop.f32.mrb[165].mxu1  ;;  %9242 = vmatprep.mubr.msk.f32.mxu1 %vm11573_vm9, %v14938_v35  ;;  %10562 = vmatpush3.bf16.msra.mxu1 %v10561_v32 }
 0x929   :  { %10563 = vmatprep.subr.bf16.mxu1 %v14982_v33 }
 0x92a   :  { %v5540_v61 = vsel %vm5502_vm4, %v5483_v20, %v5521_v16  ;;  %v5484_v2 = vadd.f32 %v13671_v60, %v5458_v23  ;;  %v13735_v21 = vld [vmem:[#allocation7 + $0x20] sm:$0xff] }
 0x92b   :  { %5559 = vst.msk [vmem:[#allocation7 + $0x30] sm:$0xff] %vm4882_vm14, %v5540_v61  ;;  %v5393_v39 = vpop.f32.mrb[166].mxu1  ;;  %9243 = vmatmul.mubr.msk.f32.gmra.mrb[196].mxu1 %vm4882_vm14, %v13735_v21 }
 0x92c   :  { %vm5503_vm5 = vcmp.ge.f32.partialorder %v5484_v2, 0.0  ;;  %v5522_v37 = vmul.f32 0.4, %v5484_v2  ;;  %v5459_v26 = vadd.f32 %v5393_v39, %v13644_v57  ;;  %v9183_v42 = vpop.f32.mrb[167].mxu1  ;;  %9245 = vmatprep.mubr.msk.f32.mxu1 %vm11573_vm9, %v14938_v35  ;;  %10565 = vmatpush3.bf16.msra.mxu1 %v10564_v11 }
 0x92d   :  { %10566 = vmatprep.subr.bf16.mxu1 %v14982_v33 }
 0x92e   :  { %v5541_v17 = vsel %vm5503_vm5, %v5484_v2, %v5522_v37  ;;  %v5485_v59 = vadd.f32 %v13671_v60, %v5459_v26  ;;  %v13745_v19 = vld [vmem:[#allocation7 + $0x28] sm:$0xff] }
 0x92f   :  { %5560 = vst.msk [vmem:[#allocation7 + $0x38] sm:$0xff] %vm4882_vm14, %v5541_v17  ;;  %v5398_v41 = vpop.f32.mrb[168].mxu1  ;;  %9246 = vmatmul.mubr.msk.f32.gmra.mrb[198].mxu1 %vm4882_vm14, %v13745_v19 }
 0x930   :  { %vm5504_vm6 = vcmp.ge.f32.partialorder %v5485_v59, 0.0  ;;  %v5523_v57 = vmul.f32 0.4, %v5485_v59  ;;  %v5460_v58 = vadd.f32 %v5398_v41, %v13646_v38  ;;  %v9186_v4 = vpop.f32.mrb[169].mxu1  ;;  %9248 = vmatprep.mubr.msk.f32.mxu1 %vm11573_vm9, %v14938_v35 }
 0x932   :  { %v5542_v8 = vsel %vm5504_vm6, %v5485_v59, %v5523_v57  ;;  %v5486_v28 = vadd.f32 %v13671_v60, %v5460_v58  ;;  %v13754_v0 = vld [vmem:[#allocation7 + $0x30] sm:$0xff] }
 0x933   :  { %5561 = vst.msk [vmem:[#allocation7 + $0x40] sm:$0xff] %vm4882_vm14, %v5542_v8  ;;  %v5403_v18 = vpop.f32.mrb[170].mxu1  ;;  %9249 = vmatmul.mubr.msk.f32.gmra.mrb[200].mxu1 %vm4882_vm14, %v13754_v0 }
 0x934   :  { %vm5505_vm7 = vcmp.ge.f32.partialorder %v5486_v28, 0.0  ;;  %v5524_v32 = vmul.f32 0.4, %v5486_v28  ;;  %v5461_v49 = vadd.f32 %v5403_v18, %v13648_v43  ;;  %v9189_v38 = vpop.f32.mrb[171].mxu1  ;;  %9251 = vmatprep.mubr.msk.f32.mxu1 %vm11573_vm9, %v14938_v35 }
 0x936   :  { %v5543_v40 = vsel %vm5505_vm7, %v5486_v28, %v5524_v32  ;;  %v5487_v63 = vadd.f32 %v13671_v60, %v5461_v49  ;;  %v13763_v20 = vld [vmem:[#allocation7 + $0x38] sm:$0xff] }
 0x937   :  { %5562 = vst.msk [vmem:[#allocation7 + $0x48] sm:$0xff] %vm4882_vm14, %v5543_v40  ;;  %v5408_v52 = vpop.f32.mrb[172].mxu1  ;;  %9252 = vmatmul.mubr.msk.f32.gmra.mrb[202].mxu1 %vm4882_vm14, %v13763_v20 }
 0x938   :  { %vm5506_vm8 = vcmp.ge.f32.partialorder %v5487_v63, 0.0  ;;  %v5525_v16 = vmul.f32 0.4, %v5487_v63  ;;  %v5462_v23 = vadd.f32 %v5408_v52, %v13650_v25  ;;  %v9192_v43 = vpop.f32.mrb[173].mxu1  ;;  %9254 = vmatprep.mubr.msk.f32.mxu1 %vm11573_vm9, %v14938_v35 }
 0x93a   :  { %v5544_v53 = vsel %vm5506_vm8, %v5487_v63, %v5525_v16  ;;  %v5488_v11 = vadd.f32 %v13671_v60, %v5462_v23  ;;  %v13772_v61 = vld [vmem:[#allocation7 + $0x40] sm:$0xff] }
 0x93b   :  { %5563 = vst.msk [vmem:[#allocation7 + $0x50] sm:$0xff] %vm4882_vm14, %v5544_v53  ;;  %v5413_v2 = vpop.f32.mrb[174].mxu1  ;;  %9255 = vmatmul.mubr.msk.f32.gmra.mrb[204].mxu1 %vm4882_vm14, %v13772_v61 }
 0x93c   :  { %vm5507_vm10 = vcmp.ge.f32.partialorder %v5488_v11, 0.0  ;;  %v5526_v39 = vmul.f32 0.4, %v5488_v11  ;;  %v5463_v37 = vadd.f32 %v5413_v2, %v13652_v46  ;;  %v9195_v25 = vpop.f32.mrb[175].mxu1  ;;  %9257 = vmatprep.mubr.msk.f32.mxu1 %vm11573_vm9, %v14938_v35 }
 0x93e   :  { %v5545_v26 = vsel %vm5507_vm10, %v5488_v11, %v5526_v39  ;;  %v5489_v42 = vadd.f32 %v13671_v60, %v5463_v37  ;;  %v13781_v17 = vld [vmem:[#allocation7 + $0x48] sm:$0xff] }
 0x93f   :  { %5564 = vst.msk [vmem:[#allocation7 + $0x58] sm:$0xff] %vm4882_vm14, %v5545_v26  ;;  %v5418_v59 = vpop.f32.mrb[176].mxu1  ;;  %9258 = vmatmul.mubr.msk.f32.gmra.mrb[206].mxu1 %vm4882_vm14, %v13781_v17 }
 0x940   :  { %vm5508_vm11 = vcmp.ge.f32.partialorder %v5489_v42, 0.0  ;;  %v5527_v41 = vmul.f32 0.4, %v5489_v42  ;;  %v5464_v57 = vadd.f32 %v5418_v59, %v13654_v6  ;;  %v9198_v46 = vpop.f32.mrb[177].mxu1  ;;  %9260 = vmatprep.mubr.msk.f32.mxu1 %vm11573_vm9, %v14938_v35 }
 0x942   :  { %v5546_v58 = vsel %vm5508_vm11, %v5489_v42, %v5527_v41  ;;  %v5490_v4 = vadd.f32 %v13671_v60, %v5464_v57  ;;  %v13790_v8 = vld [vmem:[#allocation7 + $0x50] sm:$0xff] }
 0x943   :  { %5565 = vst.msk [vmem:[#allocation7 + $0x60] sm:$0xff] %vm4882_vm14, %v5546_v58  ;;  %v5423_v28 = vpop.f32.mrb[178].mxu1  ;;  %9261 = vmatmul.mubr.msk.f32.gmra.mrb[208].mxu1 %vm4882_vm14, %v13790_v8 }
 0x944   :  { %vm5509_vm12 = vcmp.ge.f32.partialorder %v5490_v4, 0.0  ;;  %v5528_v18 = vmul.f32 0.4, %v5490_v4  ;;  %v5465_v32 = vadd.f32 %v5423_v28, %v13656_v62  ;;  %v9201_v6 = vpop.f32.mrb[179].mxu1  ;;  %9263 = vmatprep.mubr.msk.f32.mxu1 %vm11573_vm9, %v14938_v35 }
 0x946   :  { %v5547_v49 = vsel %vm5509_vm12, %v5490_v4, %v5528_v18  ;;  %v5491_v38 = vadd.f32 %v13671_v60, %v5465_v32  ;;  %v13799_v40 = vld [vmem:[#allocation7 + $0x58] sm:$0xff] }
 0x947   :  { %5566 = vst.msk [vmem:[#allocation7 + $0x68] sm:$0xff] %vm4882_vm14, %v5547_v49  ;;  %v5428_v63 = vpop.f32.mrb[180].mxu1  ;;  %9264 = vmatmul.mubr.msk.f32.gmra.mrb[210].mxu1 %vm4882_vm14, %v13799_v40 }
 0x948   :  { %vm5510_vm13 = vcmp.ge.f32.partialorder %v5491_v38, 0.0  ;;  %v5529_v52 = vmul.f32 0.4, %v5491_v38  ;;  %v5466_v16 = vadd.f32 %v5428_v63, %v13658_v56  ;;  %v9204_v62 = vpop.f32.mrb[181].mxu1  ;;  %9266 = vmatprep.mubr.msk.f32.mxu1 %vm11573_vm9, %v14938_v35 }
 0x94a   :  { %v5548_v23 = vsel %vm5510_vm13, %v5491_v38, %v5529_v52  ;;  %v5492_v43 = vadd.f32 %v13671_v60, %v5466_v16  ;;  %v13808_v53 = vld [vmem:[#allocation7 + $0x60] sm:$0xff] }
 0x94b   :  { %5567 = vst.msk [vmem:[#allocation7 + $0x70] sm:$0xff] %vm4882_vm14, %v5548_v23  ;;  %v5433_v11 = vpop.f32.mrb[182].mxu1  ;;  %9267 = vmatmul.mubr.msk.f32.gmra.mrb[212].mxu1 %vm4882_vm14, %v13808_v53 }
 0x94c   :  { %vm5511_vm15 = vcmp.ge.f32.partialorder %v5492_v43, 0.0  ;;  %v5530_v2 = vmul.f32 0.4, %v5492_v43  ;;  %v5467_v39 = vadd.f32 %v5433_v11, %v13660_v30  ;;  %v9207_v56 = vpop.f32.mrb[183].mxu1  ;;  %9269 = vmatprep.mubr.msk.f32.mxu1 %vm11573_vm9, %v14938_v35 }
 0x94e   :  { %v5549_v37 = vsel %vm5511_vm15, %v5492_v43, %v5530_v2  ;;  %v5493_v25 = vadd.f32 %v13671_v60, %v5467_v39  ;;  %v13817_v26 = vld [vmem:[#allocation7 + $0x68] sm:$0xff]  ;;  %v6008_v2 = vld [vmem:[%s14839_s17 + $0x80] sm:$0xff] }
 0x94f   :  { %5568 = vst.msk [vmem:[#allocation7 + $0x78] sm:$0xff] %vm4882_vm14, %v5549_v37  ;;  %v5438_v42 = vpop.f32.mrb[184].mxu1  ;;  %9270 = vmatmul.mubr.msk.f32.gmra.mrb[214].mxu1 %vm4882_vm14, %v13817_v26  ;;  %v6009_v39 = vld [vmem:[%s14839_s17 + $0x88] sm:$0xff]  ;;  %v5573_v37 = vld [vmem:[#allocation7] sm:$0xff] }
 0x950   :  { %vm5512_vm0 = vcmp.ge.f32.partialorder %v5493_v25, 0.0  ;;  %v5531_v59 = vmul.f32 0.4, %v5493_v25  ;;  %v5468_v41 = vadd.f32 %v5438_v42, %v13662_v29  ;;  %v9210_v30 = vpop.f32.mrb[185].mxu1  ;;  %9272 = vmatprep.mubr.msk.f32.mxu1 %vm11573_vm9, %v14938_v35  ;;  %v6010_v42 = vld [vmem:[%s14839_s17 + $0x90] sm:$0xff] }
 0x951   :  { %v6012_v30 = vld [vmem:[%s14839_s17 + $0xa0] sm:$0xff] }
 0x952   :  { %v5550_v57 = vsel %vm5512_vm0, %v5493_v25, %v5531_v59  ;;  %v5494_v46 = vadd.f32 %v13671_v60, %v5468_v41  ;;  %v13826_v58 = vld [vmem:[#allocation7 + $0x70] sm:$0xff]  ;;  %v10567_v25 = vpack.c.bf16 %v6009_v39, %v6008_v2  ;;  %v6011_v59 = vld [vmem:[%s14839_s17 + $0x98] sm:$0xff] }
 0x953   :  { %5569 = vst.msk [vmem:[#allocation7 + $0x80] sm:$0xff] %vm4882_vm14, %v5550_v57  ;;  %v5443_v4 = vpop.f32.mrb[186].mxu1  ;;  %9273 = vmatmul.mubr.msk.f32.gmra.mrb[216].mxu1 %vm4882_vm14, %v13826_v58  ;;  %v10570_v41 = vpack.c.bf16 %v6011_v59, %v6010_v42  ;;  %v6013_v57 = vld [vmem:[%s14839_s17 + $0xa8] sm:$0xff]  ;;  %v6307_v2 = vld [vmem:[%s14841_s19 + $0x50] sm:$0xff]  ;;  %v6308_v39 = vld [vmem:[%s14841_s19 + $0x58] sm:$0xff] }
 0x954   :  { %vm5513_vm1 = vcmp.ge.f32.partialorder %v5494_v46, 0.0  ;;  %v5532_v28 = vmul.f32 0.4, %v5494_v46  ;;  %v5469_v18 = vadd.f32 %v5443_v4, %v13664_v55  ;;  %v9213_v29 = vpop.f32.mrb[187].mxu1  ;;  %9275 = vmatprep.mubr.msk.f32.mxu1 %vm11573_vm9, %v14938_v35  ;;  %v6014_v4 = vld [vmem:[%s14839_s17 + $0xb0] sm:$0xff]  ;;  %v6527_v42 = vld [vmem:[%s14843_s21 + $0x48] sm:$0xff] }
 0x955   :  { %v6298_v29 = vld [vmem:[%s14841_s19 + $0x8] sm:$0xff]  ;;  %v6528_v59 = vld [vmem:[%s14843_s21 + $0x50] sm:$0xff] }
 0x956   :  { %v5551_v32 = vsel %vm5513_vm1, %v5494_v46, %v5532_v28  ;;  %v5495_v6 = vadd.f32 %v13671_v60, %v5469_v18  ;;  %v13835_v49 = vld [vmem:[#allocation7 + $0x78] sm:$0xff]  ;;  %v10573_v46 = vpack.c.bf16 %v6013_v57, %v6012_v30  ;;  %v6297_v18 = vld [vmem:[%s14841_s19] sm:$0xff]  ;;  %v6311_v57 = vld [vmem:[%s14841_s19 + $0x70] sm:$0xff] }
 0x957   :  { %5570 = vst.msk [vmem:[#allocation7 + $0x88] sm:$0xff] %vm4882_vm14, %v5551_v32  ;;  %v5448_v38 = vpop.f32.mrb[188].mxu1  ;;  %9276 = vmatmul.mubr.msk.f32.gmra.mrb[218].mxu1 %vm4882_vm14, %v13835_v49  ;;  %v6015_v28 = vld [vmem:[%s14839_s17 + $0xb8] sm:$0xff]  ;;  %v10579_v32 = vpack.c.bf16 %v6298_v29, %v6297_v18 }
 0x958   :  { %vm5514_vm2 = vcmp.ge.f32.partialorder %v5495_v6, 0.0  ;;  %v5533_v63 = vmul.f32 0.4, %v5495_v6  ;;  %v5470_v52 = vadd.f32 %v5448_v38, %v13666_v51  ;;  %v9216_v55 = vpop.f32.mrb[189].mxu1  ;;  %9278 = vmatprep.mubr.msk.f32.mxu1 %vm11573_vm9, %v14938_v35  ;;  %v6300_v38 = vld [vmem:[%s14841_s19 + $0x18] sm:$0xff] }
 0x959   :  { %v6302_v55 = vld [vmem:[%s14841_s19 + $0x28] sm:$0xff] }
 0x95a   :  { %v5552_v16 = vsel %vm5514_vm2, %v5495_v6, %v5533_v63  ;;  %v5496_v62 = vadd.f32 %v13671_v60, %v5470_v52  ;;  %v13844_v23 = vld [vmem:[#allocation7 + $0x80] sm:$0xff]  ;;  %v6299_v6 = vld [vmem:[%s14841_s19 + $0x10] sm:$0xff] }
 0x95b   :  { %5571 = vst.msk [vmem:[#allocation7 + $0x90] sm:$0xff] %vm4882_vm14, %v5552_v16  ;;  %9279 = vmatmul.mubr.msk.f32.gmra.mrb[220].mxu1 %vm4882_vm14, %v13844_v23  ;;  %v10582_v63 = vpack.c.bf16 %v6300_v38, %v6299_v6  ;;  %v6301_v52 = vld [vmem:[%s14841_s19 + $0x20] sm:$0xff]  ;;  %v6303_v16 = vld [vmem:[%s14841_s19 + $0x30] sm:$0xff] }
 0x95c   :  { %vm5515_vm3 = vcmp.ge.f32.partialorder %v5496_v62, 0.0  ;;  %v5534_v43 = vmul.f32 0.4, %v5496_v62  ;;  %9281 = vmatprep.mubr.msk.f32.mxu1 %vm11573_vm9, %v14938_v35  ;;  %v6522_v38 = vld [vmem:[%s14843_s21 + $0x20] sm:$0xff] }
 0x95e   :  { %v5553_v51 = vsel %vm5515_vm3, %v5496_v62, %v5534_v43  ;;  %v13851_v11 = vld [vmem:[#allocation7 + $0x88] sm:$0xff]  ;;  %v6304_v62 = vld [vmem:[%s14841_s19 + $0x38] sm:$0xff]  ;;  %v6305_v43 = vld [vmem:[%s14841_s19 + $0x40] sm:$0xff] }
 0x95f   :  { %5572 = vst.msk [vmem:[#allocation7 + $0x98] sm:$0xff] %vm4882_vm14, %v5553_v51  ;;  %9282 = vmatmul.mubr.msk.f32.gmra.mrb[222].mxu1 %vm4882_vm14, %v13851_v11  ;;  %v6306_v51 = vld [vmem:[%s14841_s19 + $0x48] sm:$0xff] }
 0x960   :  { %9284 = vmatprep.mubr.msk.f32.mxu1 %vm11573_vm9, %v14938_v35 }
 0x962   :  { %v13858_v60 = vld [vmem:[#allocation7 + $0x90] sm:$0xff] }
 0x963   :  { %9285 = vmatmul.mubr.msk.f32.gmra.mrb[224].mxu1 %vm4882_vm14, %v13858_v60 }
 0x964   :  { %9287 = vmatprep.mubr.msk.f32.mxu1 %vm11573_vm9, %v14938_v35 }
 0x966   :  { %v13870_v56 = vld [vmem:[#allocation7 + $0x98] sm:$0xff] }
 0x967   :  { %9288 = vmatmul.mubr.msk.f32.gmra.mrb[226].mxu1 %vm4882_vm14, %v13870_v56 }
 0x968   :  { %9306 = vmatprep.mubr.msk.f32.mxu1 %vm11573_vm9, %v14938_v35 }
 0x96b   :  { %9307 = vmatmul.mubr.msk.f32.vlgmr.msra.gmra.mrb[190].mxu1 %vm4882_vm14, %v5573_v37  ;;  %v6309_v37 = vld [vmem:[%s14841_s19 + $0x60] sm:$0xff] }
 0x96c   :  { %10568 = vmatpush3.bf16.msra.mxu1 %v10567_v25  ;;  %9309 = vmatprep.mubr.msk.f32.mxu1 %vm11573_vm9, %v14938_v35  ;;  %v6310_v25 = vld [vmem:[%s14841_s19 + $0x68] sm:$0xff] }
 0x96d   :  { %10569 = vmatprep.subr.bf16.mxu1 %v14982_v33 }
 0x96f   :  { %9310 = vmatmul.mubr.msk.f32.gmra.mrb[192].mxu1 %vm4882_vm14, %v13693_v3  ;;  %v10576_v3 = vpack.c.bf16 %v6015_v28, %v6014_v4  ;;  %v6530_v28 = vld [vmem:[%s14843_s21 + $0x60] sm:$0xff] }
 0x970   :  { %9312 = vmatprep.mubr.msk.f32.mxu1 %vm11573_vm9, %v14938_v35  ;;  %10571 = vmatpush3.bf16.msra.mxu1 %v10570_v41  ;;  %v10597_v41 = vpack.c.bf16 %v6310_v25, %v6309_v37 }
 0x971   :  { %10572 = vmatprep.subr.bf16.mxu1 %v14982_v33 }
 0x973   :  { %9313 = vmatmul.mubr.msk.f32.gmra.mrb[194].mxu1 %vm4882_vm14, %v13709_v1 }
 0x974   :  { %9315 = vmatprep.mubr.msk.f32.mxu1 %vm11573_vm9, %v14938_v35  ;;  %10574 = vmatpush3.bf16.msra.mxu1 %v10573_v46  ;;  %v6312_v46 = vld [vmem:[%s14841_s19 + $0x78] sm:$0xff]  ;;  %s15013_s19 = sld [smem:[#allocation60_spill]] }
 0x975   :  { %10575 = vmatprep.subr.bf16.mxu1 %v14982_v33  ;;  %v10600_v18 = vpack.c.bf16 %v6312_v46, %v6311_v57  ;;  %v6684_v57 = vld [vmem:[%s14843_s21 + $0xa0] sm:$0xff]  ;;  %v6685_v46 = vld [vmem:[%s14843_s21 + $0xa8] sm:$0xff] }
 0x977   :  { %9316 = vmatmul.mubr.msk.f32.gmra.mrb[196].mxu1 %vm4882_vm14, %v13725_v5 }
 0x978   :  { %9318 = vmatprep.mubr.msk.f32.mxu1 %vm11573_vm9, %v14938_v35  ;;  %10577 = vmatpush3.bf16.msra.mxu1 %v10576_v3  ;;  %v6531_v3 = vld [vmem:[%s14843_s21 + $0x68] sm:$0xff] }
 0x979   :  { %10578 = vmatprep.subr.bf16.mxu1 %v14982_v33  ;;  %v10609_v29 = vpack.c.bf16 %v6531_v3, %v6530_v28  ;;  %v10633_v3 = vpack.c.bf16 %v6685_v46, %v6684_v57 }
 0x97b   :  { %9319 = vmatmul.mubr.msk.f32.gmra.mrb[198].mxu1 %vm4882_vm14, %v13735_v21 }
 0x97c   :  { %9321 = vmatprep.mubr.msk.f32.mxu1 %vm11573_vm9, %v14938_v35 }
 0x97f   :  { %9322 = vmatmul.mubr.msk.f32.gmra.mrb[200].mxu1 %vm4882_vm14, %v13745_v19 }
 0x980   :  { %9324 = vmatprep.mubr.msk.f32.mxu1 %vm11573_vm9, %v14938_v35 }
 0x983   :  { %9325 = vmatmul.mubr.msk.f32.gmra.mrb[202].mxu1 %vm4882_vm14, %v13754_v0 }
 0x984   :  { %9327 = vmatprep.mubr.msk.f32.mxu1 %vm11573_vm9, %v14938_v35 }
 0x987   :  { %9328 = vmatmul.mubr.msk.f32.gmra.mrb[204].mxu1 %vm4882_vm14, %v13763_v20 }
 0x988   :  { %9330 = vmatprep.mubr.msk.f32.mxu1 %vm11573_vm9, %v14938_v35 }
 0x98b   :  { %9331 = vmatmul.mubr.msk.f32.gmra.mrb[206].mxu1 %vm4882_vm14, %v13772_v61 }
 0x98c   :  { %9333 = vmatprep.mubr.msk.f32.mxu1 %vm11573_vm9, %v14938_v35 }
 0x98f   :  { %9334 = vmatmul.mubr.msk.f32.gmra.mrb[208].mxu1 %vm4882_vm14, %v13781_v17 }
 0x990   :  { %9336 = vmatprep.mubr.msk.f32.mxu1 %vm11573_vm9, %v14938_v35 }
 0x993   :  { %9337 = vmatmul.mubr.msk.f32.gmra.mrb[210].mxu1 %vm4882_vm14, %v13790_v8 }
 0x994   :  { %9339 = vmatprep.mubr.msk.f32.mxu1 %vm11573_vm9, %v14938_v35 }
 0x997   :  { %9340 = vmatmul.mubr.msk.f32.gmra.mrb[212].mxu1 %vm4882_vm14, %v13799_v40 }
 0x998   :  { %9342 = vmatprep.mubr.msk.f32.mxu1 %vm11573_vm9, %v14938_v35 }
 0x99b   :  { %9343 = vmatmul.mubr.msk.f32.gmra.mrb[214].mxu1 %vm4882_vm14, %v13808_v53 }
 0x99c   :  { %9345 = vmatprep.mubr.msk.f32.mxu1 %vm11573_vm9, %v14938_v35 }
 0x99f   :  { %9346 = vmatmul.mubr.msk.f32.gmra.mrb[216].mxu1 %vm4882_vm14, %v13817_v26 }
 0x9a0   :  { %9348 = vmatprep.mubr.msk.f32.mxu1 %vm11573_vm9, %v14938_v35 }
 0x9a3   :  { %9349 = vmatmul.mubr.msk.f32.gmra.mrb[218].mxu1 %vm4882_vm14, %v13826_v58 }
 0x9a4   :  { %9351 = vmatprep.mubr.msk.f32.mxu1 %vm11573_vm9, %v14938_v35 }
 0x9a7   :  { %9352 = vmatmul.mubr.msk.f32.gmra.mrb[220].mxu1 %vm4882_vm14, %v13835_v49 }
 0x9a8   :  { %9354 = vmatprep.mubr.msk.f32.mxu1 %vm11573_vm9, %v14938_v35 }
 0x9ab   :  { %9355 = vmatmul.mubr.msk.f32.gmra.mrb[222].mxu1 %vm4882_vm14, %v13844_v23 }
 0x9ac   :  { %9357 = vmatprep.mubr.msk.f32.mxu1 %vm11573_vm9, %v14938_v35 }
 0x9af   :  { %9358 = vmatmul.mubr.msk.f32.gmra.mrb[224].mxu1 %vm4882_vm14, %v13851_v11 }
 0x9b0   :  { %9360 = vmatprep.mubr.msk.f32.mxu1 %vm11573_vm9, %v14938_v35 }
 0x9b3   :  { %9361 = vmatmul.mubr.msk.f32.gmra.mrb[226].mxu1 %vm4882_vm14, %v13858_v60 }
 0x9b4   :  { %9379 = vmatprep.mubr.msk.f32.mxu1 %vm11573_vm9, %v14938_v35 }
 0x9b7   :  { %9380 = vmatmul.mubr.msk.f32.vlgmr.msra.gmra.mrb[190].mxu1 %vm4882_vm14, %v13709_v1  ;;  %v10585_v1 = vpack.c.bf16 %v6302_v55, %v6301_v52 }
 0x9b8   :  { %10580 = vmatpush3.bf16.msra.mxu1 %v10579_v32  ;;  %9382 = vmatprep.mubr.msk.f32.mxu1 %vm11573_vm9, %v14938_v35  ;;  %v6533_v32 = vld [vmem:[%s14843_s21 + $0x78] sm:$0xff] }
 0x9b9   :  { %10581 = vmatprep.subr.bf16.mxu1 %v14982_v33 }
 0x9bb   :  { %9383 = vmatmul.mubr.msk.f32.gmra.mrb[192].mxu1 %vm4882_vm14, %v13725_v5  ;;  %v10588_v5 = vpack.c.bf16 %v6304_v62, %v6303_v16  ;;  %v6524_v16 = vld [vmem:[%s14843_s21 + $0x30] sm:$0xff]  ;;  %v6525_v62 = vld [vmem:[%s14843_s21 + $0x38] sm:$0xff] }
 0x9bc   :  { %9385 = vmatprep.mubr.msk.f32.mxu1 %vm11573_vm9, %v14938_v35  ;;  %10583 = vmatpush3.bf16.msra.mxu1 %v10582_v63  ;;  %v6523_v63 = vld [vmem:[%s14843_s21 + $0x28] sm:$0xff] }
 0x9bd   :  { %10584 = vmatprep.subr.bf16.mxu1 %v14982_v33 }
 0x9bf   :  { %9386 = vmatmul.mubr.msk.f32.gmra.mrb[194].mxu1 %vm4882_vm14, %v13735_v21  ;;  %v10591_v21 = vpack.c.bf16 %v6306_v51, %v6305_v43  ;;  %v10624_v51 = vpack.c.bf16 %v6525_v62, %v6524_v16  ;;  %v6848_v16 = vld [vmem:[%s14843_s21 + $0x120] sm:$0xff]  ;;  %v6849_v62 = vld [vmem:[%s14843_s21 + $0x128] sm:$0xff] }
 0x9c0   :  { %9388 = vmatprep.mubr.msk.f32.mxu1 %vm11573_vm9, %v14938_v35  ;;  %10586 = vmatpush3.bf16.msra.mxu1 %v10585_v1  ;;  %v10621_v1 = vpack.c.bf16 %v6523_v63, %v6522_v38  ;;  %v6846_v38 = vld [vmem:[%s14843_s21 + $0x110] sm:$0xff]  ;;  %v6847_v63 = vld [vmem:[%s14843_s21 + $0x118] sm:$0xff] }
 0x9c1   :  { %10587 = vmatprep.subr.bf16.mxu1 %v14982_v33 }
 0x9c3   :  { %9389 = vmatmul.mubr.msk.f32.gmra.mrb[196].mxu1 %vm4882_vm14, %v13745_v19  ;;  %v10594_v19 = vpack.c.bf16 %v6308_v39, %v6307_v2  ;;  %v6680_v2 = vld [vmem:[%s14843_s21 + $0x80] sm:$0xff]  ;;  %v6681_v39 = vld [vmem:[%s14843_s21 + $0x88] sm:$0xff] }
 0x9c4   :  { %9391 = vmatprep.mubr.msk.f32.mxu1 %vm11573_vm9, %v14938_v35  ;;  %10589 = vmatpush3.bf16.msra.mxu1 %v10588_v5  ;;  %v10627_v25 = vpack.c.bf16 %v6681_v39, %v6680_v2  ;;  %v6850_v2 = vld [vmem:[%s14843_s21 + $0x130] sm:$0xff]  ;;  %v6851_v39 = vld [vmem:[%s14843_s21 + $0x138] sm:$0xff] }
 0x9c5   :  { %10590 = vmatprep.subr.bf16.mxu1 %v14982_v33 }
 0x9c7   :  { %9392 = vmatmul.mubr.msk.f32.gmra.mrb[198].mxu1 %vm4882_vm14, %v13754_v0  ;;  %v6526_v0 = vld [vmem:[%s14843_s21 + $0x40] sm:$0xff] }
 0x9c8   :  { %9394 = vmatprep.mubr.msk.f32.mxu1 %vm11573_vm9, %v14938_v35  ;;  %10592 = vmatpush3.bf16.msra.mxu1 %v10591_v21  ;;  %v10603_v30 = vpack.c.bf16 %v6527_v42, %v6526_v0  ;;  %v6682_v42 = vld [vmem:[%s14843_s21 + $0x90] sm:$0xff] }
 0x9c9   :  { %10593 = vmatprep.subr.bf16.mxu1 %v14982_v33 }
 0x9ca   :  { %10604 = vmatpush3.bf16.msra.mxu0 %v10603_v30 }
 0x9cb   :  { %9395 = vmatmul.mubr.msk.f32.gmra.mrb[200].mxu1 %vm4882_vm14, %v13763_v20  ;;  %v6529_v20 = vld [vmem:[%s14843_s21 + $0x58] sm:$0xff]  ;;  %10605 = vmatprep.subr.bf16.mxu0 %v14982_v33 }
 0x9cc   :  { %9397 = vmatprep.mubr.msk.f32.mxu1 %vm11573_vm9, %v14938_v35  ;;  %10595 = vmatpush3.bf16.msra.mxu1 %v10594_v19  ;;  %v10606_v4 = vpack.c.bf16 %v6529_v20, %v6528_v59  ;;  %v6683_v59 = vld [vmem:[%s14843_s21 + $0x98] sm:$0xff] }
 0x9cd   :  { %10596 = vmatprep.subr.bf16.mxu1 %v14982_v33  ;;  %v10630_v20 = vpack.c.bf16 %v6683_v59, %v6682_v42  ;;  %v6926_v59 = vld [vmem:[%s14843_s21 + $0x140] sm:$0xff] }
 0x9ce   :  { %10607 = vmatpush3.bf16.msra.mxu0 %v10606_v4 }
 0x9cf   :  { %9398 = vmatmul.mubr.msk.f32.gmra.mrb[202].mxu1 %vm4882_vm14, %v13772_v61  ;;  %10608 = vmatprep.subr.bf16.mxu0 %v14982_v33  ;;  %v6532_v61 = vld [vmem:[%s14843_s21 + $0x70] sm:$0xff] }
 0x9d0   :  { %9400 = vmatprep.mubr.msk.f32.mxu1 %vm11573_vm9, %v14938_v35  ;;  %10598 = vmatpush3.bf16.msra.mxu1 %v10597_v41  ;;  %v10612_v6 = vpack.c.bf16 %v6533_v32, %v6532_v61 }
 0x9d1   :  { %10599 = vmatprep.subr.bf16.mxu1 %v14982_v33 }
 0x9d2   :  { %10610 = vmatpush3.bf16.msra.mxu0 %v10609_v29  ;;  %v6687_v29 = vld [vmem:[%s14843_s21 + $0xb8] sm:$0xff] }
 0x9d3   :  { %9401 = vmatmul.mubr.msk.f32.gmra.mrb[204].mxu1 %vm4882_vm14, %v13781_v17  ;;  %10611 = vmatprep.subr.bf16.mxu0 %v14982_v33  ;;  %v6007_v17 = vld [vmem:[#allocation7 + $0xa0] sm:$0xff] }
 0x9d4   :  { %9403 = vmatprep.mubr.msk.f32.mxu1 %vm11573_vm9, %v14938_v35  ;;  %10601 = vmatpush3.bf16.msra.mxu1 %v10600_v18  ;;  %v6686_v18 = vld [vmem:[%s14843_s21 + $0xb0] sm:$0xff] }
 0x9d5   :  { %10806 = vmatprep.subr.bf16.mxu1 %v14982_v33 }
 0x9d6   :  { %10613 = vmatpush3.bf16.msra.mxu0 %v10612_v6  ;;  %v10636_v6 = vpack.c.bf16 %v6687_v29, %v6686_v18  ;;  %v6929_v29 = vld [vmem:[%s14843_s21 + $0x158] sm:$0xff] }
 0x9d7   :  { %9404 = vmatmul.mubr.msk.f32.gmra.mrb[206].mxu1 %vm4882_vm14, %v13790_v8  ;;  %10614 = vmatprep.subr.bf16.mxu0 %v14982_v33 }
 0x9d8   :  { %9406 = vmatprep.mubr.msk.f32.mxu1 %vm11573_vm9, %v14938_v35 }
 0x9db   :  { %9407 = vmatmul.mubr.msk.f32.gmra.mrb[208].mxu1 %vm4882_vm14, %v13799_v40 }
 0x9dc   :  { %9409 = vmatprep.mubr.msk.f32.mxu1 %vm11573_vm9, %v14938_v35 }
 0x9df   :  { %9410 = vmatmul.mubr.msk.f32.gmra.mrb[210].mxu1 %vm4882_vm14, %v13808_v53 }
 0x9e0   :  { %9412 = vmatprep.mubr.msk.f32.mxu1 %vm11573_vm9, %v14938_v35 }
 0x9e3   :  { %9413 = vmatmul.mubr.msk.f32.gmra.mrb[212].mxu1 %vm4882_vm14, %v13817_v26 }
 0x9e4   :  { %9415 = vmatprep.mubr.msk.f32.mxu1 %vm11573_vm9, %v14938_v35 }
 0x9e7   :  { %9416 = vmatmul.mubr.msk.f32.gmra.mrb[214].mxu1 %vm4882_vm14, %v13826_v58 }
 0x9e8   :  { %9418 = vmatprep.mubr.msk.f32.mxu1 %vm11573_vm9, %v14938_v35 }
 0x9eb   :  { %9419 = vmatmul.mubr.msk.f32.gmra.mrb[216].mxu1 %vm4882_vm14, %v13835_v49  ;;  %v6520_v49 = vld [vmem:[%s14843_s21 + $0x10] sm:$0xff] }
 0x9ec   :  { %9421 = vmatprep.mubr.msk.f32.mxu1 %vm11573_vm9, %v14938_v35 }
 0x9ef   :  { %9422 = vmatmul.mubr.msk.f32.gmra.mrb[218].mxu1 %vm4882_vm14, %v13844_v23  ;;  %v6521_v23 = vld [vmem:[%s14843_s21 + $0x18] sm:$0xff] }
 0x9f0   :  { %9424 = vmatprep.mubr.msk.f32.mxu1 %vm11573_vm9, %v14938_v35 }
 0x9f3   :  { %9425 = vmatmul.mubr.msk.f32.gmra.mrb[220].mxu1 %vm4882_vm14, %v13851_v11 }
 0x9f4   :  { %9427 = vmatprep.mubr.msk.f32.mxu1 %vm11573_vm9, %v14938_v35 }
 0x9f7   :  { %9428 = vmatmul.mubr.msk.f32.gmra.mrb[222].mxu1 %vm4882_vm14, %v13858_v60 }
 0x9f8   :  { %9430 = vmatprep.mubr.msk.f32.mxu1 %vm11573_vm9, %v14938_v35 }
 0x9fb   :  { %9431 = vmatmul.mubr.msk.f32.gmra.mrb[224].mxu1 %vm4882_vm14, %v13870_v56  ;;  %v10618_v56 = vpack.c.bf16 %v6521_v23, %v6520_v49  ;;  %v6845_v49 = vld [vmem:[%s14843_s21 + $0x108] sm:$0xff] }
 0x9fc   :  { %9433 = vmatprep.mubr.msk.f32.mxu1 %vm11573_vm9, %v14938_v35 }
 0x9ff   :  { %9434 = vmatmul.mubr.msk.f32.gmra.mrb[226].mxu1 %vm4882_vm14, %v6007_v17 }
 0xa00   :  { %9468 = vmatprep.mubr.msk.f32.mxu1 %vm11573_vm9, %v14938_v35 }
 0xa03   :  { %9469 = vmatmul.mubr.f32.vlgmr.msra.gmra.mrb[190].mxu1 %v13269_v47  ;;  %v7910_v47 = vld [vmem:[%s14843_s21 + $0x440] sm:$0xff] }
 0xa04   :  { %9471 = vmatprep.mubr.msk.f32.mxu1 %vm11573_vm9, %v14938_v35 }
 0xa07   :  { %9472 = vmatmul.mubr.f32.gmra.mrb[192].mxu1 %v13281_v14  ;;  %v7911_v14 = vld [vmem:[%s14843_s21 + $0x448] sm:$0xff] }
 0xa08   :  { %9474 = vmatprep.mubr.msk.f32.mxu1 %vm11573_vm9, %v14938_v35 }
 0xa0b   :  { %9475 = vmatmul.mubr.f32.gmra.mrb[194].mxu1 %v13294_v22  ;;  %v10807_v22 = vpack.c.bf16 %v7911_v14, %v7910_v47  ;;  %v6762_v47 = vld [vmem:[%s14843_s21 + $0xc0] sm:$0xff]  ;;  %v6763_v14 = vld [vmem:[%s14843_s21 + $0xc8] sm:$0xff] }
 0xa0c   :  { %9477 = vmatprep.mubr.msk.f32.mxu1 %vm11573_vm9, %v14938_v35 }
 0xa0d   :  { %10808 = vmatpush3.bf16.msra.mxu1 %v10807_v22 }
 0xa0e   :  { %10809 = vmatprep.subr.bf16.mxu1 %v14982_v33 }
 0xa0f   :  { %9478 = vmatmul.mubr.f32.gmra.mrb[196].mxu1 %v13307_v15  ;;  %v7912_v15 = vld [vmem:[%s14843_s21 + $0x450] sm:$0xff] }
 0xa10   :  { %9480 = vmatprep.mubr.msk.f32.mxu1 %vm11573_vm9, %v14938_v35 }
 0xa13   :  { %9481 = vmatmul.mubr.f32.gmra.mrb[198].mxu1 %v13320_v24  ;;  %v7913_v24 = vld [vmem:[%s14843_s21 + $0x458] sm:$0xff] }
 0xa14   :  { %9483 = vmatprep.mubr.msk.f32.mxu1 %vm11573_vm9, %v14938_v35 }
 0xa17   :  { %9484 = vmatmul.mubr.f32.gmra.mrb[200].mxu1 %v13333_v45  ;;  %v10810_v45 = vpack.c.bf16 %v7913_v24, %v7912_v15  ;;  %v10639_v24 = vpack.c.bf16 %v6763_v14, %v6762_v47  ;;  %v6930_v47 = vld [vmem:[%s14843_s21 + $0x160] sm:$0xff]  ;;  %v6931_v14 = vld [vmem:[%s14843_s21 + $0x168] sm:$0xff] }
 0xa18   :  { %9486 = vmatprep.mubr.msk.f32.mxu1 %vm11573_vm9, %v14938_v35 }
 0xa19   :  { %10811 = vmatpush3.bf16.msra.mxu1 %v10810_v45 }
 0xa1a   :  { %10812 = vmatprep.subr.bf16.mxu1 %v14982_v33 }
 0xa1b   :  { %9487 = vmatmul.mubr.f32.gmra.mrb[202].mxu1 %v13346_v48  ;;  %v7914_v48 = vld [vmem:[%s14843_s21 + $0x460] sm:$0xff] }
 0xa1c   :  { %9489 = vmatprep.mubr.msk.f32.mxu1 %vm11573_vm9, %v14938_v35 }
 0xa1f   :  { %9490 = vmatmul.mubr.f32.gmra.mrb[204].mxu1 %v13359_v7  ;;  %v7915_v7 = vld [vmem:[%s14843_s21 + $0x468] sm:$0xff] }
 0xa20   :  { %9492 = vmatprep.mubr.msk.f32.mxu1 %vm11573_vm9, %v14938_v35 }
 0xa23   :  { %9493 = vmatmul.mubr.f32.gmra.mrb[206].mxu1 %v13366_v9  ;;  %v10813_v9 = vpack.c.bf16 %v7915_v7, %v7914_v48  ;;  %v6764_v48 = vld [vmem:[%s14843_s21 + $0xd0] sm:$0xff]  ;;  %v6765_v7 = vld [vmem:[%s14843_s21 + $0xd8] sm:$0xff] }
 0xa24   :  { %9495 = vmatprep.mubr.msk.f32.mxu1 %vm11573_vm9, %v14938_v35 }
 0xa25   :  { %10814 = vmatpush3.bf16.msra.mxu1 %v10813_v9 }
 0xa26   :  { %10815 = vmatprep.subr.bf16.mxu1 %v14982_v33 }
 0xa27   :  { %9496 = vmatmul.mubr.f32.gmra.mrb[208].mxu1 %v13373_v36  ;;  %v7916_v36 = vld [vmem:[%s14843_s21 + $0x470] sm:$0xff] }
 0xa28   :  { %9498 = vmatprep.mubr.msk.f32.mxu1 %vm11573_vm9, %v14938_v35 }
 0xa2b   :  { %9499 = vmatmul.mubr.f32.gmra.mrb[210].mxu1 %v13379_v31  ;;  %v7917_v31 = vld [vmem:[%s14843_s21 + $0x478] sm:$0xff] }
 0xa2c   :  { %9501 = vmatprep.mubr.msk.f32.mxu1 %vm11573_vm9, %v14938_v35 }
 0xa2f   :  { %9502 = vmatmul.mubr.f32.gmra.mrb[212].mxu1 %v13385_v10  ;;  %v10816_v10 = vpack.c.bf16 %v7917_v31, %v7916_v36  ;;  %v10642_v31 = vpack.c.bf16 %v6765_v7, %v6764_v48 }
 0xa30   :  { %9504 = vmatprep.mubr.msk.f32.mxu1 %vm11573_vm9, %v14938_v35 }
 0xa31   :  { %10817 = vmatpush3.bf16.msra.mxu1 %v10816_v10  ;;  %v6766_v10 = vld [vmem:[%s14843_s21 + $0xe0] sm:$0xff] }
 0xa33   :  { %9505 = vmatmul.mubr.f32.gmra.mrb[214].mxu1 %v13391_v44  ;;  %v8164_v44 = vld [vmem:[%s14840_s18] ss:$0 sm:$0xff] }
 0xa34   :  { %9507 = vmatprep.mubr.msk.f32.mxu1 %vm11573_vm9, %v14938_v35 }
 0xa37   :  { %9508 = vmatmul.mubr.f32.gmra.mrb[216].mxu1 %v13397_v34  ;;  %v8165_v34 = vld [vmem:[%s14842_s20] ss:$0 sm:$0xff] }
 0xa38   :  { %9510 = vmatprep.mubr.msk.f32.mxu1 %vm11573_vm9, %v14938_v35 }
 0xa3b   :  { %9511 = vmatmul.mubr.f32.gmra.mrb[218].mxu1 %v13403_v54 }
 0xa3c   :  { %9513 = vmatprep.mubr.msk.f32.mxu1 %vm11573_vm9, %v14938_v35 }
 0xa3f   :  { %9514 = vmatmul.mubr.f32.gmra.mrb[220].mxu1 %v13409_v50 }
 0xa40   :  { %9516 = vmatprep.mubr.msk.f32.mxu1 %vm11573_vm9, %v14938_v35 }
 0xa43   :  { %9517 = vmatmul.mubr.f32.gmra.mrb[222].mxu1 %v13415_v13  ;;  %v14222_v13 = vadd.f32 %v8165_v34, %v8164_v44  ;;  %v6767_v44 = vld [vmem:[%s14843_s21 + $0xe8] sm:$0xff] }
 0xa44   :  { %9519 = vmatprep.mubr.msk.f32.mxu1 %vm11573_vm9, %v14938_v35 }
 0xa47   :  { %9520 = vmatmul.mubr.f32.gmra.mrb[224].mxu1 %v13421_v12  ;;  %v6518_v12 = vld [vmem:[%s14843_s21] sm:$0xff] }
 0xa48   :  { %9522 = vmatprep.mubr.msk.f32.mxu1 %vm11573_vm9, %v14938_v35 }
 0xa4b   :  { %9523 = vmatmul.mubr.f32.gmra.mrb[226].mxu1 %v13427_v27  ;;  %v6519_v27 = vld [vmem:[%s14843_s21 + $0x8] sm:$0xff] }
 0xa4c   :  { %9864 = vmatprep.mubr.msk.f32.mxu1 %vm11573_vm9, %v14938_v35  ;;  %v10615_v26 = vpack.c.bf16 %v6519_v27, %v6518_v12  ;;  %v6768_v12 = vld [vmem:[%s14843_s21 + $0xf0] sm:$0xff]  ;;  %v6769_v27 = vld [vmem:[%s14843_s21 + $0xf8] sm:$0xff] }
 0xad6   :  { %v6386_v54 = vpop.f32.mrb[190].mxu1 }
 0xad7   :  { %v9470_v50 = vpop.f32.mrb[191].mxu1  ;;  %v10945_v21 = vadd.f32 %v14222_v13, %v6386_v54 }
 0xad8   :  { %v10645_v50 = vpack.c.bf16 %v6767_v44, %v6766_v10 }
 0xad9   :  { %v6499_v0 = vmax.f32 %v10945_v21, 0.0  ;;  %v10657_v21 = vpack.c.bf16 %v6849_v62, %v6848_v16  ;;  %v7095_v16 = vld [vmem:[%s14843_s21 + $0x1e8] sm:$0xff] }
 0xada   :  { %v6391_v8 = vpop.f32.mrb[192].mxu1 }
 0xadb   :  { %v10947_v40 = vadd.f32 %v14222_v13, %v6391_v8  ;;  %v9473_v53 = vpop.f32.mrb[193].mxu1 }
 0xadc   :  { %v10648_v53 = vpack.c.bf16 %v6769_v27, %v6768_v12  ;;  %v7012_v12 = vld [vmem:[%s14843_s21 + $0x1a0] sm:$0xff]  ;;  %v7013_v27 = vld [vmem:[%s14843_s21 + $0x1a8] sm:$0xff] }
 0xadd   :  { %v6500_v58 = vmax.f32 %v10947_v40, 0.0 }
 0xade   :  { %v6396_v11 = vpop.f32.mrb[194].mxu1 }
 0xadf   :  { %v9476_v60 = vpop.f32.mrb[195].mxu1  ;;  %9542 = vmatmul.mubr.msk.f32.vlgmr.msra.gmra.mrb[152].mxu0 %vm4882_vm14, %v6500_v58  ;;  %v10949_v17 = vadd.f32 %v14222_v13, %v6396_v11  ;;  %v6844_v58 = vld [vmem:[%s14843_s21 + $0x100] sm:$0xff] }
 0xae0   :  { %10616 = vmatpush3.bf16.msra.mxu0 %v10615_v26  ;;  %9560 = vmatprep.mubr.msk.f32.mxu0 %vm11573_vm9, %v14938_v35  ;;  %v10651_v60 = vpack.c.bf16 %v6845_v49, %v6844_v58 }
 0xae1   :  { %10617 = vmatprep.subr.bf16.mxu0 %v14982_v33  ;;  %v6501_v45 = vmax.f32 %v10949_v17, 0.0 }
 0xae2   :  { %v14247_v52 = vpop.f32.mrb[196].mxu1 }
 0xae3   :  { %v9479_v55 = vpop.f32.mrb[197].mxu1  ;;  %v10951_v26 = vadd.f32 %v14222_v13, %v14247_v52 }
 0xae4   :  { %10619 = vmatpush3.bf16.msra.mxu0 %v10618_v56 }
 0xae5   :  { %10620 = vmatprep.subr.bf16.mxu0 %v14982_v33  ;;  %v6502_v56 = vmax.f32 %v10951_v26, 0.0  ;;  %v7015_v26 = vld [vmem:[%s14843_s21 + $0x1b8] sm:$0xff] }
 0xae6   :  { %v14256_v5 = vpop.f32.mrb[198].mxu1 }
 0xae7   :  { %v9482_v43 = vpop.f32.mrb[199].mxu1  ;;  %v10953_v42 = vadd.f32 %v14222_v13, %v14256_v5  ;;  %v6928_v5 = vld [vmem:[%s14843_s21 + $0x150] sm:$0xff] }
 0xae8   :  { %10622 = vmatpush3.bf16.msra.mxu0 %v10621_v1  ;;  %v10654_v1 = vpack.c.bf16 %v6847_v63, %v6846_v38  ;;  %v10666_v17 = vpack.c.bf16 %v6929_v29, %v6928_v5  ;;  %v7092_v63 = vld [vmem:[%s14843_s21 + $0x1d0] sm:$0xff] }
 0xae9   :  { %10623 = vmatprep.subr.bf16.mxu0 %v14982_v33 }
 0xaea   :  { %v14266_v19 = vpop.f32.mrb[200].mxu1 }
 0xaeb   :  { %v9485_v37 = vpop.f32.mrb[201].mxu1  ;;  %v10955_v7 = vadd.f32 %v14222_v13, %v14266_v19  ;;  %v7011_v19 = vld [vmem:[%s14843_s21 + $0x198] sm:$0xff] }
 0xaec   :  { %10625 = vmatpush3.bf16.msra.mxu0 %v10624_v51 }
 0xaed   :  { %10626 = vmatprep.subr.bf16.mxu0 %v14982_v33  ;;  %v6504_v44 = vmax.f32 %v10955_v7, 0.0 }
 0xaee   :  { %v14275_v41 = vpop.f32.mrb[202].mxu1 }
 0xaef   :  { %9561 = vmatmul.mubr.msk.f32.vlgmr.msra.gmra.mrb[154].mxu0 %vm4882_vm14, %v6499_v0  ;;  %v9488_v30 = vpop.f32.mrb[203].mxu1  ;;  %v10660_v0 = vpack.c.bf16 %v6851_v39, %v6850_v2  ;;  %v10957_v49 = vadd.f32 %v14222_v13, %v14275_v41  ;;  %v7093_v41 = vld [vmem:[%s14843_s21 + $0x1d8] sm:$0xff] }
 0xaf0   :  { %10628 = vmatpush3.bf16.msra.mxu0 %v10627_v25  ;;  %9579 = vmatprep.mubr.msk.f32.mxu0 %vm11573_vm9, %v14938_v35  ;;  %v6927_v30 = vld [vmem:[%s14843_s21 + $0x148] sm:$0xff] }
 0xaf1   :  { %10629 = vmatprep.subr.bf16.mxu0 %v14982_v33  ;;  %v6505_v38 = vmax.f32 %v10957_v49, 0.0  ;;  %v7342_v49 = vld [vmem:[%s14843_s21 + $0x2b0] sm:$0xff] }
 0xaf2   :  { %v14287_v4 = vpop.f32.mrb[204].mxu1 }
 0xaf3   :  { %v9491_v28 = vpop.f32.mrb[205].mxu1  ;;  %v10959_v39 = vadd.f32 %v14222_v13, %v14287_v4  ;;  %v7175_v4 = vld [vmem:[%s14843_s21 + $0x218] sm:$0xff] }
 0xaf4   :  { %10631 = vmatpush3.bf16.msra.mxu0 %v10630_v20  ;;  %v10663_v28 = vpack.c.bf16 %v6927_v30, %v6926_v59  ;;  %v7174_v30 = vld [vmem:[%s14843_s21 + $0x210] sm:$0xff] }
 0xaf5   :  { %10632 = vmatprep.subr.bf16.mxu0 %v14982_v33  ;;  %v6506_v59 = vmax.f32 %v10959_v39, 0.0  ;;  %v7425_v39 = vld [vmem:[%s14843_s21 + $0x2f8] sm:$0xff] }
 0xaf6   :  { %v14296_v61 = vpop.f32.mrb[206].mxu1 }
 0xaf7   :  { %v9494_v32 = vpop.f32.mrb[207].mxu1  ;;  %v10961_v29 = vadd.f32 %v14222_v13, %v14296_v61  ;;  %v7257_v61 = vld [vmem:[%s14843_s21 + $0x258] sm:$0xff] }
 0xaf8   :  { %10634 = vmatpush3.bf16.msra.mxu0 %v10633_v3  ;;  %v6503_v3 = vmax.f32 %v10953_v42, 0.0 }
 0xaf9   :  { %10635 = vmatprep.subr.bf16.mxu0 %v14982_v33 }
 0xafa   :  { %v14306_v22 = vpop.f32.mrb[208].mxu1 }
 0xafb   :  { %v9497_v15 = vpop.f32.mrb[209].mxu1 }
 0xafc   :  { %10637 = vmatpush3.bf16.msra.mxu0 %v10636_v6  ;;  %v10669_v15 = vpack.c.bf16 %v6931_v14, %v6930_v47  ;;  %v6507_v14 = vmax.f32 %v10961_v29, 0.0 }
 0xafd   :  { %10638 = vmatprep.subr.bf16.mxu0 %v14982_v33 }
 0xafe   :  { %v14315_v9 = vpop.f32.mrb[210].mxu1 }
 0xaff   :  { %9580 = vmatmul.mubr.msk.f32.vlgmr.msra.gmra.mrb[156].mxu0 %vm4882_vm14, %v6501_v45  ;;  %v9500_v36 = vpop.f32.mrb[211].mxu1  ;;  %v6933_v45 = vld [vmem:[%s14843_s21 + $0x178] sm:$0xff] }
 0xb00   :  { %10640 = vmatpush3.bf16.msra.mxu0 %v10639_v24  ;;  %9598 = vmatprep.mubr.msk.f32.mxu0 %vm11573_vm9, %v14938_v35  ;;  %v6932_v24 = vld [vmem:[%s14843_s21 + $0x170] sm:$0xff]  ;;  %v7008_v36 = vld [vmem:[%s14843_s21 + $0x180] sm:$0xff] }
 0xb01   :  { %10641 = vmatprep.subr.bf16.mxu0 %v14982_v33  ;;  %v10672_v48 = vpack.c.bf16 %v6933_v45, %v6932_v24  ;;  %v7258_v45 = vld [vmem:[%s14843_s21 + $0x260] sm:$0xff] }
 0xb02   :  { %v14327_v34 = vpop.f32.mrb[212].mxu1 }
 0xb03   :  { %v9503_v54 = vpop.f32.mrb[213].mxu1 }
 0xb04   :  { %10643 = vmatpush3.bf16.msra.mxu0 %v10642_v31  ;;  %v7009_v31 = vld [vmem:[%s14843_s21 + $0x188] sm:$0xff]  ;;  %v7010_v54 = vld [vmem:[%s14843_s21 + $0x190] sm:$0xff] }
 0xb05   :  { %10644 = vmatprep.subr.bf16.mxu0 %v14982_v33  ;;  %v10675_v10 = vpack.c.bf16 %v7009_v31, %v7008_v36  ;;  %v7260_v36 = vld [vmem:[%s14843_s21 + $0x270] sm:$0xff]  ;;  %v7261_v31 = vld [vmem:[%s14843_s21 + $0x278] sm:$0xff] }
 0xb06   :  { %v14336_v8 = vpop.f32.mrb[214].mxu1 }
 0xb07   :  { %v9506_v40 = vpop.f32.mrb[215].mxu1 }
 0xb08   :  { %10646 = vmatpush3.bf16.msra.mxu0 %v10645_v50  ;;  %v10678_v50 = vpack.c.bf16 %v7011_v19, %v7010_v54  ;;  %v10681_v40 = vpack.c.bf16 %v7013_v27, %v7012_v12  ;;  %v7336_v54 = vld [vmem:[%s14843_s21 + $0x280] sm:$0xff]  ;;  %v7337_v19 = vld [vmem:[%s14843_s21 + $0x288] sm:$0xff]  ;;  %v7338_v27 = vld [vmem:[%s14843_s21 + $0x290] sm:$0xff] }
 0xb09   :  { %10647 = vmatprep.subr.bf16.mxu0 %v14982_v33 }
 0xb0a   :  { %v14347_v23 = vpop.f32.mrb[216].mxu1 }
 0xb0b   :  { %v9509_v11 = vpop.f32.mrb[217].mxu1 }
 0xb0c   :  { %10649 = vmatpush3.bf16.msra.mxu0 %v10648_v53  ;;  %v7014_v53 = vld [vmem:[%s14843_s21 + $0x1b0] sm:$0xff]  ;;  %v7090_v11 = vld [vmem:[%s14843_s21 + $0x1c0] sm:$0xff] }
 0xb0d   :  { %10650 = vmatprep.subr.bf16.mxu0 %v14982_v33  ;;  %v10684_v58 = vpack.c.bf16 %v7015_v26, %v7014_v53  ;;  %v7340_v53 = vld [vmem:[%s14843_s21 + $0x2a0] sm:$0xff]  ;;  %v7341_v26 = vld [vmem:[%s14843_s21 + $0x2a8] sm:$0xff] }
 0xb0e   :  { %v14356_v52 = vpop.f32.mrb[218].mxu1 }
 0xb0f   :  { %9599 = vmatmul.mubr.msk.f32.vlgmr.msra.gmra.mrb[158].mxu0 %vm4882_vm14, %v6502_v56  ;;  %v9512_v55 = vpop.f32.mrb[219].mxu1 }
 0xb10   :  { %10652 = vmatpush3.bf16.msra.mxu0 %v10651_v60  ;;  %9617 = vmatprep.mubr.msk.f32.mxu0 %vm11573_vm9, %v14938_v35  ;;  %v7091_v60 = vld [vmem:[%s14843_s21 + $0x1c8] sm:$0xff]  ;;  %v10690_v55 = vpack.c.bf16 %v7093_v41, %v7092_v63 }
 0xb11   :  { %10653 = vmatprep.subr.bf16.mxu0 %v14982_v33  ;;  %v10687_v56 = vpack.c.bf16 %v7091_v60, %v7090_v11  ;;  %v7343_v11 = vld [vmem:[%s14843_s21 + $0x2b8] sm:$0xff]  ;;  %v7419_v63 = vld [vmem:[%s14843_s21 + $0x2c8] sm:$0xff] }
 0xb12   :  { %v14368_v43 = vpop.f32.mrb[220].mxu1  ;;  %v10732_v60 = vpack.c.bf16 %v7343_v11, %v7342_v49  ;;  %v7670_v11 = vld [vmem:[%s14843_s21 + $0x3b0] sm:$0xff] }
 0xb13   :  { %v9515_v51 = vpop.f32.mrb[221].mxu1 }
 0xb14   :  { %10655 = vmatpush3.bf16.msra.mxu0 %v10654_v1  ;;  %v7094_v1 = vld [vmem:[%s14843_s21 + $0x1e0] sm:$0xff]  ;;  %v7096_v51 = vld [vmem:[%s14843_s21 + $0x1f0] sm:$0xff] }
 0xb15   :  { %10656 = vmatprep.subr.bf16.mxu0 %v14982_v33  ;;  %v10693_v62 = vpack.c.bf16 %v7095_v16, %v7094_v1  ;;  %v7420_v1 = vld [vmem:[%s14843_s21 + $0x2d0] sm:$0xff] }
 0xb16   :  { %v14377_v37 = vpop.f32.mrb[222].mxu1 }
 0xb17   :  { %v9518_v25 = vpop.f32.mrb[223].mxu1 }
 0xb18   :  { %10658 = vmatpush3.bf16.msra.mxu0 %v10657_v21  ;;  %v7097_v21 = vld [vmem:[%s14843_s21 + $0x1f8] sm:$0xff]  ;;  %v7172_v25 = vld [vmem:[%s14843_s21 + $0x200] sm:$0xff] }
 0xb19   :  { %10659 = vmatprep.subr.bf16.mxu0 %v14982_v33  ;;  %v10696_v2 = vpack.c.bf16 %v7097_v21, %v7096_v51  ;;  %v7423_v51 = vld [vmem:[%s14843_s21 + $0x2e8] sm:$0xff] }
 0xb1a   :  { %v6471_v20 = vpop.f32.mrb[224].mxu1 }
 0xb1b   :  { %v10979_v57 = vadd.f32 %v14222_v13, %v6471_v20  ;;  %v9521_v46 = vpop.f32.mrb[225].mxu1  ;;  %v10702_v20 = vpack.c.bf16 %v7175_v4, %v7174_v30 }
 0xb1c   :  { %10661 = vmatpush3.bf16.msra.mxu0 %v10660_v0  ;;  %v7173_v0 = vld [vmem:[%s14843_s21 + $0x208] sm:$0xff] }
 0xb1d   :  { %v6516_v18 = vmax.f32 %v10979_v57, 0.0  ;;  %10662 = vmatprep.subr.bf16.mxu0 %v14982_v33  ;;  %v10699_v42 = vpack.c.bf16 %v7173_v0, %v7172_v25  ;;  %v7176_v57 = vld [vmem:[%s14843_s21 + $0x220] sm:$0xff]  ;;  %v7177_v46 = vld [vmem:[%s14843_s21 + $0x228] sm:$0xff]  ;;  %v10967_v0 = vadd.f32 %v14222_v13, %v14327_v34  ;;  %v7503_v34 = vld [vmem:[%s14843_s21 + $0x318] sm:$0xff] }
 0xb1e   :  { %v14396_v32 = vpop.f32.mrb[226].mxu1 }
 0xb1f   :  { %9618 = vmatmul.mubr.msk.f32.vlgmr.msra.gmra.mrb[160].mxu0 %vm4882_vm14, %v6503_v3  ;;  %v9524_v6 = vpop.f32.mrb[227].mxu1  ;;  %9865 = vmatmul.mubr.msk.f32.vlgmr.msra.gmra.mrb[228].mxu1 %vm4882_vm14, %v6516_v18  ;;  %v7178_v3 = vld [vmem:[%s14843_s21 + $0x230] sm:$0xff]  ;;  %v7179_v18 = vld [vmem:[%s14843_s21 + $0x238] sm:$0xff]  ;;  %v6510_v4 = vmax.f32 %v10967_v0, 0.0 }
 0xb20   :  { %10664 = vmatpush3.bf16.msra.mxu0 %v10663_v28  ;;  %9636 = vmatprep.mubr.msk.f32.mxu0 %vm11573_vm9, %v14938_v35  ;;  %v10705_v28 = vpack.c.bf16 %v7177_v46, %v7176_v57  ;;  %v10708_v5 = vpack.c.bf16 %v7179_v18, %v7178_v3  ;;  %v7254_v6 = vld [vmem:[%s14843_s21 + $0x240] sm:$0xff]  ;;  %v7506_v18 = vld [vmem:[%s14843_s21 + $0x330] sm:$0xff] }
 0xb21   :  { %10665 = vmatprep.subr.bf16.mxu0 %v14982_v33  ;;  %v7504_v46 = vld [vmem:[%s14843_s21 + $0x320] sm:$0xff]  ;;  %v7752_v0 = vld [vmem:[%s14843_s21 + $0x3f0] sm:$0xff] }
 0xb24   :  { %10667 = vmatpush3.bf16.msra.mxu0 %v10666_v17  ;;  %v7255_v17 = vld [vmem:[%s14843_s21 + $0x248] sm:$0xff] }
 0xb25   :  { %10668 = vmatprep.subr.bf16.mxu0 %v14982_v33  ;;  %v10711_v47 = vpack.c.bf16 %v7255_v17, %v7254_v6  ;;  %v10969_v6 = vadd.f32 %v14222_v13, %v14336_v8  ;;  %v7582_v17 = vld [vmem:[%s14843_s21 + $0x340] sm:$0xff]  ;;  %v7585_v8 = vld [vmem:[%s14843_s21 + $0x358] sm:$0xff] }
 0xb28   :  { %10670 = vmatpush3.bf16.msra.mxu0 %v10669_v15  ;;  %v7256_v15 = vld [vmem:[%s14843_s21 + $0x250] sm:$0xff] }
 0xb29   :  { %10671 = vmatprep.subr.bf16.mxu0 %v14982_v33  ;;  %v10714_v24 = vpack.c.bf16 %v7257_v61, %v7256_v15  ;;  %v6511_v15 = vmax.f32 %v10969_v6, 0.0  ;;  %v7584_v61 = vld [vmem:[%s14843_s21 + $0x350] sm:$0xff] }
 0xb2c   :  { %10673 = vmatpush3.bf16.msra.mxu0 %v10672_v48  ;;  %v7259_v48 = vld [vmem:[%s14843_s21 + $0x268] sm:$0xff] }
 0xb2d   :  { %10674 = vmatprep.subr.bf16.mxu0 %v14982_v33  ;;  %v10717_v7 = vpack.c.bf16 %v7259_v48, %v7258_v45  ;;  %v7586_v45 = vld [vmem:[%s14843_s21 + $0x360] sm:$0xff]  ;;  %v7587_v48 = vld [vmem:[%s14843_s21 + $0x368] sm:$0xff] }
 0xb2f   :  { %9637 = vmatmul.mubr.msk.f32.vlgmr.msra.gmra.mrb[162].mxu0 %vm4882_vm14, %v6504_v44  ;;  %v10963_v44 = vadd.f32 %v14222_v13, %v14306_v22  ;;  %v7339_v22 = vld [vmem:[%s14843_s21 + $0x298] sm:$0xff] }
 0xb30   :  { %10676 = vmatpush3.bf16.msra.mxu0 %v10675_v10  ;;  %9655 = vmatprep.mubr.msk.f32.mxu0 %vm11573_vm9, %v14938_v35  ;;  %v10720_v10 = vpack.c.bf16 %v7261_v31, %v7260_v36  ;;  %v7588_v36 = vld [vmem:[%s14843_s21 + $0x370] sm:$0xff]  ;;  %v7589_v31 = vld [vmem:[%s14843_s21 + $0x378] sm:$0xff] }
 0xb31   :  { %10677 = vmatprep.subr.bf16.mxu0 %v14982_v33  ;;  %v6508_v12 = vmax.f32 %v10963_v44, 0.0  ;;  %v10971_v44 = vadd.f32 %v14222_v13, %v14347_v23  ;;  %v7667_v23 = vld [vmem:[%s14843_s21 + $0x398] sm:$0xff] }
 0xb34   :  { %10679 = vmatpush3.bf16.msra.mxu0 %v10678_v50  ;;  %v10723_v50 = vpack.c.bf16 %v7337_v19, %v7336_v54  ;;  %v7664_v54 = vld [vmem:[%s14843_s21 + $0x380] sm:$0xff]  ;;  %v7665_v19 = vld [vmem:[%s14843_s21 + $0x388] sm:$0xff] }
 0xb35   :  { %10680 = vmatprep.subr.bf16.mxu0 %v14982_v33 }
 0xb38   :  { %10682 = vmatpush3.bf16.msra.mxu0 %v10681_v40  ;;  %v10726_v40 = vpack.c.bf16 %v7339_v22, %v7338_v27  ;;  %v7666_v27 = vld [vmem:[%s14843_s21 + $0x390] sm:$0xff] }
 0xb39   :  { %10683 = vmatprep.subr.bf16.mxu0 %v14982_v33  ;;  %v10774_v22 = vpack.c.bf16 %v7667_v23, %v7666_v27  ;;  %v10981_v23 = vadd.f32 %v14222_v13, %v14396_v32 }
 0xb3c   :  { %10685 = vmatpush3.bf16.msra.mxu0 %v10684_v58  ;;  %v10729_v58 = vpack.c.bf16 %v7341_v26, %v7340_v53  ;;  %v7669_v53 = vld [vmem:[%s14843_s21 + $0x3a8] sm:$0xff] }
 0xb3d   :  { %10686 = vmatprep.subr.bf16.mxu0 %v14982_v33 }
 0xb3f   :  { %9656 = vmatmul.mubr.msk.f32.vlgmr.msra.gmra.mrb[164].mxu0 %vm4882_vm14, %v6505_v38  ;;  %v7418_v38 = vld [vmem:[%s14843_s21 + $0x2c0] sm:$0xff] }
 0xb40   :  { %10688 = vmatpush3.bf16.msra.mxu0 %v10687_v56  ;;  %9674 = vmatprep.mubr.msk.f32.mxu0 %vm11573_vm9, %v14938_v35  ;;  %v10965_v56 = vadd.f32 %v14222_v13, %v14315_v9  ;;  %v10735_v41 = vpack.c.bf16 %v7419_v63, %v7418_v38  ;;  %v7421_v9 = vld [vmem:[%s14843_s21 + $0x2d8] sm:$0xff]  ;;  %v10973_v38 = vadd.f32 %v14222_v13, %v14356_v52  ;;  %v7746_v63 = vld [vmem:[%s14843_s21 + $0x3c0] sm:$0xff] }
 0xb41   :  { %10689 = vmatprep.subr.bf16.mxu0 %v14982_v33  ;;  %v10738_v16 = vpack.c.bf16 %v7421_v9, %v7420_v1  ;;  %v7748_v9 = vld [vmem:[%s14843_s21 + $0x3d0] sm:$0xff]  ;;  %v7749_v52 = vld [vmem:[%s14843_s21 + $0x3d8] sm:$0xff] }
 0xb42   :  { %v6513_v1 = vmax.f32 %v10973_v38, 0.0 }
 0xb44   :  { %10691 = vmatpush3.bf16.msra.mxu0 %v10690_v55  ;;  %v6509_v55 = vmax.f32 %v10965_v56, 0.0 }
 0xb45   :  { %10692 = vmatprep.subr.bf16.mxu0 %v14982_v33 }
 0xb48   :  { %10694 = vmatpush3.bf16.msra.mxu0 %v10693_v62  ;;  %v7422_v62 = vld [vmem:[%s14843_s21 + $0x2e0] sm:$0xff] }
 0xb49   :  { %10695 = vmatprep.subr.bf16.mxu0 %v14982_v33  ;;  %v10741_v21 = vpack.c.bf16 %v7423_v51, %v7422_v62  ;;  %v7750_v62 = vld [vmem:[%s14843_s21 + $0x3e0] sm:$0xff]  ;;  %v7751_v51 = vld [vmem:[%s14843_s21 + $0x3e8] sm:$0xff] }
 0xb4c   :  { %10697 = vmatpush3.bf16.msra.mxu0 %v10696_v2  ;;  %v7424_v2 = vld [vmem:[%s14843_s21 + $0x2f0] sm:$0xff] }
 0xb4d   :  { %10698 = vmatprep.subr.bf16.mxu0 %v14982_v33  ;;  %v10744_v25 = vpack.c.bf16 %v7425_v39, %v7424_v2 }
 0xb4f   :  { %9675 = vmatmul.mubr.msk.f32.vlgmr.msra.gmra.mrb[166].mxu0 %vm4882_vm14, %v6506_v59  ;;  %v7501_v59 = vld [vmem:[%s14843_s21 + $0x308] sm:$0xff] }
 0xb50   :  { %10700 = vmatpush3.bf16.msra.mxu0 %v10699_v42  ;;  %9693 = vmatprep.mubr.msk.f32.mxu0 %vm11573_vm9, %v14938_v35  ;;  %v7500_v42 = vld [vmem:[%s14843_s21 + $0x300] sm:$0xff] }
 0xb51   :  { %10701 = vmatprep.subr.bf16.mxu0 %v14982_v33  ;;  %v10747_v30 = vpack.c.bf16 %v7501_v59, %v7500_v42  ;;  %v7753_v42 = vld [vmem:[%s14843_s21 + $0x3f8] sm:$0xff] }
 0xb52   :  { %v10792_v59 = vpack.c.bf16 %v7753_v42, %v7752_v0 }
 0xb54   :  { %10703 = vmatpush3.bf16.msra.mxu0 %v10702_v20  ;;  %v7502_v20 = vld [vmem:[%s14843_s21 + $0x310] sm:$0xff] }
 0xb55   :  { %10704 = vmatprep.subr.bf16.mxu0 %v14982_v33  ;;  %v10750_v57 = vpack.c.bf16 %v7503_v34, %v7502_v20  ;;  %v7829_v20 = vld [vmem:[%s14843_s21 + $0x408] sm:$0xff] }
 0xb58   :  { %10706 = vmatpush3.bf16.msra.mxu0 %v10705_v28  ;;  %v7505_v28 = vld [vmem:[%s14843_s21 + $0x328] sm:$0xff] }
 0xb59   :  { %10707 = vmatprep.subr.bf16.mxu0 %v14982_v33  ;;  %v10753_v3 = vpack.c.bf16 %v7505_v28, %v7504_v46  ;;  %v7830_v46 = vld [vmem:[%s14843_s21 + $0x410] sm:$0xff] }
 0xb5c   :  { %10709 = vmatpush3.bf16.msra.mxu0 %v10708_v5  ;;  %v7507_v5 = vld [vmem:[%s14843_s21 + $0x338] sm:$0xff] }
 0xb5d   :  { %10710 = vmatprep.subr.bf16.mxu0 %v14982_v33  ;;  %v10756_v29 = vpack.c.bf16 %v7507_v5, %v7506_v18  ;;  %v7833_v18 = vld [vmem:[%s14843_s21 + $0x428] sm:$0xff] }
 0xb5f   :  { %9694 = vmatmul.mubr.msk.f32.vlgmr.msra.gmra.mrb[168].mxu0 %vm4882_vm14, %v6507_v14 }
 0xb60   :  { %10712 = vmatpush3.bf16.msra.mxu0 %v10711_v47  ;;  %9712 = vmatprep.mubr.msk.f32.mxu0 %vm11573_vm9, %v14938_v35  ;;  %v7583_v47 = vld [vmem:[%s14843_s21 + $0x348] sm:$0xff] }
 0xb61   :  { %10713 = vmatprep.subr.bf16.mxu0 %v14982_v33  ;;  %v10759_v14 = vpack.c.bf16 %v7583_v47, %v7582_v17  ;;  %v7834_v47 = vld [vmem:[%s14843_s21 + $0x430] sm:$0xff] }
 0xb64   :  { %10715 = vmatpush3.bf16.msra.mxu0 %v10714_v24  ;;  %v10762_v24 = vpack.c.bf16 %v7585_v8, %v7584_v61  ;;  %v10977_v61 = vadd.f32 %v14222_v13, %v14377_v37  ;;  %v7992_v8 = vld [vmem:[%s14843_s21 + $0x480] sm:$0xff]  ;;  %v7995_v37 = vld [vmem:[%s14843_s21 + $0x498] sm:$0xff] }
 0xb65   :  { %10716 = vmatprep.subr.bf16.mxu0 %v14982_v33 }
 0xb68   :  { %10718 = vmatpush3.bf16.msra.mxu0 %v10717_v7  ;;  %v10765_v7 = vpack.c.bf16 %v7587_v48, %v7586_v45  ;;  %v6515_v48 = vmax.f32 %v10977_v61, 0.0 }
 0xb69   :  { %10719 = vmatprep.subr.bf16.mxu0 %v14982_v33 }
 0xb6c   :  { %10721 = vmatpush3.bf16.msra.mxu0 %v10720_v10  ;;  %v10768_v10 = vpack.c.bf16 %v7589_v31, %v7588_v36  ;;  %v7996_v31 = vld [vmem:[%s14843_s21 + $0x4a0] sm:$0xff] }
 0xb6d   :  { %10722 = vmatprep.subr.bf16.mxu0 %v14982_v33 }
 0xb6f   :  { %9713 = vmatmul.mubr.msk.f32.vlgmr.msra.gmra.mrb[170].mxu0 %vm4882_vm14, %v6508_v12  ;;  %v6512_v12 = vmax.f32 %v10971_v44, 0.0 }
 0xb70   :  { %10724 = vmatpush3.bf16.msra.mxu0 %v10723_v50  ;;  %9731 = vmatprep.mubr.msk.f32.mxu0 %vm11573_vm9, %v14938_v35  ;;  %v10771_v50 = vpack.c.bf16 %v7665_v19, %v7664_v54 }
 0xb71   :  { %10725 = vmatprep.subr.bf16.mxu0 %v14982_v33 }
 0xb74   :  { %10727 = vmatpush3.bf16.msra.mxu0 %v10726_v40  ;;  %v7668_v40 = vld [vmem:[%s14843_s21 + $0x3a0] sm:$0xff] }
 0xb75   :  { %10728 = vmatprep.subr.bf16.mxu0 %v14982_v33  ;;  %v10777_v49 = vpack.c.bf16 %v7669_v53, %v7668_v40 }
 0xb78   :  { %10730 = vmatpush3.bf16.msra.mxu0 %v10729_v58 }
 0xb79   :  { %10731 = vmatprep.subr.bf16.mxu0 %v14982_v33 }
 0xb7c   :  { %10733 = vmatpush3.bf16.msra.mxu0 %v10732_v60  ;;  %v7671_v60 = vld [vmem:[%s14843_s21 + $0x3b8] sm:$0xff] }
 0xb7d   :  { %10734 = vmatprep.subr.bf16.mxu0 %v14982_v33  ;;  %v10780_v56 = vpack.c.bf16 %v7671_v60, %v7670_v11 }
 0xb7f   :  { %9732 = vmatmul.mubr.msk.f32.vlgmr.msra.gmra.mrb[172].mxu0 %vm4882_vm14, %v6509_v55 }
 0xb80   :  { %10736 = vmatpush3.bf16.msra.mxu0 %v10735_v41  ;;  %9750 = vmatprep.mubr.msk.f32.mxu0 %vm11573_vm9, %v14938_v35  ;;  %v7747_v41 = vld [vmem:[%s14843_s21 + $0x3c8] sm:$0xff] }
 0xb81   :  { %10737 = vmatprep.subr.bf16.mxu0 %v14982_v33  ;;  %v10783_v55 = vpack.c.bf16 %v7747_v41, %v7746_v63 }
 0xb84   :  { %10739 = vmatpush3.bf16.msra.mxu0 %v10738_v16  ;;  %v10786_v16 = vpack.c.bf16 %v7749_v52, %v7748_v9 }
 0xb85   :  { %10740 = vmatprep.subr.bf16.mxu0 %v14982_v33 }
 0xb88   :  { %10742 = vmatpush3.bf16.msra.mxu0 %v10741_v21 }
 0xb89   :  { %10743 = vmatprep.subr.bf16.mxu0 %v14982_v33 }
 0xb8c   :  { %10745 = vmatpush3.bf16.msra.mxu0 %v10744_v25  ;;  %v10789_v25 = vpack.c.bf16 %v7751_v51, %v7750_v62 }
 0xb8d   :  { %10746 = vmatprep.subr.bf16.mxu0 %v14982_v33 }
 0xb8f   :  { %9751 = vmatmul.mubr.msk.f32.vlgmr.msra.gmra.mrb[174].mxu0 %vm4882_vm14, %v6510_v4  ;;  %v7828_v4 = vld [vmem:[%s14843_s21 + $0x400] sm:$0xff] }
 0xb90   :  { %10748 = vmatpush3.bf16.msra.mxu0 %v10747_v30  ;;  %9769 = vmatprep.mubr.msk.f32.mxu0 %vm11573_vm9, %v14938_v35  ;;  %v10975_v30 = vadd.f32 %v14222_v13, %v14368_v43  ;;  %v10795_v34 = vpack.c.bf16 %v7829_v20, %v7828_v4  ;;  %v7831_v43 = vld [vmem:[%s14843_s21 + $0x418] sm:$0xff] }
 0xb91   :  { %10749 = vmatprep.subr.bf16.mxu0 %v14982_v33  ;;  %v10798_v28 = vpack.c.bf16 %v7831_v43, %v7830_v46 }
 0xb94   :  { %10751 = vmatpush3.bf16.msra.mxu0 %v10750_v57  ;;  %v6514_v57 = vmax.f32 %v10975_v30, 0.0 }
 0xb95   :  { %10752 = vmatprep.subr.bf16.mxu0 %v14982_v33 }
 0xb98   :  { %10754 = vmatpush3.bf16.msra.mxu0 %v10753_v3  ;;  %v7832_v3 = vld [vmem:[%s14843_s21 + $0x420] sm:$0xff] }
 0xb99   :  { %10755 = vmatprep.subr.bf16.mxu0 %v14982_v33  ;;  %v10801_v17 = vpack.c.bf16 %v7833_v18, %v7832_v3 }
 0xb9c   :  { %10757 = vmatpush3.bf16.msra.mxu0 %v10756_v29 }
 0xb9d   :  { %10758 = vmatprep.subr.bf16.mxu0 %v14982_v33 }
 0xb9f   :  { %9770 = vmatmul.mubr.msk.f32.vlgmr.msra.gmra.mrb[176].mxu0 %vm4882_vm14, %v6511_v15 }
 0xba0   :  { %10760 = vmatpush3.bf16.msra.mxu0 %v10759_v14  ;;  %9788 = vmatprep.mubr.msk.f32.mxu0 %vm11573_vm9, %v14938_v35  ;;  %v7835_v14 = vld [vmem:[%s14843_s21 + $0x438] sm:$0xff] }
 0xba1   :  { %10761 = vmatprep.subr.bf16.mxu0 %v14982_v33  ;;  %v10804_v15 = vpack.c.bf16 %v7835_v14, %v7834_v47  ;;  %v8185_v14 = vld [vmem:[%s15012_s12] ss:$0 sm:$0xff] }
 0xba4   :  { %10763 = vmatpush3.bf16.msra.mxu0 %v10762_v24  ;;  %v7993_v24 = vld [vmem:[%s14843_s21 + $0x488] sm:$0xff] }
 0xba5   :  { %10764 = vmatprep.subr.bf16.mxu0 %v14982_v33  ;;  %v10819_v45 = vpack.c.bf16 %v7993_v24, %v7992_v8 }
 0xba8   :  { %10766 = vmatpush3.bf16.msra.mxu0 %v10765_v7  ;;  %v7994_v7 = vld [vmem:[%s14843_s21 + $0x490] sm:$0xff] }
 0xba9   :  { %10767 = vmatprep.subr.bf16.mxu0 %v14982_v33  ;;  %v10822_v36 = vpack.c.bf16 %v7995_v37, %v7994_v7 }
 0xbac   :  { %10769 = vmatpush3.bf16.msra.mxu0 %v10768_v10  ;;  %v7997_v10 = vld [vmem:[%s14843_s21 + $0x4a8] sm:$0xff] }
 0xbad   :  { %10770 = vmatprep.subr.bf16.mxu0 %v14982_v33 }
 0xbaf   :  { %9789 = vmatmul.mubr.msk.f32.vlgmr.msra.gmra.mrb[178].mxu0 %vm4882_vm14, %v6512_v12  ;;  %v7999_v12 = vld [vmem:[%s14843_s21 + $0x4b8] sm:$0xff] }
 0xbb0   :  { %10772 = vmatpush3.bf16.msra.mxu0 %v10771_v50  ;;  %9807 = vmatprep.mubr.msk.f32.mxu0 %vm11573_vm9, %v14938_v35  ;;  %v10825_v50 = vpack.c.bf16 %v7997_v10, %v7996_v31 }
 0xbb1   :  { %10773 = vmatprep.subr.bf16.mxu0 %v14982_v33 }
 0xbb2   :  { %v6603_v26 = vpop.f32.mrb[152].mxu0 }
 0xbb3   :  { %v9543_v58 = vpop.f32.mrb[153].mxu0 }
 0xbb4   :  { %10775 = vmatpush3.bf16.msra.mxu0 %v10774_v22  ;;  %v6517_v22 = vmax.f32 %v10981_v23, 0.0 }
 0xbb5   :  { %10776 = vmatprep.subr.bf16.mxu0 %v14982_v33 }
 0xbb8   :  { %10778 = vmatpush3.bf16.msra.mxu0 %v10777_v49 }
 0xbb9   :  { %10779 = vmatprep.subr.bf16.mxu0 %v14982_v33 }
 0xbbc   :  { %10781 = vmatpush3.bf16.msra.mxu0 %v10780_v56 }
 0xbbd   :  { %10782 = vmatprep.subr.bf16.mxu0 %v14982_v33 }
 0xbbf   :  { %9808 = vmatmul.mubr.msk.f32.vlgmr.msra.gmra.mrb[180].mxu0 %vm4882_vm14, %v6513_v1 }
 0xbc0   :  { %10784 = vmatpush3.bf16.msra.mxu0 %v10783_v55  ;;  %9826 = vmatprep.mubr.msk.f32.mxu0 %vm11573_vm9, %v14938_v35 }
 0xbc1   :  { %10785 = vmatprep.subr.bf16.mxu0 %v14982_v33 }
 0xbc2   :  { %v6676_v21 = vpop.f32.mrb[154].mxu0 }
 0xbc3   :  { %v6677_v2 = vadd.f32 %v6676_v21, %v6603_v26  ;;  %v9562_v39 = vpop.f32.mrb[155].mxu0 }
 0xbc4   :  { %10787 = vmatpush3.bf16.msra.mxu0 %v10786_v16 }
 0xbc5   :  { %10788 = vmatprep.subr.bf16.mxu0 %v14982_v33 }
 0xbc8   :  { %10790 = vmatpush3.bf16.msra.mxu0 %v10789_v25 }
 0xbc9   :  { %10791 = vmatprep.subr.bf16.mxu0 %v14982_v33 }
 0xbcc   :  { %10793 = vmatpush3.bf16.msra.mxu0 %v10792_v59 }
 0xbcd   :  { %10794 = vmatprep.subr.bf16.mxu0 %v14982_v33 }
 0xbcf   :  { %9827 = vmatmul.mubr.msk.f32.vlgmr.msra.gmra.mrb[182].mxu0 %vm4882_vm14, %v6514_v57 }
 0xbd0   :  { %10796 = vmatpush3.bf16.msra.mxu0 %v10795_v34  ;;  %9845 = vmatprep.mubr.msk.f32.mxu0 %vm11573_vm9, %v14938_v35 }
 0xbd1   :  { %10797 = vmatprep.subr.bf16.mxu0 %v14982_v33 }
 0xbd2   :  { %v6757_v5 = vpop.f32.mrb[156].mxu0 }
 0xbd3   :  { %v6761_v29 = vadd.f32 %v6757_v5, %v6677_v2  ;;  %v9581_v6 = vpop.f32.mrb[157].mxu0 }
 0xbd4   :  { %10799 = vmatpush3.bf16.msra.mxu0 %v10798_v28 }
 0xbd5   :  { %10800 = vmatprep.subr.bf16.mxu0 %v14982_v33 }
 0xbd8   :  { %10802 = vmatpush3.bf16.msra.mxu0 %v10801_v17 }
 0xbd9   :  { %10803 = vmatprep.subr.bf16.mxu0 %v14982_v33 }
 0xbdc   :  { %10805 = vmatpush3.bf16.msra.mxu0 %v10804_v15 }
 0xbdd   :  { %10818 = vmatprep.subr.bf16.mxu0 %v14982_v33 }
 0xbdf   :  { %9846 = vmatmul.mubr.msk.f32.vlgmr.msra.gmra.mrb[184].mxu0 %vm4882_vm14, %v6515_v48 }
 0xbe0   :  { %10820 = vmatpush3.bf16.msra.mxu0 %v10819_v45  ;;  %9883 = vmatprep.mubr.msk.f32.mxu0 %vm11573_vm9, %v14938_v35  ;;  %v7998_v35 = vld [vmem:[%s14843_s21 + $0x4b0] sm:$0xff] }
 0xbe1   :  { %10821 = vmatprep.subr.bf16.mxu0 %v14982_v33  ;;  %v10828_v27 = vpack.c.bf16 %v7999_v12, %v7998_v35 }
 0xbe2   :  { %v6839_v44 = vpop.f32.mrb[158].mxu0 }
 0xbe3   :  { %v6843_v54 = vadd.f32 %v6839_v44, %v6761_v29  ;;  %v9600_v19 = vpop.f32.mrb[159].mxu0 }
 0xbe4   :  { %10823 = vmatpush3.bf16.msra.mxu0 %v10822_v36 }
 0xbe5   :  { %10824 = vmatprep.subr.bf16.mxu0 %v14982_v33 }
 0xbe8   :  { %10826 = vmatpush3.bf16.msra.mxu0 %v10825_v50 }
 0xbe9   :  { %10827 = vmatprep.subr.bf16.mxu0 %v14982_v33 }
 0xbec   :  { %10829 = vmatpush3.bf16.msra.mxu0 %v10828_v27 }
 0xbef   :  { %9884 = vmatmul.mubr.msk.f32.vlgmr.msra.gmra.mrb[186].mxu0 %vm4882_vm14, %v6517_v22 }
 0xbf2   :  { %v6921_v40 = vpop.f32.mrb[160].mxu0  ;;  %v7987_v53 = vpop.f32.mrb[228].mxu1 }
 0xbf3   :  { %v6925_v26 = vadd.f32 %v6921_v40, %v6843_v54  ;;  %v9619_v58 = vpop.f32.mrb[161].mxu0  ;;  %v9866_v49 = vpop.f32.mrb[229].mxu1 }
 0xc02   :  { %v7003_v11 = vpop.f32.mrb[162].mxu0 }
 0xc03   :  { %v7007_v60 = vadd.f32 %v7003_v11, %v6925_v26  ;;  %v9638_v56 = vpop.f32.mrb[163].mxu0 }
 0xc12   :  { %v7085_v38 = vpop.f32.mrb[164].mxu0 }
 0xc13   :  { %v7089_v63 = vadd.f32 %v7085_v38, %v7007_v60  ;;  %v9657_v41 = vpop.f32.mrb[165].mxu0 }
 0xc22   :  { %v7167_v55 = vpop.f32.mrb[166].mxu0 }
 0xc23   :  { %v7171_v1 = vadd.f32 %v7167_v55, %v7089_v63  ;;  %v9676_v13 = vpop.f32.mrb[167].mxu0 }
 0xc32   :  { %v7249_v32 = vpop.f32.mrb[168].mxu0 }
 0xc33   :  { %v7253_v33 = vadd.f32 %v7249_v32, %v7171_v1  ;;  %v9695_v9 = vpop.f32.mrb[169].mxu0 }
 0xc42   :  { %v7331_v52 = vpop.f32.mrb[170].mxu0 }
 0xc43   :  { %v7335_v16 = vadd.f32 %v7331_v52, %v7253_v33  ;;  %v9714_v62 = vpop.f32.mrb[171].mxu0 }
 0xc52   :  { %v7413_v51 = vpop.f32.mrb[172].mxu0 }
 0xc53   :  { %v7417_v21 = vadd.f32 %v7413_v51, %v7335_v16  ;;  %v9733_v2 = vpop.f32.mrb[173].mxu0 }
 0xc62   :  { %v7495_v39 = vpop.f32.mrb[174].mxu0 }
 0xc63   :  { %v7499_v25 = vadd.f32 %v7495_v39, %v7417_v21  ;;  %v9752_v0 = vpop.f32.mrb[175].mxu0 }
 0xc72   :  { %v7577_v42 = vpop.f32.mrb[176].mxu0 }
 0xc73   :  { %v7581_v59 = vadd.f32 %v7577_v42, %v7499_v25  ;;  %v9771_v30 = vpop.f32.mrb[177].mxu0 }
 0xc82   :  { %v7659_v4 = vpop.f32.mrb[178].mxu0 }
 0xc83   :  { %v7663_v20 = vadd.f32 %v7659_v4, %v7581_v59  ;;  %v9790_v34 = vpop.f32.mrb[179].mxu0 }
 0xc92   :  { %v7741_v57 = vpop.f32.mrb[180].mxu0 }
 0xc93   :  { %v7745_v46 = vadd.f32 %v7741_v57, %v7663_v20  ;;  %v9809_v43 = vpop.f32.mrb[181].mxu0 }
 0xca2   :  { %v7823_v28 = vpop.f32.mrb[182].mxu0 }
 0xca3   :  { %v7827_v3 = vadd.f32 %v7823_v28, %v7745_v46  ;;  %v9828_v18 = vpop.f32.mrb[183].mxu0 }
 0xcb2   :  { %v7905_v5 = vpop.f32.mrb[184].mxu0 }
 0xcb3   :  { %v7909_v29 = vadd.f32 %v7905_v5, %v7827_v3  ;;  %v9847_v6 = vpop.f32.mrb[185].mxu0 }
 0xcb5   :  { %v7991_v17 = vadd.f32 %v7987_v53, %v7909_v29 }
 0xcc2   :  { %v8069_v47 = vpop.f32.mrb[186].mxu0 }
 0xcc3   :  { %v8073_v15 = vadd.f32 %v8069_v47, %v7991_v17  ;;  %v9885_v61 = vpop.f32.mrb[187].mxu0 }
 0xcc5   :  { %v8081_v8 = vadd.f32 %v8185_v14, %v8073_v15 }
 0xcc7   :  { %v8082_v24 = vsub.f32 0.0, %v8081_v8 }
 0xcc9   :  { %v8083_v45 = vmul.f32 1.442695, %v8082_v24 }
 0xccb   :  { %11416 = vpow2.f32 %v8083_v45 }
 0xcd5   :  { %v11417_v48 = vpop.eup %11416 }
 0xcd6   :  { %v8085_v7 = vadd.f32 1.0, %v11417_v48 }
 0xcd8   :  { %11418 = vrcp.f32 %v8085_v7 }
 0xce2   :  { %v11419_v37 = vpop.eup %11418 }
 0xce3   :  { %v8087_v36 = vmin.f32 %v11419_v37, 1.0 }
 0xce5   :  { %8088 = vst [vmem:[%s15013_s19] sm:$0xff] %v8087_v36 }
 0xce6   :  { %8093 = vsyncpa [#allocation9], 1 }
 0xce7   :  { %8094 = vsyncpa [#allocation11], 1 }
 0xce8   :  { %8095 = vsyncpa [#allocation14], 1 }
 0xce9   :  { %8096 = vsyncpa [#allocation17], 1 }

</bundles_post_ra>
